<compile_context>
chip_gen: v7x
topology: tpu7x:2x2x1
jax: 0.10.0
libtpu: 0.0.40
codegen_flags: <defaults>
</compile_context>

<pallas_src>
import functools

import jax
import jax.numpy as jnp
from jax.experimental import pallas as pl
from jax.experimental.pallas import tpu as pltpu

EPS = 1e-5  # BatchNorm2d default eps
VMEM_LIMIT = 32 * 1024 * 1024  # safe on v5e/v6e/v7x; can be raised on 128 MiB parts

# MXU operand dtype: bf16 inputs + f32 accumulation are native on v5e/v6e/v7x MXUs
# (f32 operands force multi-pass emulation). Set to jnp.float32 for ~1e-5 parity.
MXU_DTYPE = jnp.bfloat16


def _mxu(x):
    return x.astype(MXU_DTYPE)


def _pad_halo(x, h, w, c):
    """Build the 1-px zero halo of a (h, w, c) tile in VMEM (replaces wrapper jnp.pad)."""
    zc = jnp.zeros((h, 1, c), jnp.float32)
    xw = jnp.concatenate([zc, x, zc], axis=1)          # (h, w+2, c)
    zr = jnp.zeros((1, w + 2, c), jnp.float32)
    return jnp.concatenate([zr, xw, zr], axis=0)       # (h+2, w+2, c)


def _depthwise3x3(xp, dww_ref, p, h, w):
    """9-tap depthwise conv (stride 1) from shifted static slices of the padded tile.
    The depthwise bias is intentionally dropped: a per-channel constant shift cancels
    exactly under train-mode BatchNorm."""
    acc = None
    for i in range(3):
        for j in range(3):
            t = xp[i:i + h, j:j + w, :] * dww_ref[p, i * 3 + j]
            acc = t if acc is None else acc + t
    return acc.reshape(h * w, -1)                      # (h*w, C)


# ---------------------------------------------------------------------------
# Kernel 1: exact per-channel BatchNorm batch statistics (reduction over batch)
# ---------------------------------------------------------------------------
def _bn_stats_kernel(x_ref, dww_ref, stat_ref):
    b = pl.program_id(0)
    _, H, W, C = x_ref.shape

    @pl.when(b == 0)
    def _init():
        stat_ref[...] = jnp.zeros(stat_ref.shape, jnp.float32)

    xp = _pad_halo(x_ref[0], H, W, C)
    for p in range(3):
        d = _depthwise3x3(xp, dww_ref, p, H, W)        # (H*W, C)
        stat_ref[0, p:p + 1] = stat_ref[0, p:p + 1] + jnp.sum(d, axis=0, keepdims=True)
        stat_ref[1, p:p + 1] = stat_ref[1, p:p + 1] + jnp.sum(d * d, axis=0, keepdims=True)


# ---------------------------------------------------------------------------
# Kernel 2: depthwise 3x3 + (BN folded into) pointwise 1x1 -> q and k|v slabs
# ---------------------------------------------------------------------------
def _qkv_project_kernel(*refs, scale, last_stage):
    it = iter(refs)
    x_ref, dww_ref, wf_ref, bf_ref = next(it), next(it), next(it), next(it)
    cls_ref = next(it) if last_stage else None
    q_ref, kv_ref = next(it), next(it)

    _, H, W, C = x_ref.shape
    xp = _pad_halo(x_ref[0], H, W, C)

    ys = []
    for p in range(3):
        d = _depthwise3x3(xp, dww_ref, p, H, W)        # (H*W, C) f32
        y = jnp.dot(_mxu(d), _mxu(wf_ref[p]),
                    preferred_element_type=jnp.float32) + bf_ref[p]
        ys.append(y)
    y_q, y_k, y_v = ys

    kv = jnp.concatenate([y_k, y_v], axis=-1)          # (H*W, 2*inner), lane-dense
    if last_stage:
        cls = cls_ref[0]                               # (1, inner), raw input token
        y_q = jnp.concatenate([cls * scale, y_q], axis=0)   # scale folded into q
        kv = jnp.concatenate([jnp.concatenate([cls, cls], axis=-1), kv], axis=0)
    q_ref[0] = y_q.astype(q_ref.dtype)
    kv_ref[0] = kv.astype(kv_ref.dtype)


# ---------------------------------------------------------------------------
# Kernel 3: flash attention over KV tiles + head merge + fused output projection
# ---------------------------------------------------------------------------
def _flash_attn_kernel(*refs, heads, dim_head, nq, tk, project):
    it = iter(refs)
    q_ref, kv_ref = next(it), next(it)
    ow_ref = next(it) if project else None
    ob_ref = next(it) if project else None
    o_ref = next(it)
    m_ref, l_ref, acc_ref = next(it), next(it), next(it)

    kv_i = pl.program_id(1)
    n_kv = pl.num_programs(1)
    inner = heads * dim_head

    @pl.when(kv_i == 0)
    def _init():
        m_ref[...] = jnp.full(m_ref.shape, -jnp.inf, jnp.float32)
        l_ref[...] = jnp.zeros(l_ref.shape, jnp.float32)
        acc_ref[...] = jnp.zeros(acc_ref.shape, jnp.float32)

    q_all = q_ref[0]                                   # (nq, inner); scale pre-folded
    kv_tile = kv_ref[0]                                # (tk, 2*inner)

    need_mask = (nq % tk) != 0
    if need_mask:
        base = kv_i * tk
        row_ok = (jax.lax.broadcasted_iota(jnp.int32, (tk, 1), 0) + base) < nq
        col_ok = (jax.lax.broadcasted_iota(jnp.int32, (1, tk), 1) + base) < nq

    for h in range(heads):                             # static head loop (lane slices)
        lo, hi = h * dim_head, (h + 1) * dim_head
        q_h = q_all[:, lo:hi]
        k_h = kv_tile[:, lo:hi]
        v_h = kv_tile[:, inner + lo:inner + hi]
        if need_mask:
            v_h = jnp.where(row_ok, v_h, 0.0)
        s = jax.lax.dot_general(_mxu(q_h), _mxu(k_h), (((1,), (1,)), ((), ())),
                                preferred_element_type=jnp.float32)   # (nq, tk)
        if need_mask:
            s = jnp.where(col_ok, s, -jnp.inf)
        m_prev = m_ref[:, h:h + 1]
        m_new = jnp.maximum(m_prev, jnp.max(s, axis=-1, keepdims=True))
        alpha = jnp.exp(m_prev - m_new)
        p = jnp.exp(s - m_new)
        l_ref[:, h:h + 1] = alpha * l_ref[:, h:h + 1] + jnp.sum(p, axis=-1, keepdims=True)
        acc_ref[:, lo:hi] = alpha * acc_ref[:, lo:hi] + jnp.dot(
            _mxu(p), _mxu(v_h), preferred_element_type=jnp.float32)
        m_ref[:, h:h + 1] = m_new

    @pl.when(kv_i == n_kv - 1)
    def _finalize():
        for h in range(heads):
            lo, hi = h * dim_head, (h + 1) * dim_head
            inv = pl.reciprocal(l_ref[:, h:h + 1], approx=True)   # EUP slot
            acc_ref[:, lo:hi] = acc_ref[:, lo:hi] * inv
        out = acc_ref[...]                             # (nq, inner) == 'b n (h d)' merge
        if project:                                    # fused to_out Linear
            out = jnp.dot(_mxu(out), _mxu(ow_ref[...]),
                          preferred_element_type=jnp.float32) + ob_ref[...]
        o_ref[0] = out.astype(o_ref.dtype)


# ---------------------------------------------------------------------------
# Wrapper
# ---------------------------------------------------------------------------
def conv_attention(x, params, *, heads, dim_head, img_size, last_stage=False,
                   kv_block_size=None):
    B, N, dim = x.shape
    inner = heads * dim_head
    project = not (heads == 1 and dim_head == dim)
    H = W = img_size
    HW = H * W
    scale = float(dim_head) ** -0.5

    if last_stage:
        assert dim == inner, "last_stage cls path requires dim == heads*dim_head"
        assert N == HW + 1
        cls = x[:, :1]                                 # (B, 1, dim)
        x_sp = x[:, 1:]
    else:
        assert N == HW
        x_sp = x
    x_img = x_sp.reshape(B, H, W, dim)                 # 'b (l w) n -> b l w n'
    Nq = HW + (1 if last_stage else 0)

    # Fold the softmax scale into q's pointwise-conv weights/bias (tiny one-time rescale).
    pw_w = params["pw_w"].at[0].multiply(scale)        # (3, dim, inner)
    pw_b = params["pw_b"].at[0].multiply(scale)        # (3, inner)

    # ---- pass 1: exact BatchNorm batch statistics (sequential batch reduction) ----
    stats = pl.pallas_call(
        _bn_stats_kernel,
        grid=(B,),
        in_specs=[pl.BlockSpec((1, H, W, dim), lambda b: (b, 0, 0, 0)),
                  pl.BlockSpec((3, 9, dim), lambda b: (0, 0, 0))],
        out_specs=pl.BlockSpec((2, 3, dim), lambda b: (0, 0, 0)),
        out_shape=jax.ShapeDtypeStruct((2, 3, dim), jnp.float32),
        compiler_params=pltpu.CompilerParams(
            dimension_semantics=("arbitrary",),
            vmem_limit_bytes=VMEM_LIMIT),
    )(x_img, params["dw_w"])

    # Fold BN (train-mode batch stats, biased variance) into the pointwise conv on the
    # tiny (3,C[,inner]) tensors so the hot kernel does zero per-element normalize work.
    inv_count = 1.0 / float(B * HW)
    mean = stats[0] * inv_count                        # (3, C)
    var = jnp.maximum(stats[1] * inv_count - mean * mean, 0.0)
    s_bn = params["bn_g"] * jax.lax.rsqrt(var + EPS)   # (3, C)
    w_fold = pw_w * s_bn[:, :, None]                   # (3, C, inner)
    b_fold = jnp.einsum("pc,pci->pi", params["bn_b"] - mean * s_bn, pw_w) + pw_b  # (3, inner)

    # ---- pass 2: per-image depthwise MAC + folded pointwise 1x1 (MXU) -> q, k|v ----
    proj_inputs = [x_img, params["dw_w"], w_fold, b_fold]
    proj_specs = [
        pl.BlockSpec((1, H, W, dim), lambda b: (b, 0, 0, 0)),
        pl.BlockSpec((3, 9, dim), lambda b: (0, 0, 0)),
        pl.BlockSpec((3, dim, inner), lambda b: (0, 0, 0)),
        pl.BlockSpec((3, inner), lambda b: (0, 0)),
    ]
    if last_stage:
        proj_inputs.append(cls)
        proj_specs.append(pl.BlockSpec((1, 1, inner), lambda b: (b, 0, 0)))

    q_arr, kv_arr = pl.pallas_call(
        functools.partial(_qkv_project_kernel, scale=scale, last_stage=last_stage),
        grid=(B,),
        in_specs=proj_specs,
        out_specs=(pl.BlockSpec((1, Nq, inner), lambda b: (b, 0, 0)),
                   pl.BlockSpec((1, Nq, 2 * inner), lambda b: (b, 0, 0))),
        out_shape=(jax.ShapeDtypeStruct((B, Nq, inner), jnp.float32),
                   jax.ShapeDtypeStruct((B, Nq, 2 * inner), jnp.float32)),
        compiler_params=pltpu.CompilerParams(
            dimension_semantics=("parallel",),
            vmem_limit_bytes=VMEM_LIMIT),
    )(*proj_inputs)

    # ---- pass 3: flash attention over KV tiles + head merge + fused projection ----
    if kv_block_size is None:
        tk = Nq if Nq <= 512 else 512
    else:
        tk = min(kv_block_size, Nq)
    assert tk == Nq or tk % 8 == 0, "kv_block_size must be a multiple of 8 (or == Nq)"
    num_kv = pl.cdiv(Nq, tk)
    out_dim = dim if project else inner

    att_inputs = [q_arr, kv_arr]
    att_specs = [pl.BlockSpec((1, Nq, inner), lambda b, k: (b, 0, 0)),
                 pl.BlockSpec((1, tk, 2 * inner), lambda b, k: (b, k, 0))]
    if project:
        att_inputs += [params["out_w"], params["out_b"]]
        att_specs += [pl.BlockSpec((inner, dim), lambda b, k: (0, 0)),
                      pl.BlockSpec((1, dim), lambda b, k: (0, 0))]

    out = pl.pallas_call(
        functools.partial(_flash_attn_kernel, heads=heads, dim_head=dim_head,
                          nq=Nq, tk=tk, project=project),
        grid=(B, num_kv),
        in_specs=att_specs,
        out_specs=pl.BlockSpec((1, Nq, out_dim), lambda b, k: (b, 0, 0)),
        out_shape=jax.ShapeDtypeStruct((B, Nq, out_dim), jnp.float32),
        scratch_shapes=[pltpu.VMEM((Nq, heads), jnp.float32),    # running max m
                        pltpu.VMEM((Nq, heads), jnp.float32),    # running denom l
                        pltpu.VMEM((Nq, inner), jnp.float32)],   # running head outputs
        compiler_params=pltpu.CompilerParams(
            dimension_semantics=("parallel", "arbitrary"),
            vmem_limit_bytes=VMEM_LIMIT),
    )(*att_inputs)
    return out


# ---------------------------------------------------------------------------
# Deterministic parameter init + pure-JAX f32 reference (for a correctness check)
# ---------------------------------------------------------------------------
def init_params(key, dim, heads, dim_head):
    inner = heads * dim_head
    ks = jax.random.split(key, 8)

    def nrm(k, shape, s):
        return (s * jax.random.normal(k, shape)).astype(jnp.float32)

    params = {
        "dw_w": nrm(ks[0], (3, 9, dim), 0.25),   # (projection, tap=kh*3+kw, C)
        "dw_b": nrm(ks[1], (3, dim), 0.1),       # reference only: cancels exactly under BN
        "bn_g": (1.0 + nrm(ks[2], (3, dim), 0.1)).astype(jnp.float32),
        "bn_b": nrm(ks[3], (3, dim), 0.1),
        "pw_w": nrm(ks[4], (3, dim, inner), 0.2),
        "pw_b": nrm(ks[5], (3, inner), 0.1),
    }
    if not (heads == 1 and dim_head == dim):
        params["out_w"] = nrm(ks[6], (inner, dim), 0.2)
        params["out_b"] = nrm(ks[7], (1, dim), 0.1)
    return params


def conv_attention_ref(x, params, *, heads, dim_head, img_size, last_stage=False):
    B, N, dim = x.shape
    inner = heads * dim_head
    project = not (heads == 1 and dim_head == dim)
    H = W = img_size
    if last_stage:
        cls = x[:, :1]
        x_sp = x[:, 1:]
    else:
        x_sp = x
    x_img = x_sp.reshape(B, H, W, dim)
    xp = jnp.pad(x_img, ((0, 0), (1, 1), (1, 1), (0, 0)))

    proj = []
    for p in range(3):
        acc = jnp.zeros((B, H, W, dim), jnp.float32) + params["dw_b"][p].reshape(1, 1, 1, dim)
        for i in range(3):
            for j in range(3):
                acc = acc + xp[:, i:i + H, j:j + W, :] * params["dw_w"][p, i * 3 + j].reshape(1, 1, 1, dim)
        mean = jnp.mean(acc, axis=(0, 1, 2), keepdims=True)
        var = jnp.mean((acc - mean) ** 2, axis=(0, 1, 2), keepdims=True)
        y = (acc - mean) * jax.lax.rsqrt(var + EPS)
        y = y * params["bn_g"][p].reshape(1, 1, 1, dim) + params["bn_b"][p].reshape(1, 1, 1, dim)
        y = jnp.einsum("bhwc,cn->bhwn", y, params["pw_w"][p]) + params["pw_b"][p].reshape(1, 1, 1, inner)
        proj.append(y.reshape(B, H * W, inner))

    def to_heads(t):
        return t.reshape(B, -1, heads, dim_head).transpose(0, 2, 1, 3)

    q, k, v = (to_heads(t) for t in proj)
    if last_stage:
        cls_h = to_heads(cls)
        q = jnp.concatenate([cls_h, q], axis=2)
        k = jnp.concatenate([cls_h, k], axis=2)
        v = jnp.concatenate([cls_h, v], axis=2)
    dots = jnp.einsum("bhid,bhjd->bhij", q, k) * (float(dim_head) ** -0.5)
    attn = jax.nn.softmax(dots, axis=-1)
    out = jnp.einsum("bhij,bhjd->bhid", attn, v)
    out = out.transpose(0, 2, 1, 3).reshape(B, -1, inner)
    if project:
        out = out @ params["out_w"] + params["out_b"].reshape(1, 1, dim)
    return out


if __name__ == "__main__":
    key = jax.random.PRNGKey(0)

    configs = [
        # (name,                     B, dim, img, heads, dim_head, last_stage, kv_block)
        ("proj, single kv tile    ", 2, 32, 8, 2, 16, False, None),
        ("last_stage, masked tiles", 2, 32, 8, 2, 16, True, 16),
        ("identity to_out, 2 tiles", 2, 32, 8, 1, 32, False, 32),
    ]

    ok = True
    for name, B, dim, img_size, heads, dim_head, last_stage, kvb in configs:
        kp, kx, key = jax.random.split(key, 3)
        params = init_params(kp, dim, heads, dim_head)
        N = img_size * img_size + (1 if last_stage else 0)
        x = jax.random.normal(kx, (B, N, dim), jnp.float32)

        fwd = jax.jit(functools.partial(conv_attention, heads=heads, dim_head=dim_head,
                                        img_size=img_size, last_stage=last_stage,
                                        kv_block_size=kvb))
        out = jax.block_until_ready(fwd(x, params))
        ref = conv_attention_ref(x, params, heads=heads, dim_head=dim_head,
                                 img_size=img_size, last_stage=last_stage)

        finite = bool(jnp.all(jnp.isfinite(out)))
        shapes_ok = out.shape == ref.shape
        # Tolerance sized for bf16 MXU operands (f32 accumulate) vs the f32 reference plus
        # the approx (EUP) softmax reciprocal.  Set MXU_DTYPE=jnp.float32 for ~1e-5 parity.
        close = bool(jnp.allclose(out, ref, rtol=1e-1, atol=1e-1))
        if not (finite and shapes_ok and close):
            ok = False
            err = float(jnp.max(jnp.abs(out - ref)))
            print(f"MISMATCH [{name}] shape={out.shape} finite={finite} max|diff|={err:.3e}")

    if ok:
        print("KERNEL_OK")
</pallas_src>

<mosaic_0001>
module attributes {stable_mosaic.version = 11 : i64} {
  func.func @_bn_stats_kernel(%arg0: i32, %arg1: memref<1x8x8x32xf32, #tpu.memory_space<vmem>>, %arg2: memref<3x9x32xf32, #tpu.memory_space<vmem>>, %arg3: memref<2x3x32xf32, #tpu.memory_space<vmem>>) attributes {dimension_semantics = [#tpu.dimension_semantics<arbitrary>], iteration_bounds = array<i64: 2>, scalar_prefetch = 0 : i64, scratch_operands = 0 : i64, tpu.core_type = #tpu.core_type<tc>, window_params = [{transform_indices = @transform_0, window_bounds = array<i64: 1, 8, 8, 32>}, {pipeline_mode = #tpu.pipeline_mode<synchronous>, transform_indices = @transform_1, window_bounds = array<i64: 3, 9, 32>}, {pipeline_mode = #tpu.pipeline_mode<synchronous>, transform_indices = @transform_2, window_bounds = array<i64: 2, 3, 32>}]} {
    %c0_i32 = arith.constant 0 : i32
    %0 = arith.cmpi eq, %arg0, %c0_i32 : i32
    %1 = arith.extui %0 : i1 to i32
    %c0_i32_0 = arith.constant 0 : i32
    %2 = arith.cmpi ne, %1, %c0_i32_0 : i32
    scf.if %2 {
      %cst_120 = arith.constant 0.000000e+00 : f32
      %249 = vector.broadcast %cst_120 : f32 to vector<2x3x32xf32>
      %c0_121 = arith.constant 0 : index
      %c0_122 = arith.constant 0 : index
      %c0_123 = arith.constant 0 : index
      %250 = vector.load %arg3[%c0_121, %c0_122, %c0_123] : memref<2x3x32xf32, #tpu.memory_space<vmem>>, vector<2x3x32xf32>
      tpu.vector_store %arg3[%c0_121, %c0_122, %c0_123], %249 {strides = array<i32>} : memref<2x3x32xf32, #tpu.memory_space<vmem>>, vector<2x3x32xf32>,
    } else {
    }
    %c0 = arith.constant 0 : index
    %c0_1 = arith.constant 0 : index
    %c0_2 = arith.constant 0 : index
    %c0_3 = arith.constant 0 : index
    %3 = vector.load %arg1[%c0, %c0_1, %c0_2, %c0_3] : memref<1x8x8x32xf32, #tpu.memory_space<vmem>>, vector<1x8x8x32xf32>
    %4 = vector.shape_cast %3 : vector<1x8x8x32xf32> to vector<8x8x32xf32>
    %cst = arith.constant 0.000000e+00 : f32
    %5 = vector.broadcast %cst : f32 to vector<8x1x32xf32>
    %6 = tpu.concatenate %5, %4, %5 in 1 : vector<8x1x32xf32>, vector<8x8x32xf32>, vector<8x1x32xf32> -> vector<8x10x32xf32>
    %cst_4 = arith.constant 0.000000e+00 : f32
    %7 = vector.broadcast %cst_4 : f32 to vector<1x10x32xf32>
    %8 = tpu.concatenate %7, %6, %7 in 0 : vector<1x10x32xf32>, vector<8x10x32xf32>, vector<1x10x32xf32> -> vector<10x10x32xf32>
    %9 = vector.extract_strided_slice %8 {offsets = [0, 0, 0], sizes = [8, 8, 32], strides = [1, 1, 1]} : vector<10x10x32xf32> to vector<8x8x32xf32>
    %c0_5 = arith.constant 0 : index
    %c0_6 = arith.constant 0 : index
    %c0_7 = arith.constant 0 : index
    %10 = vector.load %arg2[%c0_5, %c0_6, %c0_7] : memref<3x9x32xf32, #tpu.memory_space<vmem>>, vector<1x1x32xf32>
    %11 = vector.shape_cast %10 : vector<1x1x32xf32> to vector<32xf32>
    %12 = vector.shape_cast %11 : vector<32xf32> to vector<1x1x32xf32>
    %13 = vector.broadcast %12 : vector<1x1x32xf32> to vector<8x8x32xf32>
    %14 = arith.mulf %9, %13 : vector<8x8x32xf32>
    %15 = vector.extract_strided_slice %8 {offsets = [0, 1, 0], sizes = [8, 8, 32], strides = [1, 1, 1]} : vector<10x10x32xf32> to vector<8x8x32xf32>
    %c0_8 = arith.constant 0 : index
    %c1 = arith.constant 1 : index
    %c0_9 = arith.constant 0 : index
    %16 = vector.load %arg2[%c0_8, %c1, %c0_9] : memref<3x9x32xf32, #tpu.memory_space<vmem>>, vector<1x1x32xf32>
    %17 = vector.shape_cast %16 : vector<1x1x32xf32> to vector<32xf32>
    %18 = vector.shape_cast %17 : vector<32xf32> to vector<1x1x32xf32>
    %19 = vector.broadcast %18 : vector<1x1x32xf32> to vector<8x8x32xf32>
    %20 = arith.mulf %15, %19 : vector<8x8x32xf32>
    %21 = arith.addf %14, %20 : vector<8x8x32xf32>
    %22 = vector.extract_strided_slice %8 {offsets = [0, 2, 0], sizes = [8, 8, 32], strides = [1, 1, 1]} : vector<10x10x32xf32> to vector<8x8x32xf32>
    %c0_10 = arith.constant 0 : index
    %c2 = arith.constant 2 : index
    %c0_11 = arith.constant 0 : index
    %23 = vector.load %arg2[%c0_10, %c2, %c0_11] : memref<3x9x32xf32, #tpu.memory_space<vmem>>, vector<1x1x32xf32>
    %24 = vector.shape_cast %23 : vector<1x1x32xf32> to vector<32xf32>
    %25 = vector.shape_cast %24 : vector<32xf32> to vector<1x1x32xf32>
    %26 = vector.broadcast %25 : vector<1x1x32xf32> to vector<8x8x32xf32>
    %27 = arith.mulf %22, %26 : vector<8x8x32xf32>
    %28 = arith.addf %21, %27 : vector<8x8x32xf32>
    %29 = vector.extract_strided_slice %8 {offsets = [1, 0, 0], sizes = [8, 8, 32], strides = [1, 1, 1]} : vector<10x10x32xf32> to vector<8x8x32xf32>
    %c0_12 = arith.constant 0 : index
    %c3 = arith.constant 3 : index
    %c0_13 = arith.constant 0 : index
    %30 = vector.load %arg2[%c0_12, %c3, %c0_13] : memref<3x9x32xf32, #tpu.memory_space<vmem>>, vector<1x1x32xf32>
    %31 = vector.shape_cast %30 : vector<1x1x32xf32> to vector<32xf32>
    %32 = vector.shape_cast %31 : vector<32xf32> to vector<1x1x32xf32>
    %33 = vector.broadcast %32 : vector<1x1x32xf32> to vector<8x8x32xf32>
    %34 = arith.mulf %29, %33 : vector<8x8x32xf32>
    %35 = arith.addf %28, %34 : vector<8x8x32xf32>
    %36 = vector.extract_strided_slice %8 {offsets = [1, 1, 0], sizes = [8, 8, 32], strides = [1, 1, 1]} : vector<10x10x32xf32> to vector<8x8x32xf32>
    %c0_14 = arith.constant 0 : index
    %c4 = arith.constant 4 : index
    %c0_15 = arith.constant 0 : index
    %37 = vector.load %arg2[%c0_14, %c4, %c0_15] : memref<3x9x32xf32, #tpu.memory_space<vmem>>, vector<1x1x32xf32>
    %38 = vector.shape_cast %37 : vector<1x1x32xf32> to vector<32xf32>
    %39 = vector.shape_cast %38 : vector<32xf32> to vector<1x1x32xf32>
    %40 = vector.broadcast %39 : vector<1x1x32xf32> to vector<8x8x32xf32>
    %41 = arith.mulf %36, %40 : vector<8x8x32xf32>
    %42 = arith.addf %35, %41 : vector<8x8x32xf32>
    %43 = vector.extract_strided_slice %8 {offsets = [1, 2, 0], sizes = [8, 8, 32], strides = [1, 1, 1]} : vector<10x10x32xf32> to vector<8x8x32xf32>
    %c0_16 = arith.constant 0 : index
    %c5 = arith.constant 5 : index
    %c0_17 = arith.constant 0 : index
    %44 = vector.load %arg2[%c0_16, %c5, %c0_17] : memref<3x9x32xf32, #tpu.memory_space<vmem>>, vector<1x1x32xf32>
    %45 = vector.shape_cast %44 : vector<1x1x32xf32> to vector<32xf32>
    %46 = vector.shape_cast %45 : vector<32xf32> to vector<1x1x32xf32>
    %47 = vector.broadcast %46 : vector<1x1x32xf32> to vector<8x8x32xf32>
    %48 = arith.mulf %43, %47 : vector<8x8x32xf32>
    %49 = arith.addf %42, %48 : vector<8x8x32xf32>
    %50 = vector.extract_strided_slice %8 {offsets = [2, 0, 0], sizes = [8, 8, 32], strides = [1, 1, 1]} : vector<10x10x32xf32> to vector<8x8x32xf32>
    %c0_18 = arith.constant 0 : index
    %c6 = arith.constant 6 : index
    %c0_19 = arith.constant 0 : index
    %51 = vector.load %arg2[%c0_18, %c6, %c0_19] : memref<3x9x32xf32, #tpu.memory_space<vmem>>, vector<1x1x32xf32>
    %52 = vector.shape_cast %51 : vector<1x1x32xf32> to vector<32xf32>
    %53 = vector.shape_cast %52 : vector<32xf32> to vector<1x1x32xf32>
    %54 = vector.broadcast %53 : vector<1x1x32xf32> to vector<8x8x32xf32>
    %55 = arith.mulf %50, %54 : vector<8x8x32xf32>
    %56 = arith.addf %49, %55 : vector<8x8x32xf32>
    %57 = vector.extract_strided_slice %8 {offsets = [2, 1, 0], sizes = [8, 8, 32], strides = [1, 1, 1]} : vector<10x10x32xf32> to vector<8x8x32xf32>
    %c0_20 = arith.constant 0 : index
    %c7 = arith.constant 7 : index
    %c0_21 = arith.constant 0 : index
    %58 = vector.load %arg2[%c0_20, %c7, %c0_21] : memref<3x9x32xf32, #tpu.memory_space<vmem>>, vector<1x1x32xf32>
    %59 = vector.shape_cast %58 : vector<1x1x32xf32> to vector<32xf32>
    %60 = vector.shape_cast %59 : vector<32xf32> to vector<1x1x32xf32>
    %61 = vector.broadcast %60 : vector<1x1x32xf32> to vector<8x8x32xf32>
    %62 = arith.mulf %57, %61 : vector<8x8x32xf32>
    %63 = arith.addf %56, %62 : vector<8x8x32xf32>
    %64 = vector.extract_strided_slice %8 {offsets = [2, 2, 0], sizes = [8, 8, 32], strides = [1, 1, 1]} : vector<10x10x32xf32> to vector<8x8x32xf32>
    %c0_22 = arith.constant 0 : index
    %c8 = arith.constant 8 : index
    %c0_23 = arith.constant 0 : index
    %65 = vector.load %arg2[%c0_22, %c8, %c0_23] : memref<3x9x32xf32, #tpu.memory_space<vmem>>, vector<1x1x32xf32>
    %66 = vector.shape_cast %65 : vector<1x1x32xf32> to vector<32xf32>
    %67 = vector.shape_cast %66 : vector<32xf32> to vector<1x1x32xf32>
    %68 = vector.broadcast %67 : vector<1x1x32xf32> to vector<8x8x32xf32>
    %69 = arith.mulf %64, %68 : vector<8x8x32xf32>
    %70 = arith.addf %63, %69 : vector<8x8x32xf32>
    %71 = vector.shape_cast %70 : vector<8x8x32xf32> to vector<64x32xf32>
    %c0_24 = arith.constant 0 : index
    %c0_25 = arith.constant 0 : index
    %c0_26 = arith.constant 0 : index
    %72 = vector.load %arg3[%c0_24, %c0_25, %c0_26] : memref<2x3x32xf32, #tpu.memory_space<vmem>>, vector<1x1x32xf32>
    %73 = vector.shape_cast %72 : vector<1x1x32xf32> to vector<1x32xf32>
    %cst_27 = arith.constant dense<0.000000e+00> : vector<32xf32>
    %74 = vector.multi_reduction <add>, %71, %cst_27 [0] : vector<64x32xf32> to vector<32xf32>
    %75 = vector.shape_cast %74 : vector<32xf32> to vector<1x32xf32>
    %76 = arith.addf %73, %75 : vector<1x32xf32>
    %c0_28 = arith.constant 0 : index
    %c0_29 = arith.constant 0 : index
    %c0_30 = arith.constant 0 : index
    %77 = vector.load %arg3[%c0_28, %c0_29, %c0_30] : memref<2x3x32xf32, #tpu.memory_space<vmem>>, vector<1x1x32xf32>
    %78 = vector.shape_cast %77 : vector<1x1x32xf32> to vector<1x32xf32>
    %79 = vector.shape_cast %76 : vector<1x32xf32> to vector<1x1x32xf32>
    tpu.vector_store %arg3[%c0_28, %c0_29, %c0_30], %79 {strides = array<i32>} : memref<2x3x32xf32, #tpu.memory_space<vmem>>, vector<1x1x32xf32>,
    %c1_31 = arith.constant 1 : index
    %c0_32 = arith.constant 0 : index
    %c0_33 = arith.constant 0 : index
    %80 = vector.load %arg3[%c1_31, %c0_32, %c0_33] : memref<2x3x32xf32, #tpu.memory_space<vmem>>, vector<1x1x32xf32>
    %81 = vector.shape_cast %80 : vector<1x1x32xf32> to vector<1x32xf32>
    %82 = arith.mulf %71, %71 : vector<64x32xf32>
    %cst_34 = arith.constant dense<0.000000e+00> : vector<32xf32>
    %83 = vector.multi_reduction <add>, %82, %cst_34 [0] : vector<64x32xf32> to vector<32xf32>
    %84 = vector.shape_cast %83 : vector<32xf32> to vector<1x32xf32>
    %85 = arith.addf %81, %84 : vector<1x32xf32>
    %c1_35 = arith.constant 1 : index
    %c0_36 = arith.constant 0 : index
    %c0_37 = arith.constant 0 : index
    %86 = vector.load %arg3[%c1_35, %c0_36, %c0_37] : memref<2x3x32xf32, #tpu.memory_space<vmem>>, vector<1x1x32xf32>
    %87 = vector.shape_cast %86 : vector<1x1x32xf32> to vector<1x32xf32>
    %88 = vector.shape_cast %85 : vector<1x32xf32> to vector<1x1x32xf32>
    tpu.vector_store %arg3[%c1_35, %c0_36, %c0_37], %88 {strides = array<i32>} : memref<2x3x32xf32, #tpu.memory_space<vmem>>, vector<1x1x32xf32>,
    %89 = vector.extract_strided_slice %8 {offsets = [0, 0, 0], sizes = [8, 8, 32], strides = [1, 1, 1]} : vector<10x10x32xf32> to vector<8x8x32xf32>
    %c1_38 = arith.constant 1 : index
    %c0_39 = arith.constant 0 : index
    %c0_40 = arith.constant 0 : index
    %90 = vector.load %arg2[%c1_38, %c0_39, %c0_40] : memref<3x9x32xf32, #tpu.memory_space<vmem>>, vector<1x1x32xf32>
    %91 = vector.shape_cast %90 : vector<1x1x32xf32> to vector<32xf32>
    %92 = vector.shape_cast %91 : vector<32xf32> to vector<1x1x32xf32>
    %93 = vector.broadcast %92 : vector<1x1x32xf32> to vector<8x8x32xf32>
    %94 = arith.mulf %89, %93 : vector<8x8x32xf32>
    %95 = vector.extract_strided_slice %8 {offsets = [0, 1, 0], sizes = [8, 8, 32], strides = [1, 1, 1]} : vector<10x10x32xf32> to vector<8x8x32xf32>
    %c1_41 = arith.constant 1 : index
    %c1_42 = arith.constant 1 : index
    %c0_43 = arith.constant 0 : index
    %96 = vector.load %arg2[%c1_41, %c1_42, %c0_43] : memref<3x9x32xf32, #tpu.memory_space<vmem>>, vector<1x1x32xf32>
    %97 = vector.shape_cast %96 : vector<1x1x32xf32> to vector<32xf32>
    %98 = vector.shape_cast %97 : vector<32xf32> to vector<1x1x32xf32>
    %99 = vector.broadcast %98 : vector<1x1x32xf32> to vector<8x8x32xf32>
    %100 = arith.mulf %95, %99 : vector<8x8x32xf32>
    %101 = arith.addf %94, %100 : vector<8x8x32xf32>
    %102 = vector.extract_strided_slice %8 {offsets = [0, 2, 0], sizes = [8, 8, 32], strides = [1, 1, 1]} : vector<10x10x32xf32> to vector<8x8x32xf32>
    %c1_44 = arith.constant 1 : index
    %c2_45 = arith.constant 2 : index
    %c0_46 = arith.constant 0 : index
    %103 = vector.load %arg2[%c1_44, %c2_45, %c0_46] : memref<3x9x32xf32, #tpu.memory_space<vmem>>, vector<1x1x32xf32>
    %104 = vector.shape_cast %103 : vector<1x1x32xf32> to vector<32xf32>
    %105 = vector.shape_cast %104 : vector<32xf32> to vector<1x1x32xf32>
    %106 = vector.broadcast %105 : vector<1x1x32xf32> to vector<8x8x32xf32>
    %107 = arith.mulf %102, %106 : vector<8x8x32xf32>
    %108 = arith.addf %101, %107 : vector<8x8x32xf32>
    %109 = vector.extract_strided_slice %8 {offsets = [1, 0, 0], sizes = [8, 8, 32], strides = [1, 1, 1]} : vector<10x10x32xf32> to vector<8x8x32xf32>
    %c1_47 = arith.constant 1 : index
    %c3_48 = arith.constant 3 : index
    %c0_49 = arith.constant 0 : index
    %110 = vector.load %arg2[%c1_47, %c3_48, %c0_49] : memref<3x9x32xf32, #tpu.memory_space<vmem>>, vector<1x1x32xf32>
    %111 = vector.shape_cast %110 : vector<1x1x32xf32> to vector<32xf32>
    %112 = vector.shape_cast %111 : vector<32xf32> to vector<1x1x32xf32>
    %113 = vector.broadcast %112 : vector<1x1x32xf32> to vector<8x8x32xf32>
    %114 = arith.mulf %109, %113 : vector<8x8x32xf32>
    %115 = arith.addf %108, %114 : vector<8x8x32xf32>
    %116 = vector.extract_strided_slice %8 {offsets = [1, 1, 0], sizes = [8, 8, 32], strides = [1, 1, 1]} : vector<10x10x32xf32> to vector<8x8x32xf32>
    %c1_50 = arith.constant 1 : index
    %c4_51 = arith.constant 4 : index
    %c0_52 = arith.constant 0 : index
    %117 = vector.load %arg2[%c1_50, %c4_51, %c0_52] : memref<3x9x32xf32, #tpu.memory_space<vmem>>, vector<1x1x32xf32>
    %118 = vector.shape_cast %117 : vector<1x1x32xf32> to vector<32xf32>
    %119 = vector.shape_cast %118 : vector<32xf32> to vector<1x1x32xf32>
    %120 = vector.broadcast %119 : vector<1x1x32xf32> to vector<8x8x32xf32>
    %121 = arith.mulf %116, %120 : vector<8x8x32xf32>
    %122 = arith.addf %115, %121 : vector<8x8x32xf32>
    %123 = vector.extract_strided_slice %8 {offsets = [1, 2, 0], sizes = [8, 8, 32], strides = [1, 1, 1]} : vector<10x10x32xf32> to vector<8x8x32xf32>
    %c1_53 = arith.constant 1 : index
    %c5_54 = arith.constant 5 : index
    %c0_55 = arith.constant 0 : index
    %124 = vector.load %arg2[%c1_53, %c5_54, %c0_55] : memref<3x9x32xf32, #tpu.memory_space<vmem>>, vector<1x1x32xf32>
    %125 = vector.shape_cast %124 : vector<1x1x32xf32> to vector<32xf32>
    %126 = vector.shape_cast %125 : vector<32xf32> to vector<1x1x32xf32>
    %127 = vector.broadcast %126 : vector<1x1x32xf32> to vector<8x8x32xf32>
    %128 = arith.mulf %123, %127 : vector<8x8x32xf32>
    %129 = arith.addf %122, %128 : vector<8x8x32xf32>
    %130 = vector.extract_strided_slice %8 {offsets = [2, 0, 0], sizes = [8, 8, 32], strides = [1, 1, 1]} : vector<10x10x32xf32> to vector<8x8x32xf32>
    %c1_56 = arith.constant 1 : index
    %c6_57 = arith.constant 6 : index
    %c0_58 = arith.constant 0 : index
    %131 = vector.load %arg2[%c1_56, %c6_57, %c0_58] : memref<3x9x32xf32, #tpu.memory_space<vmem>>, vector<1x1x32xf32>
    %132 = vector.shape_cast %131 : vector<1x1x32xf32> to vector<32xf32>
    %133 = vector.shape_cast %132 : vector<32xf32> to vector<1x1x32xf32>
    %134 = vector.broadcast %133 : vector<1x1x32xf32> to vector<8x8x32xf32>
    %135 = arith.mulf %130, %134 : vector<8x8x32xf32>
    %136 = arith.addf %129, %135 : vector<8x8x32xf32>
    %137 = vector.extract_strided_slice %8 {offsets = [2, 1, 0], sizes = [8, 8, 32], strides = [1, 1, 1]} : vector<10x10x32xf32> to vector<8x8x32xf32>
    %c1_59 = arith.constant 1 : index
    %c7_60 = arith.constant 7 : index
    %c0_61 = arith.constant 0 : index
    %138 = vector.load %arg2[%c1_59, %c7_60, %c0_61] : memref<3x9x32xf32, #tpu.memory_space<vmem>>, vector<1x1x32xf32>
    %139 = vector.shape_cast %138 : vector<1x1x32xf32> to vector<32xf32>
    %140 = vector.shape_cast %139 : vector<32xf32> to vector<1x1x32xf32>
    %141 = vector.broadcast %140 : vector<1x1x32xf32> to vector<8x8x32xf32>
    %142 = arith.mulf %137, %141 : vector<8x8x32xf32>
    %143 = arith.addf %136, %142 : vector<8x8x32xf32>
    %144 = vector.extract_strided_slice %8 {offsets = [2, 2, 0], sizes = [8, 8, 32], strides = [1, 1, 1]} : vector<10x10x32xf32> to vector<8x8x32xf32>
    %c1_62 = arith.constant 1 : index
    %c8_63 = arith.constant 8 : index
    %c0_64 = arith.constant 0 : index
    %145 = vector.load %arg2[%c1_62, %c8_63, %c0_64] : memref<3x9x32xf32, #tpu.memory_space<vmem>>, vector<1x1x32xf32>
    %146 = vector.shape_cast %145 : vector<1x1x32xf32> to vector<32xf32>
    %147 = vector.shape_cast %146 : vector<32xf32> to vector<1x1x32xf32>
    %148 = vector.broadcast %147 : vector<1x1x32xf32> to vector<8x8x32xf32>
    %149 = arith.mulf %144, %148 : vector<8x8x32xf32>
    %150 = arith.addf %143, %149 : vector<8x8x32xf32>
    %151 = vector.shape_cast %150 : vector<8x8x32xf32> to vector<64x32xf32>
    %c0_65 = arith.constant 0 : index
    %c1_66 = arith.constant 1 : index
    %c0_67 = arith.constant 0 : index
    %152 = vector.load %arg3[%c0_65, %c1_66, %c0_67] : memref<2x3x32xf32, #tpu.memory_space<vmem>>, vector<1x1x32xf32>
    %153 = vector.shape_cast %152 : vector<1x1x32xf32> to vector<1x32xf32>
    %cst_68 = arith.constant dense<0.000000e+00> : vector<32xf32>
    %154 = vector.multi_reduction <add>, %151, %cst_68 [0] : vector<64x32xf32> to vector<32xf32>
    %155 = vector.shape_cast %154 : vector<32xf32> to vector<1x32xf32>
    %156 = arith.addf %153, %155 : vector<1x32xf32>
    %c0_69 = arith.constant 0 : index
    %c1_70 = arith.constant 1 : index
    %c0_71 = arith.constant 0 : index
    %157 = vector.load %arg3[%c0_69, %c1_70, %c0_71] : memref<2x3x32xf32, #tpu.memory_space<vmem>>, vector<1x1x32xf32>
    %158 = vector.shape_cast %157 : vector<1x1x32xf32> to vector<1x32xf32>
    %159 = vector.shape_cast %156 : vector<1x32xf32> to vector<1x1x32xf32>
    tpu.vector_store %arg3[%c0_69, %c1_70, %c0_71], %159 {strides = array<i32>} : memref<2x3x32xf32, #tpu.memory_space<vmem>>, vector<1x1x32xf32>,
    %c1_72 = arith.constant 1 : index
    %c1_73 = arith.constant 1 : index
    %c0_74 = arith.constant 0 : index
    %160 = vector.load %arg3[%c1_72, %c1_73, %c0_74] : memref<2x3x32xf32, #tpu.memory_space<vmem>>, vector<1x1x32xf32>
    %161 = vector.shape_cast %160 : vector<1x1x32xf32> to vector<1x32xf32>
    %162 = arith.mulf %151, %151 : vector<64x32xf32>
    %cst_75 = arith.constant dense<0.000000e+00> : vector<32xf32>
    %163 = vector.multi_reduction <add>, %162, %cst_75 [0] : vector<64x32xf32> to vector<32xf32>
    %164 = vector.shape_cast %163 : vector<32xf32> to vector<1x32xf32>
    %165 = arith.addf %161, %164 : vector<1x32xf32>
    %c1_76 = arith.constant 1 : index
    %c1_77 = arith.constant 1 : index
    %c0_78 = arith.constant 0 : index
    %166 = vector.load %arg3[%c1_76, %c1_77, %c0_78] : memref<2x3x32xf32, #tpu.memory_space<vmem>>, vector<1x1x32xf32>
    %167 = vector.shape_cast %166 : vector<1x1x32xf32> to vector<1x32xf32>
    %168 = vector.shape_cast %165 : vector<1x32xf32> to vector<1x1x32xf32>
    tpu.vector_store %arg3[%c1_76, %c1_77, %c0_78], %168 {strides = array<i32>} : memref<2x3x32xf32, #tpu.memory_space<vmem>>, vector<1x1x32xf32>,
    %169 = vector.extract_strided_slice %8 {offsets = [0, 0, 0], sizes = [8, 8, 32], strides = [1, 1, 1]} : vector<10x10x32xf32> to vector<8x8x32xf32>
    %c2_79 = arith.constant 2 : index
    %c0_80 = arith.constant 0 : index
    %c0_81 = arith.constant 0 : index
    %170 = vector.load %arg2[%c2_79, %c0_80, %c0_81] : memref<3x9x32xf32, #tpu.memory_space<vmem>>, vector<1x1x32xf32>
    %171 = vector.shape_cast %170 : vector<1x1x32xf32> to vector<32xf32>
    %172 = vector.shape_cast %171 : vector<32xf32> to vector<1x1x32xf32>
    %173 = vector.broadcast %172 : vector<1x1x32xf32> to vector<8x8x32xf32>
    %174 = arith.mulf %169, %173 : vector<8x8x32xf32>
    %175 = vector.extract_strided_slice %8 {offsets = [0, 1, 0], sizes = [8, 8, 32], strides = [1, 1, 1]} : vector<10x10x32xf32> to vector<8x8x32xf32>
    %c2_82 = arith.constant 2 : index
    %c1_83 = arith.constant 1 : index
    %c0_84 = arith.constant 0 : index
    %176 = vector.load %arg2[%c2_82, %c1_83, %c0_84] : memref<3x9x32xf32, #tpu.memory_space<vmem>>, vector<1x1x32xf32>
    %177 = vector.shape_cast %176 : vector<1x1x32xf32> to vector<32xf32>
    %178 = vector.shape_cast %177 : vector<32xf32> to vector<1x1x32xf32>
    %179 = vector.broadcast %178 : vector<1x1x32xf32> to vector<8x8x32xf32>
    %180 = arith.mulf %175, %179 : vector<8x8x32xf32>
    %181 = arith.addf %174, %180 : vector<8x8x32xf32>
    %182 = vector.extract_strided_slice %8 {offsets = [0, 2, 0], sizes = [8, 8, 32], strides = [1, 1, 1]} : vector<10x10x32xf32> to vector<8x8x32xf32>
    %c2_85 = arith.constant 2 : index
    %c2_86 = arith.constant 2 : index
    %c0_87 = arith.constant 0 : index
    %183 = vector.load %arg2[%c2_85, %c2_86, %c0_87] : memref<3x9x32xf32, #tpu.memory_space<vmem>>, vector<1x1x32xf32>
    %184 = vector.shape_cast %183 : vector<1x1x32xf32> to vector<32xf32>
    %185 = vector.shape_cast %184 : vector<32xf32> to vector<1x1x32xf32>
    %186 = vector.broadcast %185 : vector<1x1x32xf32> to vector<8x8x32xf32>
    %187 = arith.mulf %182, %186 : vector<8x8x32xf32>
    %188 = arith.addf %181, %187 : vector<8x8x32xf32>
    %189 = vector.extract_strided_slice %8 {offsets = [1, 0, 0], sizes = [8, 8, 32], strides = [1, 1, 1]} : vector<10x10x32xf32> to vector<8x8x32xf32>
    %c2_88 = arith.constant 2 : index
    %c3_89 = arith.constant 3 : index
    %c0_90 = arith.constant 0 : index
    %190 = vector.load %arg2[%c2_88, %c3_89, %c0_90] : memref<3x9x32xf32, #tpu.memory_space<vmem>>, vector<1x1x32xf32>
    %191 = vector.shape_cast %190 : vector<1x1x32xf32> to vector<32xf32>
    %192 = vector.shape_cast %191 : vector<32xf32> to vector<1x1x32xf32>
    %193 = vector.broadcast %192 : vector<1x1x32xf32> to vector<8x8x32xf32>
    %194 = arith.mulf %189, %193 : vector<8x8x32xf32>
    %195 = arith.addf %188, %194 : vector<8x8x32xf32>
    %196 = vector.extract_strided_slice %8 {offsets = [1, 1, 0], sizes = [8, 8, 32], strides = [1, 1, 1]} : vector<10x10x32xf32> to vector<8x8x32xf32>
    %c2_91 = arith.constant 2 : index
    %c4_92 = arith.constant 4 : index
    %c0_93 = arith.constant 0 : index
    %197 = vector.load %arg2[%c2_91, %c4_92, %c0_93] : memref<3x9x32xf32, #tpu.memory_space<vmem>>, vector<1x1x32xf32>
    %198 = vector.shape_cast %197 : vector<1x1x32xf32> to vector<32xf32>
    %199 = vector.shape_cast %198 : vector<32xf32> to vector<1x1x32xf32>
    %200 = vector.broadcast %199 : vector<1x1x32xf32> to vector<8x8x32xf32>
    %201 = arith.mulf %196, %200 : vector<8x8x32xf32>
    %202 = arith.addf %195, %201 : vector<8x8x32xf32>
    %203 = vector.extract_strided_slice %8 {offsets = [1, 2, 0], sizes = [8, 8, 32], strides = [1, 1, 1]} : vector<10x10x32xf32> to vector<8x8x32xf32>
    %c2_94 = arith.constant 2 : index
    %c5_95 = arith.constant 5 : index
    %c0_96 = arith.constant 0 : index
    %204 = vector.load %arg2[%c2_94, %c5_95, %c0_96] : memref<3x9x32xf32, #tpu.memory_space<vmem>>, vector<1x1x32xf32>
    %205 = vector.shape_cast %204 : vector<1x1x32xf32> to vector<32xf32>
    %206 = vector.shape_cast %205 : vector<32xf32> to vector<1x1x32xf32>
    %207 = vector.broadcast %206 : vector<1x1x32xf32> to vector<8x8x32xf32>
    %208 = arith.mulf %203, %207 : vector<8x8x32xf32>
    %209 = arith.addf %202, %208 : vector<8x8x32xf32>
    %210 = vector.extract_strided_slice %8 {offsets = [2, 0, 0], sizes = [8, 8, 32], strides = [1, 1, 1]} : vector<10x10x32xf32> to vector<8x8x32xf32>
    %c2_97 = arith.constant 2 : index
    %c6_98 = arith.constant 6 : index
    %c0_99 = arith.constant 0 : index
    %211 = vector.load %arg2[%c2_97, %c6_98, %c0_99] : memref<3x9x32xf32, #tpu.memory_space<vmem>>, vector<1x1x32xf32>
    %212 = vector.shape_cast %211 : vector<1x1x32xf32> to vector<32xf32>
    %213 = vector.shape_cast %212 : vector<32xf32> to vector<1x1x32xf32>
    %214 = vector.broadcast %213 : vector<1x1x32xf32> to vector<8x8x32xf32>
    %215 = arith.mulf %210, %214 : vector<8x8x32xf32>
    %216 = arith.addf %209, %215 : vector<8x8x32xf32>
    %217 = vector.extract_strided_slice %8 {offsets = [2, 1, 0], sizes = [8, 8, 32], strides = [1, 1, 1]} : vector<10x10x32xf32> to vector<8x8x32xf32>
    %c2_100 = arith.constant 2 : index
    %c7_101 = arith.constant 7 : index
    %c0_102 = arith.constant 0 : index
    %218 = vector.load %arg2[%c2_100, %c7_101, %c0_102] : memref<3x9x32xf32, #tpu.memory_space<vmem>>, vector<1x1x32xf32>
    %219 = vector.shape_cast %218 : vector<1x1x32xf32> to vector<32xf32>
    %220 = vector.shape_cast %219 : vector<32xf32> to vector<1x1x32xf32>
    %221 = vector.broadcast %220 : vector<1x1x32xf32> to vector<8x8x32xf32>
    %222 = arith.mulf %217, %221 : vector<8x8x32xf32>
    %223 = arith.addf %216, %222 : vector<8x8x32xf32>
    %224 = vector.extract_strided_slice %8 {offsets = [2, 2, 0], sizes = [8, 8, 32], strides = [1, 1, 1]} : vector<10x10x32xf32> to vector<8x8x32xf32>
    %c2_103 = arith.constant 2 : index
    %c8_104 = arith.constant 8 : index
    %c0_105 = arith.constant 0 : index
    %225 = vector.load %arg2[%c2_103, %c8_104, %c0_105] : memref<3x9x32xf32, #tpu.memory_space<vmem>>, vector<1x1x32xf32>
    %226 = vector.shape_cast %225 : vector<1x1x32xf32> to vector<32xf32>
    %227 = vector.shape_cast %226 : vector<32xf32> to vector<1x1x32xf32>
    %228 = vector.broadcast %227 : vector<1x1x32xf32> to vector<8x8x32xf32>
    %229 = arith.mulf %224, %228 : vector<8x8x32xf32>
    %230 = arith.addf %223, %229 : vector<8x8x32xf32>
    %231 = vector.shape_cast %230 : vector<8x8x32xf32> to vector<64x32xf32>
    %c0_106 = arith.constant 0 : index
    %c2_107 = arith.constant 2 : index
    %c0_108 = arith.constant 0 : index
    %232 = vector.load %arg3[%c0_106, %c2_107, %c0_108] : memref<2x3x32xf32, #tpu.memory_space<vmem>>, vector<1x1x32xf32>
    %233 = vector.shape_cast %232 : vector<1x1x32xf32> to vector<1x32xf32>
    %cst_109 = arith.constant dense<0.000000e+00> : vector<32xf32>
    %234 = vector.multi_reduction <add>, %231, %cst_109 [0] : vector<64x32xf32> to vector<32xf32>
    %235 = vector.shape_cast %234 : vector<32xf32> to vector<1x32xf32>
    %236 = arith.addf %233, %235 : vector<1x32xf32>
    %c0_110 = arith.constant 0 : index
    %c2_111 = arith.constant 2 : index
    %c0_112 = arith.constant 0 : index
    %237 = vector.load %arg3[%c0_110, %c2_111, %c0_112] : memref<2x3x32xf32, #tpu.memory_space<vmem>>, vector<1x1x32xf32>
    %238 = vector.shape_cast %237 : vector<1x1x32xf32> to vector<1x32xf32>
    %239 = vector.shape_cast %236 : vector<1x32xf32> to vector<1x1x32xf32>
    tpu.vector_store %arg3[%c0_110, %c2_111, %c0_112], %239 {strides = array<i32>} : memref<2x3x32xf32, #tpu.memory_space<vmem>>, vector<1x1x32xf32>,
    %c1_113 = arith.constant 1 : index
    %c2_114 = arith.constant 2 : index
    %c0_115 = arith.constant 0 : index
    %240 = vector.load %arg3[%c1_113, %c2_114, %c0_115] : memref<2x3x32xf32, #tpu.memory_space<vmem>>, vector<1x1x32xf32>
    %241 = vector.shape_cast %240 : vector<1x1x32xf32> to vector<1x32xf32>
    %242 = arith.mulf %231, %231 : vector<64x32xf32>
    %cst_116 = arith.constant dense<0.000000e+00> : vector<32xf32>
    %243 = vector.multi_reduction <add>, %242, %cst_116 [0] : vector<64x32xf32> to vector<32xf32>
    %244 = vector.shape_cast %243 : vector<32xf32> to vector<1x32xf32>
    %245 = arith.addf %241, %244 : vector<1x32xf32>
    %c1_117 = arith.constant 1 : index
    %c2_118 = arith.constant 2 : index
    %c0_119 = arith.constant 0 : index
    %246 = vector.load %arg3[%c1_117, %c2_118, %c0_119] : memref<2x3x32xf32, #tpu.memory_space<vmem>>, vector<1x1x32xf32>
    %247 = vector.shape_cast %246 : vector<1x1x32xf32> to vector<1x32xf32>
    %248 = vector.shape_cast %245 : vector<1x32xf32> to vector<1x1x32xf32>
    tpu.vector_store %arg3[%c1_117, %c2_118, %c0_119], %248 {strides = array<i32>} : memref<2x3x32xf32, #tpu.memory_space<vmem>>, vector<1x1x32xf32>,
    return
  }
  func.func @transform_0(%arg0: i32) -> (i32, i32, i32, i32) {
    %c0_i32 = arith.constant 0 : i32
    %c0_i32_0 = arith.constant 0 : i32
    %c0_i32_1 = arith.constant 0 : i32
    %c0_i32_2 = arith.constant 0 : i32
    return %arg0, %c0_i32, %c0_i32_0, %c0_i32_1 : i32, i32, i32, i32
  }
  func.func @transform_1(%arg0: i32) -> (i32, i32, i32) {
    %c0_i32 = arith.constant 0 : i32
    %c0_i32_0 = arith.constant 0 : i32
    %c0_i32_1 = arith.constant 0 : i32
    %c0_i32_2 = arith.constant 0 : i32
    return %c0_i32, %c0_i32_0, %c0_i32_1 : i32, i32, i32
  }
  func.func @transform_2(%arg0: i32) -> (i32, i32, i32) {
    %c0_i32 = arith.constant 0 : i32
    %c0_i32_0 = arith.constant 0 : i32
    %c0_i32_1 = arith.constant 0 : i32
    %c0_i32_2 = arith.constant 0 : i32
    return %c0_i32, %c0_i32_0, %c0_i32_1 : i32, i32, i32
  }
}

module attributes {stable_mosaic.version = 11 : i64} {
  func.func @_flash_attn_kernel(%arg0: i32, %arg1: i32, %arg2: memref<1x64x32xf32, #tpu.memory_space<vmem>>, %arg3: memref<1x64x64xf32, #tpu.memory_space<vmem>>, %arg4: memref<32x32xf32, #tpu.memory_space<vmem>>, %arg5: memref<1x32xf32, #tpu.memory_space<vmem>>, %arg6: memref<1x64x32xf32, #tpu.memory_space<vmem>>, %arg7: memref<64x2xf32, #tpu.memory_space<vmem>>, %arg8: memref<64x2xf32, #tpu.memory_space<vmem>>, %arg9: memref<64x32xf32, #tpu.memory_space<vmem>>) attributes {dimension_semantics = [#tpu.dimension_semantics<parallel>, #tpu.dimension_semantics<arbitrary>], iteration_bounds = array<i64: 2, 1>, scalar_prefetch = 0 : i64, scratch_operands = 3 : i64, tpu.core_type = #tpu.core_type<tc>, window_params = [{transform_indices = @transform_0, window_bounds = array<i64: 1, 64, 32>}, {transform_indices = @transform_1, window_bounds = array<i64: 1, 64, 64>}, {pipeline_mode = #tpu.pipeline_mode<synchronous>, transform_indices = @transform_2, window_bounds = array<i64: 32, 32>}, {pipeline_mode = #tpu.pipeline_mode<synchronous>, transform_indices = @transform_3, window_bounds = array<i64: 1, 32>}, {transform_indices = @transform_4, window_bounds = array<i64: 1, 64, 32>}]} {
    %c0_i32 = arith.constant 0 : i32
    %0 = arith.cmpi eq, %arg1, %c0_i32 : i32
    %1 = arith.extui %0 : i1 to i32
    %c0_i32_0 = arith.constant 0 : i32
    %2 = arith.cmpi ne, %1, %c0_i32_0 : i32
    scf.if %2 {
      %cst_37 = arith.constant 0xFF800000 : f32
      %70 = vector.broadcast %cst_37 : f32 to vector<64x2xf32>
      %c0_38 = arith.constant 0 : index
      %c0_39 = arith.constant 0 : index
      %71 = vector.load %arg7[%c0_38, %c0_39] : memref<64x2xf32, #tpu.memory_space<vmem>>, vector<64x2xf32>
      tpu.vector_store %arg7[%c0_38, %c0_39], %70 {strides = array<i32>} : memref<64x2xf32, #tpu.memory_space<vmem>>, vector<64x2xf32>,
      %cst_40 = arith.constant 0.000000e+00 : f32
      %72 = vector.broadcast %cst_40 : f32 to vector<64x2xf32>
      %c0_41 = arith.constant 0 : index
      %c0_42 = arith.constant 0 : index
      %73 = vector.load %arg8[%c0_41, %c0_42] : memref<64x2xf32, #tpu.memory_space<vmem>>, vector<64x2xf32>
      tpu.vector_store %arg8[%c0_41, %c0_42], %72 {strides = array<i32>} : memref<64x2xf32, #tpu.memory_space<vmem>>, vector<64x2xf32>,
      %cst_43 = arith.constant 0.000000e+00 : f32
      %74 = vector.broadcast %cst_43 : f32 to vector<64x32xf32>
      %c0_44 = arith.constant 0 : index
      %c0_45 = arith.constant 0 : index
      %75 = vector.load %arg9[%c0_44, %c0_45] : memref<64x32xf32, #tpu.memory_space<vmem>>, vector<64x32xf32>
      tpu.vector_store %arg9[%c0_44, %c0_45], %74 {strides = array<i32>} : memref<64x32xf32, #tpu.memory_space<vmem>>, vector<64x32xf32>,
    } else {
    }
    %c0 = arith.constant 0 : index
    %c0_1 = arith.constant 0 : index
    %c0_2 = arith.constant 0 : index
    %3 = vector.load %arg2[%c0, %c0_1, %c0_2] : memref<1x64x32xf32, #tpu.memory_space<vmem>>, vector<1x64x32xf32>
    %4 = vector.shape_cast %3 : vector<1x64x32xf32> to vector<64x32xf32>
    %c0_3 = arith.constant 0 : index
    %c0_4 = arith.constant 0 : index
    %c0_5 = arith.constant 0 : index
    %5 = vector.load %arg3[%c0_3, %c0_4, %c0_5] : memref<1x64x64xf32, #tpu.memory_space<vmem>>, vector<1x64x64xf32>
    %6 = vector.shape_cast %5 : vector<1x64x64xf32> to vector<64x64xf32>
    %7 = vector.extract_strided_slice %4 {offsets = [0, 0], sizes = [64, 16], strides = [1, 1]} : vector<64x32xf32> to vector<64x16xf32>
    %8 = vector.extract_strided_slice %6 {offsets = [0, 0], sizes = [64, 16], strides = [1, 1]} : vector<64x64xf32> to vector<64x16xf32>
    %9 = vector.extract_strided_slice %6 {offsets = [0, 32], sizes = [64, 16], strides = [1, 1]} : vector<64x64xf32> to vector<64x16xf32>
    %10 = arith.truncf %7 : vector<64x16xf32> to vector<64x16xbf16>
    %11 = arith.truncf %8 : vector<64x16xf32> to vector<64x16xbf16>
    %cst = arith.constant dense<0.000000e+00> : vector<64x64xf32>
    %12 = tpu.matmul %10, %11, %cst {dimension_numbers = #tpu.dot_dimension_numbers<[1], [1], [0], [0], [0, 0, 1, 0], [], []>} : vector<64x16xbf16>, vector<64x16xbf16>, vector<64x64xf32> -> vector<64x64xf32>
    %c0_6 = arith.constant 0 : index
    %c0_7 = arith.constant 0 : index
    %13 = vector.load %arg7[%c0_6, %c0_7] : memref<64x2xf32, #tpu.memory_space<vmem>>, vector<64x1xf32>
    %cst_8 = arith.constant dense<0xFF800000> : vector<64xf32>
    %14 = vector.multi_reduction <maximumf>, %12, %cst_8 [1] : vector<64x64xf32> to vector<64xf32>
    %15 = vector.shape_cast %14 : vector<64xf32> to vector<64x1xf32>
    %16 = arith.maximumf %13, %15 : vector<64x1xf32>
    %17 = arith.subf %13, %16 : vector<64x1xf32>
    %18 = math.exp %17 : vector<64x1xf32>
    %19 = vector.broadcast %16 : vector<64x1xf32> to vector<64x64xf32>
    %20 = arith.subf %12, %19 : vector<64x64xf32>
    %21 = math.exp %20 : vector<64x64xf32>
    %c0_9 = arith.constant 0 : index
    %c0_10 = arith.constant 0 : index
    %22 = vector.load %arg8[%c0_9, %c0_10] : memref<64x2xf32, #tpu.memory_space<vmem>>, vector<64x1xf32>
    %23 = arith.mulf %18, %22 : vector<64x1xf32>
    %cst_11 = arith.constant dense<0.000000e+00> : vector<64xf32>
    %24 = vector.multi_reduction <add>, %21, %cst_11 [1] : vector<64x64xf32> to vector<64xf32>
    %25 = vector.shape_cast %24 : vector<64xf32> to vector<64x1xf32>
    %26 = arith.addf %23, %25 : vector<64x1xf32>
    %c0_12 = arith.constant 0 : index
    %c0_13 = arith.constant 0 : index
    %27 = vector.load %arg8[%c0_12, %c0_13] : memref<64x2xf32, #tpu.memory_space<vmem>>, vector<64x1xf32>
    tpu.vector_store %arg8[%c0_12, %c0_13], %26 {strides = array<i32>} : memref<64x2xf32, #tpu.memory_space<vmem>>, vector<64x1xf32>,
    %c0_14 = arith.constant 0 : index
    %c0_15 = arith.constant 0 : index
    %28 = vector.load %arg9[%c0_14, %c0_15] : memref<64x32xf32, #tpu.memory_space<vmem>>, vector<64x16xf32>
    %29 = vector.broadcast %18 : vector<64x1xf32> to vector<64x16xf32>
    %30 = arith.mulf %29, %28 : vector<64x16xf32>
    %31 = arith.truncf %21 : vector<64x64xf32> to vector<64x64xbf16>
    %32 = arith.truncf %9 : vector<64x16xf32> to vector<64x16xbf16>
    %cst_16 = arith.constant dense<0.000000e+00> : vector<64x16xf32>
    %33 = tpu.matmul %31, %32, %cst_16 {dimension_numbers = #tpu.dot_dimension_numbers<[1], [0], [0], [1], [0, 0, 1, 1], [], []>} : vector<64x64xbf16>, vector<64x16xbf16>, vector<64x16xf32> -> vector<64x16xf32>
    %34 = arith.addf %30, %33 : vector<64x16xf32>
    %c0_17 = arith.constant 0 : index
    %c0_18 = arith.constant 0 : index
    %35 = vector.load %arg9[%c0_17, %c0_18] : memref<64x32xf32, #tpu.memory_space<vmem>>, vector<64x16xf32>
    tpu.vector_store %arg9[%c0_17, %c0_18], %34 {strides = array<i32>} : memref<64x32xf32, #tpu.memory_space<vmem>>, vector<64x16xf32>,
    %c0_19 = arith.constant 0 : index
    %c0_20 = arith.constant 0 : index
    %36 = vector.load %arg7[%c0_19, %c0_20] : memref<64x2xf32, #tpu.memory_space<vmem>>, vector<64x1xf32>
    tpu.vector_store %arg7[%c0_19, %c0_20], %16 {strides = array<i32>} : memref<64x2xf32, #tpu.memory_space<vmem>>, vector<64x1xf32>,
    %37 = vector.extract_strided_slice %4 {offsets = [0, 16], sizes = [64, 16], strides = [1, 1]} : vector<64x32xf32> to vector<64x16xf32>
    %38 = vector.extract_strided_slice %6 {offsets = [0, 16], sizes = [64, 16], strides = [1, 1]} : vector<64x64xf32> to vector<64x16xf32>
    %39 = vector.extract_strided_slice %6 {offsets = [0, 48], sizes = [64, 16], strides = [1, 1]} : vector<64x64xf32> to vector<64x16xf32>
    %40 = arith.truncf %37 : vector<64x16xf32> to vector<64x16xbf16>
    %41 = arith.truncf %38 : vector<64x16xf32> to vector<64x16xbf16>
    %cst_21 = arith.constant dense<0.000000e+00> : vector<64x64xf32>
    %42 = tpu.matmul %40, %41, %cst_21 {dimension_numbers = #tpu.dot_dimension_numbers<[1], [1], [0], [0], [0, 0, 1, 0], [], []>} : vector<64x16xbf16>, vector<64x16xbf16>, vector<64x64xf32> -> vector<64x64xf32>
    %c0_22 = arith.constant 0 : index
    %c1 = arith.constant 1 : index
    %43 = vector.load %arg7[%c0_22, %c1] : memref<64x2xf32, #tpu.memory_space<vmem>>, vector<64x1xf32>
    %cst_23 = arith.constant dense<0xFF800000> : vector<64xf32>
    %44 = vector.multi_reduction <maximumf>, %42, %cst_23 [1] : vector<64x64xf32> to vector<64xf32>
    %45 = vector.shape_cast %44 : vector<64xf32> to vector<64x1xf32>
    %46 = arith.maximumf %43, %45 : vector<64x1xf32>
    %47 = arith.subf %43, %46 : vector<64x1xf32>
    %48 = math.exp %47 : vector<64x1xf32>
    %49 = vector.broadcast %46 : vector<64x1xf32> to vector<64x64xf32>
    %50 = arith.subf %42, %49 : vector<64x64xf32>
    %51 = math.exp %50 : vector<64x64xf32>
    %c0_24 = arith.constant 0 : index
    %c1_25 = arith.constant 1 : index
    %52 = vector.load %arg8[%c0_24, %c1_25] : memref<64x2xf32, #tpu.memory_space<vmem>>, vector<64x1xf32>
    %53 = arith.mulf %48, %52 : vector<64x1xf32>
    %cst_26 = arith.constant dense<0.000000e+00> : vector<64xf32>
    %54 = vector.multi_reduction <add>, %51, %cst_26 [1] : vector<64x64xf32> to vector<64xf32>
    %55 = vector.shape_cast %54 : vector<64xf32> to vector<64x1xf32>
    %56 = arith.addf %53, %55 : vector<64x1xf32>
    %c0_27 = arith.constant 0 : index
    %c1_28 = arith.constant 1 : index
    %57 = vector.load %arg8[%c0_27, %c1_28] : memref<64x2xf32, #tpu.memory_space<vmem>>, vector<64x1xf32>
    tpu.vector_store %arg8[%c0_27, %c1_28], %56 {strides = array<i32>} : memref<64x2xf32, #tpu.memory_space<vmem>>, vector<64x1xf32>,
    %c0_29 = arith.constant 0 : index
    %c16 = arith.constant 16 : index
    %58 = vector.load %arg9[%c0_29, %c16] : memref<64x32xf32, #tpu.memory_space<vmem>>, vector<64x16xf32>
    %59 = vector.broadcast %48 : vector<64x1xf32> to vector<64x16xf32>
    %60 = arith.mulf %59, %58 : vector<64x16xf32>
    %61 = arith.truncf %51 : vector<64x64xf32> to vector<64x64xbf16>
    %62 = arith.truncf %39 : vector<64x16xf32> to vector<64x16xbf16>
    %cst_30 = arith.constant dense<0.000000e+00> : vector<64x16xf32>
    %63 = tpu.matmul %61, %62, %cst_30 {dimension_numbers = #tpu.dot_dimension_numbers<[1], [0], [0], [1], [0, 0, 1, 1], [], []>} : vector<64x64xbf16>, vector<64x16xbf16>, vector<64x16xf32> -> vector<64x16xf32>
    %64 = arith.addf %60, %63 : vector<64x16xf32>
    %c0_31 = arith.constant 0 : index
    %c16_32 = arith.constant 16 : index
    %65 = vector.load %arg9[%c0_31, %c16_32] : memref<64x32xf32, #tpu.memory_space<vmem>>, vector<64x16xf32>
    tpu.vector_store %arg9[%c0_31, %c16_32], %64 {strides = array<i32>} : memref<64x32xf32, #tpu.memory_space<vmem>>, vector<64x16xf32>,
    %c0_33 = arith.constant 0 : index
    %c1_34 = arith.constant 1 : index
    %66 = vector.load %arg7[%c0_33, %c1_34] : memref<64x2xf32, #tpu.memory_space<vmem>>, vector<64x1xf32>
    tpu.vector_store %arg7[%c0_33, %c1_34], %46 {strides = array<i32>} : memref<64x2xf32, #tpu.memory_space<vmem>>, vector<64x1xf32>,
    %c0_i32_35 = arith.constant 0 : i32
    %67 = arith.cmpi eq, %arg1, %c0_i32_35 : i32
    %68 = arith.extui %67 : i1 to i32
    %c0_i32_36 = arith.constant 0 : i32
    %69 = arith.cmpi ne, %68, %c0_i32_36 : i32
    scf.if %69 {
      %c0_37 = arith.constant 0 : index
      %c0_38 = arith.constant 0 : index
      %70 = vector.load %arg8[%c0_37, %c0_38] : memref<64x2xf32, #tpu.memory_space<vmem>>, vector<64x1xf32>
      %71 = tpu.reciprocal %70 {approx = true} : vector<64x1xf32> -> vector<64x1xf32>
      %c0_39 = arith.constant 0 : index
      %c0_40 = arith.constant 0 : index
      %72 = vector.load %arg9[%c0_39, %c0_40] : memref<64x32xf32, #tpu.memory_space<vmem>>, vector<64x16xf32>
      %73 = vector.broadcast %71 : vector<64x1xf32> to vector<64x16xf32>
      %74 = arith.mulf %72, %73 : vector<64x16xf32>
      %c0_41 = arith.constant 0 : index
      %c0_42 = arith.constant 0 : index
      %75 = vector.load %arg9[%c0_41, %c0_42] : memref<64x32xf32, #tpu.memory_space<vmem>>, vector<64x16xf32>
      tpu.vector_store %arg9[%c0_41, %c0_42], %74 {strides = array<i32>} : memref<64x32xf32, #tpu.memory_space<vmem>>, vector<64x16xf32>,
      %c0_43 = arith.constant 0 : index
      %c1_44 = arith.constant 1 : index
      %76 = vector.load %arg8[%c0_43, %c1_44] : memref<64x2xf32, #tpu.memory_space<vmem>>, vector<64x1xf32>
      %77 = tpu.reciprocal %76 {approx = true} : vector<64x1xf32> -> vector<64x1xf32>
      %c0_45 = arith.constant 0 : index
      %c16_46 = arith.constant 16 : index
      %78 = vector.load %arg9[%c0_45, %c16_46] : memref<64x32xf32, #tpu.memory_space<vmem>>, vector<64x16xf32>
      %79 = vector.broadcast %77 : vector<64x1xf32> to vector<64x16xf32>
      %80 = arith.mulf %78, %79 : vector<64x16xf32>
      %c0_47 = arith.constant 0 : index
      %c16_48 = arith.constant 16 : index
      %81 = vector.load %arg9[%c0_47, %c16_48] : memref<64x32xf32, #tpu.memory_space<vmem>>, vector<64x16xf32>
      tpu.vector_store %arg9[%c0_47, %c16_48], %80 {strides = array<i32>} : memref<64x32xf32, #tpu.memory_space<vmem>>, vector<64x16xf32>,
      %c0_49 = arith.constant 0 : index
      %c0_50 = arith.constant 0 : index
      %82 = vector.load %arg9[%c0_49, %c0_50] : memref<64x32xf32, #tpu.memory_space<vmem>>, vector<64x32xf32>
      %83 = arith.truncf %82 : vector<64x32xf32> to vector<64x32xbf16>
      %c0_51 = arith.constant 0 : index
      %c0_52 = arith.constant 0 : index
      %84 = vector.load %arg4[%c0_51, %c0_52] : memref<32x32xf32, #tpu.memory_space<vmem>>, vector<32x32xf32>
      %85 = arith.truncf %84 : vector<32x32xf32> to vector<32x32xbf16>
      %cst_53 = arith.constant dense<0.000000e+00> : vector<64x32xf32>
      %86 = tpu.matmul %83, %85, %cst_53 {dimension_numbers = #tpu.dot_dimension_numbers<[1], [0], [0], [1], [0, 0, 1, 1], [], []>} : vector<64x32xbf16>, vector<32x32xbf16>, vector<64x32xf32> -> vector<64x32xf32>
      %c0_54 = arith.constant 0 : index
      %c0_55 = arith.constant 0 : index
      %87 = vector.load %arg5[%c0_54, %c0_55] : memref<1x32xf32, #tpu.memory_space<vmem>>, vector<1x32xf32>
      %88 = vector.broadcast %87 : vector<1x32xf32> to vector<64x32xf32>
      %89 = arith.addf %86, %88 : vector<64x32xf32>
      %c0_56 = arith.constant 0 : index
      %c0_57 = arith.constant 0 : index
      %c0_58 = arith.constant 0 : index
      %90 = vector.load %arg6[%c0_56, %c0_57, %c0_58] : memref<1x64x32xf32, #tpu.memory_space<vmem>>, vector<1x64x32xf32>
      %91 = vector.shape_cast %90 : vector<1x64x32xf32> to vector<64x32xf32>
      %92 = vector.shape_cast %89 : vector<64x32xf32> to vector<1x64x32xf32>
      tpu.vector_store %arg6[%c0_56, %c0_57, %c0_58], %92 {strides = array<i32>} : memref<1x64x32xf32, #tpu.memory_space<vmem>>, vector<1x64x32xf32>,
    } else {
    }
    return
  }
  func.func @transform_0(%arg0: i32, %arg1: i32) -> (i32, i32, i32) {
    %c0_i32 = arith.constant 0 : i32
    %c0_i32_0 = arith.constant 0 : i32
    %c0_i32_1 = arith.constant 0 : i32
    return %arg0, %c0_i32, %c0_i32_0 : i32, i32, i32
  }
  func.func @transform_1(%arg0: i32, %arg1: i32) -> (i32, i32, i32) {
    %c0_i32 = arith.constant 0 : i32
    %c0_i32_0 = arith.constant 0 : i32
    return %arg0, %arg1, %c0_i32 : i32, i32, i32
  }
  func.func @transform_2(%arg0: i32, %arg1: i32) -> (i32, i32) {
    %c0_i32 = arith.constant 0 : i32
    %c0_i32_0 = arith.constant 0 : i32
    %c0_i32_1 = arith.constant 0 : i32
    return %c0_i32, %c0_i32_0 : i32, i32
  }
  func.func @transform_3(%arg0: i32, %arg1: i32) -> (i32, i32) {
    %c0_i32 = arith.constant 0 : i32
    %c0_i32_0 = arith.constant 0 : i32
    %c0_i32_1 = arith.constant 0 : i32
    return %c0_i32, %c0_i32_0 : i32, i32
  }
  func.func @transform_4(%arg0: i32, %arg1: i32) -> (i32, i32, i32) {
    %c0_i32 = arith.constant 0 : i32
    %c0_i32_0 = arith.constant 0 : i32
    %c0_i32_1 = arith.constant 0 : i32
    return %arg0, %c0_i32, %c0_i32_0 : i32, i32, i32
  }
}

module attributes {stable_mosaic.version = 11 : i64} {
  func.func @_qkv_project_kernel(%arg0: i32, %arg1: memref<1x8x8x32xf32, #tpu.memory_space<vmem>>, %arg2: memref<3x9x32xf32, #tpu.memory_space<vmem>>, %arg3: memref<3x32x32xf32, #tpu.memory_space<vmem>>, %arg4: memref<3x32xf32, #tpu.memory_space<vmem>>, %arg5: memref<1x64x32xf32, #tpu.memory_space<vmem>>, %arg6: memref<1x64x64xf32, #tpu.memory_space<vmem>>) attributes {dimension_semantics = [#tpu.dimension_semantics<parallel>], iteration_bounds = array<i64: 2>, scalar_prefetch = 0 : i64, scratch_operands = 0 : i64, tpu.core_type = #tpu.core_type<tc>, window_params = [{transform_indices = @transform_0, window_bounds = array<i64: 1, 8, 8, 32>}, {pipeline_mode = #tpu.pipeline_mode<synchronous>, transform_indices = @transform_1, window_bounds = array<i64: 3, 9, 32>}, {pipeline_mode = #tpu.pipeline_mode<synchronous>, transform_indices = @transform_2, window_bounds = array<i64: 3, 32, 32>}, {pipeline_mode = #tpu.pipeline_mode<synchronous>, transform_indices = @transform_3, window_bounds = array<i64: 3, 32>}, {transform_indices = @transform_4, window_bounds = array<i64: 1, 64, 32>}, {transform_indices = @transform_5, window_bounds = array<i64: 1, 64, 64>}]} {
    %c0 = arith.constant 0 : index
    %c0_0 = arith.constant 0 : index
    %c0_1 = arith.constant 0 : index
    %c0_2 = arith.constant 0 : index
    %0 = vector.load %arg1[%c0, %c0_0, %c0_1, %c0_2] : memref<1x8x8x32xf32, #tpu.memory_space<vmem>>, vector<1x8x8x32xf32>
    %1 = vector.shape_cast %0 : vector<1x8x8x32xf32> to vector<8x8x32xf32>
    %cst = arith.constant 0.000000e+00 : f32
    %2 = vector.broadcast %cst : f32 to vector<8x1x32xf32>
    %3 = tpu.concatenate %2, %1, %2 in 1 : vector<8x1x32xf32>, vector<8x8x32xf32>, vector<8x1x32xf32> -> vector<8x10x32xf32>
    %cst_3 = arith.constant 0.000000e+00 : f32
    %4 = vector.broadcast %cst_3 : f32 to vector<1x10x32xf32>
    %5 = tpu.concatenate %4, %3, %4 in 0 : vector<1x10x32xf32>, vector<8x10x32xf32>, vector<1x10x32xf32> -> vector<10x10x32xf32>
    %6 = vector.extract_strided_slice %5 {offsets = [0, 0, 0], sizes = [8, 8, 32], strides = [1, 1, 1]} : vector<10x10x32xf32> to vector<8x8x32xf32>
    %c0_4 = arith.constant 0 : index
    %c0_5 = arith.constant 0 : index
    %c0_6 = arith.constant 0 : index
    %7 = vector.load %arg2[%c0_4, %c0_5, %c0_6] : memref<3x9x32xf32, #tpu.memory_space<vmem>>, vector<1x1x32xf32>
    %8 = vector.shape_cast %7 : vector<1x1x32xf32> to vector<32xf32>
    %9 = vector.shape_cast %8 : vector<32xf32> to vector<1x1x32xf32>
    %10 = vector.broadcast %9 : vector<1x1x32xf32> to vector<8x8x32xf32>
    %11 = arith.mulf %6, %10 : vector<8x8x32xf32>
    %12 = vector.extract_strided_slice %5 {offsets = [0, 1, 0], sizes = [8, 8, 32], strides = [1, 1, 1]} : vector<10x10x32xf32> to vector<8x8x32xf32>
    %c0_7 = arith.constant 0 : index
    %c1 = arith.constant 1 : index
    %c0_8 = arith.constant 0 : index
    %13 = vector.load %arg2[%c0_7, %c1, %c0_8] : memref<3x9x32xf32, #tpu.memory_space<vmem>>, vector<1x1x32xf32>
    %14 = vector.shape_cast %13 : vector<1x1x32xf32> to vector<32xf32>
    %15 = vector.shape_cast %14 : vector<32xf32> to vector<1x1x32xf32>
    %16 = vector.broadcast %15 : vector<1x1x32xf32> to vector<8x8x32xf32>
    %17 = arith.mulf %12, %16 : vector<8x8x32xf32>
    %18 = arith.addf %11, %17 : vector<8x8x32xf32>
    %19 = vector.extract_strided_slice %5 {offsets = [0, 2, 0], sizes = [8, 8, 32], strides = [1, 1, 1]} : vector<10x10x32xf32> to vector<8x8x32xf32>
    %c0_9 = arith.constant 0 : index
    %c2 = arith.constant 2 : index
    %c0_10 = arith.constant 0 : index
    %20 = vector.load %arg2[%c0_9, %c2, %c0_10] : memref<3x9x32xf32, #tpu.memory_space<vmem>>, vector<1x1x32xf32>
    %21 = vector.shape_cast %20 : vector<1x1x32xf32> to vector<32xf32>
    %22 = vector.shape_cast %21 : vector<32xf32> to vector<1x1x32xf32>
    %23 = vector.broadcast %22 : vector<1x1x32xf32> to vector<8x8x32xf32>
    %24 = arith.mulf %19, %23 : vector<8x8x32xf32>
    %25 = arith.addf %18, %24 : vector<8x8x32xf32>
    %26 = vector.extract_strided_slice %5 {offsets = [1, 0, 0], sizes = [8, 8, 32], strides = [1, 1, 1]} : vector<10x10x32xf32> to vector<8x8x32xf32>
    %c0_11 = arith.constant 0 : index
    %c3 = arith.constant 3 : index
    %c0_12 = arith.constant 0 : index
    %27 = vector.load %arg2[%c0_11, %c3, %c0_12] : memref<3x9x32xf32, #tpu.memory_space<vmem>>, vector<1x1x32xf32>
    %28 = vector.shape_cast %27 : vector<1x1x32xf32> to vector<32xf32>
    %29 = vector.shape_cast %28 : vector<32xf32> to vector<1x1x32xf32>
    %30 = vector.broadcast %29 : vector<1x1x32xf32> to vector<8x8x32xf32>
    %31 = arith.mulf %26, %30 : vector<8x8x32xf32>
    %32 = arith.addf %25, %31 : vector<8x8x32xf32>
    %33 = vector.extract_strided_slice %5 {offsets = [1, 1, 0], sizes = [8, 8, 32], strides = [1, 1, 1]} : vector<10x10x32xf32> to vector<8x8x32xf32>
    %c0_13 = arith.constant 0 : index
    %c4 = arith.constant 4 : index
    %c0_14 = arith.constant 0 : index
    %34 = vector.load %arg2[%c0_13, %c4, %c0_14] : memref<3x9x32xf32, #tpu.memory_space<vmem>>, vector<1x1x32xf32>
    %35 = vector.shape_cast %34 : vector<1x1x32xf32> to vector<32xf32>
    %36 = vector.shape_cast %35 : vector<32xf32> to vector<1x1x32xf32>
    %37 = vector.broadcast %36 : vector<1x1x32xf32> to vector<8x8x32xf32>
    %38 = arith.mulf %33, %37 : vector<8x8x32xf32>
    %39 = arith.addf %32, %38 : vector<8x8x32xf32>
    %40 = vector.extract_strided_slice %5 {offsets = [1, 2, 0], sizes = [8, 8, 32], strides = [1, 1, 1]} : vector<10x10x32xf32> to vector<8x8x32xf32>
    %c0_15 = arith.constant 0 : index
    %c5 = arith.constant 5 : index
    %c0_16 = arith.constant 0 : index
    %41 = vector.load %arg2[%c0_15, %c5, %c0_16] : memref<3x9x32xf32, #tpu.memory_space<vmem>>, vector<1x1x32xf32>
    %42 = vector.shape_cast %41 : vector<1x1x32xf32> to vector<32xf32>
    %43 = vector.shape_cast %42 : vector<32xf32> to vector<1x1x32xf32>
    %44 = vector.broadcast %43 : vector<1x1x32xf32> to vector<8x8x32xf32>
    %45 = arith.mulf %40, %44 : vector<8x8x32xf32>
    %46 = arith.addf %39, %45 : vector<8x8x32xf32>
    %47 = vector.extract_strided_slice %5 {offsets = [2, 0, 0], sizes = [8, 8, 32], strides = [1, 1, 1]} : vector<10x10x32xf32> to vector<8x8x32xf32>
    %c0_17 = arith.constant 0 : index
    %c6 = arith.constant 6 : index
    %c0_18 = arith.constant 0 : index
    %48 = vector.load %arg2[%c0_17, %c6, %c0_18] : memref<3x9x32xf32, #tpu.memory_space<vmem>>, vector<1x1x32xf32>
    %49 = vector.shape_cast %48 : vector<1x1x32xf32> to vector<32xf32>
    %50 = vector.shape_cast %49 : vector<32xf32> to vector<1x1x32xf32>
    %51 = vector.broadcast %50 : vector<1x1x32xf32> to vector<8x8x32xf32>
    %52 = arith.mulf %47, %51 : vector<8x8x32xf32>
    %53 = arith.addf %46, %52 : vector<8x8x32xf32>
    %54 = vector.extract_strided_slice %5 {offsets = [2, 1, 0], sizes = [8, 8, 32], strides = [1, 1, 1]} : vector<10x10x32xf32> to vector<8x8x32xf32>
    %c0_19 = arith.constant 0 : index
    %c7 = arith.constant 7 : index
    %c0_20 = arith.constant 0 : index
    %55 = vector.load %arg2[%c0_19, %c7, %c0_20] : memref<3x9x32xf32, #tpu.memory_space<vmem>>, vector<1x1x32xf32>
    %56 = vector.shape_cast %55 : vector<1x1x32xf32> to vector<32xf32>
    %57 = vector.shape_cast %56 : vector<32xf32> to vector<1x1x32xf32>
    %58 = vector.broadcast %57 : vector<1x1x32xf32> to vector<8x8x32xf32>
    %59 = arith.mulf %54, %58 : vector<8x8x32xf32>
    %60 = arith.addf %53, %59 : vector<8x8x32xf32>
    %61 = vector.extract_strided_slice %5 {offsets = [2, 2, 0], sizes = [8, 8, 32], strides = [1, 1, 1]} : vector<10x10x32xf32> to vector<8x8x32xf32>
    %c0_21 = arith.constant 0 : index
    %c8 = arith.constant 8 : index
    %c0_22 = arith.constant 0 : index
    %62 = vector.load %arg2[%c0_21, %c8, %c0_22] : memref<3x9x32xf32, #tpu.memory_space<vmem>>, vector<1x1x32xf32>
    %63 = vector.shape_cast %62 : vector<1x1x32xf32> to vector<32xf32>
    %64 = vector.shape_cast %63 : vector<32xf32> to vector<1x1x32xf32>
    %65 = vector.broadcast %64 : vector<1x1x32xf32> to vector<8x8x32xf32>
    %66 = arith.mulf %61, %65 : vector<8x8x32xf32>
    %67 = arith.addf %60, %66 : vector<8x8x32xf32>
    %68 = vector.shape_cast %67 : vector<8x8x32xf32> to vector<64x32xf32>
    %69 = arith.truncf %68 : vector<64x32xf32> to vector<64x32xbf16>
    %c0_23 = arith.constant 0 : index
    %c0_24 = arith.constant 0 : index
    %c0_25 = arith.constant 0 : index
    %70 = vector.load %arg3[%c0_23, %c0_24, %c0_25] : memref<3x32x32xf32, #tpu.memory_space<vmem>>, vector<1x32x32xf32>
    %71 = vector.shape_cast %70 : vector<1x32x32xf32> to vector<32x32xf32>
    %72 = arith.truncf %71 : vector<32x32xf32> to vector<32x32xbf16>
    %cst_26 = arith.constant dense<0.000000e+00> : vector<64x32xf32>
    %73 = tpu.matmul %69, %72, %cst_26 {dimension_numbers = #tpu.dot_dimension_numbers<[1], [0], [0], [1], [0, 0, 1, 1], [], []>} : vector<64x32xbf16>, vector<32x32xbf16>, vector<64x32xf32> -> vector<64x32xf32>
    %c0_27 = arith.constant 0 : index
    %c0_28 = arith.constant 0 : index
    %74 = vector.load %arg4[%c0_27, %c0_28] : memref<3x32xf32, #tpu.memory_space<vmem>>, vector<1x32xf32>
    %75 = vector.shape_cast %74 : vector<1x32xf32> to vector<32xf32>
    %76 = vector.shape_cast %75 : vector<32xf32> to vector<1x32xf32>
    %77 = vector.broadcast %76 : vector<1x32xf32> to vector<64x32xf32>
    %78 = arith.addf %73, %77 : vector<64x32xf32>
    %79 = vector.extract_strided_slice %5 {offsets = [0, 0, 0], sizes = [8, 8, 32], strides = [1, 1, 1]} : vector<10x10x32xf32> to vector<8x8x32xf32>
    %c1_29 = arith.constant 1 : index
    %c0_30 = arith.constant 0 : index
    %c0_31 = arith.constant 0 : index
    %80 = vector.load %arg2[%c1_29, %c0_30, %c0_31] : memref<3x9x32xf32, #tpu.memory_space<vmem>>, vector<1x1x32xf32>
    %81 = vector.shape_cast %80 : vector<1x1x32xf32> to vector<32xf32>
    %82 = vector.shape_cast %81 : vector<32xf32> to vector<1x1x32xf32>
    %83 = vector.broadcast %82 : vector<1x1x32xf32> to vector<8x8x32xf32>
    %84 = arith.mulf %79, %83 : vector<8x8x32xf32>
    %85 = vector.extract_strided_slice %5 {offsets = [0, 1, 0], sizes = [8, 8, 32], strides = [1, 1, 1]} : vector<10x10x32xf32> to vector<8x8x32xf32>
    %c1_32 = arith.constant 1 : index
    %c1_33 = arith.constant 1 : index
    %c0_34 = arith.constant 0 : index
    %86 = vector.load %arg2[%c1_32, %c1_33, %c0_34] : memref<3x9x32xf32, #tpu.memory_space<vmem>>, vector<1x1x32xf32>
    %87 = vector.shape_cast %86 : vector<1x1x32xf32> to vector<32xf32>
    %88 = vector.shape_cast %87 : vector<32xf32> to vector<1x1x32xf32>
    %89 = vector.broadcast %88 : vector<1x1x32xf32> to vector<8x8x32xf32>
    %90 = arith.mulf %85, %89 : vector<8x8x32xf32>
    %91 = arith.addf %84, %90 : vector<8x8x32xf32>
    %92 = vector.extract_strided_slice %5 {offsets = [0, 2, 0], sizes = [8, 8, 32], strides = [1, 1, 1]} : vector<10x10x32xf32> to vector<8x8x32xf32>
    %c1_35 = arith.constant 1 : index
    %c2_36 = arith.constant 2 : index
    %c0_37 = arith.constant 0 : index
    %93 = vector.load %arg2[%c1_35, %c2_36, %c0_37] : memref<3x9x32xf32, #tpu.memory_space<vmem>>, vector<1x1x32xf32>
    %94 = vector.shape_cast %93 : vector<1x1x32xf32> to vector<32xf32>
    %95 = vector.shape_cast %94 : vector<32xf32> to vector<1x1x32xf32>
    %96 = vector.broadcast %95 : vector<1x1x32xf32> to vector<8x8x32xf32>
    %97 = arith.mulf %92, %96 : vector<8x8x32xf32>
    %98 = arith.addf %91, %97 : vector<8x8x32xf32>
    %99 = vector.extract_strided_slice %5 {offsets = [1, 0, 0], sizes = [8, 8, 32], strides = [1, 1, 1]} : vector<10x10x32xf32> to vector<8x8x32xf32>
    %c1_38 = arith.constant 1 : index
    %c3_39 = arith.constant 3 : index
    %c0_40 = arith.constant 0 : index
    %100 = vector.load %arg2[%c1_38, %c3_39, %c0_40] : memref<3x9x32xf32, #tpu.memory_space<vmem>>, vector<1x1x32xf32>
    %101 = vector.shape_cast %100 : vector<1x1x32xf32> to vector<32xf32>
    %102 = vector.shape_cast %101 : vector<32xf32> to vector<1x1x32xf32>
    %103 = vector.broadcast %102 : vector<1x1x32xf32> to vector<8x8x32xf32>
    %104 = arith.mulf %99, %103 : vector<8x8x32xf32>
    %105 = arith.addf %98, %104 : vector<8x8x32xf32>
    %106 = vector.extract_strided_slice %5 {offsets = [1, 1, 0], sizes = [8, 8, 32], strides = [1, 1, 1]} : vector<10x10x32xf32> to vector<8x8x32xf32>
    %c1_41 = arith.constant 1 : index
    %c4_42 = arith.constant 4 : index
    %c0_43 = arith.constant 0 : index
    %107 = vector.load %arg2[%c1_41, %c4_42, %c0_43] : memref<3x9x32xf32, #tpu.memory_space<vmem>>, vector<1x1x32xf32>
    %108 = vector.shape_cast %107 : vector<1x1x32xf32> to vector<32xf32>
    %109 = vector.shape_cast %108 : vector<32xf32> to vector<1x1x32xf32>
    %110 = vector.broadcast %109 : vector<1x1x32xf32> to vector<8x8x32xf32>
    %111 = arith.mulf %106, %110 : vector<8x8x32xf32>
    %112 = arith.addf %105, %111 : vector<8x8x32xf32>
    %113 = vector.extract_strided_slice %5 {offsets = [1, 2, 0], sizes = [8, 8, 32], strides = [1, 1, 1]} : vector<10x10x32xf32> to vector<8x8x32xf32>
    %c1_44 = arith.constant 1 : index
    %c5_45 = arith.constant 5 : index
    %c0_46 = arith.constant 0 : index
    %114 = vector.load %arg2[%c1_44, %c5_45, %c0_46] : memref<3x9x32xf32, #tpu.memory_space<vmem>>, vector<1x1x32xf32>
    %115 = vector.shape_cast %114 : vector<1x1x32xf32> to vector<32xf32>
    %116 = vector.shape_cast %115 : vector<32xf32> to vector<1x1x32xf32>
    %117 = vector.broadcast %116 : vector<1x1x32xf32> to vector<8x8x32xf32>
    %118 = arith.mulf %113, %117 : vector<8x8x32xf32>
    %119 = arith.addf %112, %118 : vector<8x8x32xf32>
    %120 = vector.extract_strided_slice %5 {offsets = [2, 0, 0], sizes = [8, 8, 32], strides = [1, 1, 1]} : vector<10x10x32xf32> to vector<8x8x32xf32>
    %c1_47 = arith.constant 1 : index
    %c6_48 = arith.constant 6 : index
    %c0_49 = arith.constant 0 : index
    %121 = vector.load %arg2[%c1_47, %c6_48, %c0_49] : memref<3x9x32xf32, #tpu.memory_space<vmem>>, vector<1x1x32xf32>
    %122 = vector.shape_cast %121 : vector<1x1x32xf32> to vector<32xf32>
    %123 = vector.shape_cast %122 : vector<32xf32> to vector<1x1x32xf32>
    %124 = vector.broadcast %123 : vector<1x1x32xf32> to vector<8x8x32xf32>
    %125 = arith.mulf %120, %124 : vector<8x8x32xf32>
    %126 = arith.addf %119, %125 : vector<8x8x32xf32>
    %127 = vector.extract_strided_slice %5 {offsets = [2, 1, 0], sizes = [8, 8, 32], strides = [1, 1, 1]} : vector<10x10x32xf32> to vector<8x8x32xf32>
    %c1_50 = arith.constant 1 : index
    %c7_51 = arith.constant 7 : index
    %c0_52 = arith.constant 0 : index
    %128 = vector.load %arg2[%c1_50, %c7_51, %c0_52] : memref<3x9x32xf32, #tpu.memory_space<vmem>>, vector<1x1x32xf32>
    %129 = vector.shape_cast %128 : vector<1x1x32xf32> to vector<32xf32>
    %130 = vector.shape_cast %129 : vector<32xf32> to vector<1x1x32xf32>
    %131 = vector.broadcast %130 : vector<1x1x32xf32> to vector<8x8x32xf32>
    %132 = arith.mulf %127, %131 : vector<8x8x32xf32>
    %133 = arith.addf %126, %132 : vector<8x8x32xf32>
    %134 = vector.extract_strided_slice %5 {offsets = [2, 2, 0], sizes = [8, 8, 32], strides = [1, 1, 1]} : vector<10x10x32xf32> to vector<8x8x32xf32>
    %c1_53 = arith.constant 1 : index
    %c8_54 = arith.constant 8 : index
    %c0_55 = arith.constant 0 : index
    %135 = vector.load %arg2[%c1_53, %c8_54, %c0_55] : memref<3x9x32xf32, #tpu.memory_space<vmem>>, vector<1x1x32xf32>
    %136 = vector.shape_cast %135 : vector<1x1x32xf32> to vector<32xf32>
    %137 = vector.shape_cast %136 : vector<32xf32> to vector<1x1x32xf32>
    %138 = vector.broadcast %137 : vector<1x1x32xf32> to vector<8x8x32xf32>
    %139 = arith.mulf %134, %138 : vector<8x8x32xf32>
    %140 = arith.addf %133, %139 : vector<8x8x32xf32>
    %141 = vector.shape_cast %140 : vector<8x8x32xf32> to vector<64x32xf32>
    %142 = arith.truncf %141 : vector<64x32xf32> to vector<64x32xbf16>
    %c1_56 = arith.constant 1 : index
    %c0_57 = arith.constant 0 : index
    %c0_58 = arith.constant 0 : index
    %143 = vector.load %arg3[%c1_56, %c0_57, %c0_58] : memref<3x32x32xf32, #tpu.memory_space<vmem>>, vector<1x32x32xf32>
    %144 = vector.shape_cast %143 : vector<1x32x32xf32> to vector<32x32xf32>
    %145 = arith.truncf %144 : vector<32x32xf32> to vector<32x32xbf16>
    %cst_59 = arith.constant dense<0.000000e+00> : vector<64x32xf32>
    %146 = tpu.matmul %142, %145, %cst_59 {dimension_numbers = #tpu.dot_dimension_numbers<[1], [0], [0], [1], [0, 0, 1, 1], [], []>} : vector<64x32xbf16>, vector<32x32xbf16>, vector<64x32xf32> -> vector<64x32xf32>
    %c1_60 = arith.constant 1 : index
    %c0_61 = arith.constant 0 : index
    %147 = vector.load %arg4[%c1_60, %c0_61] : memref<3x32xf32, #tpu.memory_space<vmem>>, vector<1x32xf32>
    %148 = vector.shape_cast %147 : vector<1x32xf32> to vector<32xf32>
    %149 = vector.shape_cast %148 : vector<32xf32> to vector<1x32xf32>
    %150 = vector.broadcast %149 : vector<1x32xf32> to vector<64x32xf32>
    %151 = arith.addf %146, %150 : vector<64x32xf32>
    %152 = vector.extract_strided_slice %5 {offsets = [0, 0, 0], sizes = [8, 8, 32], strides = [1, 1, 1]} : vector<10x10x32xf32> to vector<8x8x32xf32>
    %c2_62 = arith.constant 2 : index
    %c0_63 = arith.constant 0 : index
    %c0_64 = arith.constant 0 : index
    %153 = vector.load %arg2[%c2_62, %c0_63, %c0_64] : memref<3x9x32xf32, #tpu.memory_space<vmem>>, vector<1x1x32xf32>
    %154 = vector.shape_cast %153 : vector<1x1x32xf32> to vector<32xf32>
    %155 = vector.shape_cast %154 : vector<32xf32> to vector<1x1x32xf32>
    %156 = vector.broadcast %155 : vector<1x1x32xf32> to vector<8x8x32xf32>
    %157 = arith.mulf %152, %156 : vector<8x8x32xf32>
    %158 = vector.extract_strided_slice %5 {offsets = [0, 1, 0], sizes = [8, 8, 32], strides = [1, 1, 1]} : vector<10x10x32xf32> to vector<8x8x32xf32>
    %c2_65 = arith.constant 2 : index
    %c1_66 = arith.constant 1 : index
    %c0_67 = arith.constant 0 : index
    %159 = vector.load %arg2[%c2_65, %c1_66, %c0_67] : memref<3x9x32xf32, #tpu.memory_space<vmem>>, vector<1x1x32xf32>
    %160 = vector.shape_cast %159 : vector<1x1x32xf32> to vector<32xf32>
    %161 = vector.shape_cast %160 : vector<32xf32> to vector<1x1x32xf32>
    %162 = vector.broadcast %161 : vector<1x1x32xf32> to vector<8x8x32xf32>
    %163 = arith.mulf %158, %162 : vector<8x8x32xf32>
    %164 = arith.addf %157, %163 : vector<8x8x32xf32>
    %165 = vector.extract_strided_slice %5 {offsets = [0, 2, 0], sizes = [8, 8, 32], strides = [1, 1, 1]} : vector<10x10x32xf32> to vector<8x8x32xf32>
    %c2_68 = arith.constant 2 : index
    %c2_69 = arith.constant 2 : index
    %c0_70 = arith.constant 0 : index
    %166 = vector.load %arg2[%c2_68, %c2_69, %c0_70] : memref<3x9x32xf32, #tpu.memory_space<vmem>>, vector<1x1x32xf32>
    %167 = vector.shape_cast %166 : vector<1x1x32xf32> to vector<32xf32>
    %168 = vector.shape_cast %167 : vector<32xf32> to vector<1x1x32xf32>
    %169 = vector.broadcast %168 : vector<1x1x32xf32> to vector<8x8x32xf32>
    %170 = arith.mulf %165, %169 : vector<8x8x32xf32>
    %171 = arith.addf %164, %170 : vector<8x8x32xf32>
    %172 = vector.extract_strided_slice %5 {offsets = [1, 0, 0], sizes = [8, 8, 32], strides = [1, 1, 1]} : vector<10x10x32xf32> to vector<8x8x32xf32>
    %c2_71 = arith.constant 2 : index
    %c3_72 = arith.constant 3 : index
    %c0_73 = arith.constant 0 : index
    %173 = vector.load %arg2[%c2_71, %c3_72, %c0_73] : memref<3x9x32xf32, #tpu.memory_space<vmem>>, vector<1x1x32xf32>
    %174 = vector.shape_cast %173 : vector<1x1x32xf32> to vector<32xf32>
    %175 = vector.shape_cast %174 : vector<32xf32> to vector<1x1x32xf32>
    %176 = vector.broadcast %175 : vector<1x1x32xf32> to vector<8x8x32xf32>
    %177 = arith.mulf %172, %176 : vector<8x8x32xf32>
    %178 = arith.addf %171, %177 : vector<8x8x32xf32>
    %179 = vector.extract_strided_slice %5 {offsets = [1, 1, 0], sizes = [8, 8, 32], strides = [1, 1, 1]} : vector<10x10x32xf32> to vector<8x8x32xf32>
    %c2_74 = arith.constant 2 : index
    %c4_75 = arith.constant 4 : index
    %c0_76 = arith.constant 0 : index
    %180 = vector.load %arg2[%c2_74, %c4_75, %c0_76] : memref<3x9x32xf32, #tpu.memory_space<vmem>>, vector<1x1x32xf32>
    %181 = vector.shape_cast %180 : vector<1x1x32xf32> to vector<32xf32>
    %182 = vector.shape_cast %181 : vector<32xf32> to vector<1x1x32xf32>
    %183 = vector.broadcast %182 : vector<1x1x32xf32> to vector<8x8x32xf32>
    %184 = arith.mulf %179, %183 : vector<8x8x32xf32>
    %185 = arith.addf %178, %184 : vector<8x8x32xf32>
    %186 = vector.extract_strided_slice %5 {offsets = [1, 2, 0], sizes = [8, 8, 32], strides = [1, 1, 1]} : vector<10x10x32xf32> to vector<8x8x32xf32>
    %c2_77 = arith.constant 2 : index
    %c5_78 = arith.constant 5 : index
    %c0_79 = arith.constant 0 : index
    %187 = vector.load %arg2[%c2_77, %c5_78, %c0_79] : memref<3x9x32xf32, #tpu.memory_space<vmem>>, vector<1x1x32xf32>
    %188 = vector.shape_cast %187 : vector<1x1x32xf32> to vector<32xf32>
    %189 = vector.shape_cast %188 : vector<32xf32> to vector<1x1x32xf32>
    %190 = vector.broadcast %189 : vector<1x1x32xf32> to vector<8x8x32xf32>
    %191 = arith.mulf %186, %190 : vector<8x8x32xf32>
    %192 = arith.addf %185, %191 : vector<8x8x32xf32>
    %193 = vector.extract_strided_slice %5 {offsets = [2, 0, 0], sizes = [8, 8, 32], strides = [1, 1, 1]} : vector<10x10x32xf32> to vector<8x8x32xf32>
    %c2_80 = arith.constant 2 : index
    %c6_81 = arith.constant 6 : index
    %c0_82 = arith.constant 0 : index
    %194 = vector.load %arg2[%c2_80, %c6_81, %c0_82] : memref<3x9x32xf32, #tpu.memory_space<vmem>>, vector<1x1x32xf32>
    %195 = vector.shape_cast %194 : vector<1x1x32xf32> to vector<32xf32>
    %196 = vector.shape_cast %195 : vector<32xf32> to vector<1x1x32xf32>
    %197 = vector.broadcast %196 : vector<1x1x32xf32> to vector<8x8x32xf32>
    %198 = arith.mulf %193, %197 : vector<8x8x32xf32>
    %199 = arith.addf %192, %198 : vector<8x8x32xf32>
    %200 = vector.extract_strided_slice %5 {offsets = [2, 1, 0], sizes = [8, 8, 32], strides = [1, 1, 1]} : vector<10x10x32xf32> to vector<8x8x32xf32>
    %c2_83 = arith.constant 2 : index
    %c7_84 = arith.constant 7 : index
    %c0_85 = arith.constant 0 : index
    %201 = vector.load %arg2[%c2_83, %c7_84, %c0_85] : memref<3x9x32xf32, #tpu.memory_space<vmem>>, vector<1x1x32xf32>
    %202 = vector.shape_cast %201 : vector<1x1x32xf32> to vector<32xf32>
    %203 = vector.shape_cast %202 : vector<32xf32> to vector<1x1x32xf32>
    %204 = vector.broadcast %203 : vector<1x1x32xf32> to vector<8x8x32xf32>
    %205 = arith.mulf %200, %204 : vector<8x8x32xf32>
    %206 = arith.addf %199, %205 : vector<8x8x32xf32>
    %207 = vector.extract_strided_slice %5 {offsets = [2, 2, 0], sizes = [8, 8, 32], strides = [1, 1, 1]} : vector<10x10x32xf32> to vector<8x8x32xf32>
    %c2_86 = arith.constant 2 : index
    %c8_87 = arith.constant 8 : index
    %c0_88 = arith.constant 0 : index
    %208 = vector.load %arg2[%c2_86, %c8_87, %c0_88] : memref<3x9x32xf32, #tpu.memory_space<vmem>>, vector<1x1x32xf32>
    %209 = vector.shape_cast %208 : vector<1x1x32xf32> to vector<32xf32>
    %210 = vector.shape_cast %209 : vector<32xf32> to vector<1x1x32xf32>
    %211 = vector.broadcast %210 : vector<1x1x32xf32> to vector<8x8x32xf32>
    %212 = arith.mulf %207, %211 : vector<8x8x32xf32>
    %213 = arith.addf %206, %212 : vector<8x8x32xf32>
    %214 = vector.shape_cast %213 : vector<8x8x32xf32> to vector<64x32xf32>
    %215 = arith.truncf %214 : vector<64x32xf32> to vector<64x32xbf16>
    %c2_89 = arith.constant 2 : index
    %c0_90 = arith.constant 0 : index
    %c0_91 = arith.constant 0 : index
    %216 = vector.load %arg3[%c2_89, %c0_90, %c0_91] : memref<3x32x32xf32, #tpu.memory_space<vmem>>, vector<1x32x32xf32>
    %217 = vector.shape_cast %216 : vector<1x32x32xf32> to vector<32x32xf32>
    %218 = arith.truncf %217 : vector<32x32xf32> to vector<32x32xbf16>
    %cst_92 = arith.constant dense<0.000000e+00> : vector<64x32xf32>
    %219 = tpu.matmul %215, %218, %cst_92 {dimension_numbers = #tpu.dot_dimension_numbers<[1], [0], [0], [1], [0, 0, 1, 1], [], []>} : vector<64x32xbf16>, vector<32x32xbf16>, vector<64x32xf32> -> vector<64x32xf32>
    %c2_93 = arith.constant 2 : index
    %c0_94 = arith.constant 0 : index
    %220 = vector.load %arg4[%c2_93, %c0_94] : memref<3x32xf32, #tpu.memory_space<vmem>>, vector<1x32xf32>
    %221 = vector.shape_cast %220 : vector<1x32xf32> to vector<32xf32>
    %222 = vector.shape_cast %221 : vector<32xf32> to vector<1x32xf32>
    %223 = vector.broadcast %222 : vector<1x32xf32> to vector<64x32xf32>
    %224 = arith.addf %219, %223 : vector<64x32xf32>
    %225 = tpu.concatenate %151, %224 in 1 : vector<64x32xf32>, vector<64x32xf32> -> vector<64x64xf32>
    %c0_95 = arith.constant 0 : index
    %c0_96 = arith.constant 0 : index
    %c0_97 = arith.constant 0 : index
    %226 = vector.load %arg5[%c0_95, %c0_96, %c0_97] : memref<1x64x32xf32, #tpu.memory_space<vmem>>, vector<1x64x32xf32>
    %227 = vector.shape_cast %226 : vector<1x64x32xf32> to vector<64x32xf32>
    %228 = vector.shape_cast %78 : vector<64x32xf32> to vector<1x64x32xf32>
    tpu.vector_store %arg5[%c0_95, %c0_96, %c0_97], %228 {strides = array<i32>} : memref<1x64x32xf32, #tpu.memory_space<vmem>>, vector<1x64x32xf32>,
    %c0_98 = arith.constant 0 : index
    %c0_99 = arith.constant 0 : index
    %c0_100 = arith.constant 0 : index
    %229 = vector.load %arg6[%c0_98, %c0_99, %c0_100] : memref<1x64x64xf32, #tpu.memory_space<vmem>>, vector<1x64x64xf32>
    %230 = vector.shape_cast %229 : vector<1x64x64xf32> to vector<64x64xf32>
    %231 = vector.shape_cast %225 : vector<64x64xf32> to vector<1x64x64xf32>
    tpu.vector_store %arg6[%c0_98, %c0_99, %c0_100], %231 {strides = array<i32>} : memref<1x64x64xf32, #tpu.memory_space<vmem>>, vector<1x64x64xf32>,
    return
  }
  func.func @transform_0(%arg0: i32) -> (i32, i32, i32, i32) {
    %c0_i32 = arith.constant 0 : i32
    %c0_i32_0 = arith.constant 0 : i32
    %c0_i32_1 = arith.constant 0 : i32
    %c0_i32_2 = arith.constant 0 : i32
    return %arg0, %c0_i32, %c0_i32_0, %c0_i32_1 : i32, i32, i32, i32
  }
  func.func @transform_1(%arg0: i32) -> (i32, i32, i32) {
    %c0_i32 = arith.constant 0 : i32
    %c0_i32_0 = arith.constant 0 : i32
    %c0_i32_1 = arith.constant 0 : i32
    %c0_i32_2 = arith.constant 0 : i32
    return %c0_i32, %c0_i32_0, %c0_i32_1 : i32, i32, i32
  }
  func.func @transform_2(%arg0: i32) -> (i32, i32, i32) {
    %c0_i32 = arith.constant 0 : i32
    %c0_i32_0 = arith.constant 0 : i32
    %c0_i32_1 = arith.constant 0 : i32
    %c0_i32_2 = arith.constant 0 : i32
    return %c0_i32, %c0_i32_0, %c0_i32_1 : i32, i32, i32
  }
  func.func @transform_3(%arg0: i32) -> (i32, i32) {
    %c0_i32 = arith.constant 0 : i32
    %c0_i32_0 = arith.constant 0 : i32
    %c0_i32_1 = arith.constant 0 : i32
    return %c0_i32, %c0_i32_0 : i32, i32
  }
  func.func @transform_4(%arg0: i32) -> (i32, i32, i32) {
    %c0_i32 = arith.constant 0 : i32
    %c0_i32_0 = arith.constant 0 : i32
    %c0_i32_1 = arith.constant 0 : i32
    return %arg0, %c0_i32, %c0_i32_0 : i32, i32, i32
  }
  func.func @transform_5(%arg0: i32) -> (i32, i32, i32) {
    %c0_i32 = arith.constant 0 : i32
    %c0_i32_0 = arith.constant 0 : i32
    %c0_i32_1 = arith.constant 0 : i32
    return %arg0, %c0_i32, %c0_i32_0 : i32, i32, i32
  }
}

</mosaic_0001>

<bundles_post_ra>
// kernel: conv_attention.5
= control target key start
LH: loop header
LB: loop body
LE: loop exit
PB: predicated region body
PF: predicated region fallthrough
CT: control target
= control target key end

     0   :  { %s1955_s15 = smov 0   ;;  %s1957_s16 = smov 0   ;;  %s2631_s0 = inlined_call_operand.vmem [shape: f32[2,64,32], index: 0, kind: input, shape index: {}]   ;;  %s2632_s1 = inlined_call_operand.vmem [shape: f32[2,64,64], index: 1, kind: input, shape index: {}]   ;;  %s2633_s2 = inlined_call_operand.vmem [shape: f32[32,32], index: 2, kind: input, shape index: {}]   ;;  %s2634_s3 = inlined_call_operand.vmem [shape: f32[1,32], index: 3, kind: input, shape index: {}]   ;;  %s2635_s4 = inlined_call_operand.vmem [shape: f32[2,64,32], index: 4, kind: output, shape index: {}]  }
   0x1   :  { %s1959_s17 = smov 0  }
   0x2 LB: > { %s26_s18 = sadd.s32 1, %s1916_s16  ;;  %p1613_p0 = scmp.ge.s32.totalorder %s1920_s17, 1  ;;  %s1920_s17 = sphi %s1959_s17, %s14_s17   ;;  %s1916_s16 = sphi %s1957_s16, %s2660_s16   ;;  %s1912_s15 = sphi %s1955_s15, %s2659_s15  }
   0x3   : > { %p28_p1 = scmp.ge.s32.totalorder %s26_s18, 2  ;;  %p191_p2 = scmp.lt.s32.totalorder %s1920_s17, 3 }
   0x5   : > { %s2662_s18 = smov (%p28_p1, %s26_s18), 0  ;;  %p192_p3 = pnand %p1613_p0, %p191_p2 }
   0x6   : > { %p226_p4 = scmp.lt.s32.totalorder (!%p192_p3), %s1912_s15, 1  ;;  %vm301_vm0 = vcmask (!%p192_p3), 130048   ;;  %vm251_vm1 = vcmask (!%p192_p3), 15360   ;;  %v1922_v28 = vmov (!%p192_p3), -inf   ;;  %vm399_vm2 = vcmask (!%p192_p3), 523264   ;;  %s1925_s26 = smov (!%p192_p3), 96  }
   0x7   : > { %195 = sbr.rel (%p192_p3) target bundleno = 1742 (0x6ce), region = 36  ;;  %254 = vst.msk [vmem:[#allocation2 + $0x10] sm:$0xff] (!%p192_p3), %vm251_vm1, %v1922_v28  ;;  %252 = vst.msk [vmem:[#allocation2] sm:$0xff] (!%p192_p3), %vm251_vm1, %v1922_v28  ;;  %v2640_v45 = vmov (!%p192_p3), 0   ;;  %v2638_v46 = vmov (!%p192_p3), 0.0   ;;  %vm568_vm3 = vcmask (!%p192_p3), 7168  }
   0x8   : > { %253 = vst.msk [vmem:[#allocation2 + $0x8] sm:$0xff] (!%p192_p3), %vm251_vm1, %v1922_v28  ;;  %255 = vst.msk [vmem:[#allocation2 + $0x18] sm:$0xff] (!%p192_p3), %vm251_vm1, %v1922_v28  ;;  %1808 = vset.pattern.permute.xlu0 (!%p192_p3), %v2640_v45  ;;  %1809 = vset.pattern.permute.xlu1 (!%p192_p3), %v2640_v45  ;;  %s1926_s27 = smov (!%p192_p3), 112   ;;  %vm1039_vm4 = vcmask (!%p192_p3), 15368   ;;  %s1928_s28 = smov (!%p192_p3), 80   ;;  %vm268_vm5 = vcmask (!%p192_p3), 261120  }
   0x9   : > { %256 = vst.msk [vmem:[#allocation2 + $0x20] sm:$0xff] (!%p192_p3), %vm251_vm1, %v1922_v28  ;;  %257 = vst.msk [vmem:[#allocation2 + $0x28] sm:$0xff] (!%p192_p3), %vm251_vm1, %v1922_v28  ;;  %s1929_s29 = smov (!%p192_p3), 16   ;;  %vm1237_vm6 = vcmask (!%p192_p3), 261248  }
   0xa   : > { %258 = vst.msk [vmem:[#allocation2 + $0x30] sm:$0xff] (!%p192_p3), %vm251_vm1, %v1922_v28  ;;  %259 = vst.msk [vmem:[#allocation2 + $0x38] sm:$0xff] (!%p192_p3), %vm251_vm1, %v1922_v28 }
   0xb   : > { %261 = vst.msk [vmem:[#allocation3 + $0x8] sm:$0xff] (!%p192_p3), %vm251_vm1, %v2638_v46  ;;  %260 = vst.msk [vmem:[#allocation3] sm:$0xff] (!%p192_p3), %vm251_vm1, %v2638_v46 }
   0xc   : > { %262 = vst.msk [vmem:[#allocation3 + $0x10] sm:$0xff] (!%p192_p3), %vm251_vm1, %v2638_v46  ;;  %263 = vst.msk [vmem:[#allocation3 + $0x18] sm:$0xff] (!%p192_p3), %vm251_vm1, %v2638_v46 }
   0xd   : > { %264 = vst.msk [vmem:[#allocation3 + $0x20] sm:$0xff] (!%p192_p3), %vm251_vm1, %v2638_v46  ;;  %265 = vst.msk [vmem:[#allocation3 + $0x28] sm:$0xff] (!%p192_p3), %vm251_vm1, %v2638_v46 }
   0xe   : > { %s2664_s15 = smov (!%p226_p4, %s1912_s15), 1  ;;  %266 = vst.msk [vmem:[#allocation3 + $0x30] sm:$0xff] %vm251_vm1, %v2638_v46  ;;  %267 = vst.msk [vmem:[#allocation3 + $0x38] sm:$0xff] %vm251_vm1, %v2638_v46  ;;  %v2091_v47 = vld [vmem:[#allocation2 + $0x10] sm:$0xff]  ;;  %v2093_v48 = vld [vmem:[#allocation2] sm:$0xff] }
   0xf   : > { %s1973_s19 = sshll.u32 %s2664_s15, 6  ;;  %v2101_v53 = vld [vmem:[#allocation2 + $0x18] sm:$0xff]  ;;  %v2108_v55 = vld [vmem:[#allocation2 + $0x8] sm:$0xff] }
  0x10   : > { %s239_s22 = scalar_lea.vmem %s2632_s1, %s1973_s19  ;;  %s1983_s25 = scalar_lea.vmem %s2631_s0, %s1973_s19  ;;  %v2127_v62 = vld [vmem:[#allocation2 + $0x20] sm:$0xff] }
  0x11   : > { %v285_v0 = vld [vmem:[%s239_s22] sm:$0xff]  ;;  %v286_v1 = vld [vmem:[%s239_s22 + $0x8] sm:$0xff]  ;;  %v287_v2 = vld [vmem:[%s239_s22 + $0x10] sm:$0xff]  ;;  %s245_s20 = scalar_lea.vmem %s2635_s4, %s1973_s19 }
  0x12   : > { %v1985_v3 = vpack.c.bf16 %v286_v1, %v285_v0  ;;  %v288_v4 = vld [vmem:[%s239_s22 + $0x18] sm:$0xff]  ;;  %v277_v6 = vld [vmem:[%s1983_s25] sm:$0xff]  ;;  %v278_v8 = vld [vmem:[%s1983_s25 + $0x8] sm:$0xff] }
  0x13   : > { %v1987_v5 = vpack.c.bf16 %v288_v4, %v287_v2  ;;  %v1995_v9 = vpack.c.bf16 %v278_v8, %v277_v6  ;;  %v289_v10 = vld [vmem:[%s239_s22 + $0x20] sm:$0xff]  ;;  %v290_v11 = vld [vmem:[%s239_s22 + $0x28] sm:$0xff]  ;;  %v291_v14 = vld [vmem:[%s239_s22 + $0x30] sm:$0xff] }
  0x14   : > { %1768 = vmatprep.subr.msk.bf16.mxu0 %vm301_vm0, %v1985_v3  ;;  %v315_v7 = vsel %vm301_vm0, %v1985_v3, 0  ;;  %v2003_v13 = vpack.c.bf16 %v290_v11, %v289_v10  ;;  %v292_v15 = vld [vmem:[%s239_s22 + $0x38] sm:$0xff]  ;;  %v279_v19 = vld [vmem:[%s1983_s25 + $0x10] sm:$0xff]  ;;  %v281_v21 = vld [vmem:[%s1983_s25 + $0x20] sm:$0xff] }
  0x15   : > { %1685 = vmatpush3.bf16.xpose.msra.mxu0 %v315_v7  ;;  %1692 = vmatprep.mubr.msk.bf16.mxu0 %vm301_vm0, %v1995_v9  ;;  %v318_v12 = vsel %vm301_vm0, %v1987_v5, 0  ;;  %v2009_v17 = vpack.c.bf16 %v292_v15, %v291_v14  ;;  %v280_v20 = vld [vmem:[%s1983_s25 + $0x18] sm:$0xff]  ;;  %v282_v22 = vld [vmem:[%s1983_s25 + $0x28] sm:$0xff]  ;;  %v283_v25 = vld [vmem:[%s1983_s25 + $0x30] sm:$0xff] }
  0x16   : > { %1769 = vmatprep.subr.msk.bf16.mxu0 %vm301_vm0, %v1987_v5  ;;  %v321_v16 = vsel %vm301_vm0, %v2003_v13, 0  ;;  %v2019_v23 = vpack.c.bf16 %v280_v20, %v279_v19  ;;  %v2021_v24 = vpack.c.bf16 %v282_v22, %v281_v21  ;;  %v284_v26 = vld [vmem:[%s1983_s25 + $0x38] sm:$0xff]  ;;  %v2133_v0 = vld [vmem:[#allocation2 + $0x28] sm:$0xff]  ;;  %v2139_v6 = vld [vmem:[#allocation2 + $0x30] sm:$0xff] }
  0x17   : > { %v324_v18 = vsel %vm301_vm0, %v2009_v17, 0  ;;  %v2029_v27 = vpack.c.bf16 %v284_v26, %v283_v25  ;;  %v2148_v10 = vld [vmem:[#allocation2 + $0x38] sm:$0xff] }
  0x1d   : > { %1687 = vmatpush3.bf16.xpose.msra.mxu0 %v318_v12 }
  0x1e   : > { %1770 = vmatprep.subr.msk.bf16.mxu0 %vm301_vm0, %v2003_v13 }
  0x25   : > { %1689 = vmatpush3.bf16.xpose.msra.mxu0 %v321_v16 }
  0x26   : > { %1771 = vmatprep.subr.msk.bf16.mxu0 %vm301_vm0, %v2009_v17 }
  0x2d   : > { %1691 = vmatpush3.bf16.xpose.msra.mxu0 %v324_v18 }
  0x34   : > { %1693 = vmatmul.mubr.msk.bf16.vlgmr.msra.gmra.mrb[0].mxu0 %vm301_vm0, %v2019_v23 }
  0x35   : > { %1696 = vmatprep.mubr.msk.bf16.mxu0 %vm301_vm0, %v2021_v24 }
  0x3c   : > { %1697 = vmatmul.mubr.msk.bf16.gmra.mrb[4].mxu0 %vm301_vm0, %v2029_v27 }
 0x107   : > { %v2041_v29 = vpop.f32.mrb[0].mxu0 }
 0x108   : > { %v2043_v30 = vpop.f32.mrb[1].mxu0  ;;  %v406_v31 = vsel %vm399_vm2, %v2041_v29, -inf }
 0x109   : > { %407 = vmax.xlane.f32.xlu1 %v406_v31  ;;  %v2047_v32 = vpop.f32.mrb[2].mxu0  ;;  %v400_v33 = vsel %vm399_vm2, %v2043_v30, -inf }
 0x10a   : > { %401 = vmax.xlane.f32.xlu0 %v400_v33  ;;  %v2051_v34 = vpop.f32.mrb[3].mxu0  ;;  %v409_v35 = vsel %vm399_vm2, %v2047_v32, -inf }
 0x10b   : > { %v403_v36 = vsel %vm399_vm2, %v2051_v34, -inf }
 0x10d   : > { %410 = vmax.xlane.f32.xlu1 %v409_v35 }
 0x10e   : > { %404 = vmax.xlane.f32.xlu0 %v403_v36 }
 0x10f   : > { %v2057_v37 = vpop.f32.mrb[4].mxu0 }
 0x110   : > { %v2059_v38 = vpop.f32.mrb[5].mxu0  ;;  %v418_v43 = vsel %vm399_vm2, %v2057_v37, -inf }
 0x111   : > { %v2061_v39 = vpop.f32.mrb[6].mxu0  ;;  %v412_v40 = vsel %vm399_vm2, %v2059_v38, -inf }
 0x112   : > { %v2065_v41 = vpop.f32.mrb[7].mxu0  ;;  %413 = vmax.xlane.f32.xlu0 %v412_v40  ;;  %v421_v44 = vsel %vm399_vm2, %v2061_v39, -inf }
 0x113   : > { %v415_v42 = vsel %vm399_vm2, %v2065_v41, -inf }
 0x114   : > { %416 = vmax.xlane.f32.xlu1 %v415_v42 }
 0x116   : > { %419 = vmax.xlane.f32.xlu0 %v418_v43 }
 0x118   : > { %422 = vmax.xlane.f32.xlu1 %v421_v44 }
 0x196   : > { %v408_v49 = vpop.xlane.xlu1 %407 }
 0x197   : > { %v2096_v50 = vmax.f32 %v2091_v47, %v408_v49  ;;  %v402_v51 = vpop.xlane.xlu0 %401 }
 0x198   : > { %v2099_v52 = vmax.f32 %v2093_v48, %v402_v51 }
 0x199   : > { %748 = vst.msk [vmem:[#allocation2 + $0x10] sm:$0xff] %vm568_vm3, %v2096_v50  ;;  %468 = vperm.xlu1 %1809, %v2096_v50  }
 0x19a   : > { %746 = vst.msk [vmem:[#allocation2] sm:$0xff] %vm568_vm3, %v2099_v52  ;;  %v411_v57 = vpop.xlane.xlu1 %410  ;;  %458 = vperm.xlu0 %1808, %v2099_v52  }
 0x19b   : > { %v2116_v58 = vmax.f32 %v2101_v53, %v411_v57  ;;  %v405_v59 = vpop.xlane.xlu0 %404 }
 0x19c   : > { %v2119_v60 = vmax.f32 %v2108_v55, %v405_v59 }
 0x19d   : > { %749 = vst.msk [vmem:[#allocation2 + $0x18] sm:$0xff] %vm568_vm3, %v2116_v58  ;;  %641 = vrot.lane.b32.xlu1 %v1985_v3, %s1925_s26 }
 0x19e   : > { %v433_v63 = vsub.f32 %v2108_v55, %v2119_v60  ;;  %747 = vst.msk [vmem:[#allocation2 + $0x8] sm:$0xff] %vm568_vm3, %v2119_v60 }
 0x19f   : > { %v414_v1 = vpop.xlane.xlu0 %413 }
 0x1a0   : > { %v2136_v2 = vmax.f32 %v2127_v62, %v414_v1 }
 0x1a1   : > { %473 = vperm.xlu1 %1809, %v2116_v58   ;;  %v417_v4 = vpop.xlane.xlu1 %416 }
 0x1a2   : > { %v2142_v7 = vmax.f32 %v2133_v0, %v417_v4  ;;  %750 = vst.msk [vmem:[#allocation2 + $0x20] sm:$0xff] %vm568_vm3, %v2136_v2 }
 0x1a3   : > { %v420_v11 = vpop.xlane.xlu0 %419 }
 0x1a4   : > { %751 = vst.msk [vmem:[#allocation2 + $0x28] sm:$0xff] %vm568_vm3, %v2142_v7  ;;  %483 = vperm.xlu0 %1808, %v2142_v7   ;;  %v2156_v14 = vmax.f32 %v2139_v6, %v420_v11 }
 0x1a5   : > { %463 = vperm.xlu1 %1809, %v2119_v60   ;;  %v423_v15 = vpop.xlane.xlu1 %422 }
 0x1a6   : > { %v2160_v16 = vmax.f32 %v2148_v10, %v423_v15  ;;  %752 = vst.msk [vmem:[#allocation2 + $0x30] sm:$0xff] %vm568_vm3, %v2156_v14 }
 0x1a8   : > { %753 = vst.msk [vmem:[#allocation2 + $0x38] sm:$0xff] %vm568_vm3, %v2160_v16  ;;  %493 = vperm.xlu0 %1808, %v2160_v16  }
 0x1a9   : > { %643 = vrot.lane.b32.xlu1 %v1987_v5, %s1925_s26 }
 0x1ab   : > { %v2327_v19 = vld [vmem:[#allocation2 + $0x28] sm:$0xff] }
 0x1ac   : > { %768 = vrot.lane.b32.xlu0 %v1987_v5, %s1926_s27 }
 0x1ad   : > { %645 = vrot.lane.b32.xlu1 %v2003_v13, %s1925_s26 }
 0x1af   : > { %v2348_v61 = vld [vmem:[#allocation2 + $0x38] sm:$0xff] }
 0x1b0   : > { %772 = vrot.lane.b32.xlu0 %v2009_v17, %s1926_s27 }
 0x1b1   : > { %647 = vrot.lane.b32.xlu1 %v2009_v17, %s1925_s26 }
 0x1b4   : > { %760 = vrot.lane.b32.xlu0 %v2019_v23, %s1926_s27 }
 0x1b5   : > { %488 = vperm.xlu1 %1809, %v2156_v14  }
 0x1b8   : > { %764 = vrot.lane.b32.xlu0 %v2029_v27, %s1926_s27 }
 0x1b9   : > { %478 = vperm.xlu1 %1809, %v2136_v2  }
 0x1bd   : > { %766 = vrot.lane.b32.xlu1 %v1985_v3, %s1926_s27 }
 0x1c1   : > { %770 = vrot.lane.b32.xlu1 %v2003_v13, %s1926_s27 }
 0x1c5   : > { %758 = vrot.lane.b32.xlu1 %v1995_v9, %s1926_s27 }
 0x1c9   : > { %762 = vrot.lane.b32.xlu1 %v2021_v24, %s1926_s27 }
 0x218   : > { %v469_v20 = vpop.permute.xlu1 %468 }
 0x219   : > { %v498_v21 = vsub.f32 %v2041_v29, %v469_v20  ;;  %v459_v25 = vpop.permute.xlu0 %458 }
 0x21a   : > { %v496_v26 = vsub.f32 %v2043_v30, %v459_v25 }
 0x21b   : > { %v508_v23 = vmul.f32 1.442695, %v498_v21 }
 0x21c   : > { %v642_v22 = vpop.permute.xlu1 %641  ;;  %v504_v33 = vmul.f32 1.442695, %v496_v26 }
 0x21d   : > { %1700 = vmatprep.subr.bf16.mxu1 %v642_v22  ;;  %1818 = vpow2.f32 %v508_v23 }
 0x21e   : > { %1701 = vmatpush3.bf16.msra.mxu1 %v642_v22 }
 0x220   : > { %v474_v27 = vpop.permute.xlu1 %473 }
 0x221   : > { %v499_v28 = vsub.f32 %v2047_v32, %v474_v27 }
 0x223   : > { %v510_v31 = vmul.f32 1.442695, %v499_v28  ;;  %v484_v24 = vpop.permute.xlu0 %483 }
 0x224   : > { %v464_v35 = vpop.permute.xlu1 %463  ;;  %v501_v57 = vsub.f32 %v2065_v41, %v484_v24 }
 0x225   : > { %1820 = vpow2.f32 %v510_v31  ;;  %v497_v9 = vsub.f32 %v2051_v34, %v464_v35 }
 0x226   : > { %1822 = vpow2.f32 %v504_v33  ;;  %v514_v15 = vmul.f32 1.442695, %v501_v57 }
 0x227   : > { %v506_v36 = vmul.f32 1.442695, %v497_v9  ;;  %v494_v42 = vpop.permute.xlu0 %493  ;;  %v2191_v30 = vpop.eup %1818 }
 0x228   : > { %v644_v29 = vpop.permute.xlu1 %643  ;;  %v503_v43 = vsub.f32 %v2061_v39, %v494_v42 }
 0x229   : > { %1824 = vpow2.f32 %v506_v36  ;;  %1702 = vmatprep.subr.bf16.mxu1 %v644_v29 }
 0x22a   : > { %1703 = vmatpush3.bf16.msra.mxu1 %v644_v29  ;;  %v518_v59 = vmul.f32 1.442695, %v503_v43 }
 0x22b   : > { %v769_v25 = vpop.permute.xlu0 %768 }
 0x22c   : > { %v646_v40 = vpop.permute.xlu1 %645  ;;  %1826 = vpow2.f32 %v518_v59  ;;  %v790_v27 = vsel %vm301_vm0, %v769_v25, 0 }
 0x22d   : > { %1704 = vmatprep.subr.bf16.mxu1 %v646_v40 }
 0x22e   : > { %1705 = vmatpush3.bf16.msra.mxu1 %v646_v40 }
 0x22f   : > { %v2193_v32 = vpop.eup %1820  ;;  %v773_v36 = vpop.permute.xlu0 %772 }
 0x230   : > { %v648_v44 = vpop.permute.xlu1 %647  ;;  %v634_v34 = vpack.c.bf16 %v2193_v32, %v2191_v30  ;;  %v2198_v49 = vpop.eup %1822  ;;  %v796_v29 = vsel %vm301_vm0, %v773_v36, 0 }
 0x231   : > { %1706 = vmatprep.subr.bf16.mxu1 %v648_v44 }
 0x232   : > { %1707 = vmatpush3.bf16.msra.mxu1 %v648_v44 }
 0x233   : > { %v2200_v51 = vpop.eup %1824  ;;  %v761_v40 = vpop.permute.xlu0 %760 }
 0x234   : > { %v489_v1 = vpop.permute.xlu1 %488  ;;  %v633_v4 = vpack.c.bf16 %v2200_v51, %v2198_v49 }
 0x235   : > { %v502_v11 = vsub.f32 %v2057_v37, %v489_v1 }
 0x236   : > { %1708 = vmatprep.mubr.msk.bf16.mxu1 %vm399_vm2, %v633_v4  ;;  %v2212_v37 = vpop.eup %1826 }
 0x237   : > { %v516_v39 = vmul.f32 1.442695, %v502_v11  ;;  %1709 = vmatmul.mubr.msk.bf16.vlgmr.msra.gmra.mrb[0].mxu1 %vm399_vm2, %v634_v34  ;;  %v765_v43 = vpop.permute.xlu0 %764 }
 0x238   : > { %v479_v20 = vpop.permute.xlu1 %478 }
 0x239   : > { %1828 = vpow2.f32 %v516_v39  ;;  %v500_v21 = vsub.f32 %v2059_v38, %v479_v20 }
 0x23a   : > { %1830 = vpow2.f32 %v514_v15 }
 0x23b   : > { %v512_v22 = vmul.f32 1.442695, %v500_v21 }
 0x23c   : > { %v767_v41 = vpop.permute.xlu1 %766 }
 0x23d   : > { %1832 = vpow2.f32 %v512_v22  ;;  %v787_v23 = vsel %vm301_vm0, %v767_v41, 0  ;;  %1772 = vmatprep.subr.msk.bf16.mxu1 %vm301_vm0, %v767_v41 }
 0x23e   : > { %1717 = vmatpush3.bf16.xpose.msra.mxu1 %v787_v23 }
 0x23f   : > { %1773 = vmatprep.subr.msk.bf16.mxu1 %vm301_vm0, %v769_v25 }
 0x240   : > { %v771_v28 = vpop.permute.xlu1 %770 }
 0x241   : > { %v793_v24 = vsel %vm301_vm0, %v771_v28, 0 }
 0x243   : > { %v2214_v26 = vpop.eup %1828 }
 0x244   : > { %v636_v38 = vpack.c.bf16 %v2212_v37, %v2214_v26  ;;  %v2219_v31 = vpop.eup %1830  ;;  %v759_v9 = vpop.permute.xlu1 %758 }
 0x246   : > { %1719 = vmatpush3.bf16.xpose.msra.mxu1 %v790_v27 }
 0x247   : > { %v2221_v33 = vpop.eup %1832  ;;  %1774 = vmatprep.subr.msk.bf16.mxu1 %vm301_vm0, %v771_v28 }
 0x248   : > { %v635_v35 = vpack.c.bf16 %v2219_v31, %v2221_v33  ;;  %v763_v42 = vpop.permute.xlu1 %762 }
 0x24a   : > { %1712 = vmatprep.mubr.msk.bf16.mxu1 %vm399_vm2, %v635_v35 }
 0x24b   : > { %1713 = vmatmul.mubr.msk.bf16.gmra.mrb[4].mxu1 %vm399_vm2, %v636_v38 }
 0x24c   : > { %1724 = vmatprep.mubr.msk.bf16.mxu1 %vm301_vm0, %v759_v9 }
 0x24e   : > { %1721 = vmatpush3.bf16.xpose.msra.mxu1 %v793_v24 }
 0x24f   : > { %1775 = vmatprep.subr.msk.bf16.mxu1 %vm301_vm0, %v773_v36 }
 0x256   : > { %1723 = vmatpush3.bf16.xpose.msra.mxu1 %v796_v29 }
 0x25d   : > { %1725 = vmatmul.mubr.msk.bf16.vlgmr.msra.gmra.mrb[8].mxu1 %vm301_vm0, %v761_v40 }
 0x25e   : > { %1728 = vmatprep.mubr.msk.bf16.mxu1 %vm301_vm0, %v763_v42  ;;  %v2636_v42 = vmov 1  }
 0x25f   : > { %1810 = vset.pattern.permute.xlu0 %v2636_v42  ;;  %1811 = vset.pattern.permute.xlu1 %v2636_v42 }
 0x265   : > { %1729 = vmatmul.mubr.msk.bf16.gmra.mrb[12].mxu1 %vm301_vm0, %v765_v43  ;;  %v2285_v43 = vld [vmem:[#allocation2] sm:$0xff] }
 0x30a   : > { %v2235_v44 = vpop.f32.mrb[0].mxu1 }
 0x30b   : > { %v2237_v34 = vpop.f32.mrb[1].mxu1 }
 0x30c   : > { %v2239_v57 = vpop.f32.mrb[2].mxu1 }
 0x30d   : > { %v2241_v59 = vpop.f32.mrb[3].mxu1 }
 0x31e   : > { %v2243_v1 = vpop.f32.mrb[4].mxu1 }
 0x31f   : > { %v2245_v4 = vpop.f32.mrb[5].mxu1 }
 0x320   : > { %v2247_v11 = vpop.f32.mrb[6].mxu1 }
 0x321   : > { %v2249_v39 = vpop.f32.mrb[7].mxu1 }
 0x330   : > { %v2251_v15 = vpop.f32.mrb[8].mxu1 }
 0x331   : > { %v2253_v20 = vpop.f32.mrb[9].mxu1  ;;  %v877_v38 = vsel %vm399_vm2, %v2251_v15, -inf }
 0x332   : > { %v2255_v21 = vpop.f32.mrb[10].mxu1  ;;  %v871_v22 = vsel %vm399_vm2, %v2253_v20, -inf }
 0x333   : > { %872 = vmax.xlane.f32.xlu1 %v871_v22  ;;  %v2259_v41 = vpop.f32.mrb[11].mxu1  ;;  %v880_v23 = vsel %vm399_vm2, %v2255_v21, -inf }
 0x334   : > { %v874_v25 = vsel %vm399_vm2, %v2259_v41, -inf }
 0x335   : > { %875 = vmax.xlane.f32.xlu0 %v874_v25 }
 0x337   : > { %881 = vmax.xlane.f32.xlu1 %v880_v23  ;;  %v2290_v23 = vld [vmem:[#allocation2 + $0x8] sm:$0xff] }
 0x338   : > { %v2265_v27 = vpop.f32.mrb[12].mxu1 }
 0x339   : > { %878 = vmax.xlane.f32.xlu0 %v877_v38  ;;  %v2269_v28 = vpop.f32.mrb[13].mxu1  ;;  %v889_v29 = vsel %vm399_vm2, %v2265_v27, -inf }
 0x33a   : > { %v2271_v35 = vpop.f32.mrb[14].mxu1  ;;  %v883_v9 = vsel %vm399_vm2, %v2269_v28, -inf }
 0x33b   : > { %v2275_v24 = vpop.f32.mrb[15].mxu1  ;;  %v892_v40 = vsel %vm399_vm2, %v2271_v35, -inf }
 0x33c   : > { %v886_v36 = vsel %vm399_vm2, %v2275_v24, -inf }
 0x33d   : > { %884 = vmax.xlane.f32.xlu0 %v883_v9  ;;  %887 = vmax.xlane.f32.xlu1 %v886_v36  ;;  %v2309_v9 = vld [vmem:[#allocation2 + $0x10] sm:$0xff] }
 0x341   : > { %890 = vmax.xlane.f32.xlu0 %v889_v29  ;;  %893 = vmax.xlane.f32.xlu1 %v892_v40  ;;  %v2300_v29 = vld [vmem:[#allocation2 + $0x18] sm:$0xff] }
 0x3c0   : > { %v873_v22 = vpop.xlane.xlu1 %872 }
 0x3c1   : > { %v2288_v25 = vmax.f32 %v2285_v43, %v873_v22  ;;  %v2325_v22 = vld [vmem:[#allocation2 + $0x20] sm:$0xff] }
 0x3c2   : > { %v876_v38 = vpop.xlane.xlu0 %875 }
 0x3c3   : > { %1246 = vst.msk [vmem:[#allocation2] sm:$0xff] %vm1039_vm4, %v2288_v25  ;;  %v2297_v36 = vmax.f32 %v2290_v23, %v876_v38  ;;  %929 = vperm.xlu0 %1810, %v2288_v25  }
 0x3c4   : > { %v882_v40 = vpop.xlane.xlu1 %881 }
 0x3c5   : > { %1247 = vst.msk [vmem:[#allocation2 + $0x8] sm:$0xff] %vm1039_vm4, %v2297_v36  ;;  %v2307_v42 = vmax.f32 %v2300_v29, %v882_v40  ;;  %v545_v40 = vsel %vm399_vm2, %v2193_v32, 0.0  ;;  %v554_v32 = vsel %vm399_vm2, %v2214_v26, 0.0 }
 0x3c6   : > { %v879_v18 = vpop.xlane.xlu0 %878 }
 0x3c7   : > { %1249 = vst.msk [vmem:[#allocation2 + $0x18] sm:$0xff] %vm1039_vm4, %v2307_v42  ;;  %v2316_v8 = vmax.f32 %v2309_v9, %v879_v18  ;;  %1110 = vrot.lane.b32.xlu0 %v1987_v5, %s1928_s28 }
 0x3c9   : > { %1248 = vst.msk [vmem:[#allocation2 + $0x10] sm:$0xff] %vm1039_vm4, %v2316_v8  ;;  %939 = vperm.xlu1 %1811, %v2316_v8  }
 0x3ca   : > { %v885_v38 = vpop.xlane.xlu0 %884  ;;  %v888_v46 = vpop.xlane.xlu1 %887 }
 0x3cb   : > { %v2330_v18 = vmax.f32 %v2325_v22, %v885_v38  ;;  %v2333_v12 = vmax.f32 %v2327_v19, %v888_v46  ;;  %1114 = vrot.lane.b32.xlu0 %v2009_v17, %s1928_s28  ;;  %v2346_v38 = vld [vmem:[#allocation2 + $0x30] sm:$0xff] }
 0x3cd   : > { %1250 = vst.msk [vmem:[#allocation2 + $0x20] sm:$0xff] %vm1039_vm4, %v2330_v18  ;;  %1251 = vst.msk [vmem:[#allocation2 + $0x28] sm:$0xff] %vm1039_vm4, %v2333_v12  ;;  %944 = vperm.xlu1 %1811, %v2307_v42  }
 0x3ce   : > { %v891_v46 = vpop.xlane.xlu0 %890  ;;  %v894_v17 = vpop.xlane.xlu1 %893 }
 0x3cf   : > { %v2351_v56 = vmax.f32 %v2346_v38, %v891_v46  ;;  %v2354_v5 = vmax.f32 %v2348_v61, %v894_v17  ;;  %v539_v46 = vsel %vm399_vm2, %v2200_v51, 0.0  ;;  %v542_v17 = vsel %vm399_vm2, %v2191_v30, 0.0 }
 0x3d0   : > { %v548_v30 = vsel %vm399_vm2, %v2221_v33, 0.0 }
 0x3d1   : > { %1252 = vst.msk [vmem:[#allocation2 + $0x30] sm:$0xff] %vm1039_vm4, %v2351_v56  ;;  %v910_v54 = vsub.f32 %v2348_v61, %v2354_v5  ;;  %1253 = vst.msk [vmem:[#allocation2 + $0x38] sm:$0xff] %vm1039_vm4, %v2354_v5  ;;  %934 = vperm.xlu1 %1811, %v2297_v36  }
 0x3d5   : > { %959 = vperm.xlu1 %1811, %v2351_v56  }
 0x3d9   : > { %949 = vperm.xlu1 %1811, %v2330_v18  }
 0x3dd   : > { %964 = vperm.xlu1 %1811, %v2354_v5  }
 0x3e1   : > { %954 = vperm.xlu1 %1811, %v2333_v12  }
 0x3e5   : > { %1108 = vrot.lane.b32.xlu1 %v1985_v3, %s1928_s28  ;;  %v551_v3 = vsel %vm399_vm2, %v2219_v31, 0.0 }
 0x3e6   : > { %1812 = vset.pattern.permute.xlu1 %v2640_v45  ;;  %v557_v45 = vsel %vm399_vm2, %v2212_v37, 0.0 }
 0x3e9   : > { %1112 = vrot.lane.b32.xlu1 %v2003_v13, %s1928_s28  ;;  %v536_v13 = vsel %vm399_vm2, %v2198_v49, 0.0 }
 0x3ea   : > { %540 = vadd.xlane.f32.xlu0 %v539_v46 }
 0x3ee   : > { %543 = vadd.xlane.f32.xlu0 %v542_v17 }
 0x3f2   : > { %546 = vadd.xlane.f32.xlu0 %v545_v40 }
 0x3f6   : > { %552 = vadd.xlane.f32.xlu0 %v551_v3 }
 0x3fa   : > { %558 = vadd.xlane.f32.xlu0 %v557_v45 }
 0x40d   : > { %537 = vadd.xlane.f32.xlu1 %v536_v13 }
 0x411   : > { %549 = vadd.xlane.f32.xlu1 %v548_v30 }
 0x415   : > { %555 = vadd.xlane.f32.xlu1 %v554_v32 }
 0x442   : > { %v930_v51 = vpop.permute.xlu0 %929 }
 0x443   : > { %v967_v31 = vsub.f32 %v2253_v20, %v930_v51 }
 0x445   : > { %v975_v37 = vmul.f32 1.442695, %v967_v31 }
 0x448   : > { %v940_v40 = vpop.permute.xlu1 %939 }
 0x449   : > { %v969_v46 = vsub.f32 %v2251_v15, %v940_v40 }
 0x44b   : > { %v979_v45 = vmul.f32 1.442695, %v969_v46 }
 0x44c   : > { %v945_v17 = vpop.permute.xlu1 %944 }
 0x44d   : > { %1834 = vpow2.f32 %v979_v45  ;;  %v970_v49 = vsub.f32 %v2255_v21, %v945_v17 }
 0x44e   : > { %1836 = vpow2.f32 %v975_v37 }
 0x44f   : > { %v981_v3 = vmul.f32 1.442695, %v970_v49 }
 0x450   : > { %v935_v33 = vpop.permute.xlu1 %934 }
 0x451   : > { %1838 = vpow2.f32 %v981_v3  ;;  %v968_v13 = vsub.f32 %v2259_v41, %v935_v33 }
 0x453   : > { %v977_v26 = vmul.f32 1.442695, %v968_v13 }
 0x454   : > { %v960_v30 = vpop.permute.xlu1 %959 }
 0x455   : > { %1840 = vpow2.f32 %v977_v26  ;;  %v973_v20 = vsub.f32 %v2265_v27, %v960_v30 }
 0x457   : > { %v2395_v32 = vpop.eup %1834  ;;  %v987_v15 = vmul.f32 1.442695, %v973_v20 }
 0x458   : > { %v950_v51 = vpop.permute.xlu1 %949  ;;  %v1013_v31 = vsel %vm399_vm2, %v2395_v32, 0.0  ;;  %v1837_v40 = vpop.eup %1836 }
 0x459   : > { %1842 = vpow2.f32 %v987_v15  ;;  %v971_v21 = vsub.f32 %v2269_v28, %v950_v51  ;;  %1014 = vadd.xlane.f32.xlu1 %v1013_v31  ;;  %v1007_v27 = vsel %vm399_vm2, %v1837_v40, 0.0  ;;  %v442_v31 = vmul.f32 1.442695, %v433_v63 }
 0x45a   : > { %v2643_v63 = vsub.f32 %v2093_v48, %v2099_v52  ;;  %v2645_v52 = vsub.f32 %v2133_v0, %v2142_v7  ;;  %v2647_v0 = vsub.f32 %v2148_v10, %v2160_v16 }
 0x45b   : > { %v2400_v46 = vpop.eup %1838  ;;  %v983_v41 = vmul.f32 1.442695, %v971_v21 }
 0x45c   : > { %v1105_v37 = vpack.c.bf16 %v2400_v46, %v2395_v32  ;;  %v965_v45 = vpop.permute.xlu1 %964  ;;  %v454_v7 = vmul.f32 1.442695, %v2647_v0  ;;  %v2656_v0 = vmov 1  }
 0x45d   : > { %1844 = vpow2.f32 %v983_v41  ;;  %v974_v17 = vsub.f32 %v2271_v35, %v965_v45  ;;  %1008 = vadd.xlane.f32.xlu1 %v1007_v27  ;;  %v1016_v35 = vsel %vm399_vm2, %v2400_v46, 0.0  ;;  %v2642_v41 = vsub.f32 %v2091_v47, %v2096_v50 }
 0x45e   : > { %v440_v27 = vmul.f32 1.442695, %v2643_v63  ;;  %v525_v63 = vld [vmem:[#allocation3 + $0x28] sm:$0xff] }
 0x45f   : > { %v1841_v49 = vpop.eup %1840  ;;  %v989_v3 = vmul.f32 1.442695, %v974_v17  ;;  %v444_v45 = vmul.f32 1.442695, %v2642_v41 }
 0x460   : > { %v955_v33 = vpop.permute.xlu1 %954  ;;  %v1010_v13 = vsel %vm399_vm2, %v1841_v49, 0.0  ;;  %v1104_v28 = vpack.c.bf16 %v1841_v49, %v1837_v40  ;;  %v2644_v49 = vsub.f32 %v2101_v53, %v2116_v58  ;;  %v521_v58 = vld [vmem:[#allocation3 + $0x8] sm:$0xff] }
 0x461   : > { %1846 = vpow2.f32 %v989_v3  ;;  %v972_v26 = vsub.f32 %v2275_v24, %v955_v33  ;;  %1011 = vadd.xlane.f32.xlu0 %v1010_v13  ;;  %v1111_v24 = vpop.permute.xlu0 %1110  ;;  %v450_v13 = vmul.f32 1.442695, %v2645_v52 }
 0x462   : > { %1740 = vmatprep.mubr.msk.bf16.mxu0 %vm399_vm2, %v1104_v28  ;;  %v446_v47 = vmul.f32 1.442695, %v2644_v49 }
 0x463   : > { %v2409_v30 = vpop.eup %1842  ;;  %v985_v20 = vmul.f32 1.442695, %v972_v26  ;;  %v2646_v26 = vmov 0.0  }
 0x464   : > { %v1109_v15 = vpop.permute.xlu1 %1108  ;;  %v1025_v51 = vsel %vm399_vm2, %v2409_v30, 0.0  ;;  %269 = vst.msk [vmem:[#allocation4] sm:$0xff] %vm268_vm5, %v2646_v26  ;;  %270 = vst.msk [vmem:[#allocation4 + $0x8] sm:$0xff] %vm268_vm5, %v2646_v26 }
 0x465   : > { %1848 = vpow2.f32 %v985_v20  ;;  %1017 = vadd.xlane.f32.xlu0 %v1016_v35  ;;  %1026 = vadd.xlane.f32.xlu1 %v1025_v51  ;;  %v1115_v50 = vpop.permute.xlu0 %1114  ;;  %271 = vst.msk [vmem:[#allocation4 + $0x10] sm:$0xff] %vm268_vm5, %v2646_v26  ;;  %272 = vst.msk [vmem:[#allocation4 + $0x18] sm:$0xff] %vm268_vm5, %v2646_v26 }
 0x466   : > { %1732 = vmatprep.subr.bf16.mxu0 %v1109_v15  ;;  %1760 = vmatprep.subr.bf16.mxu1 %v1109_v15  ;;  %1850 = vpow2.f32 %v442_v31  ;;  %273 = vst.msk [vmem:[#allocation4 + $0x20] sm:$0xff] %vm268_vm5, %v2646_v26  ;;  %274 = vst.msk [vmem:[#allocation4 + $0x28] sm:$0xff] %vm268_vm5, %v2646_v26  ;;  %v522_v31 = vld [vmem:[#allocation3 + $0x10] sm:$0xff] }
 0x467   : > { %v1845_v40 = vpop.eup %1844  ;;  %1733 = vmatpush3.bf16.msra.mxu0 %v1109_v15  ;;  %1764 = vmatpush3.bf16.msra.mxu1 %v1109_v15  ;;  %1852 = vpow2.f32 %v444_v45  ;;  %275 = vst.msk [vmem:[#allocation4 + $0x30] sm:$0xff] %vm268_vm5, %v2646_v26  ;;  %276 = vst.msk [vmem:[#allocation4 + $0x38] sm:$0xff] %vm268_vm5, %v2646_v26  ;;  %v2648_v15 = vsub.f32 %v2127_v62, %v2136_v2  ;;  %v2650_v45 = vsub.f32 %v2139_v6, %v2156_v14 }
 0x468   : > { %v1019_v21 = vsel %vm399_vm2, %v1845_v40, 0.0  ;;  %1734 = vmatprep.subr.bf16.mxu0 %v1111_v24  ;;  %1761 = vmatprep.subr.bf16.mxu1 %v1111_v24  ;;  %v1113_v55 = vpop.permute.xlu1 %1112  ;;  %1854 = vpow2.f32 %v440_v27  ;;  %v2651_v27 = vsub.f32 %v2327_v19, %v2333_v12  ;;  %v925_v6 = vmul.f32 1.442695, %v910_v54 }
 0x469   : > { %1020 = vadd.xlane.f32.xlu1 %v1019_v21  ;;  %1856 = vpow2.f32 %v446_v47  ;;  %v448_v35 = vmul.f32 1.442695, %v2648_v15  ;;  %v2653_v54 = vsub.f32 %v2290_v23, %v2297_v36  ;;  %v2655_v23 = vsub.f32 %v2325_v22, %v2330_v18  ;;  %v524_v22 = vld [vmem:[#allocation3 + $0x20] sm:$0xff] }
 0x46a   : > { %1858 = vpow2.f32 %v450_v13 }
 0x46b   : > { %v1847_v60 = vpop.eup %1846  ;;  %1735 = vmatpush3.bf16.msra.mxu0 %v1111_v24  ;;  %1765 = vmatpush3.bf16.msra.mxu1 %v1111_v24  ;;  %1860 = vpow2.f32 %v454_v7  ;;  %v913_v61 = vmul.f32 1.442695, %v2653_v54  ;;  %v919_v36 = vmul.f32 1.442695, %v2655_v23  ;;  %v520_v7 = vld [vmem:[#allocation3] sm:$0xff] }
 0x46c   : > { %v1107_v17 = vpack.c.bf16 %v1847_v60, %v2409_v30  ;;  %1736 = vmatprep.subr.bf16.mxu0 %v1113_v55  ;;  %1762 = vmatprep.subr.bf16.mxu1 %v1113_v55  ;;  %v1028_v28 = vsel %vm399_vm2, %v1847_v60, 0.0  ;;  %1862 = vpow2.f32 %v448_v35 }
 0x46f   : > { %v1849_v3 = vpop.eup %1848  ;;  %1737 = vmatpush3.bf16.msra.mxu0 %v1113_v55  ;;  %1766 = vmatpush3.bf16.msra.mxu1 %v1113_v55  ;;  %v452_v55 = vmul.f32 1.442695, %v2650_v45 }
 0x470   : > { %v1022_v33 = vsel %vm399_vm2, %v1849_v3, 0.0  ;;  %1738 = vmatprep.subr.bf16.mxu0 %v1115_v50  ;;  %1763 = vmatprep.subr.bf16.mxu1 %v1115_v50  ;;  %v1106_v48 = vpack.c.bf16 %v1849_v3, %v1845_v40  ;;  %v2434_v53 = vpop.eup %1850  ;;  %v2649_v40 = vsub.f32 %v2309_v9, %v2316_v8 }
 0x471   : > { %1023 = vadd.xlane.f32.xlu0 %v1022_v33  ;;  %v529_v30 = vmul.f32 %v2434_v53, %v521_v58  ;;  %v1853_v20 = vpop.eup %1852  ;;  %v2652_v33 = vsub.f32 %v2285_v43, %v2288_v25  ;;  %v2654_v43 = vsub.f32 %v2300_v29, %v2307_v42  ;;  %v2658_v42 = vsub.f32 %v2346_v38, %v2351_v56 }
 0x472   : > { %1744 = vmatprep.mubr.msk.bf16.mxu1 %vm399_vm2, %v1106_v48  ;;  %v2465_v10 = vpop.eup %1854  ;;  %v530_v16 = vmul.f32 %v1853_v20, %v522_v31  ;;  %v915_v62 = vmul.f32 1.442695, %v2649_v40 }
 0x473   : > { %1739 = vmatpush3.bf16.msra.mxu0 %v1115_v50  ;;  %1767 = vmatpush3.bf16.msra.mxu1 %v1115_v50  ;;  %v1857_v32 = vpop.eup %1856  ;;  %v527_v50 = vld [vmem:[#allocation3 + $0x38] sm:$0xff]  ;;  %v911_v48 = vmul.f32 1.442695, %v2652_v33  ;;  %v917_v25 = vmul.f32 1.442695, %v2654_v43 }
 0x474   : > { %v1859_v41 = vpop.eup %1858  ;;  %1864 = vpow2.f32 %v915_v62  ;;  %v923_v29 = vmul.f32 1.442695, %v2658_v42 }
 0x475   : > { %1029 = vadd.xlane.f32.xlu0 %v1028_v28  ;;  %v533_v8 = vmul.f32 %v1859_v41, %v525_v63  ;;  %v1861_v9 = vpop.eup %1860  ;;  %1866 = vpow2.f32 %v452_v55 }
 0x476   : > { %1741 = vmatmul.mubr.msk.bf16.vlgmr.msra.gmra.mrb[8].mxu0 %vm399_vm2, %v1105_v37  ;;  %1745 = vmatmul.mubr.msk.bf16.vlgmr.msra.gmra.mrb[16].mxu1 %vm399_vm2, %v1107_v17  ;;  %v523_v37 = vld [vmem:[#allocation3 + $0x18] sm:$0xff]  ;;  %v921_v17 = vmul.f32 1.442695, %v2651_v27  ;;  %v1863_v3 = vpop.eup %1862  ;;  %v535_v12 = vmul.f32 %v1861_v9, %v527_v50 }
 0x477   : > { %v541_v51 = vpop.xlane.xlu0 %540  ;;  %v531_v21 = vmul.f32 %v1857_v32, %v523_v37 }
 0x478   : > { %v561_v24 = vadd.f32 %v541_v51, %v529_v30  ;;  %1868 = vpow2.f32 %v921_v17  ;;  %v2657_v30 = vmov 0   ;;  %v532_v51 = vmul.f32 %v1863_v3, %v524_v22 }
 0x479   : > { %1870 = vpow2.f32 %v925_v6 }
 0x47a   : > { %570 = vst.msk [vmem:[#allocation3 + $0x8] sm:$0xff] %vm568_vm3, %v561_v24  ;;  %587 = vperm.xlu1 %1812, %v2465_v10   ;;  %1872 = vpow2.f32 %v911_v48 }
 0x47b   : > { %v544_v46 = vpop.xlane.xlu0 %543  ;;  %1874 = vpow2.f32 %v913_v61  ;;  %v577_v61 = vld [vmem:[#allocation4] sm:$0xff] }
 0x47c   : > { %v562_v2 = vadd.f32 %v544_v46, %v530_v16  ;;  %1876 = vpow2.f32 %v917_v25  ;;  %v526_v16 = vld [vmem:[#allocation3 + $0x30] sm:$0xff] }
 0x47d   : > { %1878 = vpow2.f32 %v919_v36 }
 0x47e   : > { %571 = vst.msk [vmem:[#allocation3 + $0x10] sm:$0xff] %vm568_vm3, %v562_v2  ;;  %597 = vperm.xlu1 %1812, %v1853_v20   ;;  %v1865_v13 = vpop.eup %1864  ;;  %v528_v20 = vmul.f32 %v2465_v10, %v520_v7  ;;  %1880 = vpow2.f32 %v923_v29  ;;  %v579_v7 = vld [vmem:[#allocation4 + $0x10] sm:$0xff] }
 0x47f   : > { %v547_v60 = vpop.xlane.xlu0 %546  ;;  %v1867_v5 = vpop.eup %1866 }
 0x480   : > { %v563_v49 = vadd.f32 %v547_v60, %v531_v21  ;;  %v534_v56 = vmul.f32 %v1867_v5, %v526_v16 }
 0x481   : > { %v992_v55 = vld [vmem:[#allocation3 + $0x8] sm:$0xff] }
 0x482   : > { %572 = vst.msk [vmem:[#allocation3 + $0x18] sm:$0xff] %vm568_vm3, %v563_v49  ;;  %602 = vperm.xlu1 %1812, %v1857_v32   ;;  %v2491_v58 = vpop.eup %1868 }
 0x483   : > { %v553_v47 = vpop.xlane.xlu0 %552  ;;  %v2497_v28 = vpop.eup %1870 }
 0x484   : > { %v565_v14 = vadd.f32 %v553_v47, %v533_v8  ;;  %v1873_v26 = vpop.eup %1872 }
 0x485   : > { %v1875_v15 = vpop.eup %1874  ;;  %v993_v37 = vld [vmem:[#allocation3 + $0x10] sm:$0xff] }
 0x486   : > { %574 = vst.msk [vmem:[#allocation3 + $0x28] sm:$0xff] %vm568_vm3, %v565_v14  ;;  %607 = vperm.xlu1 %1812, %v1863_v3   ;;  %v1877_v31 = vpop.eup %1876  ;;  %v1001_v40 = vmul.f32 %v1865_v13, %v993_v37  ;;  %v1000_v63 = vmul.f32 %v1875_v15, %v992_v55  ;;  %v583_v55 = vld [vmem:[#allocation4 + $0x30] sm:$0xff] }
 0x487   : > { %v559_v19 = vpop.xlane.xlu0 %558  ;;  %v1879_v38 = vpop.eup %1878 }
 0x488   : > { %v567_v52 = vadd.f32 %v559_v19, %v535_v12  ;;  %v1881_v46 = vpop.eup %1880 }
 0x489   : > { %v994_v17 = vld [vmem:[#allocation3 + $0x18] sm:$0xff] }
 0x48a   : > { %576 = vst.msk [vmem:[#allocation3 + $0x38] sm:$0xff] %vm568_vm3, %v567_v52  ;;  %612 = vperm.xlu1 %1812, %v1859_v41   ;;  %v1002_v47 = vmul.f32 %v1877_v31, %v994_v17 }
 0x48b   : > { %1068 = vperm.xlu0 %1810, %v1865_v13  }
 0x48d   : > { %v996_v43 = vld [vmem:[#allocation3 + $0x28] sm:$0xff] }
 0x48e   : > { %617 = vperm.xlu1 %1812, %v1867_v5   ;;  %v1004_v42 = vmul.f32 %v2491_v58, %v996_v43 }
 0x48f   : > { %1083 = vperm.xlu0 %1810, %v2491_v58  }
 0x492   : > { %622 = vperm.xlu1 %1812, %v1861_v9  }
 0x493   : > { %1093 = vperm.xlu0 %1810, %v2497_v28  }
 0x496   : > { %1813 = vset.pattern.permute.xlu1 %v2656_v0 }
 0x497   : > { %1058 = vperm.xlu1 %1813, %v1873_v26   ;;  %1814 = vset.pattern.permute.xlu0 %v2657_v30 }
 0x498   : > { %592 = vperm.xlu0 %1814, %v2434_v53  }
 0x49a   : > { %v538_v35 = vpop.xlane.xlu1 %537 }
 0x49b   : > { %v560_v18 = vadd.f32 %v538_v35, %v528_v20  ;;  %1063 = vperm.xlu1 %1813, %v1875_v15   ;;  %v998_v15 = vld [vmem:[#allocation3 + $0x38] sm:$0xff] }
 0x49c   : > { %v1006_v58 = vmul.f32 %v2497_v28, %v998_v15 }
 0x49d   : > { %569 = vst.msk [vmem:[#allocation3] sm:$0xff] %vm568_vm3, %v560_v18 }
 0x49e   : > { %v550_v24 = vpop.xlane.xlu1 %549 }
 0x49f   : > { %v564_v32 = vadd.f32 %v550_v24, %v532_v51  ;;  %1073 = vperm.xlu1 %1813, %v1877_v31   ;;  %v580_v31 = vld [vmem:[#allocation4 + $0x18] sm:$0xff] }
 0x4a1   : > { %573 = vst.msk [vmem:[#allocation3 + $0x20] sm:$0xff] %vm568_vm3, %v564_v32 }
 0x4a2   : > { %v556_v53 = vpop.xlane.xlu1 %555 }
 0x4a3   : > { %v566_v10 = vadd.f32 %v556_v53, %v534_v56  ;;  %1078 = vperm.xlu1 %1813, %v1879_v38   ;;  %v581_v53 = vld [vmem:[#allocation4 + $0x20] sm:$0xff] }
 0x4a4   : > { %v991_v2 = vld [vmem:[#allocation3] sm:$0xff] }
 0x4a5   : > { %575 = vst.msk [vmem:[#allocation3 + $0x30] sm:$0xff] %vm568_vm3, %v566_v10  ;;  %v999_v41 = vmul.f32 %v1873_v26, %v991_v2 }
 0x4a7   : > { %1088 = vperm.xlu1 %1813, %v1881_v46  }
 0x4a8   : > { %v995_v3 = vld [vmem:[#allocation3 + $0x20] sm:$0xff] }
 0x4a9   : > { %v1003_v48 = vmul.f32 %v1879_v38, %v995_v3 }
 0x4ab   : > { %1815 = vset.pattern.permute.xlu1 %v2657_v30 }
 0x4ac   : > { %v997_v49 = vld [vmem:[#allocation3 + $0x30] sm:$0xff] }
 0x4ad   : > { %v1005_v50 = vmul.f32 %v1881_v46, %v997_v49  ;;  %v584_v49 = vld [vmem:[#allocation4 + $0x38] sm:$0xff] }
 0x4e6   : > { %v1015_v62 = vpop.xlane.xlu1 %1014 }
 0x4e7   : > { %v1033_v21 = vadd.f32 %v1015_v62, %v1001_v40  ;;  %v582_v40 = vld [vmem:[#allocation4 + $0x28] sm:$0xff] }
 0x4e9   : > { %1042 = vst.msk [vmem:[#allocation3 + $0x10] sm:$0xff] %vm1039_vm4, %v1033_v21 }
 0x4ea   : > { %v1009_v45 = vpop.xlane.xlu1 %1008 }
 0x4eb   : > { %v1031_v60 = vadd.f32 %v1009_v45, %v999_v41 }
 0x4ed   : > { %1040 = vst.msk [vmem:[#allocation3] sm:$0xff] %vm1039_vm4, %v1031_v60 }
 0x4ee   : > { %v1012_v27 = vpop.xlane.xlu0 %1011 }
 0x4ef   : > { %v1032_v8 = vadd.f32 %v1012_v27, %v1000_v63 }
 0x4f0   : > { %v1259_v9 = vld [vmem:[#allocation3 + $0x10] sm:$0xff] }
 0x4f1   : > { %1882 = vrcp.f32 %v1259_v9  ;;  %1041 = vst.msk [vmem:[#allocation3 + $0x8] sm:$0xff] %vm1039_vm4, %v1032_v8 }
 0x4f2   : > { %v1018_v6 = vpop.xlane.xlu0 %1017  ;;  %v1027_v14 = vpop.xlane.xlu1 %1026 }
 0x4f3   : > { %v1034_v12 = vadd.f32 %v1018_v6, %v1002_v47  ;;  %v1037_v19 = vadd.f32 %v1027_v14, %v1005_v50  ;;  %v578_v6 = vld [vmem:[#allocation4 + $0x8] sm:$0xff] }
 0x4f4   : > { %v1257_v33 = vld [vmem:[#allocation3] sm:$0xff] }
 0x4f5   : > { %1884 = vrcp.f32 %v1257_v33  ;;  %1043 = vst.msk [vmem:[#allocation3 + $0x18] sm:$0xff] %vm1039_vm4, %v1034_v12  ;;  %1046 = vst.msk [vmem:[#allocation3 + $0x30] sm:$0xff] %vm1039_vm4, %v1037_v19 }
 0x4f6   : > { %v1021_v52 = vpop.xlane.xlu1 %1020 }
 0x4f7   : > { %v1035_v13 = vadd.f32 %v1021_v52, %v1003_v48 }
 0x4f8   : > { %v1338_v54 = vld [vmem:[#allocation3 + $0x8] sm:$0xff] }
 0x4f9   : > { %1886 = vrcp.f32 %v1338_v54  ;;  %1044 = vst.msk [vmem:[#allocation3 + $0x20] sm:$0xff] %vm1039_vm4, %v1035_v13 }
 0x4fa   : > { %v588_v5 = vpop.permute.xlu1 %587 }
 0x4fb   : > { %v2520_v25 = vpop.eup %1882  ;;  %v625_v23 = vmul.f32 %v588_v5, %v577_v61 }
 0x4fc   : > { %v1260_v36 = vld [vmem:[#allocation3 + $0x18] sm:$0xff]  ;;  %v1343_v26 = vld [vmem:[#allocation3 + $0x30] sm:$0xff]  ;;  %1293 = vperm.xlu1 %1815, %v2520_v25  }
 0x4fd   : > { %1888 = vrcp.f32 %v1260_v36  ;;  %v730_v30 = vadd.f32 %v2237_v34, %v625_v23  ;;  %v1431_v23 = vld [vmem:[%s2633_s2 + $0x10] sm:$0xff] }
 0x4fe   : > { %1890 = vrcp.f32 %v1343_v26  ;;  %v1024_v29 = vpop.xlane.xlu0 %1023  ;;  %v598_v20 = vpop.permute.xlu1 %597 }
 0x4ff   : > { %v2525_v35 = vpop.eup %1884  ;;  %738 = vst.msk [vmem:[#allocation4] sm:$0xff] %vm301_vm0, %v730_v30  ;;  %v1036_v22 = vadd.f32 %v1024_v29, %v1004_v42  ;;  %v627_v18 = vmul.f32 %v598_v20, %v579_v7 }
 0x500   : > { %v1341_v51 = vld [vmem:[#allocation3 + $0x20] sm:$0xff]  ;;  %1283 = vperm.xlu1 %1815, %v2525_v35  }
 0x501   : > { %1892 = vrcp.f32 %v1341_v51  ;;  %1045 = vst.msk [vmem:[#allocation3 + $0x28] sm:$0xff] %vm1039_vm4, %v1036_v22  ;;  %v732_v34 = vadd.f32 %v2235_v44, %v627_v18 }
 0x502   : > { %v1030_v24 = vpop.xlane.xlu0 %1029  ;;  %v603_v16 = vpop.permute.xlu1 %602 }
 0x503   : > { %v2532_v32 = vpop.eup %1886  ;;  %740 = vst.msk [vmem:[#allocation4 + $0x10] sm:$0xff] %vm301_vm0, %v732_v34  ;;  %v1038_v56 = vadd.f32 %v1030_v24, %v1006_v58  ;;  %v628_v38 = vmul.f32 %v603_v16, %v580_v31 }
 0x504   : > { %1288 = vperm.xlu0 %1814, %v2532_v32  }
 0x505   : > { %1047 = vst.msk [vmem:[#allocation3 + $0x38] sm:$0xff] %vm1039_vm4, %v1038_v56  ;;  %v733_v10 = vadd.f32 %v2239_v57, %v628_v38 }
 0x506   : > { %v608_v46 = vpop.permute.xlu1 %607 }
 0x507   : > { %v1889_v37 = vpop.eup %1888  ;;  %741 = vst.msk [vmem:[#allocation4 + $0x18] sm:$0xff] %vm301_vm0, %v733_v10  ;;  %v629_v44 = vmul.f32 %v608_v46, %v581_v53  ;;  %v1048_v53 = vld [vmem:[#allocation4] sm:$0xff] }
 0x508   : > { %v2539_v28 = vpop.eup %1890  ;;  %1298 = vperm.xlu1 %1815, %v1889_v37   ;;  %v1262_v63 = vld [vmem:[#allocation3 + $0x28] sm:$0xff] }
 0x509   : > { %v734_v62 = vadd.f32 %v2245_v4, %v629_v44  ;;  %1313 = vperm.xlu0 %1814, %v2539_v28  }
 0x50a   : > { %v2543_v2 = vpop.permute.xlu0 %1068  ;;  %v613_v21 = vpop.permute.xlu1 %612  ;;  %v1050_v31 = vld [vmem:[#allocation4 + $0x10] sm:$0xff] }
 0x50b   : > { %v1893_v41 = vpop.eup %1892  ;;  %742 = vst.msk [vmem:[#allocation4 + $0x20] sm:$0xff] %vm301_vm0, %v734_v62  ;;  %v630_v57 = vmul.f32 %v613_v21, %v582_v40  ;;  %v1098_v24 = vmul.f32 %v2543_v2, %v1050_v31 }
 0x50c   : > { %v1264_v45 = vld [vmem:[#allocation3 + $0x38] sm:$0xff] }
 0x50d   : > { %1894 = vrcp.f32 %v1264_v45  ;;  %v735_v60 = vadd.f32 %v2249_v39, %v630_v57  ;;  %1303 = vperm.xlu0 %1814, %v1893_v41  }
 0x50e   : > { %v2547_v27 = vpop.permute.xlu0 %1083  ;;  %v618_v17 = vpop.permute.xlu1 %617  ;;  %1896 = vrcp.f32 %v1262_v63  ;;  %v1051_v16 = vld [vmem:[#allocation4 + $0x18] sm:$0xff] }
 0x50f   : > { %743 = vst.msk [vmem:[#allocation4 + $0x28] sm:$0xff] %vm301_vm0, %v735_v60  ;;  %v631_v4 = vmul.f32 %v618_v17, %v583_v55 }
 0x511   : > { %v736_v8 = vadd.f32 %v2243_v1, %v631_v4  ;;  %1816 = vset.pattern.permute.xlu0 %v2656_v0 }
 0x512   : > { %v2552_v9 = vpop.permute.xlu0 %1093  ;;  %v623_v47 = vpop.permute.xlu1 %622 }
 0x513   : > { %744 = vst.msk [vmem:[#allocation4 + $0x30] sm:$0xff] %vm301_vm0, %v736_v8  ;;  %v632_v39 = vmul.f32 %v623_v47, %v584_v49 }
 0x515   : > { %v737_v50 = vadd.f32 %v2247_v11, %v632_v39 }
 0x516   : > { %v1059_v26 = vpop.permute.xlu1 %1058  ;;  %v1053_v45 = vld [vmem:[#allocation4 + $0x28] sm:$0xff] }
 0x517   : > { %v1895_v14 = vpop.eup %1894  ;;  %745 = vst.msk [vmem:[#allocation4 + $0x38] sm:$0xff] %vm301_vm0, %v737_v50  ;;  %v593_v3 = vpop.permute.xlu0 %592  ;;  %v1101_v8 = vmul.f32 %v2547_v27, %v1053_v45  ;;  %v1052_v50 = vld [vmem:[#allocation4 + $0x20] sm:$0xff] }
 0x518   : > { %v626_v12 = vmul.f32 %v593_v3, %v578_v6  ;;  %1318 = vperm.xlu1 %1815, %v1895_v14   ;;  %v1897_v1 = vpop.eup %1896 }
 0x51a   : > { %v731_v19 = vadd.f32 %v2241_v59, %v626_v12  ;;  %v1429_v59 = vld [vmem:[%s2633_s2] sm:$0xff]  ;;  %v1064_v7 = vpop.permute.xlu1 %1063  ;;  %v1054_v55 = vld [vmem:[#allocation4 + $0x30] sm:$0xff] }
 0x51c   : > { %739 = vst.msk [vmem:[#allocation4 + $0x8] sm:$0xff] %vm301_vm0, %v731_v19  ;;  %1308 = vperm.xlu1 %1815, %v1897_v1  }
 0x51e   : > { %v1074_v30 = vpop.permute.xlu1 %1073  ;;  %v1055_v40 = vld [vmem:[#allocation4 + $0x38] sm:$0xff] }
 0x51f   : > { %v1099_v56 = vmul.f32 %v1074_v30, %v1051_v16  ;;  %v1103_v57 = vmul.f32 %v2552_v9, %v1055_v40 }
 0x520   : > { %1817 = vset.pattern.permute.xlu1 %v2656_v0  ;;  %v1430_v0 = vld [vmem:[%s2633_s2 + $0x8] sm:$0xff] }
 0x521   : > { %v1433_v43 = vpack.c.bf16 %v1430_v0, %v1429_v59 }
 0x522   : > { %v1079_v42 = vpop.permute.xlu1 %1078 }
 0x523   : > { %1748 = vmatprep.subr.bf16.mxu0 %v1433_v43  ;;  %v1049_v10 = vld [vmem:[#allocation4 + $0x8] sm:$0xff]  ;;  %v1100_v3 = vmul.f32 %v1079_v42, %v1052_v50 }
 0x524   : > { %1749 = vmatpush3.bf16.msra.mxu0 %v1433_v43  ;;  %v1097_v62 = vmul.f32 %v1064_v7, %v1049_v10 }
 0x526   : > { %v1089_v29 = vpop.permute.xlu1 %1088 }
 0x527   : > { %v1102_v63 = vmul.f32 %v1089_v29, %v1054_v55 }
 0x549   : > { %v1742_v33 = vpop.f32.mrb[8].mxu0  ;;  %v1746_v48 = vpop.f32.mrb[16].mxu1 }
 0x54a   : > { %v1166_v52 = vpop.f32.mrb[9].mxu0  ;;  %v1182_v13 = vpop.f32.mrb[17].mxu1  ;;  %1209 = vrot.lane.b32.xlu1 %v1742_v33, %s1929_s29 }
 0x54b   : > { %v1743_v11 = vpop.f32.mrb[10].mxu0  ;;  %v1747_v54 = vpop.f32.mrb[18].mxu1 }
 0x54c   : > { %v1169_v61 = vpop.f32.mrb[11].mxu0  ;;  %v1185_v5 = vpop.f32.mrb[19].mxu1  ;;  %1211 = vrot.lane.b32.xlu0 %v1743_v11, %s1929_s29 }
 0x54e   : > { %1205 = vrot.lane.b32.xlu1 %v1166_v52, %s1929_s29 }
 0x550   : > { %1207 = vrot.lane.b32.xlu0 %v1169_v61, %s1929_s29 }
 0x552   : > { %1219 = vrot.lane.b32.xlu1 %v1747_v54, %s1929_s29 }
 0x554   : > { %1217 = vrot.lane.b32.xlu0 %v1746_v48, %s1929_s29 }
 0x556   : > { %1215 = vrot.lane.b32.xlu1 %v1185_v5, %s1929_s29 }
 0x558   : > { %1213 = vrot.lane.b32.xlu0 %v1182_v13, %s1929_s29 }
 0x55a   : > { %1368 = vperm.xlu1 %1817, %v2532_v32  }
 0x55c   : > { %1363 = vperm.xlu0 %1816, %v2525_v35  }
 0x55e   : > { %1373 = vperm.xlu1 %1817, %v2520_v25   ;;  %v1432_v25 = vld [vmem:[%s2633_s2 + $0x18] sm:$0xff] }
 0x55f   : > { %v1434_v36 = vpack.c.bf16 %v1432_v25, %v1431_v23 }
 0x560   : > { %1378 = vperm.xlu0 %1816, %v1889_v37   ;;  %v1096_v37 = vmul.f32 %v1059_v26, %v1048_v53 }
 0x561   : > { %1750 = vmatprep.subr.bf16.mxu0 %v1434_v36 }
 0x562   : > { %1383 = vperm.xlu1 %1817, %v1893_v41   ;;  %1751 = vmatpush3.bf16.msra.mxu0 %v1434_v36 }
 0x564   : > { %1388 = vperm.xlu0 %1816, %v1897_v1  }
 0x566   : > { %1393 = vperm.xlu1 %1817, %v2539_v28  }
 0x568   : > { %1398 = vperm.xlu0 %1816, %v1895_v14  }
 0x57b   : > { %v1294_v20 = vpop.permute.xlu1 %1293 }
 0x57f   : > { %v1284_v15 = vpop.permute.xlu1 %1283 }
 0x583   : > { %v1289_v35 = vpop.permute.xlu0 %1288 }
 0x587   : > { %v1299_v22 = vpop.permute.xlu1 %1298 }
 0x588   : > { %v1314_v51 = vpop.permute.xlu0 %1313 }
 0x58c   : > { %v1304_v58 = vpop.permute.xlu0 %1303 }
 0x597   : > { %v1319_v18 = vpop.permute.xlu1 %1318 }
 0x59b   : > { %v1309_v34 = vpop.permute.xlu1 %1308 }
 0x5bc   : > { %v1210_v32 = vpop.permute.xlu1 %1209 }
 0x5bd   : > { %v1231_v38 = vadd.f32 %v1210_v32, %v1098_v24 }
 0x5be   : > { %v1212_v46 = vpop.permute.xlu0 %1211 }
 0x5bf   : > { %1240 = vst.msk [vmem:[#allocation4 + $0x10] sm:$0xff] %vm1237_vm6, %v1231_v38  ;;  %v1232_v44 = vadd.f32 %v1212_v46, %v1099_v56 }
 0x5c0   : > { %v1206_v28 = vpop.permute.xlu1 %1205 }
 0x5c1   : > { %1241 = vst.msk [vmem:[#allocation4 + $0x18] sm:$0xff] %vm1237_vm6, %v1232_v44  ;;  %v1229_v21 = vadd.f32 %v1206_v28, %v1096_v37 }
 0x5c2   : > { %v1208_v41 = vpop.permute.xlu0 %1207 }
 0x5c3   : > { %1238 = vst.msk [vmem:[#allocation4] sm:$0xff] %vm1237_vm6, %v1229_v21  ;;  %v1230_v2 = vadd.f32 %v1208_v41, %v1097_v62 }
 0x5c4   : > { %v1220_v60 = vpop.permute.xlu1 %1219 }
 0x5c5   : > { %1239 = vst.msk [vmem:[#allocation4 + $0x8] sm:$0xff] %vm1237_vm6, %v1230_v2  ;;  %v1236_v17 = vadd.f32 %v1220_v60, %v1103_v57  ;;  %v1636_v60 = vld [vmem:[%s2634_s3] ss:$0 sm:$0xff] }
 0x5c6   : > { %v1218_v4 = vpop.permute.xlu0 %1217  ;;  %v1275_v49 = vld [vmem:[#allocation4 + $0x10] sm:$0xff] }
 0x5c7   : > { %1245 = vst.msk [vmem:[#allocation4 + $0x38] sm:$0xff] %vm1237_vm6, %v1236_v17  ;;  %v1235_v47 = vadd.f32 %v1218_v4, %v1102_v63  ;;  %v1323_v39 = vmul.f32 %v1294_v20, %v1275_v49 }
 0x5c8   : > { %v1216_v6 = vpop.permute.xlu1 %1215  ;;  %v1276_v14 = vld [vmem:[#allocation4 + $0x18] sm:$0xff] }
 0x5c9   : > { %1244 = vst.msk [vmem:[#allocation4 + $0x30] sm:$0xff] %vm1237_vm6, %v1235_v47  ;;  %v1234_v9 = vadd.f32 %v1216_v6, %v1101_v8  ;;  %v1324_v12 = vmul.f32 %v1299_v22, %v1276_v14 }
 0x5ca   : > { %1331 = vst.msk [vmem:[#allocation4 + $0x10] sm:$0xff] %vm301_vm0, %v1323_v39  ;;  %v1214_v19 = vpop.permute.xlu0 %1213  ;;  %v1273_v1 = vld [vmem:[#allocation4] sm:$0xff] }
 0x5cb   : > { %1243 = vst.msk [vmem:[#allocation4 + $0x28] sm:$0xff] %vm1237_vm6, %v1234_v9  ;;  %v1233_v33 = vadd.f32 %v1214_v19, %v1100_v3  ;;  %v1321_v27 = vmul.f32 %v1284_v15, %v1273_v1 }
 0x5cc   : > { %1332 = vst.msk [vmem:[#allocation4 + $0x18] sm:$0xff] %vm301_vm0, %v1324_v12  ;;  %v1274_v48 = vld [vmem:[#allocation4 + $0x8] sm:$0xff] }
 0x5cd   : > { %1242 = vst.msk [vmem:[#allocation4 + $0x20] sm:$0xff] %vm1237_vm6, %v1233_v33  ;;  %v1322_v52 = vmul.f32 %v1289_v35, %v1274_v48 }
 0x5ce   : > { %1329 = vst.msk [vmem:[#allocation4] sm:$0xff] %vm301_vm0, %v1321_v27  ;;  %v1280_v13 = vld [vmem:[#allocation4 + $0x38] sm:$0xff] }
 0x5cf   : > { %1330 = vst.msk [vmem:[#allocation4 + $0x8] sm:$0xff] %vm301_vm0, %v1322_v52  ;;  %v1328_v11 = vmul.f32 %v1319_v18, %v1280_v13 }
 0x5d0   : > { %v1279_v54 = vld [vmem:[#allocation4 + $0x30] sm:$0xff] }
 0x5d1   : > { %v1327_v61 = vmul.f32 %v1314_v51, %v1279_v54  ;;  %1336 = vst.msk [vmem:[#allocation4 + $0x38] sm:$0xff] %vm301_vm0, %v1328_v11  ;;  %v1355_v42 = vld [vmem:[#allocation4 + $0x10] sm:$0xff] }
 0x5d2   : > { %v1278_v5 = vld [vmem:[#allocation4 + $0x28] sm:$0xff] }
 0x5d3   : > { %v1326_v59 = vmul.f32 %v1309_v34, %v1278_v5  ;;  %1335 = vst.msk [vmem:[#allocation4 + $0x30] sm:$0xff] %vm301_vm0, %v1327_v61  ;;  %v1356_v35 = vld [vmem:[#allocation4 + $0x18] sm:$0xff] }
 0x5d4   : > { %v1277_v0 = vld [vmem:[#allocation4 + $0x20] sm:$0xff] }
 0x5d5   : > { %v1325_v43 = vmul.f32 %v1304_v58, %v1277_v0  ;;  %1334 = vst.msk [vmem:[#allocation4 + $0x28] sm:$0xff] %vm301_vm0, %v1326_v59  ;;  %v1353_v7 = vld [vmem:[#allocation4] sm:$0xff] }
 0x5d6   : > { %v1354_v23 = vld [vmem:[#allocation4 + $0x8] sm:$0xff] }
 0x5d7   : > { %1333 = vst.msk [vmem:[#allocation4 + $0x20] sm:$0xff] %vm301_vm0, %v1325_v43 }
 0x5d8   : > { %v1360_v37 = vld [vmem:[#allocation4 + $0x38] sm:$0xff] }
 0x5d9   : > { %v1369_v25 = vpop.permute.xlu1 %1368 }
 0x5da   : > { %v1402_v36 = vmul.f32 %v1369_v25, %v1354_v23  ;;  %v1359_v16 = vld [vmem:[#allocation4 + $0x30] sm:$0xff] }
 0x5db   : > { %v1364_v26 = vpop.permute.xlu0 %1363 }
 0x5dc   : > { %1410 = vst.msk [vmem:[#allocation4 + $0x8] sm:$0xff] %vm1237_vm6, %v1402_v36  ;;  %v1401_v30 = vmul.f32 %v1364_v26, %v1353_v7  ;;  %v1358_v58 = vld [vmem:[#allocation4 + $0x28] sm:$0xff] }
 0x5dd   : > { %v1374_v29 = vpop.permute.xlu1 %1373 }
 0x5de   : > { %1409 = vst.msk [vmem:[#allocation4] sm:$0xff] %vm1237_vm6, %v1401_v30  ;;  %v1403_v20 = vmul.f32 %v1374_v29, %v1355_v42  ;;  %v1357_v18 = vld [vmem:[#allocation4 + $0x20] sm:$0xff] }
 0x5df   : > { %v1379_v15 = vpop.permute.xlu0 %1378 }
 0x5e0   : > { %1411 = vst.msk [vmem:[#allocation4 + $0x10] sm:$0xff] %vm1237_vm6, %v1403_v20  ;;  %v1404_v22 = vmul.f32 %v1379_v15, %v1356_v35 }
 0x5e1   : > { %v1384_v51 = vpop.permute.xlu1 %1383 }
 0x5e2   : > { %1412 = vst.msk [vmem:[#allocation4 + $0x18] sm:$0xff] %vm1237_vm6, %v1404_v22  ;;  %v1405_v31 = vmul.f32 %v1384_v51, %v1357_v18 }
 0x5e3   : > { %v1389_v34 = vpop.permute.xlu0 %1388  ;;  %v1418_v38 = vld [vmem:[#allocation4 + $0x8] sm:$0xff] }
 0x5e4   : > { %1413 = vst.msk [vmem:[#allocation4 + $0x20] sm:$0xff] %vm1237_vm6, %v1405_v31  ;;  %v1406_v24 = vmul.f32 %v1389_v34, %v1358_v58 }
 0x5e5   : > { %v1394_v32 = vpop.permute.xlu1 %1393  ;;  %v1417_v56 = vld [vmem:[#allocation4] sm:$0xff] }
 0x5e6   : > { %1414 = vst.msk [vmem:[#allocation4 + $0x28] sm:$0xff] %vm1237_vm6, %v1406_v24  ;;  %v1407_v53 = vmul.f32 %v1394_v32, %v1359_v16  ;;  %v1425_v10 = vpack.c.bf16 %v1418_v38, %v1417_v56 }
 0x5e7   : > { %v1399_v46 = vpop.permute.xlu0 %1398  ;;  %v1419_v28 = vld [vmem:[#allocation4 + $0x10] sm:$0xff] }
 0x5e8   : > { %1415 = vst.msk [vmem:[#allocation4 + $0x30] sm:$0xff] %vm1237_vm6, %v1407_v53  ;;  %v1408_v44 = vmul.f32 %v1399_v46, %v1360_v37  ;;  %1752 = vmatprep.mubr.msk.bf16.mxu0 %vm268_vm5, %v1425_v10 }
 0x5e9   : > { %v1420_v40 = vld [vmem:[#allocation4 + $0x18] sm:$0xff] }
 0x5ea   : > { %1416 = vst.msk [vmem:[#allocation4 + $0x38] sm:$0xff] %vm1237_vm6, %v1408_v44  ;;  %v1426_v62 = vpack.c.bf16 %v1420_v40, %v1419_v28 }
 0x5eb   : > { %v1421_v21 = vld [vmem:[#allocation4 + $0x20] sm:$0xff] }
 0x5ec   : > { %1753 = vmatmul.mubr.msk.bf16.vlgmr.msra.gmra.mrb[12].mxu0 %vm268_vm5, %v1426_v62 }
 0x5ed   : > { %v1422_v41 = vld [vmem:[#allocation4 + $0x28] sm:$0xff] }
 0x5ee   : > { %v1427_v2 = vpack.c.bf16 %v1422_v41, %v1421_v21 }
 0x5ef   : > { %v1423_v57 = vld [vmem:[#allocation4 + $0x30] sm:$0xff] }
 0x5f0   : > { %1756 = vmatprep.mubr.msk.bf16.mxu0 %vm268_vm5, %v1427_v2 }
 0x5f1   : > { %v1424_v45 = vld [vmem:[#allocation4 + $0x38] sm:$0xff] }
 0x5f2   : > { %v1428_v55 = vpack.c.bf16 %v1424_v45, %v1423_v57 }
 0x5f4   : > { %1757 = vmatmul.mubr.msk.bf16.gmra.mrb[16].mxu0 %vm268_vm5, %v1428_v55 }
 0x6bf   : > { %v1754_v63 = vpop.f32.mrb[12].mxu0 }
 0x6c0   : > { %v1498_v17 = vadd.f32 %v1754_v63, %v1636_v60  ;;  %v1489_v4 = vpop.f32.mrb[13].mxu0 }
 0x6c1   : > { %v1490_v49 = vadd.f32 %v1636_v60, %v1489_v4  ;;  %v1755_v8 = vpop.f32.mrb[14].mxu0 }
 0x6c2   : > { %1522 = vst.msk [vmem:[%s245_s20 + $0x10] sm:$0xff] %vm268_vm5, %v1498_v17  ;;  %v1501_v47 = vadd.f32 %v1755_v8, %v1636_v60  ;;  %v1492_v39 = vpop.f32.mrb[15].mxu0 }
 0x6c3   : > { %1520 = vst.msk [vmem:[%s245_s20] sm:$0xff] %vm268_vm5, %v1490_v49  ;;  %v1493_v50 = vadd.f32 %v1636_v60, %v1492_v39 }
 0x6c4   : > { %1523 = vst.msk [vmem:[%s245_s20 + $0x18] sm:$0xff] %vm268_vm5, %v1501_v47 }
 0x6c5   : > { %1521 = vst.msk [vmem:[%s245_s20 + $0x8] sm:$0xff] %vm268_vm5, %v1493_v50 }
 0x6c7   : > { %v1758_v6 = vpop.f32.mrb[16].mxu0 }
 0x6c8   : > { %v1514_v14 = vadd.f32 %v1758_v6, %v1636_v60  ;;  %v1505_v3 = vpop.f32.mrb[17].mxu0 }
 0x6c9   : > { %v1506_v9 = vadd.f32 %v1636_v60, %v1505_v3  ;;  %v1759_v12 = vpop.f32.mrb[18].mxu0 }
 0x6ca   : > { %1526 = vst.msk [vmem:[%s245_s20 + $0x30] sm:$0xff] %vm268_vm5, %v1514_v14  ;;  %v1517_v19 = vadd.f32 %v1759_v12, %v1636_v60  ;;  %v1508_v1 = vpop.f32.mrb[19].mxu0 }
 0x6cb   : > { %1524 = vst.msk [vmem:[%s245_s20 + $0x20] sm:$0xff] %vm268_vm5, %v1506_v9  ;;  %v1509_v33 = vadd.f32 %v1636_v60, %v1508_v1 }
 0x6cc   : > { %1527 = vst.msk [vmem:[%s245_s20 + $0x38] sm:$0xff] %vm268_vm5, %v1517_v19 }
 0x6cd   : > { %1525 = vst.msk [vmem:[%s245_s20 + $0x28] sm:$0xff] %vm268_vm5, %v1509_v33 }
 0x6ce PF: > { %s14_s17 = sadd.s32 1, %s1920_s17   ;;  %s2659_s15 = smov %s1916_s16 }
 0x6cf   : > { %p11_p5 = scmp.ge.s32.totalorder %s14_s17, 4   ;;  %s2660_s16 = smov %s2662_s18 }
 0x6d1   :  { %13 = sbr.rel (!%p11_p5) target bundleno = 2 (0x2), region = 77 }

// kernel: conv_attention.3
= control target key start
LH: loop header
LB: loop body
LE: loop exit
PB: predicated region body
PF: predicated region fallthrough
CT: control target
= control target key end

     0   :  { %s1997_s9 = smov 0   ;;  %s2738_s0 = inlined_call_operand.vmem [shape: f32[2,8,8,32], index: 0, kind: input, shape index: {}]   ;;  %s2739_s1 = inlined_call_operand.vmem [shape: f32[3,9,32], index: 1, kind: input, shape index: {}]   ;;  %s2740_s2 = inlined_call_operand.vmem [shape: f32[2,3,32], index: 2, kind: output, shape index: {}]  }
   0x1 LB: > { %s1903_s10 = sadd.s32 4294967295, %s1979_s9   ;;  %p1906_p0 = scmp.ge.s32.totalorder %s1979_s9, 1  ;;  %s1979_s9 = sphi %s1997_s9, %s12_s9  }
   0x2   : > { %p107_p1 = scmp.lt.s32.totalorder %s1979_s9, 3 }
   0x4   : > { %p108_p2 = pnand %p1906_p0, %p107_p1 }
   0x5   : > { %p124_p3 = scmp.lt.s32.totalorder (!%p108_p2), %s1903_s10, 1  ;;  %p1909_p4 = scmp.ne.s32.totalorder (!%p108_p2), %s1903_s10, 0 }
   0x6   : > { %111 = sbr.rel (%p108_p2) target bundleno = 324 (0x144), region = 28 }
   0xd   : > { %s125_s11 = scalar_select %p124_p3, %s1903_s10, 1 }
   0xe   : > { %132 = sbr.rel (%p1909_p4) target bundleno = 21 (0x15), region = 32  ;;  %vm133_vm0 = vcmask (!%p1909_p4), 256000   ;;  %v1981_v0 = vmov (!%p1909_p4), 0.0  }
   0xf   : > { %s1963_s12 = sshll.u32 %s125_s11, 6  ;;  %134 = vst.msk [vmem:[%s2740_s2] sm:$0x7] (!%p1909_p4), %vm133_vm0, %v1981_v0  ;;  %135 = vst.msk [vmem:[%s2740_s2 + $0x4] sm:$0x7] (!%p1909_p4), %vm133_vm0, %v1981_v0 }
  0x10   : > { %s128_s15 = scalar_lea.vmem %s2738_s0, %s1963_s12 }
  0x15 PF: > { %v136_v1 = vld [vmem:[%s128_s15] sm:$0xff]  ;;  %v137_v2 = vld [vmem:[%s128_s15 + $0x8] sm:$0xff]  ;;  %v138_v3 = vld [vmem:[%s128_s15 + $0x10] sm:$0xff]  ;;  %vm168_vm1 = vcmask 1040384   ;;  %vm233_vm2 = vcmask 1046528   ;;  %vm308_vm3 = vcmask 1045504  }
  0x16   : > { %v139_v4 = vld [vmem:[%s128_s15 + $0x18] sm:$0xff]  ;;  %v140_v5 = vld [vmem:[%s128_s15 + $0x20] sm:$0xff]  ;;  %v141_v6 = vld [vmem:[%s128_s15 + $0x28] sm:$0xff]  ;;  %v152_v7 = vrot.slane %v136_v1, 7  ;;  %v153_v8 = vrot.slane %v137_v2, 7  ;;  %v154_v9 = vrot.slane %v138_v3, 7 }
  0x17   : > { %v142_v10 = vld [vmem:[%s128_s15 + $0x30] sm:$0xff]  ;;  %v143_v11 = vld [vmem:[%s128_s15 + $0x38] sm:$0xff]  ;;  %v155_v12 = vrot.slane %v139_v4, 7  ;;  %v156_v13 = vrot.slane %v140_v5, 7  ;;  %v157_v14 = vrot.slane %v141_v6, 7  ;;  %vm693_vm4 = vcmask 261120  }
  0x18   : > { %v158_v15 = vrot.slane %v142_v10, 7  ;;  %v159_v16 = vrot.slane %v143_v11, 7  ;;  %v2015_v17 = vsel %vm168_vm1, 0.0, %v152_v7  ;;  %v2018_v18 = vsel %vm168_vm1, 0.0, %v153_v8  ;;  %v1910_v23 = vld [vmem:[%s2739_s1] ss:$0 sm:$0xff] }
  0x19   : > { %v2021_v19 = vsel %vm168_vm1, 0.0, %v154_v9  ;;  %v2024_v20 = vsel %vm168_vm1, 0.0, %v155_v12  ;;  %v2027_v21 = vsel %vm168_vm1, 0.0, %v156_v13  ;;  %v2030_v22 = vsel %vm168_vm1, 0.0, %v157_v14  ;;  %v1911_v32 = vld [vmem:[%s2739_s1 + $0x1] ss:$0 sm:$0xff] }
  0x1a   : > { %v2036_v24 = vsel %vm168_vm1, 0.0, %v158_v15  ;;  %v2039_v25 = vsel %vm168_vm1, 0.0, %v159_v16  ;;  %v2042_v26 = vsel %vm168_vm1, %v152_v7, 0.0  ;;  %v2045_v27 = vsel %vm168_vm1, %v153_v8, 0.0 }
  0x1b   : > { %v2048_v28 = vsel %vm168_vm1, %v154_v9, 0.0  ;;  %v2051_v29 = vsel %vm168_vm1, %v155_v12, 0.0  ;;  %v2054_v30 = vsel %vm168_vm1, %v156_v13, 0.0  ;;  %v2057_v31 = vsel %vm168_vm1, %v157_v14, 0.0  ;;  %v1912_v13 = vld [vmem:[%s2739_s1 + $0x2] ss:$0 sm:$0xff] }
  0x1c   : > { %v2063_v33 = vsel %vm168_vm1, %v158_v15, 0.0  ;;  %v2066_v34 = vsel %vm168_vm1, %v159_v16, 0.0  ;;  %v190_v35 = vmul.f32 0.0, %v1910_v23  ;;  %v191_v36 = vmul.f32 %v1910_v23, %v2015_v17 }
  0x1d   : > { %v192_v37 = vmul.f32 %v1910_v23, %v2018_v18  ;;  %v193_v38 = vmul.f32 %v1910_v23, %v2021_v19  ;;  %v194_v39 = vmul.f32 %v1910_v23, %v2024_v20  ;;  %v195_v40 = vmul.f32 %v1910_v23, %v2027_v21 }
  0x1e   : > { %v196_v41 = vmul.f32 %v1910_v23, %v2030_v22  ;;  %v197_v42 = vmul.f32 %v1910_v23, %v2036_v24  ;;  %v203_v43 = vmul.f32 0.0, %v1911_v32  ;;  %v204_v44 = vmul.f32 %v1911_v32, %v2015_v17 }
  0x1f   : > { %v205_v45 = vmul.f32 %v1911_v32, %v2042_v26  ;;  %v206_v46 = vmul.f32 %v1911_v32, %v2018_v18  ;;  %v207_v47 = vmul.f32 %v1911_v32, %v2045_v27  ;;  %v208_v48 = vmul.f32 %v1911_v32, %v2021_v19 }
  0x20   : > { %v209_v49 = vmul.f32 %v1911_v32, %v2048_v28  ;;  %v210_v50 = vmul.f32 %v1911_v32, %v2024_v20  ;;  %v211_v51 = vmul.f32 %v1911_v32, %v2051_v29  ;;  %v212_v52 = vmul.f32 %v1911_v32, %v2027_v21 }
  0x21   : > { %v213_v53 = vmul.f32 %v1911_v32, %v2054_v30  ;;  %v214_v54 = vmul.f32 %v1911_v32, %v2030_v22  ;;  %v215_v55 = vmul.f32 %v1911_v32, %v2057_v31  ;;  %v216_v56 = vmul.f32 %v1911_v32, %v2036_v24 }
  0x22   : > { %v217_v57 = vmul.f32 %v1911_v32, %v2063_v33  ;;  %v234_v58 = vrot.slane %v203_v43, 1  ;;  %v236_v59 = vrot.slane %v204_v44, 1  ;;  %v237_v60 = vrot.slane %v205_v45, 1 }
  0x23   : > { %v239_v61 = vrot.slane %v206_v46, 1  ;;  %v240_v62 = vrot.slane %v207_v47, 1  ;;  %v242_v63 = vrot.slane %v208_v48, 1  ;;  %v243_v0 = vrot.slane %v209_v49, 1 }
  0x24   : > { %v238_v1 = vsel %vm233_vm2, %v236_v59, %v237_v60  ;;  %v245_v2 = vrot.slane %v210_v50, 1  ;;  %v246_v3 = vrot.slane %v211_v51, 1  ;;  %v248_v4 = vrot.slane %v212_v52, 1 }
  0x25   : > { %v241_v5 = vsel %vm233_vm2, %v239_v61, %v240_v62  ;;  %v244_v6 = vsel %vm233_vm2, %v242_v63, %v243_v0  ;;  %v249_v7 = vrot.slane %v213_v53, 1  ;;  %v251_v8 = vrot.slane %v214_v54, 1 }
  0x26   : > { %v247_v9 = vsel %vm233_vm2, %v245_v2, %v246_v3  ;;  %v252_v10 = vrot.slane %v215_v55, 1  ;;  %v254_v11 = vrot.slane %v216_v56, 1  ;;  %v255_v12 = vrot.slane %v217_v57, 1 }
  0x27   : > { %v250_v14 = vsel %vm233_vm2, %v248_v4, %v249_v7  ;;  %v265_v15 = vadd.f32 %v234_v58, %v190_v35  ;;  %v266_v16 = vadd.f32 %v238_v1, %v191_v36  ;;  %v267_v23 = vadd.f32 %v241_v5, %v192_v37 }
  0x28   : > { %v253_v32 = vsel %vm233_vm2, %v251_v8, %v252_v10  ;;  %v256_v43 = vsel %vm233_vm2, %v254_v11, %v255_v12  ;;  %v268_v44 = vadd.f32 %v244_v6, %v193_v38  ;;  %v269_v45 = vadd.f32 %v247_v9, %v194_v39  ;;  %v1913_v10 = vld [vmem:[%s2739_s1 + $0x3] ss:$0 sm:$0xff] }
  0x29   : > { %v270_v46 = vadd.f32 %v250_v14, %v195_v40  ;;  %v271_v47 = vadd.f32 %v253_v32, %v196_v41  ;;  %v272_v48 = vadd.f32 %v256_v43, %v197_v42  ;;  %v278_v49 = vmul.f32 0.0, %v1912_v13 }
  0x2a   : > { %v279_v50 = vmul.f32 %v1912_v13, %v2015_v17  ;;  %v280_v51 = vmul.f32 %v1912_v13, %v2042_v26  ;;  %v281_v52 = vmul.f32 %v1912_v13, %v2018_v18  ;;  %v282_v35 = vmul.f32 %v1912_v13, %v2045_v27 }
  0x2b   : > { %v283_v36 = vmul.f32 %v1912_v13, %v2021_v19  ;;  %v284_v37 = vmul.f32 %v1912_v13, %v2048_v28  ;;  %v285_v53 = vmul.f32 %v1912_v13, %v2024_v20  ;;  %v286_v38 = vmul.f32 %v1912_v13, %v2051_v29 }
  0x2c   : > { %v287_v39 = vmul.f32 %v1912_v13, %v2027_v21  ;;  %v288_v40 = vmul.f32 %v1912_v13, %v2054_v30  ;;  %v289_v41 = vmul.f32 %v1912_v13, %v2030_v22  ;;  %v290_v42 = vmul.f32 %v1912_v13, %v2057_v31 }
  0x2d   : > { %v291_v54 = vmul.f32 %v1912_v13, %v2036_v24  ;;  %v292_v55 = vmul.f32 %v1912_v13, %v2063_v33  ;;  %v309_v56 = vrot.slane %v278_v49, 2  ;;  %v311_v57 = vrot.slane %v279_v50, 2 }
  0x2e   : > { %v312_v58 = vrot.slane %v280_v51, 2  ;;  %v314_v59 = vrot.slane %v281_v52, 2  ;;  %v315_v60 = vrot.slane %v282_v35, 2  ;;  %v317_v61 = vrot.slane %v283_v36, 2 }
  0x2f   : > { %v318_v62 = vrot.slane %v284_v37, 2  ;;  %v320_v63 = vrot.slane %v285_v53, 2  ;;  %v321_v0 = vrot.slane %v286_v38, 2  ;;  %v323_v1 = vrot.slane %v287_v39, 2 }
  0x30   : > { %v313_v2 = vsel %vm308_vm3, %v311_v57, %v312_v58  ;;  %v316_v3 = vsel %vm308_vm3, %v314_v59, %v315_v60  ;;  %v324_v4 = vrot.slane %v288_v40, 2  ;;  %v326_v5 = vrot.slane %v289_v41, 2 }
  0x31   : > { %v319_v6 = vsel %vm308_vm3, %v317_v61, %v318_v62  ;;  %v322_v7 = vsel %vm308_vm3, %v320_v63, %v321_v0  ;;  %v327_v8 = vrot.slane %v290_v42, 2  ;;  %v329_v9 = vrot.slane %v291_v54, 2 }
  0x32   : > { %v325_v11 = vsel %vm308_vm3, %v323_v1, %v324_v4  ;;  %v330_v12 = vrot.slane %v292_v55, 2  ;;  %v340_v13 = vadd.f32 %v309_v56, %v265_v15  ;;  %v341_v14 = vadd.f32 %v313_v2, %v266_v16 }
  0x33   : > { %v328_v32 = vsel %vm308_vm3, %v326_v5, %v327_v8  ;;  %v342_v43 = vadd.f32 %v316_v3, %v267_v23  ;;  %v343_v49 = vadd.f32 %v319_v6, %v268_v44  ;;  %v344_v50 = vadd.f32 %v322_v7, %v269_v45  ;;  %v1914_v45 = vld [vmem:[%s2739_s1 + $0x4] ss:$0 sm:$0xff] }
  0x34   : > { %v331_v51 = vsel %vm308_vm3, %v329_v9, %v330_v12  ;;  %v345_v52 = vadd.f32 %v325_v11, %v270_v46  ;;  %v346_v35 = vadd.f32 %v328_v32, %v271_v47  ;;  %v353_v36 = vmul.f32 %v1913_v10, %v2015_v17 }
  0x35   : > { %v347_v37 = vadd.f32 %v331_v51, %v272_v48  ;;  %v354_v53 = vmul.f32 %v1913_v10, %v2018_v18  ;;  %v355_v38 = vmul.f32 %v1913_v10, %v2021_v19  ;;  %v356_v39 = vmul.f32 %v1913_v10, %v2024_v20 }
  0x36   : > { %v357_v15 = vmul.f32 %v1913_v10, %v2027_v21  ;;  %v358_v16 = vmul.f32 %v1913_v10, %v2030_v22  ;;  %v359_v23 = vmul.f32 %v1913_v10, %v2036_v24  ;;  %v360_v44 = vmul.f32 %v1913_v10, %v2039_v25 }
  0x37   : > { %v361_v46 = vadd.f32 %v353_v36, %v340_v13  ;;  %v362_v47 = vadd.f32 %v354_v53, %v341_v14  ;;  %v363_v48 = vadd.f32 %v355_v38, %v342_v43  ;;  %v364_v40 = vadd.f32 %v356_v39, %v343_v49 }
  0x38   : > { %v365_v41 = vadd.f32 %v357_v15, %v344_v50  ;;  %v366_v42 = vadd.f32 %v358_v16, %v345_v52  ;;  %v367_v54 = vadd.f32 %v359_v23, %v346_v35  ;;  %v368_v55 = vadd.f32 %v360_v44, %v347_v37  ;;  %v1915_v16 = vld [vmem:[%s2739_s1 + $0x5] ss:$0 sm:$0xff] }
  0x39   : > { %v374_v56 = vmul.f32 %v1914_v45, %v2015_v17  ;;  %v375_v57 = vmul.f32 %v1914_v45, %v2042_v26  ;;  %v376_v58 = vmul.f32 %v1914_v45, %v2018_v18  ;;  %v377_v59 = vmul.f32 %v1914_v45, %v2045_v27 }
  0x3a   : > { %v378_v60 = vmul.f32 %v1914_v45, %v2021_v19  ;;  %v379_v61 = vmul.f32 %v1914_v45, %v2048_v28  ;;  %v380_v62 = vmul.f32 %v1914_v45, %v2024_v20  ;;  %v381_v63 = vmul.f32 %v1914_v45, %v2051_v29 }
  0x3b   : > { %v382_v0 = vmul.f32 %v1914_v45, %v2027_v21  ;;  %v383_v1 = vmul.f32 %v1914_v45, %v2054_v30  ;;  %v384_v2 = vmul.f32 %v1914_v45, %v2030_v22  ;;  %v385_v3 = vmul.f32 %v1914_v45, %v2057_v31 }
  0x3c   : > { %v386_v4 = vmul.f32 %v1914_v45, %v2036_v24  ;;  %v387_v5 = vmul.f32 %v1914_v45, %v2063_v33  ;;  %v388_v6 = vmul.f32 %v1914_v45, %v2039_v25  ;;  %v389_v7 = vmul.f32 %v1914_v45, %v2066_v34 }
  0x3d   : > { %v406_v8 = vrot.slane %v374_v56, 1  ;;  %v407_v9 = vrot.slane %v375_v57, 1  ;;  %v409_v10 = vrot.slane %v376_v58, 1  ;;  %v410_v11 = vrot.slane %v377_v59, 1 }
  0x3e   : > { %v412_v12 = vrot.slane %v378_v60, 1  ;;  %v413_v13 = vrot.slane %v379_v61, 1  ;;  %v415_v14 = vrot.slane %v380_v62, 1  ;;  %v416_v32 = vrot.slane %v381_v63, 1 }
  0x3f   : > { %v408_v43 = vsel %vm233_vm2, %v406_v8, %v407_v9  ;;  %v411_v49 = vsel %vm233_vm2, %v409_v10, %v410_v11  ;;  %v418_v50 = vrot.slane %v382_v0, 1  ;;  %v419_v51 = vrot.slane %v383_v1, 1 }
  0x40   : > { %v414_v52 = vsel %vm233_vm2, %v412_v12, %v413_v13  ;;  %v417_v35 = vsel %vm233_vm2, %v415_v14, %v416_v32  ;;  %v421_v36 = vrot.slane %v384_v2, 1  ;;  %v422_v37 = vrot.slane %v385_v3, 1 }
  0x41   : > { %v420_v53 = vsel %vm233_vm2, %v418_v50, %v419_v51  ;;  %v424_v38 = vrot.slane %v386_v4, 1  ;;  %v425_v39 = vrot.slane %v387_v5, 1  ;;  %v427_v15 = vrot.slane %v388_v6, 1 }
  0x42   : > { %v423_v23 = vsel %vm233_vm2, %v421_v36, %v422_v37  ;;  %v428_v44 = vrot.slane %v389_v7, 1  ;;  %v438_v45 = vadd.f32 %v408_v43, %v361_v46  ;;  %v439_v56 = vadd.f32 %v411_v49, %v362_v47 }
  0x43   : > { %v426_v57 = vsel %vm233_vm2, %v424_v38, %v425_v39  ;;  %v440_v58 = vadd.f32 %v414_v52, %v363_v48  ;;  %v441_v59 = vadd.f32 %v417_v35, %v364_v40  ;;  %v442_v60 = vadd.f32 %v420_v53, %v365_v41 }
  0x44   : > { %v429_v61 = vsel %vm233_vm2, %v427_v15, %v428_v44  ;;  %v443_v62 = vadd.f32 %v423_v23, %v366_v42  ;;  %v444_v63 = vadd.f32 %v426_v57, %v367_v54  ;;  %v451_v0 = vmul.f32 %v1915_v16, %v2015_v17  ;;  %v1916_v23 = vld [vmem:[%s2739_s1 + $0x6] ss:$0 sm:$0xff] }
  0x45   : > { %v445_v1 = vadd.f32 %v429_v61, %v368_v55  ;;  %v452_v2 = vmul.f32 %v1915_v16, %v2042_v26  ;;  %v453_v3 = vmul.f32 %v1915_v16, %v2018_v18  ;;  %v454_v4 = vmul.f32 %v1915_v16, %v2045_v27 }
  0x46   : > { %v455_v46 = vmul.f32 %v1915_v16, %v2021_v19  ;;  %v456_v47 = vmul.f32 %v1915_v16, %v2048_v28  ;;  %v457_v48 = vmul.f32 %v1915_v16, %v2024_v20  ;;  %v458_v40 = vmul.f32 %v1915_v16, %v2051_v29 }
  0x47   : > { %v459_v41 = vmul.f32 %v1915_v16, %v2027_v21  ;;  %v460_v42 = vmul.f32 %v1915_v16, %v2054_v30  ;;  %v461_v54 = vmul.f32 %v1915_v16, %v2030_v22  ;;  %v462_v55 = vmul.f32 %v1915_v16, %v2057_v31 }
  0x48   : > { %v463_v5 = vmul.f32 %v1915_v16, %v2036_v24  ;;  %v464_v6 = vmul.f32 %v1915_v16, %v2063_v33  ;;  %v465_v7 = vmul.f32 %v1915_v16, %v2039_v25  ;;  %v466_v8 = vmul.f32 %v1915_v16, %v2066_v34 }
  0x49   : > { %v483_v9 = vrot.slane %v451_v0, 2  ;;  %v484_v10 = vrot.slane %v452_v2, 2  ;;  %v486_v11 = vrot.slane %v453_v3, 2  ;;  %v487_v12 = vrot.slane %v454_v4, 2 }
  0x4a   : > { %v489_v13 = vrot.slane %v455_v46, 2  ;;  %v490_v14 = vrot.slane %v456_v47, 2  ;;  %v492_v32 = vrot.slane %v457_v48, 2  ;;  %v493_v43 = vrot.slane %v458_v40, 2 }
  0x4b   : > { %v485_v49 = vsel %vm308_vm3, %v483_v9, %v484_v10  ;;  %v488_v50 = vsel %vm308_vm3, %v486_v11, %v487_v12  ;;  %v495_v51 = vrot.slane %v459_v41, 2  ;;  %v496_v52 = vrot.slane %v460_v42, 2 }
  0x4c   : > { %v491_v35 = vsel %vm308_vm3, %v489_v13, %v490_v14  ;;  %v494_v36 = vsel %vm308_vm3, %v492_v32, %v493_v43  ;;  %v498_v37 = vrot.slane %v461_v54, 2  ;;  %v499_v53 = vrot.slane %v462_v55, 2 }
  0x4d   : > { %v497_v38 = vsel %vm308_vm3, %v495_v51, %v496_v52  ;;  %v501_v39 = vrot.slane %v463_v5, 2  ;;  %v502_v15 = vrot.slane %v464_v6, 2  ;;  %v504_v16 = vrot.slane %v465_v7, 2 }
  0x4e   : > { %v500_v44 = vsel %vm308_vm3, %v498_v37, %v499_v53  ;;  %v505_v57 = vrot.slane %v466_v8, 2  ;;  %v515_v61 = vadd.f32 %v485_v49, %v438_v45  ;;  %v516_v0 = vadd.f32 %v488_v50, %v439_v56 }
  0x4f   : > { %v503_v2 = vsel %vm308_vm3, %v501_v39, %v502_v15  ;;  %v517_v3 = vadd.f32 %v491_v35, %v440_v58  ;;  %v518_v4 = vadd.f32 %v494_v36, %v441_v59  ;;  %v519_v46 = vadd.f32 %v497_v38, %v442_v60  ;;  %v1917_v60 = vld [vmem:[%s2739_s1 + $0x7] ss:$0 sm:$0xff] }
  0x50   : > { %v506_v47 = vsel %vm308_vm3, %v504_v16, %v505_v57  ;;  %v520_v48 = vadd.f32 %v500_v44, %v443_v62  ;;  %v521_v40 = vadd.f32 %v503_v2, %v444_v63  ;;  %v528_v41 = vmul.f32 %v1916_v23, %v2018_v18 }
  0x51   : > { %v522_v42 = vadd.f32 %v506_v47, %v445_v1  ;;  %v529_v54 = vmul.f32 %v1916_v23, %v2021_v19  ;;  %v530_v55 = vmul.f32 %v1916_v23, %v2024_v20  ;;  %v531_v5 = vmul.f32 %v1916_v23, %v2027_v21 }
  0x52   : > { %v532_v45 = vmul.f32 %v1916_v23, %v2030_v22  ;;  %v533_v56 = vmul.f32 %v1916_v23, %v2036_v24  ;;  %v534_v58 = vmul.f32 %v1916_v23, %v2039_v25  ;;  %v535_v59 = vmul.f32 0.0, %v1916_v23 }
  0x53   : > { %v536_v62 = vadd.f32 %v528_v41, %v515_v61  ;;  %v537_v63 = vadd.f32 %v529_v54, %v516_v0  ;;  %v538_v1 = vadd.f32 %v530_v55, %v517_v3  ;;  %v539_v6 = vadd.f32 %v531_v5, %v518_v4 }
  0x54   : > { %v540_v7 = vadd.f32 %v532_v45, %v519_v46  ;;  %v541_v8 = vadd.f32 %v533_v56, %v520_v48  ;;  %v542_v9 = vadd.f32 %v534_v58, %v521_v40  ;;  %v543_v10 = vadd.f32 %v535_v59, %v522_v42  ;;  %v1918_v56 = vld [vmem:[%s2739_s1 + $0x8] ss:$0 sm:$0xff] }
  0x55   : > { %v549_v11 = vmul.f32 %v1917_v60, %v2018_v18  ;;  %v550_v12 = vmul.f32 %v1917_v60, %v2045_v27  ;;  %v551_v13 = vmul.f32 %v1917_v60, %v2021_v19  ;;  %v552_v14 = vmul.f32 %v1917_v60, %v2048_v28 }
  0x56   : > { %v553_v32 = vmul.f32 %v1917_v60, %v2024_v20  ;;  %v554_v43 = vmul.f32 %v1917_v60, %v2051_v29  ;;  %v555_v49 = vmul.f32 %v1917_v60, %v2027_v21  ;;  %v556_v50 = vmul.f32 %v1917_v60, %v2054_v30 }
  0x57   : > { %v557_v51 = vmul.f32 %v1917_v60, %v2030_v22  ;;  %v558_v52 = vmul.f32 %v1917_v60, %v2057_v31  ;;  %v559_v35 = vmul.f32 %v1917_v60, %v2036_v24  ;;  %v560_v36 = vmul.f32 %v1917_v60, %v2063_v33 }
  0x58   : > { %v561_v37 = vmul.f32 %v1917_v60, %v2039_v25  ;;  %v562_v53 = vmul.f32 %v1917_v60, %v2066_v34  ;;  %v563_v38 = vmul.f32 0.0, %v1917_v60  ;;  %v579_v39 = vrot.slane %v549_v11, 1 }
  0x59   : > { %v580_v15 = vrot.slane %v550_v12, 1  ;;  %v582_v16 = vrot.slane %v551_v13, 1  ;;  %v583_v23 = vrot.slane %v552_v14, 1  ;;  %v585_v44 = vrot.slane %v553_v32, 1 }
  0x5a   : > { %v586_v57 = vrot.slane %v554_v43, 1  ;;  %v588_v61 = vrot.slane %v555_v49, 1  ;;  %v589_v0 = vrot.slane %v556_v50, 1  ;;  %v591_v2 = vrot.slane %v557_v51, 1 }
  0x5b   : > { %v581_v3 = vsel %vm233_vm2, %v579_v39, %v580_v15  ;;  %v584_v4 = vsel %vm233_vm2, %v582_v16, %v583_v23  ;;  %v592_v46 = vrot.slane %v558_v52, 1  ;;  %v594_v47 = vrot.slane %v559_v35, 1 }
  0x5c   : > { %v587_v48 = vsel %vm233_vm2, %v585_v44, %v586_v57  ;;  %v590_v40 = vsel %vm233_vm2, %v588_v61, %v589_v0  ;;  %v595_v41 = vrot.slane %v560_v36, 1  ;;  %v597_v42 = vrot.slane %v561_v37, 1 }
  0x5d   : > { %v593_v54 = vsel %vm233_vm2, %v591_v2, %v592_v46  ;;  %v598_v55 = vrot.slane %v562_v53, 1  ;;  %v600_v5 = vrot.slane %v563_v38, 1  ;;  %v610_v45 = vadd.f32 %v581_v3, %v536_v62 }
  0x5e   : > { %v596_v58 = vsel %vm233_vm2, %v594_v47, %v595_v41  ;;  %v611_v59 = vadd.f32 %v584_v4, %v537_v63  ;;  %v612_v60 = vadd.f32 %v587_v48, %v538_v1  ;;  %v613_v11 = vadd.f32 %v590_v40, %v539_v6 }
  0x5f   : > { %v599_v12 = vsel %vm233_vm2, %v597_v42, %v598_v55  ;;  %v614_v13 = vadd.f32 %v593_v54, %v540_v7  ;;  %v615_v14 = vadd.f32 %v596_v58, %v541_v8  ;;  %v617_v32 = vadd.f32 %v600_v5, %v543_v10 }
  0x60   : > { %v616_v43 = vadd.f32 %v599_v12, %v542_v9  ;;  %v623_v49 = vmul.f32 %v1918_v56, %v2018_v18  ;;  %v624_v50 = vmul.f32 %v1918_v56, %v2045_v27  ;;  %v625_v62 = vmul.f32 %v1918_v56, %v2021_v19 }
  0x61   : > { %v626_v51 = vmul.f32 %v1918_v56, %v2048_v28  ;;  %v627_v52 = vmul.f32 %v1918_v56, %v2024_v20  ;;  %v628_v63 = vmul.f32 %v1918_v56, %v2051_v29  ;;  %v629_v1 = vmul.f32 %v1918_v56, %v2027_v21 }
  0x62   : > { %v630_v6 = vmul.f32 %v1918_v56, %v2054_v30  ;;  %v631_v7 = vmul.f32 %v1918_v56, %v2030_v22  ;;  %v632_v8 = vmul.f32 %v1918_v56, %v2057_v31  ;;  %v633_v9 = vmul.f32 %v1918_v56, %v2036_v24 }
  0x63   : > { %v634_v10 = vmul.f32 %v1918_v56, %v2063_v33  ;;  %v635_v35 = vmul.f32 %v1918_v56, %v2039_v25  ;;  %v636_v36 = vmul.f32 %v1918_v56, %v2066_v34  ;;  %v637_v37 = vmul.f32 0.0, %v1918_v56 }
  0x64   : > { %v653_v53 = vrot.slane %v623_v49, 2  ;;  %v654_v38 = vrot.slane %v624_v50, 2  ;;  %v656_v39 = vrot.slane %v625_v62, 2  ;;  %v657_v15 = vrot.slane %v626_v51, 2 }
  0x65   : > { %v659_v16 = vrot.slane %v627_v52, 2  ;;  %v660_v23 = vrot.slane %v628_v63, 2  ;;  %v662_v44 = vrot.slane %v629_v1, 2  ;;  %v663_v57 = vrot.slane %v630_v6, 2 }
  0x66   : > { %v655_v61 = vsel %vm308_vm3, %v653_v53, %v654_v38  ;;  %v658_v0 = vsel %vm308_vm3, %v656_v39, %v657_v15  ;;  %v665_v2 = vrot.slane %v631_v7, 2  ;;  %v666_v3 = vrot.slane %v632_v8, 2  ;;  %v1922_v15 = vld [vmem:[%s2739_s1 + $0x10] ss:$0 sm:$0xff] }
  0x67   : > { %v661_v4 = vsel %vm308_vm3, %v659_v16, %v660_v23  ;;  %v664_v46 = vsel %vm308_vm3, %v662_v44, %v663_v57  ;;  %v668_v47 = vrot.slane %v633_v9, 2  ;;  %v669_v48 = vrot.slane %v634_v10, 2 }
  0x68   : > { %v667_v40 = vsel %vm308_vm3, %v665_v2, %v666_v3  ;;  %v671_v41 = vrot.slane %v635_v35, 2  ;;  %v672_v42 = vrot.slane %v636_v36, 2  ;;  %v674_v54 = vrot.slane %v637_v37, 2 }
  0x69   : > { %v670_v55 = vsel %vm308_vm3, %v668_v47, %v669_v48  ;;  %v684_v5 = vadd.f32 %v655_v61, %v610_v45  ;;  %v685_v56 = vadd.f32 %v658_v0, %v611_v59  ;;  %v686_v58 = vadd.f32 %v661_v4, %v612_v60  ;;  %v1924_v4 = vld [vmem:[%s2739_s1 + $0x11] ss:$0 sm:$0xff] }
  0x6a   : > { %v673_v12 = vsel %vm308_vm3, %v671_v41, %v672_v42  ;;  %v687_v49 = vadd.f32 %v664_v46, %v613_v11  ;;  %v688_v50 = vadd.f32 %v667_v40, %v614_v13  ;;  %v689_v62 = vadd.f32 %v670_v55, %v615_v14 }
  0x6b   : > { %v690_v51 = vadd.f32 %v673_v12, %v616_v43  ;;  %v691_v52 = vadd.f32 %v674_v54, %v617_v32  ;;  %v694_v63 = vsel %vm693_vm4, %v684_v5, 0.0  ;;  %v695_v1 = vsel %vm693_vm4, %v685_v56, 0.0 }
  0x6c   : > { %v696_v6 = vadd.f32 %v695_v1, %v694_v63  ;;  %v697_v7 = vsel %vm693_vm4, %v686_v58, 0.0  ;;  %v699_v8 = vsel %vm693_vm4, %v687_v49, 0.0  ;;  %v701_v45 = vsel %vm693_vm4, %v688_v50, 0.0 }
  0x6d   : > { %v703_v59 = vsel %vm693_vm4, %v689_v62, 0.0  ;;  %v705_v60 = vsel %vm693_vm4, %v690_v51, 0.0  ;;  %v707_v11 = vsel %vm693_vm4, %v691_v52, 0.0  ;;  %v720_v14 = vmul.f32 %v684_v5, %v684_v5 }
  0x6e   : > { %v698_v13 = vadd.f32 %v697_v7, %v696_v6  ;;  %v721_v32 = vmul.f32 %v685_v56, %v685_v56  ;;  %v722_v43 = vmul.f32 %v686_v58, %v686_v58  ;;  %v723_v9 = vmul.f32 %v687_v49, %v687_v49 }
  0x6f   : > { %v724_v10 = vmul.f32 %v688_v50, %v688_v50  ;;  %v725_v35 = vmul.f32 %v689_v62, %v689_v62  ;;  %v726_v36 = vmul.f32 %v690_v51, %v690_v51  ;;  %v727_v53 = vmul.f32 %v691_v52, %v691_v52 }
  0x70   : > { %v700_v37 = vadd.f32 %v699_v8, %v698_v13  ;;  %v728_v38 = vsel %vm693_vm4, %v720_v14, 0.0  ;;  %v729_v39 = vsel %vm693_vm4, %v721_v32, 0.0  ;;  %v731_v23 = vsel %vm693_vm4, %v722_v43, 0.0 }
  0x71   : > { %v730_v16 = vadd.f32 %v729_v39, %v728_v38  ;;  %v733_v44 = vsel %vm693_vm4, %v723_v9, 0.0  ;;  %v735_v57 = vsel %vm693_vm4, %v724_v10, 0.0  ;;  %v737_v0 = vsel %vm693_vm4, %v725_v35, 0.0 }
  0x72   : > { %v702_v61 = vadd.f32 %v701_v45, %v700_v37  ;;  %v739_v2 = vsel %vm693_vm4, %v726_v36, 0.0  ;;  %v741_v3 = vsel %vm693_vm4, %v727_v53, 0.0  ;;  %v757_v47 = vmul.f32 0.0, %v1922_v15 }
  0x73   : > { %v732_v46 = vadd.f32 %v731_v23, %v730_v16  ;;  %v758_v48 = vmul.f32 %v1922_v15, %v2015_v17  ;;  %v2267_v40 = vmul.f32 %v1922_v15, %v2018_v18  ;;  %v2270_v42 = vmul.f32 %v1922_v15, %v2021_v19 }
  0x74   : > { %v704_v41 = vadd.f32 %v703_v59, %v702_v61  ;;  %v2273_v54 = vmul.f32 %v1922_v15, %v2024_v20  ;;  %v2276_v55 = vmul.f32 %v1922_v15, %v2027_v21  ;;  %v2279_v56 = vmul.f32 %v1922_v15, %v2030_v22 }
  0x75   : > { %v734_v5 = vadd.f32 %v733_v44, %v732_v46  ;;  %v2282_v58 = vmul.f32 %v1922_v15, %v2036_v24  ;;  %v770_v12 = vmul.f32 0.0, %v1924_v4  ;;  %v771_v50 = vmul.f32 %v1924_v4, %v2015_v17 }
  0x76   : > { %v706_v49 = vadd.f32 %v705_v60, %v704_v41  ;;  %v772_v62 = vmul.f32 %v1924_v4, %v2042_v26  ;;  %v773_v51 = vmul.f32 %v1924_v4, %v2018_v18  ;;  %v774_v63 = vmul.f32 %v1924_v4, %v2045_v27 }
  0x77   : > { %v736_v52 = vadd.f32 %v735_v57, %v734_v5  ;;  %v775_v1 = vmul.f32 %v1924_v4, %v2021_v19  ;;  %v776_v6 = vmul.f32 %v1924_v4, %v2048_v28  ;;  %v777_v8 = vmul.f32 %v1924_v4, %v2024_v20 }
  0x78   : > { %v708_v7 = vadd.f32 %v707_v11, %v706_v49  ;;  %v778_v45 = vmul.f32 %v1924_v4, %v2051_v29  ;;  %v779_v59 = vmul.f32 %v1924_v4, %v2027_v21  ;;  %v780_v13 = vmul.f32 %v1924_v4, %v2054_v30 }
  0x79   : > { %v738_v60 = vadd.f32 %v737_v0, %v736_v52  ;;  %v781_v14 = vmul.f32 %v1924_v4, %v2030_v22  ;;  %v782_v32 = vmul.f32 %v1924_v4, %v2057_v31  ;;  %v783_v9 = vmul.f32 %v1924_v4, %v2036_v24 }
  0x7a   : > { %v709_v43 = vrot.slane %v708_v7, 4  ;;  %v784_v10 = vmul.f32 %v1924_v4, %v2063_v33  ;;  %v800_v35 = vrot.slane %v770_v12, 1  ;;  %v802_v36 = vrot.slane %v771_v50, 1 }
  0x7b   : > { %v740_v11 = vadd.f32 %v739_v2, %v738_v60  ;;  %v803_v37 = vrot.slane %v772_v62, 1  ;;  %v805_v53 = vrot.slane %v773_v51, 1  ;;  %v806_v39 = vrot.slane %v774_v63, 1 }
  0x7c   : > { %v710_v38 = vadd.f32 %v709_v43, %v708_v7  ;;  %v808_v15 = vrot.slane %v775_v1, 1  ;;  %v809_v16 = vrot.slane %v776_v6, 1  ;;  %vm716_vm5 = vcmask 253952   ;;  %v1926_v7 = vld [vmem:[%s2739_s1 + $0x12] ss:$0 sm:$0xff] }
  0x7d   : > { %v742_v23 = vadd.f32 %v741_v3, %v740_v11  ;;  %v804_v44 = vsel %vm233_vm2, %v802_v36, %v803_v37  ;;  %v811_v57 = vrot.slane %v777_v8, 1  ;;  %v812_v61 = vrot.slane %v778_v45, 1 }
  0x7e   : > { %v711_v0 = vrot.slane %v710_v38, 2  ;;  %v807_v46 = vsel %vm233_vm2, %v805_v53, %v806_v39  ;;  %v810_v4 = vsel %vm233_vm2, %v808_v15, %v809_v16  ;;  %v814_v41 = vrot.slane %v779_v59, 1  ;;  %v1919_v15 = vld [vmem:[%s2740_s2 + $0x4] sm:$0x1] }
  0x7f   : > { %v743_v2 = vrot.slane %v742_v23, 4  ;;  %v813_v5 = vsel %vm233_vm2, %v811_v57, %v812_v61  ;;  %v815_v12 = vrot.slane %v780_v13, 1  ;;  %v817_v49 = vrot.slane %v781_v14, 1  ;;  %v692_v13 = vld [vmem:[%s2740_s2] sm:$0x1] }
  0x80   : > { %v712_v50 = vadd.f32 %v711_v0, %v710_v38  ;;  %v818_v62 = vrot.slane %v782_v32, 1  ;;  %v820_v51 = vrot.slane %v783_v9, 1  ;;  %v821_v52 = vrot.slane %v784_v10, 1 }
  0x81   : > { %v744_v3 = vadd.f32 %v743_v2, %v742_v23  ;;  %v816_v63 = vsel %vm233_vm2, %v814_v41, %v815_v12  ;;  %v831_v1 = vadd.f32 %v800_v35, %v757_v47  ;;  %v832_v6 = vadd.f32 %v804_v44, %v758_v48 }
  0x82   : > { %v713_v8 = vrot.slane %v712_v50, 1  ;;  %v819_v45 = vsel %vm233_vm2, %v817_v49, %v818_v62  ;;  %v822_v59 = vsel %vm233_vm2, %v820_v51, %v821_v52  ;;  %v833_v60 = vadd.f32 %v807_v46, %v2267_v40 }
  0x83   : > { %v745_v14 = vrot.slane %v744_v3, 2  ;;  %v834_v32 = vadd.f32 %v810_v4, %v2270_v42  ;;  %v835_v47 = vadd.f32 %v813_v5, %v2273_v54  ;;  %v836_v48 = vadd.f32 %v816_v63, %v2276_v55 }
  0x84   : > { %v714_v43 = vadd.f32 %v713_v8, %v712_v50  ;;  %v837_v9 = vadd.f32 %v819_v45, %v2279_v56  ;;  %v838_v10 = vadd.f32 %v822_v59, %v2282_v58  ;;  %v844_v35 = vmul.f32 0.0, %v1926_v7 }
  0x85   : > { %v746_v11 = vadd.f32 %v745_v14, %v744_v3  ;;  %v845_v40 = vmul.f32 %v1926_v7, %v2015_v17  ;;  %v846_v36 = vmul.f32 %v1926_v7, %v2042_v26  ;;  %v847_v37 = vmul.f32 %v1926_v7, %v2018_v18 }
  0x86   : > { %v715_v53 = vadd.f32 %v714_v43, %v692_v13  ;;  %v848_v42 = vmul.f32 %v1926_v7, %v2045_v27  ;;  %v849_v54 = vmul.f32 %v1926_v7, %v2021_v19  ;;  %v850_v55 = vmul.f32 %v1926_v7, %v2048_v28 }
  0x87   : > { %v747_v38 = vrot.slane %v746_v11, 1  ;;  %v851_v56 = vmul.f32 %v1926_v7, %v2024_v20  ;;  %v852_v58 = vmul.f32 %v1926_v7, %v2051_v29  ;;  %v853_v39 = vmul.f32 %v1926_v7, %v2027_v21 }
  0x88   : > { %717 = vst.msk [vmem:[%s2740_s2] sm:$0x1] %vm716_vm5, %v715_v53  ;;  %v854_v16 = vmul.f32 %v1926_v7, %v2054_v30  ;;  %v855_v23 = vmul.f32 %v1926_v7, %v2030_v22  ;;  %v856_v44 = vmul.f32 %v1926_v7, %v2057_v31  ;;  %v857_v57 = vmul.f32 %v1926_v7, %v2036_v24 }
  0x89   : > { %v748_v61 = vadd.f32 %v747_v38, %v746_v11  ;;  %v858_v0 = vmul.f32 %v1926_v7, %v2063_v33  ;;  %v874_v46 = vrot.slane %v844_v35, 2  ;;  %v876_v4 = vrot.slane %v845_v40, 2  ;;  %v1928_v40 = vld [vmem:[%s2739_s1 + $0x13] ss:$0 sm:$0xff] }
  0x8a   : > { %v877_v41 = vrot.slane %v846_v36, 2  ;;  %v879_v2 = vrot.slane %v847_v37, 2  ;;  %v880_v5 = vrot.slane %v848_v42, 2  ;;  %v882_v12 = vrot.slane %v849_v54, 2 }
  0x8b   : > { %v749_v49 = vadd.f32 %v1919_v15, %v748_v61  ;;  %v883_v50 = vrot.slane %v850_v55, 2  ;;  %v885_v62 = vrot.slane %v851_v56, 2  ;;  %v886_v51 = vrot.slane %v852_v58, 2 }
  0x8c   : > { %v878_v52 = vsel %vm308_vm3, %v876_v4, %v877_v41  ;;  %v881_v3 = vsel %vm308_vm3, %v879_v2, %v880_v5  ;;  %v888_v63 = vrot.slane %v853_v39, 2  ;;  %v889_v8 = vrot.slane %v854_v16, 2 }
  0x8d   : > { %1920 = vst.msk [vmem:[%s2740_s2 + $0x4] sm:$0x1] %vm716_vm5, %v749_v49  ;;  %v884_v7 = vsel %vm308_vm3, %v882_v12, %v883_v50  ;;  %v887_v45 = vsel %vm308_vm3, %v885_v62, %v886_v51  ;;  %v891_v59 = vrot.slane %v855_v23, 2  ;;  %v892_v13 = vrot.slane %v856_v44, 2 }
  0x8e   : > { %v890_v14 = vsel %vm308_vm3, %v888_v63, %v889_v8  ;;  %v894_v43 = vrot.slane %v857_v57, 2  ;;  %v895_v35 = vrot.slane %v858_v0, 2  ;;  %v905_v11 = vadd.f32 %v874_v46, %v831_v1 }
  0x8f   : > { %v893_v36 = vsel %vm308_vm3, %v891_v59, %v892_v13  ;;  %v906_v37 = vadd.f32 %v878_v52, %v832_v6  ;;  %v907_v53 = vadd.f32 %v881_v3, %v833_v60  ;;  %v908_v42 = vadd.f32 %v884_v7, %v834_v32  ;;  %v1930_v32 = vld [vmem:[%s2739_s1 + $0x14] ss:$0 sm:$0xff] }
  0x90   : > { %v896_v54 = vsel %vm308_vm3, %v894_v43, %v895_v35  ;;  %v909_v55 = vadd.f32 %v887_v45, %v835_v47  ;;  %v910_v38 = vadd.f32 %v890_v14, %v836_v48  ;;  %v911_v56 = vadd.f32 %v893_v36, %v837_v9 }
  0x91   : > { %v912_v58 = vadd.f32 %v896_v54, %v838_v10  ;;  %v918_v39 = vmul.f32 %v1928_v40, %v2015_v17  ;;  %v919_v15 = vmul.f32 %v1928_v40, %v2018_v18  ;;  %v920_v1 = vmul.f32 %v1928_v40, %v2021_v19 }
  0x92   : > { %v921_v16 = vmul.f32 %v1928_v40, %v2024_v20  ;;  %v922_v23 = vmul.f32 %v1928_v40, %v2027_v21  ;;  %v923_v6 = vmul.f32 %v1928_v40, %v2030_v22  ;;  %v924_v60 = vmul.f32 %v1928_v40, %v2036_v24 }
  0x93   : > { %v925_v47 = vmul.f32 %v1928_v40, %v2039_v25  ;;  %v926_v48 = vadd.f32 %v918_v39, %v905_v11  ;;  %v927_v9 = vadd.f32 %v919_v15, %v906_v37  ;;  %v928_v10 = vadd.f32 %v920_v1, %v907_v53 }
  0x94   : > { %v929_v44 = vadd.f32 %v921_v16, %v908_v42  ;;  %v930_v57 = vadd.f32 %v922_v23, %v909_v55  ;;  %v931_v61 = vadd.f32 %v923_v6, %v910_v38  ;;  %v932_v0 = vadd.f32 %v924_v60, %v911_v56 }
  0x95   : > { %v933_v46 = vadd.f32 %v925_v47, %v912_v58  ;;  %v939_v4 = vmul.f32 %v1930_v32, %v2015_v17  ;;  %v940_v41 = vmul.f32 %v1930_v32, %v2042_v26  ;;  %v941_v2 = vmul.f32 %v1930_v32, %v2018_v18  ;;  %v1932_v47 = vld [vmem:[%s2739_s1 + $0x15] ss:$0 sm:$0xff] }
  0x96   : > { %v942_v5 = vmul.f32 %v1930_v32, %v2045_v27  ;;  %v943_v12 = vmul.f32 %v1930_v32, %v2021_v19  ;;  %v944_v49 = vmul.f32 %v1930_v32, %v2048_v28  ;;  %v945_v50 = vmul.f32 %v1930_v32, %v2024_v20 }
  0x97   : > { %v946_v62 = vmul.f32 %v1930_v32, %v2051_v29  ;;  %v947_v51 = vmul.f32 %v1930_v32, %v2027_v21  ;;  %v948_v52 = vmul.f32 %v1930_v32, %v2054_v30  ;;  %v949_v3 = vmul.f32 %v1930_v32, %v2030_v22 }
  0x98   : > { %v950_v63 = vmul.f32 %v1930_v32, %v2057_v31  ;;  %v951_v8 = vmul.f32 %v1930_v32, %v2036_v24  ;;  %v952_v7 = vmul.f32 %v1930_v32, %v2063_v33  ;;  %v953_v45 = vmul.f32 %v1930_v32, %v2039_v25 }
  0x99   : > { %v954_v59 = vmul.f32 %v1930_v32, %v2066_v34  ;;  %v971_v13 = vrot.slane %v939_v4, 1  ;;  %v972_v14 = vrot.slane %v940_v41, 1  ;;  %v974_v43 = vrot.slane %v941_v2, 1 }
  0x9a   : > { %v975_v35 = vrot.slane %v942_v5, 1  ;;  %v977_v11 = vrot.slane %v943_v12, 1  ;;  %v978_v40 = vrot.slane %v944_v49, 1  ;;  %v980_v36 = vrot.slane %v945_v50, 1 }
  0x9b   : > { %v973_v37 = vsel %vm233_vm2, %v971_v13, %v972_v14  ;;  %v981_v53 = vrot.slane %v946_v62, 1  ;;  %v983_v42 = vrot.slane %v947_v51, 1  ;;  %v984_v54 = vrot.slane %v948_v52, 1 }
  0x9c   : > { %v976_v55 = vsel %vm233_vm2, %v974_v43, %v975_v35  ;;  %v979_v38 = vsel %vm233_vm2, %v977_v11, %v978_v40  ;;  %v986_v56 = vrot.slane %v949_v3, 1  ;;  %v987_v58 = vrot.slane %v950_v63, 1 }
  0x9d   : > { %v982_v39 = vsel %vm233_vm2, %v980_v36, %v981_v53  ;;  %v985_v15 = vsel %vm233_vm2, %v983_v42, %v984_v54  ;;  %v989_v1 = vrot.slane %v951_v8, 1  ;;  %v990_v16 = vrot.slane %v952_v7, 1 }
  0x9e   : > { %v988_v23 = vsel %vm233_vm2, %v986_v56, %v987_v58  ;;  %v992_v6 = vrot.slane %v953_v45, 1  ;;  %v993_v60 = vrot.slane %v954_v59, 1  ;;  %v1003_v32 = vadd.f32 %v973_v37, %v926_v48 }
  0x9f   : > { %v991_v4 = vsel %vm233_vm2, %v989_v1, %v990_v16  ;;  %v1004_v41 = vadd.f32 %v976_v55, %v927_v9  ;;  %v1005_v2 = vadd.f32 %v979_v38, %v928_v10  ;;  %v1006_v5 = vadd.f32 %v982_v39, %v929_v44 }
  0xa0   : > { %v994_v12 = vsel %vm233_vm2, %v992_v6, %v993_v60  ;;  %v1007_v49 = vadd.f32 %v985_v15, %v930_v57  ;;  %v1008_v50 = vadd.f32 %v988_v23, %v931_v61  ;;  %v1009_v62 = vadd.f32 %v991_v4, %v932_v0 }
  0xa1   : > { %v1010_v51 = vadd.f32 %v994_v12, %v933_v46  ;;  %v1016_v52 = vmul.f32 %v1932_v47, %v2015_v17  ;;  %v1017_v3 = vmul.f32 %v1932_v47, %v2042_v26  ;;  %v1018_v48 = vmul.f32 %v1932_v47, %v2018_v18  ;;  %v1934_v12 = vld [vmem:[%s2739_s1 + $0x16] ss:$0 sm:$0xff] }
  0xa2   : > { %v1019_v63 = vmul.f32 %v1932_v47, %v2045_v27  ;;  %v1020_v8 = vmul.f32 %v1932_v47, %v2021_v19  ;;  %v1021_v9 = vmul.f32 %v1932_v47, %v2048_v28  ;;  %v1022_v10 = vmul.f32 %v1932_v47, %v2024_v20 }
  0xa3   : > { %v1023_v44 = vmul.f32 %v1932_v47, %v2051_v29  ;;  %v1024_v57 = vmul.f32 %v1932_v47, %v2027_v21  ;;  %v1025_v61 = vmul.f32 %v1932_v47, %v2054_v30  ;;  %v1026_v0 = vmul.f32 %v1932_v47, %v2030_v22 }
  0xa4   : > { %v1027_v46 = vmul.f32 %v1932_v47, %v2057_v31  ;;  %v1028_v7 = vmul.f32 %v1932_v47, %v2036_v24  ;;  %v1029_v45 = vmul.f32 %v1932_v47, %v2063_v33  ;;  %v1030_v59 = vmul.f32 %v1932_v47, %v2039_v25 }
  0xa5   : > { %v1031_v13 = vmul.f32 %v1932_v47, %v2066_v34  ;;  %v1048_v14 = vrot.slane %v1016_v52, 2  ;;  %v1049_v43 = vrot.slane %v1017_v3, 2  ;;  %v1051_v35 = vrot.slane %v1018_v48, 2 }
  0xa6   : > { %v1052_v11 = vrot.slane %v1019_v63, 2  ;;  %v1054_v40 = vrot.slane %v1020_v8, 2  ;;  %v1055_v36 = vrot.slane %v1021_v9, 2  ;;  %v1057_v37 = vrot.slane %v1022_v10, 2 }
  0xa7   : > { %v1050_v53 = vsel %vm308_vm3, %v1048_v14, %v1049_v43  ;;  %v1058_v42 = vrot.slane %v1023_v44, 2  ;;  %v1060_v54 = vrot.slane %v1024_v57, 2  ;;  %v1061_v55 = vrot.slane %v1025_v61, 2 }
  0xa8   : > { %v1053_v38 = vsel %vm308_vm3, %v1051_v35, %v1052_v11  ;;  %v1056_v56 = vsel %vm308_vm3, %v1054_v40, %v1055_v36  ;;  %v1063_v58 = vrot.slane %v1026_v0, 2  ;;  %v1064_v39 = vrot.slane %v1027_v46, 2 }
  0xa9   : > { %v1059_v15 = vsel %vm308_vm3, %v1057_v37, %v1058_v42  ;;  %v1062_v1 = vsel %vm308_vm3, %v1060_v54, %v1061_v55  ;;  %v1066_v16 = vrot.slane %v1028_v7, 2  ;;  %v1067_v23 = vrot.slane %v1029_v45, 2 }
  0xaa   : > { %v1065_v6 = vsel %vm308_vm3, %v1063_v58, %v1064_v39  ;;  %v1069_v60 = vrot.slane %v1030_v59, 2  ;;  %v1070_v47 = vrot.slane %v1031_v13, 2  ;;  %v1080_v4 = vadd.f32 %v1050_v53, %v1003_v32 }
  0xab   : > { %v1068_v52 = vsel %vm308_vm3, %v1066_v16, %v1067_v23  ;;  %v1081_v3 = vadd.f32 %v1053_v38, %v1004_v41  ;;  %v1082_v48 = vadd.f32 %v1056_v56, %v1005_v2  ;;  %v1083_v63 = vadd.f32 %v1059_v15, %v1006_v5  ;;  %v1936_v5 = vld [vmem:[%s2739_s1 + $0x17] ss:$0 sm:$0xff] }
  0xac   : > { %v1071_v8 = vsel %vm308_vm3, %v1069_v60, %v1070_v47  ;;  %v1084_v9 = vadd.f32 %v1062_v1, %v1007_v49  ;;  %v1085_v10 = vadd.f32 %v1065_v6, %v1008_v50  ;;  %v1086_v44 = vadd.f32 %v1068_v52, %v1009_v62 }
  0xad   : > { %v1087_v57 = vadd.f32 %v1071_v8, %v1010_v51  ;;  %v1093_v61 = vmul.f32 %v1934_v12, %v2018_v18  ;;  %v1094_v0 = vmul.f32 %v1934_v12, %v2021_v19  ;;  %v1095_v32 = vmul.f32 %v1934_v12, %v2024_v20 }
  0xae   : > { %v1096_v46 = vmul.f32 %v1934_v12, %v2027_v21  ;;  %v1097_v7 = vmul.f32 %v1934_v12, %v2030_v22  ;;  %v1098_v41 = vmul.f32 %v1934_v12, %v2036_v24  ;;  %v1099_v2 = vmul.f32 %v1934_v12, %v2039_v25 }
  0xaf   : > { %v1100_v49 = vmul.f32 0.0, %v1934_v12  ;;  %v1101_v50 = vadd.f32 %v1093_v61, %v1080_v4  ;;  %v1102_v62 = vadd.f32 %v1094_v0, %v1081_v3  ;;  %v1103_v51 = vadd.f32 %v1095_v32, %v1082_v48 }
  0xb0   : > { %v1104_v45 = vadd.f32 %v1096_v46, %v1083_v63  ;;  %v1105_v59 = vadd.f32 %v1097_v7, %v1084_v9  ;;  %v1106_v13 = vadd.f32 %v1098_v41, %v1085_v10  ;;  %v1107_v14 = vadd.f32 %v1099_v2, %v1086_v44  ;;  %v1938_v7 = vld [vmem:[%s2739_s1 + $0x18] ss:$0 sm:$0xff] }
  0xb1   : > { %v1108_v43 = vadd.f32 %v1100_v49, %v1087_v57  ;;  %v1114_v35 = vmul.f32 %v1936_v5, %v2018_v18  ;;  %v1115_v11 = vmul.f32 %v1936_v5, %v2045_v27  ;;  %v1116_v40 = vmul.f32 %v1936_v5, %v2021_v19 }
  0xb2   : > { %v1117_v36 = vmul.f32 %v1936_v5, %v2048_v28  ;;  %v1118_v37 = vmul.f32 %v1936_v5, %v2024_v20  ;;  %v1119_v53 = vmul.f32 %v1936_v5, %v2051_v29  ;;  %v1120_v42 = vmul.f32 %v1936_v5, %v2027_v21 }
  0xb3   : > { %v1121_v54 = vmul.f32 %v1936_v5, %v2054_v30  ;;  %v1122_v55 = vmul.f32 %v1936_v5, %v2030_v22  ;;  %v1123_v38 = vmul.f32 %v1936_v5, %v2057_v31  ;;  %v1124_v56 = vmul.f32 %v1936_v5, %v2036_v24 }
  0xb4   : > { %v1125_v58 = vmul.f32 %v1936_v5, %v2063_v33  ;;  %v1126_v39 = vmul.f32 %v1936_v5, %v2039_v25  ;;  %v1127_v15 = vmul.f32 %v1936_v5, %v2066_v34  ;;  %v1128_v1 = vmul.f32 0.0, %v1936_v5 }
  0xb5   : > { %v1144_v16 = vrot.slane %v1114_v35, 1  ;;  %v1145_v23 = vrot.slane %v1115_v11, 1  ;;  %v1147_v6 = vrot.slane %v1116_v40, 1  ;;  %v1148_v60 = vrot.slane %v1117_v36, 1 }
  0xb6   : > { %v1150_v47 = vrot.slane %v1118_v37, 1  ;;  %v1151_v4 = vrot.slane %v1119_v53, 1  ;;  %v1153_v12 = vrot.slane %v1120_v42, 1  ;;  %v1154_v52 = vrot.slane %v1121_v54, 1 }
  0xb7   : > { %v1146_v3 = vsel %vm233_vm2, %v1144_v16, %v1145_v23  ;;  %v1149_v48 = vsel %vm233_vm2, %v1147_v6, %v1148_v60  ;;  %v1156_v63 = vrot.slane %v1122_v55, 1  ;;  %v1157_v8 = vrot.slane %v1123_v38, 1 }
  0xb8   : > { %v1152_v9 = vsel %vm233_vm2, %v1150_v47, %v1151_v4  ;;  %v1155_v10 = vsel %vm233_vm2, %v1153_v12, %v1154_v52  ;;  %v1159_v44 = vrot.slane %v1124_v56, 1  ;;  %v1160_v57 = vrot.slane %v1125_v58, 1 }
  0xb9   : > { %v1158_v61 = vsel %vm233_vm2, %v1156_v63, %v1157_v8  ;;  %v1162_v0 = vrot.slane %v1126_v39, 1  ;;  %v1163_v32 = vrot.slane %v1127_v15, 1  ;;  %v1165_v46 = vrot.slane %v1128_v1, 1 }
  0xba   : > { %v1161_v41 = vsel %vm233_vm2, %v1159_v44, %v1160_v57  ;;  %v1175_v2 = vadd.f32 %v1146_v3, %v1101_v50  ;;  %v1176_v5 = vadd.f32 %v1149_v48, %v1102_v62  ;;  %v1177_v49 = vadd.f32 %v1152_v9, %v1103_v51 }
  0xbb   : > { %v1164_v35 = vsel %vm233_vm2, %v1162_v0, %v1163_v32  ;;  %v1178_v11 = vadd.f32 %v1155_v10, %v1104_v45  ;;  %v1179_v40 = vadd.f32 %v1158_v61, %v1105_v59  ;;  %v1180_v36 = vadd.f32 %v1161_v41, %v1106_v13 }
  0xbc   : > { %v1181_v37 = vadd.f32 %v1164_v35, %v1107_v14  ;;  %v1182_v53 = vadd.f32 %v1165_v46, %v1108_v43  ;;  %v1188_v42 = vmul.f32 %v1938_v7, %v2018_v18  ;;  %v1189_v54 = vmul.f32 %v1938_v7, %v2045_v27 }
  0xbd   : > { %v1190_v55 = vmul.f32 %v1938_v7, %v2021_v19  ;;  %v1191_v38 = vmul.f32 %v1938_v7, %v2048_v28  ;;  %v1192_v56 = vmul.f32 %v1938_v7, %v2024_v20  ;;  %v1193_v50 = vmul.f32 %v1938_v7, %v2051_v29 }
  0xbe   : > { %v1194_v62 = vmul.f32 %v1938_v7, %v2027_v21  ;;  %v1195_v51 = vmul.f32 %v1938_v7, %v2054_v30  ;;  %v1196_v45 = vmul.f32 %v1938_v7, %v2030_v22  ;;  %v1197_v59 = vmul.f32 %v1938_v7, %v2057_v31 }
  0xbf   : > { %v1198_v13 = vmul.f32 %v1938_v7, %v2036_v24  ;;  %v1199_v14 = vmul.f32 %v1938_v7, %v2063_v33  ;;  %v1200_v43 = vmul.f32 %v1938_v7, %v2039_v25  ;;  %v1201_v58 = vmul.f32 %v1938_v7, %v2066_v34 }
  0xc0   : > { %v1202_v39 = vmul.f32 0.0, %v1938_v7  ;;  %v1218_v15 = vrot.slane %v1188_v42, 2  ;;  %v1219_v1 = vrot.slane %v1189_v54, 2  ;;  %v1221_v16 = vrot.slane %v1190_v55, 2 }
  0xc1   : > { %v1222_v23 = vrot.slane %v1191_v38, 2  ;;  %v1224_v6 = vrot.slane %v1192_v56, 2  ;;  %v1225_v60 = vrot.slane %v1193_v50, 2  ;;  %v1227_v47 = vrot.slane %v1194_v62, 2 }
  0xc2   : > { %v1220_v4 = vsel %vm308_vm3, %v1218_v15, %v1219_v1  ;;  %v1228_v12 = vrot.slane %v1195_v51, 2  ;;  %v1230_v52 = vrot.slane %v1196_v45, 2  ;;  %v1231_v3 = vrot.slane %v1197_v59, 2 }
  0xc3   : > { %v1223_v48 = vsel %vm308_vm3, %v1221_v16, %v1222_v23  ;;  %v1226_v63 = vsel %vm308_vm3, %v1224_v6, %v1225_v60  ;;  %v1233_v8 = vrot.slane %v1198_v13, 2  ;;  %v1234_v9 = vrot.slane %v1199_v14, 2  ;;  %v2484_v23 = vld [vmem:[%s2739_s1 + $0x20] ss:$0 sm:$0xff] }
  0xc4   : > { %v1229_v10 = vsel %vm308_vm3, %v1227_v47, %v1228_v12  ;;  %v1232_v44 = vsel %vm308_vm3, %v1230_v52, %v1231_v3  ;;  %v1236_v57 = vrot.slane %v1200_v43, 2  ;;  %v1237_v61 = vrot.slane %v1201_v58, 2 }
  0xc5   : > { %v1235_v0 = vsel %vm308_vm3, %v1233_v8, %v1234_v9  ;;  %v1239_v32 = vrot.slane %v1202_v39, 2  ;;  %v1249_v46 = vadd.f32 %v1220_v4, %v1175_v2  ;;  %v1250_v41 = vadd.f32 %v1223_v48, %v1176_v5 }
  0xc6   : > { %v1238_v7 = vsel %vm308_vm3, %v1236_v57, %v1237_v61  ;;  %v1251_v35 = vadd.f32 %v1226_v63, %v1177_v49  ;;  %v1252_v42 = vadd.f32 %v1229_v10, %v1178_v11  ;;  %v1253_v54 = vadd.f32 %v1232_v44, %v1179_v40  ;;  %v1944_v63 = vld [vmem:[%s2739_s1 + $0x21] ss:$0 sm:$0xff] }
  0xc7   : > { %v1254_v55 = vadd.f32 %v1235_v0, %v1180_v36  ;;  %v1255_v38 = vadd.f32 %v1238_v7, %v1181_v37  ;;  %v1258_v56 = vsel %vm693_vm4, %v1249_v46, 0.0  ;;  %v1256_v50 = vadd.f32 %v1239_v32, %v1182_v53 }
  0xc8   : > { %v1259_v62 = vsel %vm693_vm4, %v1250_v41, 0.0  ;;  %v1261_v51 = vsel %vm693_vm4, %v1251_v35, 0.0  ;;  %v1263_v59 = vsel %vm693_vm4, %v1252_v42, 0.0  ;;  %v1265_v2 = vsel %vm693_vm4, %v1253_v54, 0.0 }
  0xc9   : > { %v1260_v45 = vadd.f32 %v1259_v62, %v1258_v56  ;;  %v1282_v13 = vmul.f32 %v1249_v46, %v1249_v46  ;;  %v1283_v14 = vmul.f32 %v1250_v41, %v1250_v41  ;;  %v1284_v5 = vmul.f32 %v1251_v35, %v1251_v35 }
  0xca   : > { %v1285_v49 = vmul.f32 %v1252_v42, %v1252_v42  ;;  %v1286_v40 = vmul.f32 %v1253_v54, %v1253_v54  ;;  %v1287_v36 = vmul.f32 %v1254_v55, %v1254_v55  ;;  %v1288_v37 = vmul.f32 %v1255_v38, %v1255_v38 }
  0xcb   : > { %v1262_v11 = vadd.f32 %v1261_v51, %v1260_v45  ;;  %v1289_v43 = vmul.f32 %v1256_v50, %v1256_v50  ;;  %v1290_v53 = vsel %vm693_vm4, %v1282_v13, 0.0  ;;  %v1291_v58 = vsel %vm693_vm4, %v1283_v14, 0.0 }
  0xcc   : > { %v1293_v39 = vsel %vm693_vm4, %v1284_v5, 0.0  ;;  %v1267_v1 = vsel %vm693_vm4, %v1254_v55, 0.0  ;;  %v1292_v16 = vadd.f32 %v1291_v58, %v1290_v53  ;;  %v1269_v6 = vsel %vm693_vm4, %v1255_v38, 0.0 }
  0xcd   : > { %v1264_v15 = vadd.f32 %v1263_v59, %v1262_v11  ;;  %v1271_v60 = vsel %vm693_vm4, %v1256_v50, 0.0  ;;  %v1295_v47 = vsel %vm693_vm4, %v1285_v49, 0.0  ;;  %v1297_v4 = vsel %vm693_vm4, %v1286_v40, 0.0 }
  0xce   : > { %v1294_v52 = vadd.f32 %v1293_v39, %v1292_v16  ;;  %v1299_v3 = vsel %vm693_vm4, %v1287_v36, 0.0  ;;  %v1301_v48 = vsel %vm693_vm4, %v1288_v37, 0.0  ;;  %v1303_v8 = vsel %vm693_vm4, %v1289_v43, 0.0 }
  0xcf   : > { %v1266_v12 = vadd.f32 %v1265_v2, %v1264_v15  ;;  %v1319_v9 = vmul.f32 0.0, %v2484_v23  ;;  %v1320_v10 = vmul.f32 %v2484_v23, %v2015_v17  ;;  %v2501_v44 = vmul.f32 %v2484_v23, %v2018_v18 }
  0xd0   : > { %v1296_v61 = vadd.f32 %v1295_v47, %v1294_v52  ;;  %v1322_v0 = vmul.f32 %v2484_v23, %v2021_v19  ;;  %v1323_v32 = vmul.f32 %v2484_v23, %v2024_v20  ;;  %v2509_v46 = vmul.f32 %v2484_v23, %v2027_v21 }
  0xd1   : > { %v1268_v57 = vadd.f32 %v1267_v1, %v1266_v12  ;;  %v1332_v7 = vmul.f32 0.0, %v1944_v63  ;;  %v1333_v41 = vmul.f32 %v1944_v63, %v2015_v17  ;;  %v1334_v35 = vmul.f32 %v1944_v63, %v2042_v26 }
  0xd2   : > { %v1298_v54 = vadd.f32 %v1297_v4, %v1296_v61  ;;  %v1335_v55 = vmul.f32 %v1944_v63, %v2018_v18  ;;  %v1336_v38 = vmul.f32 %v1944_v63, %v2045_v27  ;;  %v1337_v56 = vmul.f32 %v1944_v63, %v2021_v19 }
  0xd3   : > { %v1270_v42 = vadd.f32 %v1269_v6, %v1268_v57  ;;  %v1338_v50 = vmul.f32 %v1944_v63, %v2048_v28  ;;  %v1339_v62 = vmul.f32 %v1944_v63, %v2024_v20  ;;  %v1340_v51 = vmul.f32 %v1944_v63, %v2051_v29 }
  0xd4   : > { %v1300_v59 = vadd.f32 %v1299_v3, %v1298_v54  ;;  %v1341_v2 = vmul.f32 %v1944_v63, %v2027_v21  ;;  %v1342_v13 = vmul.f32 %v1944_v63, %v2054_v30  ;;  %v1343_v14 = vmul.f32 %v1944_v63, %v2030_v22 }
  0xd5   : > { %v1272_v45 = vadd.f32 %v1271_v60, %v1270_v42  ;;  %v1344_v5 = vmul.f32 %v1944_v63, %v2057_v31  ;;  %v1345_v49 = vmul.f32 %v1944_v63, %v2036_v24  ;;  %v1346_v11 = vmul.f32 %v1944_v63, %v2063_v33 }
  0xd6   : > { %v1302_v36 = vadd.f32 %v1301_v48, %v1300_v59  ;;  %v1364_v37 = vrot.slane %v1333_v41, 1  ;;  %v1365_v43 = vrot.slane %v1334_v35, 1  ;;  %v1367_v53 = vrot.slane %v1335_v55, 1 }
  0xd7   : > { %v1273_v40 = vrot.slane %v1272_v45, 4  ;;  %v1368_v58 = vrot.slane %v1336_v38, 1  ;;  %v1370_v39 = vrot.slane %v1337_v56, 1  ;;  %v1371_v15 = vrot.slane %v1338_v50, 1 }
  0xd8   : > { %v1304_v16 = vadd.f32 %v1303_v8, %v1302_v36  ;;  %v1373_v6 = vrot.slane %v1339_v62, 1  ;;  %v1374_v60 = vrot.slane %v1340_v51, 1  ;;  %v2527_v47 = vmul.f32 %v2484_v23, %v2030_v22 }
  0xd9   : > { %v1274_v1 = vadd.f32 %v1273_v40, %v1272_v45  ;;  %v1362_v4 = vrot.slane %v1332_v7, 1  ;;  %v1376_v12 = vrot.slane %v1341_v2, 1  ;;  %v1377_v52 = vrot.slane %v1342_v13, 1  ;;  %v1946_v7 = vld [vmem:[%s2739_s1 + $0x22] ss:$0 sm:$0xff] }
  0xda   : > { %v1305_v63 = vrot.slane %v1304_v16, 4  ;;  %v1366_v48 = vsel %vm233_vm2, %v1364_v37, %v1365_v43  ;;  %v1379_v57 = vrot.slane %v1343_v14, 1  ;;  %v1369_v61 = vsel %vm233_vm2, %v1367_v53, %v1368_v58  ;;  %v1257_v14 = vld [vmem:[%s2740_s2 + $0x1] sm:$0x1] }
  0xdb   : > { %v1275_v3 = vrot.slane %v1274_v1, 2  ;;  %v1380_v41 = vrot.slane %v1344_v5, 1  ;;  %v1382_v35 = vrot.slane %v1345_v49, 1  ;;  %v1383_v42 = vrot.slane %v1346_v11, 1 }
  0xdc   : > { %v1306_v54 = vadd.f32 %v1305_v63, %v1304_v16  ;;  %v1372_v55 = vsel %vm233_vm2, %v1370_v39, %v1371_v15  ;;  %v1375_v38 = vsel %vm233_vm2, %v1373_v6, %v1374_v60  ;;  %v1326_v56 = vmul.f32 %v2484_v23, %v2036_v24 }
  0xdd   : > { %v1276_v8 = vadd.f32 %v1275_v3, %v1274_v1  ;;  %v1378_v50 = vsel %vm233_vm2, %v1376_v12, %v1377_v52  ;;  %v1393_v62 = vadd.f32 %v1362_v4, %v1319_v9  ;;  %v1394_v51 = vadd.f32 %v1366_v48, %v1320_v10 }
  0xde   : > { %v1307_v59 = vrot.slane %v1306_v54, 2  ;;  %v1381_v2 = vsel %vm233_vm2, %v1379_v57, %v1380_v41  ;;  %v1384_v13 = vsel %vm233_vm2, %v1382_v35, %v1383_v42  ;;  %v1395_v5 = vadd.f32 %v1369_v61, %v2501_v44 }
  0xdf   : > { %v1277_v45 = vrot.slane %v1276_v8, 1  ;;  %v1396_v49 = vadd.f32 %v1372_v55, %v1322_v0  ;;  %v1397_v11 = vadd.f32 %v1375_v38, %v1323_v32  ;;  %v1406_v40 = vmul.f32 0.0, %v1946_v7  ;;  %v1939_v32 = vld [vmem:[%s2740_s2 + $0x5] sm:$0x1] }
  0xe0   : > { %v1308_v36 = vadd.f32 %v1307_v59, %v1306_v54  ;;  %v1407_v9 = vmul.f32 %v1946_v7, %v2015_v17  ;;  %v1408_v10 = vmul.f32 %v1946_v7, %v2042_v26  ;;  %v1409_v37 = vmul.f32 %v1946_v7, %v2018_v18 }
  0xe1   : > { %v1278_v23 = vadd.f32 %v1277_v45, %v1276_v8  ;;  %v1410_v43 = vmul.f32 %v1946_v7, %v2045_v27  ;;  %v1411_v53 = vmul.f32 %v1946_v7, %v2021_v19  ;;  %v1412_v58 = vmul.f32 %v1946_v7, %v2048_v28 }
  0xe2   : > { %v1309_v15 = vrot.slane %v1308_v36, 1  ;;  %v1413_v44 = vmul.f32 %v1946_v7, %v2024_v20  ;;  %v1414_v0 = vmul.f32 %v1946_v7, %v2051_v29  ;;  %v1415_v1 = vmul.f32 %v1946_v7, %v2027_v21 }
  0xe3   : > { %v1279_v39 = vadd.f32 %v1278_v23, %v1257_v14  ;;  %v1416_v16 = vmul.f32 %v1946_v7, %v2054_v30  ;;  %v1417_v6 = vmul.f32 %v1946_v7, %v2030_v22  ;;  %v1418_v60 = vmul.f32 %v1946_v7, %v2057_v31 }
  0xe4   : > { %v1310_v4 = vadd.f32 %v1309_v15, %v1308_v36  ;;  %v1419_v12 = vmul.f32 %v1946_v7, %v2036_v24  ;;  %v1420_v52 = vmul.f32 %v1946_v7, %v2063_v33  ;;  %v1438_v3 = vrot.slane %v1407_v9, 2 }
  0xe5   : > { %1280 = vst.msk [vmem:[%s2740_s2 + $0x1] sm:$0x1] %vm716_vm5, %v1279_v39  ;;  %v1439_v63 = vrot.slane %v1408_v10, 2  ;;  %v1441_v48 = vrot.slane %v1409_v37, 2  ;;  %v1442_v57 = vrot.slane %v1410_v43, 2  ;;  %v1444_v61 = vrot.slane %v1411_v53, 2 }
  0xe6   : > { %v1311_v41 = vadd.f32 %v1939_v32, %v1310_v4  ;;  %v1445_v35 = vrot.slane %v1412_v58, 2  ;;  %v1447_v42 = vrot.slane %v1413_v44, 2  ;;  %v1448_v8 = vrot.slane %v1414_v0, 2 }
  0xe7   : > { %v1398_v54 = vadd.f32 %v1378_v50, %v2509_v46  ;;  %v1436_v55 = vrot.slane %v1406_v40, 2  ;;  %v1450_v38 = vrot.slane %v1415_v1, 2  ;;  %v1451_v45 = vrot.slane %v1416_v16, 2  ;;  %v1948_v50 = vld [vmem:[%s2739_s1 + $0x23] ss:$0 sm:$0xff] }
  0xe8   : > { %1940 = vst.msk [vmem:[%s2740_s2 + $0x5] sm:$0x1] %vm716_vm5, %v1311_v41  ;;  %v1440_v7 = vsel %vm308_vm3, %v1438_v3, %v1439_v63  ;;  %v1443_v59 = vsel %vm308_vm3, %v1441_v48, %v1442_v57  ;;  %v1453_v14 = vrot.slane %v1417_v6, 2  ;;  %v1454_v23 = vrot.slane %v1418_v60, 2  ;;  %v1950_v6 = vld [vmem:[%s2739_s1 + $0x24] ss:$0 sm:$0xff] }
  0xe9   : > { %v1399_v36 = vadd.f32 %v1381_v2, %v2527_v47  ;;  %v1446_v9 = vsel %vm308_vm3, %v1444_v61, %v1445_v35  ;;  %v1456_v10 = vrot.slane %v1419_v12, 2  ;;  %v1457_v46 = vrot.slane %v1420_v52, 2 }
  0xea   : > { %v1400_v40 = vadd.f32 %v1384_v13, %v1326_v56  ;;  %v1449_v37 = vsel %vm308_vm3, %v1447_v42, %v1448_v8  ;;  %v1452_v43 = vsel %vm308_vm3, %v1450_v38, %v1451_v45  ;;  %v1455_v53 = vsel %vm308_vm3, %v1453_v14, %v1454_v23 }
  0xeb   : > { %v1458_v58 = vsel %vm308_vm3, %v1456_v10, %v1457_v46  ;;  %v1467_v39 = vadd.f32 %v1436_v55, %v1393_v62  ;;  %v1468_v15 = vadd.f32 %v1440_v7, %v1394_v51  ;;  %v1469_v47 = vadd.f32 %v1443_v59, %v1395_v5 }
  0xec   : > { %v1470_v2 = vadd.f32 %v1446_v9, %v1396_v49  ;;  %v1480_v44 = vmul.f32 %v1948_v50, %v2015_v17  ;;  %v1481_v0 = vmul.f32 %v1948_v50, %v2018_v18  ;;  %v1482_v32 = vmul.f32 %v1948_v50, %v2021_v19 }
  0xed   : > { %v1471_v1 = vadd.f32 %v1449_v37, %v1397_v11  ;;  %v1472_v56 = vadd.f32 %v1452_v43, %v1398_v54  ;;  %v1473_v13 = vadd.f32 %v1455_v53, %v1399_v36  ;;  %v1483_v16 = vmul.f32 %v1948_v50, %v2024_v20 }
  0xee   : > { %v1474_v60 = vadd.f32 %v1458_v58, %v1400_v40  ;;  %v1484_v62 = vmul.f32 %v1948_v50, %v2027_v21  ;;  %v1485_v51 = vmul.f32 %v1948_v50, %v2030_v22  ;;  %v1486_v5 = vmul.f32 %v1948_v50, %v2036_v24 }
  0xef   : > { %v1487_v49 = vmul.f32 %v1948_v50, %v2039_v25  ;;  %v1488_v4 = vadd.f32 %v1480_v44, %v1467_v39  ;;  %v1489_v12 = vadd.f32 %v1481_v0, %v1468_v15  ;;  %v1490_v11 = vadd.f32 %v1482_v32, %v1469_v47 }
  0xf0   : > { %v1491_v52 = vadd.f32 %v1483_v16, %v1470_v2  ;;  %v1501_v3 = vmul.f32 %v1950_v6, %v2015_v17  ;;  %v1502_v63 = vmul.f32 %v1950_v6, %v2042_v26  ;;  %v1503_v48 = vmul.f32 %v1950_v6, %v2018_v18 }
  0xf1   : > { %v1504_v57 = vmul.f32 %v1950_v6, %v2045_v27  ;;  %v1505_v61 = vmul.f32 %v1950_v6, %v2021_v19  ;;  %v1506_v41 = vmul.f32 %v1950_v6, %v2048_v28  ;;  %v1507_v35 = vmul.f32 %v1950_v6, %v2024_v20 }
  0xf2   : > { %v1508_v42 = vmul.f32 %v1950_v6, %v2051_v29  ;;  %v1509_v8 = vmul.f32 %v1950_v6, %v2027_v21  ;;  %v1510_v54 = vmul.f32 %v1950_v6, %v2054_v30  ;;  %v1511_v55 = vmul.f32 %v1950_v6, %v2030_v22 }
  0xf3   : > { %v1512_v38 = vmul.f32 %v1950_v6, %v2057_v31  ;;  %v1513_v45 = vmul.f32 %v1950_v6, %v2036_v24  ;;  %v1514_v7 = vmul.f32 %v1950_v6, %v2063_v33  ;;  %v1515_v59 = vmul.f32 %v1950_v6, %v2039_v25 }
  0xf4   : > { %v1516_v14 = vmul.f32 %v1950_v6, %v2066_v34  ;;  %v1533_v23 = vrot.slane %v1501_v3, 1  ;;  %v1534_v36 = vrot.slane %v1502_v63, 1  ;;  %v1536_v9 = vrot.slane %v1503_v48, 1 }
  0xf5   : > { %v1537_v10 = vrot.slane %v1504_v57, 1  ;;  %v1539_v46 = vrot.slane %v1505_v61, 1  ;;  %v1540_v50 = vrot.slane %v1506_v41, 1  ;;  %v1542_v40 = vrot.slane %v1507_v35, 1 }
  0xf6   : > { %v1492_v37 = vadd.f32 %v1484_v62, %v1471_v1  ;;  %v1543_v43 = vrot.slane %v1508_v42, 1  ;;  %v1545_v53 = vrot.slane %v1509_v8, 1  ;;  %v1546_v58 = vrot.slane %v1510_v54, 1  ;;  %v1952_v1 = vld [vmem:[%s2739_s1 + $0x25] ss:$0 sm:$0xff] }
  0xf7   : > { %v1535_v39 = vsel %vm233_vm2, %v1533_v23, %v1534_v36  ;;  %v1538_v15 = vsel %vm233_vm2, %v1536_v9, %v1537_v10  ;;  %v1548_v47 = vrot.slane %v1511_v55, 1  ;;  %v1549_v2 = vrot.slane %v1512_v38, 1 }
  0xf8   : > { %v1541_v44 = vsel %vm233_vm2, %v1539_v46, %v1540_v50  ;;  %v1544_v0 = vsel %vm233_vm2, %v1542_v40, %v1543_v43  ;;  %v1551_v32 = vrot.slane %v1513_v45, 1  ;;  %v1552_v16 = vrot.slane %v1514_v7, 1 }
  0xf9   : > { %v1493_v6 = vadd.f32 %v1485_v51, %v1472_v56  ;;  %v1494_v3 = vadd.f32 %v1486_v5, %v1473_v13  ;;  %v1554_v63 = vrot.slane %v1515_v59, 1  ;;  %v1555_v48 = vrot.slane %v1516_v14, 1 }
  0xfa   : > { %v1495_v62 = vadd.f32 %v1487_v49, %v1474_v60  ;;  %v1547_v57 = vsel %vm233_vm2, %v1545_v53, %v1546_v58  ;;  %v1550_v61 = vsel %vm233_vm2, %v1548_v47, %v1549_v2  ;;  %v1565_v41 = vadd.f32 %v1535_v39, %v1488_v4 }
  0xfb   : > { %v1553_v35 = vsel %vm233_vm2, %v1551_v32, %v1552_v16  ;;  %v1566_v42 = vadd.f32 %v1538_v15, %v1489_v12  ;;  %v1567_v8 = vadd.f32 %v1541_v44, %v1490_v11  ;;  %v1568_v54 = vadd.f32 %v1544_v0, %v1491_v52 }
  0xfc   : > { %v1556_v56 = vsel %vm233_vm2, %v1554_v63, %v1555_v48  ;;  %v1578_v13 = vmul.f32 %v1952_v1, %v2015_v17  ;;  %v1579_v51 = vmul.f32 %v1952_v1, %v2042_v26  ;;  %v1580_v5 = vmul.f32 %v1952_v1, %v2018_v18 }
  0xfd   : > { %v1569_v55 = vadd.f32 %v1547_v57, %v1492_v37  ;;  %v1581_v60 = vmul.f32 %v1952_v1, %v2045_v27  ;;  %v1582_v49 = vmul.f32 %v1952_v1, %v2021_v19  ;;  %v1583_v4 = vmul.f32 %v1952_v1, %v2048_v28  ;;  %v1954_v57 = vld [vmem:[%s2739_s1 + $0x26] ss:$0 sm:$0xff] }
  0xfe   : > { %v1584_v38 = vmul.f32 %v1952_v1, %v2024_v20  ;;  %v1585_v12 = vmul.f32 %v1952_v1, %v2051_v29  ;;  %v1586_v11 = vmul.f32 %v1952_v1, %v2027_v21  ;;  %v1587_v52 = vmul.f32 %v1952_v1, %v2054_v30 }
  0xff   : > { %v1588_v17 = vmul.f32 %v1952_v1, %v2030_v22  ;;  %v1589_v26 = vmul.f32 %v1952_v1, %v2057_v31  ;;  %v1590_v45 = vmul.f32 %v1952_v1, %v2036_v24  ;;  %v1591_v7 = vmul.f32 %v1952_v1, %v2063_v33 }
 0x100   : > { %v1592_v59 = vmul.f32 %v1952_v1, %v2039_v25  ;;  %v1610_v14 = vrot.slane %v1578_v13, 2  ;;  %v1611_v23 = vrot.slane %v1579_v51, 2  ;;  %v1613_v36 = vrot.slane %v1580_v5, 2 }
 0x101   : > { %v1593_v9 = vmul.f32 %v1952_v1, %v2066_v34  ;;  %v1614_v10 = vrot.slane %v1581_v60, 2  ;;  %v1616_v46 = vrot.slane %v1582_v49, 2  ;;  %v1617_v50 = vrot.slane %v1583_v4, 2 }
 0x102   : > { %v1619_v40 = vrot.slane %v1584_v38, 2  ;;  %v1620_v37 = vrot.slane %v1585_v12, 2  ;;  %v1622_v43 = vrot.slane %v1586_v11, 2  ;;  %v1623_v53 = vrot.slane %v1587_v52, 2  ;;  %v1956_v52 = vld [vmem:[%s2739_s1 + $0x27] ss:$0 sm:$0xff] }
 0x103   : > { %v1570_v58 = vadd.f32 %v1550_v61, %v1493_v6  ;;  %v1571_v39 = vadd.f32 %v1553_v35, %v1494_v3  ;;  %v1625_v15 = vrot.slane %v1588_v17, 2  ;;  %v1626_v47 = vrot.slane %v1589_v26, 2 }
 0x104   : > { %v1612_v2 = vsel %vm308_vm3, %v1610_v14, %v1611_v23  ;;  %v1615_v44 = vsel %vm308_vm3, %v1613_v36, %v1614_v10  ;;  %v1628_v0 = vrot.slane %v1590_v45, 2  ;;  %v1629_v32 = vrot.slane %v1591_v7, 2 }
 0x105   : > { %v1572_v16 = vadd.f32 %v1556_v56, %v1495_v62  ;;  %v1618_v63 = vsel %vm308_vm3, %v1616_v46, %v1617_v50  ;;  %v1631_v48 = vrot.slane %v1592_v59, 2  ;;  %v1632_v1 = vrot.slane %v1593_v9, 2 }
 0x106   : > { %v1621_v6 = vsel %vm308_vm3, %v1619_v40, %v1620_v37  ;;  %v1624_v3 = vsel %vm308_vm3, %v1622_v43, %v1623_v53  ;;  %v1627_v61 = vsel %vm308_vm3, %v1625_v15, %v1626_v47  ;;  %v1630_v35 = vsel %vm308_vm3, %v1628_v0, %v1629_v32 }
 0x107   : > { %v1633_v13 = vsel %vm308_vm3, %v1631_v48, %v1632_v1  ;;  %v1642_v51 = vadd.f32 %v1612_v2, %v1565_v41  ;;  %v1643_v62 = vadd.f32 %v1615_v44, %v1566_v42  ;;  %v1644_v56 = vadd.f32 %v1618_v63, %v1567_v8 }
 0x108   : > { %v1655_v5 = vmul.f32 %v1954_v57, %v2018_v18  ;;  %v1656_v60 = vmul.f32 %v1954_v57, %v2021_v19  ;;  %v1657_v49 = vmul.f32 %v1954_v57, %v2024_v20  ;;  %v1645_v4 = vadd.f32 %v1621_v6, %v1568_v54 }
 0x109   : > { %v1646_v38 = vadd.f32 %v1624_v3, %v1569_v55  ;;  %v1647_v12 = vadd.f32 %v1627_v61, %v1570_v58  ;;  %v1648_v11 = vadd.f32 %v1630_v35, %v1571_v39  ;;  %v1649_v17 = vadd.f32 %v1633_v13, %v1572_v16 }
 0x10a   : > { %v1658_v26 = vmul.f32 %v1954_v57, %v2027_v21  ;;  %v1659_v41 = vmul.f32 %v1954_v57, %v2030_v22  ;;  %v1660_v42 = vmul.f32 %v1954_v57, %v2036_v24  ;;  %v1661_v8 = vmul.f32 %v1954_v57, %v2039_v25 }
 0x10b   : > { %v1662_v45 = vmul.f32 0.0, %v1954_v57  ;;  %v1663_v7 = vadd.f32 %v1655_v5, %v1642_v51  ;;  %v1664_v59 = vadd.f32 %v1656_v60, %v1643_v62  ;;  %v1665_v54 = vadd.f32 %v1657_v49, %v1644_v56  ;;  %v1958_v49 = vld [vmem:[%s2739_s1 + $0x28] ss:$0 sm:$0xff] }
 0x10c   : > { %v1676_v55 = vmul.f32 %v1956_v52, %v2018_v18  ;;  %v1677_v14 = vmul.f32 %v1956_v52, %v2045_v27  ;;  %v1678_v23 = vmul.f32 %v1956_v52, %v2021_v19  ;;  %v1679_v36 = vmul.f32 %v1956_v52, %v2048_v28 }
 0x10d   : > { %v1680_v9 = vmul.f32 %v1956_v52, %v2024_v20  ;;  %v1681_v10 = vmul.f32 %v1956_v52, %v2051_v29  ;;  %v1682_v46 = vmul.f32 %v1956_v52, %v2027_v21  ;;  %v1666_v50 = vadd.f32 %v1658_v26, %v1645_v4 }
 0x10e   : > { %v1683_v40 = vmul.f32 %v1956_v52, %v2054_v30  ;;  %v1684_v37 = vmul.f32 %v1956_v52, %v2030_v22  ;;  %v1685_v43 = vmul.f32 %v1956_v52, %v2057_v31  ;;  %v1686_v53 = vmul.f32 %v1956_v52, %v2036_v24 }
 0x10f   : > { %v1687_v58 = vmul.f32 %v1956_v52, %v2063_v33  ;;  %v1688_v39 = vmul.f32 %v1956_v52, %v2039_v25  ;;  %v1689_v15 = vmul.f32 %v1956_v52, %v2066_v34  ;;  %v1706_v47 = vrot.slane %v1676_v55, 1 }
 0x110   : > { %v1707_v2 = vrot.slane %v1677_v14, 1  ;;  %v1709_v44 = vrot.slane %v1678_v23, 1  ;;  %v1710_v0 = vrot.slane %v1679_v36, 1  ;;  %v1712_v32 = vrot.slane %v1680_v9, 1 }
 0x111   : > { %v1713_v16 = vrot.slane %v1681_v10, 1  ;;  %v1715_v63 = vrot.slane %v1682_v46, 1  ;;  %v1716_v48 = vrot.slane %v1683_v40, 1  ;;  %v1667_v1 = vadd.f32 %v1659_v41, %v1646_v38 }
 0x112   : > { %v2671_v57 = vmul.f32 0.0, %v1956_v52  ;;  %v1718_v6 = vrot.slane %v1684_v37, 1  ;;  %v1719_v3 = vrot.slane %v1685_v43, 1  ;;  %v1708_v61 = vsel %vm233_vm2, %v1706_v47, %v1707_v2 }
 0x113   : > { %v1711_v35 = vsel %vm233_vm2, %v1709_v44, %v1710_v0  ;;  %v1721_v13 = vrot.slane %v1686_v53, 1  ;;  %v1722_v51 = vrot.slane %v1687_v58, 1  ;;  %v1668_v62 = vadd.f32 %v1660_v42, %v1647_v12 }
 0x114   : > { %v1714_v56 = vsel %vm233_vm2, %v1712_v32, %v1713_v16  ;;  %v1724_v5 = vrot.slane %v1688_v39, 1  ;;  %v1725_v60 = vrot.slane %v1689_v15, 1  ;;  %v1669_v4 = vadd.f32 %v1661_v8, %v1648_v11 }
 0x115   : > { %v1670_v38 = vadd.f32 %v1662_v45, %v1649_v17  ;;  %v1717_v52 = vsel %vm233_vm2, %v1715_v63, %v1716_v48  ;;  %v1720_v26 = vsel %vm233_vm2, %v1718_v6, %v1719_v3  ;;  %v1723_v41 = vsel %vm233_vm2, %v1721_v13, %v1722_v51 }
 0x116   : > { %v1727_v55 = vrot.slane %v2671_v57, 1  ;;  %v1737_v14 = vadd.f32 %v1708_v61, %v1663_v7  ;;  %v1738_v12 = vadd.f32 %v1711_v35, %v1664_v59  ;;  %v1726_v42 = vsel %vm233_vm2, %v1724_v5, %v1725_v60 }
 0x117   : > { %v1739_v23 = vadd.f32 %v1714_v56, %v1665_v54  ;;  %v1750_v36 = vmul.f32 %v1958_v49, %v2018_v18  ;;  %v1751_v9 = vmul.f32 %v1958_v49, %v2045_v27  ;;  %v1752_v11 = vmul.f32 %v1958_v49, %v2021_v19 }
 0x118   : > { %v1753_v17 = vmul.f32 %v1958_v49, %v2048_v28  ;;  %v1754_v8 = vmul.f32 %v1958_v49, %v2024_v20  ;;  %v1755_v45 = vmul.f32 %v1958_v49, %v2051_v29  ;;  %v1756_v10 = vmul.f32 %v1958_v49, %v2027_v21 }
 0x119   : > { %v1757_v7 = vmul.f32 %v1958_v49, %v2054_v30  ;;  %v1758_v59 = vmul.f32 %v1958_v49, %v2030_v22  ;;  %v1759_v54 = vmul.f32 %v1958_v49, %v2057_v31  ;;  %v1740_v46 = vadd.f32 %v1717_v52, %v1666_v50 }
 0x11a   : > { %v1760_v18 = vmul.f32 %v1958_v49, %v2036_v24  ;;  %v1761_v27 = vmul.f32 %v1958_v49, %v2063_v33  ;;  %v1762_v19 = vmul.f32 %v1958_v49, %v2039_v25  ;;  %v1763_v28 = vmul.f32 %v1958_v49, %v2066_v34 }
 0x11b   : > { %v1780_v20 = vrot.slane %v1750_v36, 2  ;;  %v1781_v40 = vrot.slane %v1751_v9, 2  ;;  %v1783_v29 = vrot.slane %v1752_v11, 2  ;;  %v1784_v37 = vrot.slane %v1753_v17, 2 }
 0x11c   : > { %v1786_v21 = vrot.slane %v1754_v8, 2  ;;  %v1787_v43 = vrot.slane %v1755_v45, 2  ;;  %v1789_v30 = vrot.slane %v1756_v10, 2  ;;  %v1790_v53 = vrot.slane %v1757_v7, 2 }
 0x11d   : > { %v1782_v22 = vsel %vm308_vm3, %v1780_v20, %v1781_v40  ;;  %v1792_v31 = vrot.slane %v1758_v59, 2  ;;  %v1793_v50 = vrot.slane %v1759_v54, 2  ;;  %v1785_v24 = vsel %vm308_vm3, %v1783_v29, %v1784_v37 }
 0x11e   : > { %v1788_v33 = vsel %vm308_vm3, %v1786_v21, %v1787_v43  ;;  %v1795_v58 = vrot.slane %v1760_v18, 2  ;;  %v1796_v25 = vrot.slane %v1761_v27, 2  ;;  %v1741_v39 = vadd.f32 %v1720_v26, %v1667_v1 }
 0x11f   : > { %v1791_v34 = vsel %vm308_vm3, %v1789_v30, %v1790_v53  ;;  %v1798_v15 = vrot.slane %v1762_v19, 2  ;;  %v1799_v47 = vrot.slane %v1763_v28, 2  ;;  %v1742_v2 = vadd.f32 %v1723_v41, %v1668_v62 }
 0x120   : > { %v1764_v44 = vmul.f32 0.0, %v1958_v49  ;;  %v1794_v0 = vsel %vm308_vm3, %v1792_v31, %v1793_v50  ;;  %v1811_v32 = vadd.f32 %v1782_v22, %v1737_v14  ;;  %v1797_v16 = vsel %vm308_vm3, %v1795_v58, %v1796_v25 }
 0x121   : > { %v1812_v63 = vadd.f32 %v1785_v24, %v1738_v12  ;;  %v1813_v48 = vadd.f32 %v1788_v33, %v1739_v23  ;;  %v1814_v57 = vadd.f32 %v1791_v34, %v1740_v46  ;;  %v1743_v6 = vadd.f32 %v1726_v42, %v1669_v4 }
 0x122   : > { %v1744_v3 = vadd.f32 %v1727_v55, %v1670_v38  ;;  %v1820_v61 = vsel %vm693_vm4, %v1811_v32, 0.0  ;;  %v1800_v1 = vsel %vm308_vm3, %v1798_v15, %v1799_v47  ;;  %v1815_v35 = vadd.f32 %v1794_v0, %v1741_v39  ;;  %v1819_v15 = vld [vmem:[%s2740_s2 + $0x2] sm:$0x1] }
 0x123   : > { %v1821_v13 = vsel %vm693_vm4, %v1812_v63, 0.0  ;;  %v1823_v51 = vsel %vm693_vm4, %v1813_v48, 0.0  ;;  %v1801_v62 = vrot.slane %v1764_v44, 2  ;;  %v1816_v56 = vadd.f32 %v1797_v16, %v1742_v2 }
 0x124   : > { %v1822_v5 = vadd.f32 %v1821_v13, %v1820_v61  ;;  %v1825_v60 = vsel %vm693_vm4, %v1814_v57, 0.0  ;;  %v1844_v49 = vmul.f32 %v1811_v32, %v1811_v32  ;;  %v1845_v52 = vmul.f32 %v1812_v63, %v1812_v63  ;;  %v1959_v32 = vld [vmem:[%s2740_s2 + $0x6] sm:$0x1] }
 0x125   : > { %v1846_v26 = vmul.f32 %v1813_v48, %v1813_v48  ;;  %v1847_v41 = vmul.f32 %v1814_v57, %v1814_v57  ;;  %v1817_v4 = vadd.f32 %v1800_v1, %v1743_v6  ;;  %v1827_v55 = vsel %vm693_vm4, %v1815_v35, 0.0 }
 0x126   : > { %v1824_v38 = vadd.f32 %v1823_v51, %v1822_v5  ;;  %v1848_v14 = vmul.f32 %v1815_v35, %v1815_v35  ;;  %v1852_v12 = vsel %vm693_vm4, %v1844_v49, 0.0  ;;  %v1853_v42 = vsel %vm693_vm4, %v1845_v52, 0.0 }
 0x127   : > { %v1855_v23 = vsel %vm693_vm4, %v1846_v26, 0.0  ;;  %v1854_v9 = vadd.f32 %v1853_v42, %v1852_v12  ;;  %v1818_v11 = vadd.f32 %v1801_v62, %v1744_v3  ;;  %v1829_v17 = vsel %vm693_vm4, %v1816_v56, 0.0 }
 0x128   : > { %v1826_v36 = vadd.f32 %v1825_v60, %v1824_v38  ;;  %v1849_v8 = vmul.f32 %v1816_v56, %v1816_v56  ;;  %v1857_v45 = vsel %vm693_vm4, %v1847_v41, 0.0  ;;  %v1831_v59 = vsel %vm693_vm4, %v1817_v4, 0.0 }
 0x129   : > { %v1856_v7 = vadd.f32 %v1855_v23, %v1854_v9  ;;  %v1850_v54 = vmul.f32 %v1817_v4, %v1817_v4  ;;  %v1859_v46 = vsel %vm693_vm4, %v1848_v14, 0.0  ;;  %v1833_v19 = vsel %vm693_vm4, %v1818_v11, 0.0 }
 0x12a   : > { %v1828_v10 = vadd.f32 %v1827_v55, %v1826_v36  ;;  %v1851_v28 = vmul.f32 %v1818_v11, %v1818_v11  ;;  %v1861_v20 = vsel %vm693_vm4, %v1849_v8, 0.0 }
 0x12b   : > { %v1858_v27 = vadd.f32 %v1857_v45, %v1856_v7  ;;  %v1863_v37 = vsel %vm693_vm4, %v1850_v54, 0.0 }
 0x12c   : > { %v1830_v18 = vadd.f32 %v1829_v17, %v1828_v10  ;;  %v1865_v30 = vsel %vm693_vm4, %v1851_v28, 0.0 }
 0x12d   : > { %v1860_v29 = vadd.f32 %v1859_v46, %v1858_v27 }
 0x12e   : > { %v1832_v40 = vadd.f32 %v1831_v59, %v1830_v18 }
 0x12f   : > { %v1862_v43 = vadd.f32 %v1861_v20, %v1860_v29 }
 0x130   : > { %v1834_v21 = vadd.f32 %v1833_v19, %v1832_v40 }
 0x131   : > { %v1864_v53 = vadd.f32 %v1863_v37, %v1862_v43 }
 0x132   : > { %v1835_v22 = vrot.slane %v1834_v21, 4 }
 0x133   : > { %v1866_v50 = vadd.f32 %v1865_v30, %v1864_v53 }
 0x134   : > { %v1836_v31 = vadd.f32 %v1835_v22, %v1834_v21 }
 0x135   : > { %v1867_v33 = vrot.slane %v1866_v50, 4 }
 0x136   : > { %v1837_v24 = vrot.slane %v1836_v31, 2 }
 0x137   : > { %v1868_v25 = vadd.f32 %v1867_v33, %v1866_v50 }
 0x138   : > { %v1838_v58 = vadd.f32 %v1837_v24, %v1836_v31 }
 0x139   : > { %v1869_v34 = vrot.slane %v1868_v25, 2 }
 0x13a   : > { %v1839_v39 = vrot.slane %v1838_v58, 1 }
 0x13b   : > { %v1870_v2 = vadd.f32 %v1869_v34, %v1868_v25 }
 0x13c   : > { %v1840_v47 = vadd.f32 %v1839_v39, %v1838_v58 }
 0x13d   : > { %v1871_v0 = vrot.slane %v1870_v2, 1 }
 0x13e   : > { %v1841_v44 = vadd.f32 %v1840_v47, %v1819_v15 }
 0x13f   : > { %v1872_v16 = vadd.f32 %v1871_v0, %v1870_v2 }
 0x140   : > { %1842 = vst.msk [vmem:[%s2740_s2 + $0x2] sm:$0x1] %vm716_vm5, %v1841_v44 }
 0x141   : > { %v1873_v63 = vadd.f32 %v1959_v32, %v1872_v16 }
 0x143   : > { %1960 = vst.msk [vmem:[%s2740_s2 + $0x6] sm:$0x1] %vm716_vm5, %v1873_v63 }
 0x144 PF: > { %s12_s9 = sadd.s32 1, %s1979_s9  }
 0x145   : > { %p9_p5 = scmp.ge.s32.totalorder %s12_s9, 4  }
 0x147   :  { %11 = sbr.rel (!%p9_p5) target bundleno = 1 (0x1), region = 61 }

// kernel: conv_attention.4
= control target key start
LH: loop header
LB: loop body
LE: loop exit
PB: predicated region body
PF: predicated region fallthrough
CT: control target
= control target key end

     0   :  { %s2430_s18 = smov 0   ;;  %s3608_s0 = inlined_call_operand.vmem [shape: f32[2,8,8,32], index: 0, kind: input, shape index: {}]   ;;  %s3609_s1 = inlined_call_operand.vmem [shape: f32[3,9,32], index: 1, kind: input, shape index: {}]   ;;  %s3610_s2 = inlined_call_operand.vmem [shape: f32[3,32,32], index: 2, kind: input, shape index: {}]   ;;  %s3611_s3 = inlined_call_operand.vmem [shape: f32[3,32], index: 3, kind: input, shape index: {}]   ;;  %s3612_s4 = inlined_call_operand.vmem [shape: f32[2,64,32], index: 4, kind: output, shape index: {0}]   ;;  %s3613_s5 = inlined_call_operand.vmem [shape: f32[2,64,64], index: 5, kind: output, shape index: {1}]  }
   0x1 LB: > { %s2231_s19 = sadd.s32 4294967295, %s2397_s18   ;;  %p2235_p0 = scmp.ge.s32.totalorder %s2397_s18, 1  ;;  %s2397_s18 = sphi %s2430_s18, %s16_s18  }
   0x2   : > { %p190_p1 = scmp.lt.s32.totalorder %s2397_s18, 3 }
   0x4   : > { %p191_p2 = pnand %p2235_p0, %p190_p1 }
   0x5   : > { %v799_v0 = vld [vmem:[%s3610_s2] sm:$0xff] (!%p191_p2)  ;;  %v800_v1 = vld [vmem:[%s3610_s2 + $0x8] sm:$0xff] (!%p191_p2)  ;;  %v801_v2 = vld [vmem:[%s3610_s2 + $0x10] sm:$0xff] (!%p191_p2)  ;;  %p223_p3 = scmp.lt.s32.totalorder (!%p191_p2), %s2231_s19, 1  ;;  %vm271_vm0 = vcmask (!%p191_p2), 1040384   ;;  %vm336_vm1 = vcmask (!%p191_p2), 1046528  }
   0x6   : > { %194 = sbr.rel (%p191_p2) target bundleno = 487 (0x1e7), region = 36  ;;  %v803_v3 = vpack.c.bf16 (!%p191_p2), %v800_v1, %v799_v0  ;;  %v802_v4 = vld [vmem:[%s3610_s2 + $0x18] sm:$0xff] (!%p191_p2)  ;;  %v2453_v5 = vld [vmem:[%s3609_s1] ss:$0 sm:$0xff] (!%p191_p2)  ;;  %v2458_v6 = vld [vmem:[%s3609_s1 + $0x1] ss:$0 sm:$0xff] (!%p191_p2) }
   0x7   : > { %v804_v7 = vpack.c.bf16 (!%p191_p2), %v802_v4, %v801_v2  ;;  %v293_v8 = vmul.f32 (!%p191_p2), 0.0, %v2453_v5  ;;  %v306_v9 = vmul.f32 (!%p191_p2), 0.0, %v2458_v6  ;;  %v2465_v10 = vld [vmem:[%s3609_s1 + $0x2] ss:$0 sm:$0xff] (!%p191_p2)  ;;  %v2302_v15 = vld [vmem:[%s3610_s2 + $0x48] sm:$0xff] (!%p191_p2)  ;;  %vm411_vm2 = vcmask (!%p191_p2), 1045504  }
   0x8   : > { %2333 = vmatprep.subr.bf16.mxu0 (!%p191_p2), %v803_v3  ;;  %v381_v11 = vmul.f32 (!%p191_p2), 0.0, %v2465_v10  ;;  %v2301_v12 = vld [vmem:[%s3610_s2 + $0x40] sm:$0xff] (!%p191_p2)  ;;  %2369 = vmatprep.subr.bf16.mxu1 (!%p191_p2), %v803_v3  ;;  %vm810_vm3 = vcmask (!%p191_p2), 261120   ;;  %s2399_s9 = smov (!%p191_p2), 32   ;;  %vm2134_vm4 = vcmask (!%p191_p2), 523264  }
   0x9   : > { %2334 = vmatpush3.bf16.msra.mxu0 (!%p191_p2), %v803_v3  ;;  %v337_v13 = vrot.slane (!%p191_p2), %v306_v9, 1  ;;  %2371 = vmatpush3.bf16.msra.mxu1 (!%p191_p2), %v803_v3  ;;  %v2485_v20 = vpack.c.bf16 (!%p191_p2), %v2302_v15, %v2301_v12  ;;  %v2516_v40 = vld [vmem:[%s3609_s1 + $0x3] ss:$0 sm:$0xff] (!%p191_p2)  ;;  %v2533_v45 = vld [vmem:[%s3609_s1 + $0x4] ss:$0 sm:$0xff] (!%p191_p2) }
   0xa   : > { %2335 = vmatprep.subr.bf16.mxu0 (!%p191_p2), %v804_v7  ;;  %v412_v14 = vrot.slane (!%p191_p2), %v381_v11, 2  ;;  %2370 = vmatprep.subr.bf16.mxu1 (!%p191_p2), %v804_v7  ;;  %v2565_v58 = vld [vmem:[%s3609_s1 + $0x5] ss:$0 sm:$0xff] (!%p191_p2) }
   0xb   : > { %v368_v19 = vadd.f32 (!%p191_p2), %v337_v13, %v293_v8 }
   0xd   : > { %s3615_s19 = smov (!%p223_p3, %s2231_s19), 1  ;;  %2336 = vmatpush3.bf16.msra.mxu0 %v804_v7  ;;  %v443_v31 = vadd.f32 %v412_v14, %v368_v19  ;;  %2372 = vmatpush3.bf16.msra.mxu1 %v804_v7  ;;  %v2580_v14 = vld [vmem:[%s3609_s1 + $0x6] ss:$0 sm:$0xff]  ;;  %v2590_v19 = vld [vmem:[%s3609_s1 + $0x7] ss:$0 sm:$0xff] }
   0xe   : > { %s2471_s11 = sshll.u32 %s3615_s19, 6  ;;  %2357 = vmatprep.subr.bf16.mxu0 %v2485_v20 }
   0xf   : > { %s2477_s14 = scalar_lea.vmem %s3608_s0, %s2471_s11  ;;  %s3551_s6 = scalar_lea.vmem %s3612_s4, %s2471_s11 }
  0x10   : > { %v239_v16 = vld [vmem:[%s2477_s14] sm:$0xff]  ;;  %v240_v17 = vld [vmem:[%s2477_s14 + $0x8] sm:$0xff]  ;;  %v241_v18 = vld [vmem:[%s2477_s14 + $0x10] sm:$0xff]  ;;  %s3579_s16 = scalar_lea.vmem %s3613_s5, %s2471_s11 }
  0x11   : > { %v242_v21 = vld [vmem:[%s2477_s14 + $0x18] sm:$0xff]  ;;  %v243_v22 = vld [vmem:[%s2477_s14 + $0x20] sm:$0xff]  ;;  %v244_v23 = vld [vmem:[%s2477_s14 + $0x28] sm:$0xff]  ;;  %v255_v24 = vrot.slane %v239_v16, 7  ;;  %v256_v25 = vrot.slane %v240_v17, 7  ;;  %v257_v26 = vrot.slane %v241_v18, 7 }
  0x12   : > { %v245_v27 = vld [vmem:[%s2477_s14 + $0x30] sm:$0xff]  ;;  %v258_v28 = vrot.slane %v242_v21, 7  ;;  %v259_v29 = vrot.slane %v243_v22, 7  ;;  %v260_v30 = vrot.slane %v244_v23, 7 }
  0x13   : > { %v261_v32 = vrot.slane %v245_v27, 7  ;;  %v2492_v33 = vsel %vm271_vm0, 0.0, %v255_v24  ;;  %v2495_v34 = vsel %vm271_vm0, 0.0, %v256_v25  ;;  %v2498_v35 = vsel %vm271_vm0, 0.0, %v257_v26 }
  0x14   : > { %v2502_v36 = vsel %vm271_vm0, 0.0, %v258_v28  ;;  %v2505_v37 = vsel %vm271_vm0, 0.0, %v259_v29  ;;  %v2508_v38 = vsel %vm271_vm0, 0.0, %v260_v30  ;;  %v2511_v39 = vsel %vm271_vm0, %v255_v24, 0.0 }
  0x15   : > { %v2519_v41 = vsel %vm271_vm0, 0.0, %v261_v32  ;;  %v2522_v42 = vsel %vm271_vm0, %v256_v25, 0.0  ;;  %v2525_v43 = vsel %vm271_vm0, %v257_v26, 0.0  ;;  %v2528_v44 = vsel %vm271_vm0, %v258_v28, 0.0 }
  0x16   : > { %v2536_v46 = vsel %vm271_vm0, %v259_v29, 0.0  ;;  %v2539_v47 = vsel %vm271_vm0, %v260_v30, 0.0  ;;  %v2542_v48 = vsel %vm271_vm0, %v261_v32, 0.0  ;;  %v294_v49 = vmul.f32 %v2453_v5, %v2492_v33  ;;  %v2600_v29 = vld [vmem:[%s3609_s1 + $0x8] ss:$0 sm:$0xff] }
  0x17   : > { %v307_v50 = vmul.f32 %v2458_v6, %v2492_v33  ;;  %v308_v51 = vmul.f32 %v2458_v6, %v2511_v39  ;;  %v382_v52 = vmul.f32 %v2465_v10, %v2492_v33  ;;  %v383_v53 = vmul.f32 %v2465_v10, %v2511_v39 }
  0x18   : > { %v456_v54 = vmul.f32 %v2516_v40, %v2492_v33  ;;  %v457_v55 = vmul.f32 %v2516_v40, %v2495_v34  ;;  %v477_v56 = vmul.f32 %v2533_v45, %v2492_v33  ;;  %v478_v57 = vmul.f32 %v2533_v45, %v2511_v39 }
  0x19   : > { %v339_v59 = vrot.slane %v307_v50, 1  ;;  %v340_v60 = vrot.slane %v308_v51, 1  ;;  %v414_v61 = vrot.slane %v382_v52, 2  ;;  %v415_v62 = vrot.slane %v383_v53, 2 }
  0x1a   : > { %v464_v63 = vadd.f32 %v456_v54, %v443_v31  ;;  %v479_v0 = vmul.f32 %v2533_v45, %v2495_v34  ;;  %v480_v1 = vmul.f32 %v2533_v45, %v2522_v42  ;;  %v509_v2 = vrot.slane %v477_v56, 1 }
  0x1b   : > { %v341_v3 = vsel %vm336_vm1, %v339_v59, %v340_v60  ;;  %v416_v4 = vsel %vm411_vm2, %v414_v61, %v415_v62  ;;  %v510_v7 = vrot.slane %v478_v57, 1  ;;  %v554_v8 = vmul.f32 %v2565_v58, %v2492_v33 }
  0x1c   : > { %v369_v9 = vadd.f32 %v341_v3, %v294_v49  ;;  %v512_v11 = vrot.slane %v479_v0, 1  ;;  %v513_v12 = vrot.slane %v480_v1, 1  ;;  %v555_v13 = vmul.f32 %v2565_v58, %v2511_v39 }
  0x1d   : > { %v511_v15 = vsel %vm336_vm1, %v509_v2, %v510_v7  ;;  %v556_v16 = vmul.f32 %v2565_v58, %v2495_v34  ;;  %v557_v17 = vmul.f32 %v2565_v58, %v2522_v42  ;;  %v586_v18 = vrot.slane %v554_v8, 2 }
  0x1e   : > { %v444_v21 = vadd.f32 %v416_v4, %v369_v9  ;;  %v514_v22 = vsel %vm336_vm1, %v512_v11, %v513_v12  ;;  %v541_v23 = vadd.f32 %v511_v15, %v464_v63  ;;  %v587_v24 = vrot.slane %v555_v13, 2 }
  0x1f   : > { %v589_v25 = vrot.slane %v556_v16, 2  ;;  %v590_v26 = vrot.slane %v557_v17, 2  ;;  %v631_v27 = vmul.f32 %v2580_v14, %v2495_v34  ;;  %v632_v28 = vmul.f32 %v2580_v14, %v2498_v35 }
  0x20   : > { %v465_v30 = vadd.f32 %v457_v55, %v444_v21  ;;  %v588_v31 = vsel %vm411_vm2, %v586_v18, %v587_v24  ;;  %v652_v32 = vmul.f32 %v2590_v19, %v2495_v34  ;;  %v653_v49 = vmul.f32 %v2590_v19, %v2522_v42 }
  0x21   : > { %v591_v50 = vsel %vm411_vm2, %v589_v25, %v590_v26  ;;  %v618_v51 = vadd.f32 %v588_v31, %v541_v23  ;;  %v654_v52 = vmul.f32 %v2590_v19, %v2498_v35  ;;  %v655_v53 = vmul.f32 %v2590_v19, %v2525_v43 }
  0x22   : > { %v542_v54 = vadd.f32 %v514_v22, %v465_v30  ;;  %v682_v56 = vrot.slane %v652_v32, 1  ;;  %v683_v55 = vrot.slane %v653_v49, 1  ;;  %v726_v57 = vmul.f32 %v2600_v29, %v2495_v34 }
  0x23   : > { %v639_v59 = vadd.f32 %v631_v27, %v618_v51  ;;  %v685_v60 = vrot.slane %v654_v52, 1  ;;  %v686_v61 = vrot.slane %v655_v53, 1  ;;  %v727_v62 = vmul.f32 %v2600_v29, %v2522_v42 }
  0x24   : > { %v619_v63 = vadd.f32 %v591_v50, %v542_v54  ;;  %v684_v0 = vsel %vm336_vm1, %v682_v56, %v683_v55  ;;  %v728_v1 = vmul.f32 %v2600_v29, %v2498_v35  ;;  %v729_v2 = vmul.f32 %v2600_v29, %v2525_v43 }
  0x25   : > { %v687_v3 = vsel %vm336_vm1, %v685_v60, %v686_v61  ;;  %v713_v4 = vadd.f32 %v684_v0, %v639_v59  ;;  %v756_v7 = vrot.slane %v726_v57, 2  ;;  %v757_v8 = vrot.slane %v727_v62, 2 }
  0x26   : > { %v640_v9 = vadd.f32 %v632_v28, %v619_v63  ;;  %v759_v11 = vrot.slane %v728_v1, 2  ;;  %v760_v12 = vrot.slane %v729_v2, 2  ;;  %v295_v13 = vmul.f32 %v2453_v5, %v2495_v34 }
  0x27   : > { %v758_v15 = vsel %vm411_vm2, %v756_v7, %v757_v8  ;;  %v296_v16 = vmul.f32 %v2453_v5, %v2498_v35  ;;  %v309_v17 = vmul.f32 %v2458_v6, %v2495_v34  ;;  %v310_v18 = vmul.f32 %v2458_v6, %v2522_v42 }
  0x28   : > { %v714_v21 = vadd.f32 %v687_v3, %v640_v9  ;;  %v761_v22 = vsel %vm411_vm2, %v759_v11, %v760_v12  ;;  %v787_v23 = vadd.f32 %v758_v15, %v713_v4  ;;  %v311_v24 = vmul.f32 %v2458_v6, %v2498_v35 }
  0x29   : > { %v312_v25 = vmul.f32 %v2458_v6, %v2525_v43  ;;  %v342_v26 = vrot.slane %v309_v17, 1  ;;  %v343_v27 = vrot.slane %v310_v18, 1  ;;  %v384_v5 = vmul.f32 %v2465_v10, %v2495_v34 }
  0x2a   : > { %v788_v28 = vadd.f32 %v761_v22, %v714_v21  ;;  %v345_v30 = vrot.slane %v311_v24, 1  ;;  %v385_v31 = vmul.f32 %v2465_v10, %v2522_v42  ;;  %v386_v32 = vmul.f32 %v2465_v10, %v2498_v35 }
  0x2b   : > { %v344_v49 = vsel %vm336_vm1, %v342_v26, %v343_v27  ;;  %v346_v50 = vrot.slane %v312_v25, 1  ;;  %v387_v51 = vmul.f32 %v2465_v10, %v2525_v43  ;;  %v417_v6 = vrot.slane %v384_v5, 2 }
  0x2c   : > { %v795_v52 = vpack.c.bf16 %v788_v28, %v787_v23  ;;  %v370_v53 = vadd.f32 %v344_v49, %v295_v13  ;;  %v418_v54 = vrot.slane %v385_v31, 2  ;;  %v420_v56 = vrot.slane %v386_v32, 2 }
  0x2d   : > { %v347_v55 = vsel %vm336_vm1, %v345_v30, %v346_v50  ;;  %v421_v57 = vrot.slane %v387_v51, 2  ;;  %v458_v59 = vmul.f32 %v2516_v40, %v2498_v35  ;;  %v459_v60 = vmul.f32 %v2516_v40, %v2502_v36 }
  0x2e   : > { %2337 = vmatprep.mubr.msk.bf16.mxu0 %vm810_vm3, %v795_v52  ;;  %v371_v61 = vadd.f32 %v347_v55, %v296_v16  ;;  %v419_v62 = vsel %vm411_vm2, %v417_v6, %v418_v54  ;;  %v481_v10 = vmul.f32 %v2533_v45, %v2498_v35  ;;  %v482_v63 = vmul.f32 %v2533_v45, %v2525_v43 }
  0x2f   : > { %v422_v0 = vsel %vm411_vm2, %v420_v56, %v421_v57  ;;  %v445_v1 = vadd.f32 %v419_v62, %v370_v53  ;;  %v483_v2 = vmul.f32 %v2533_v45, %v2502_v36  ;;  %v484_v40 = vmul.f32 %v2533_v45, %v2528_v44  ;;  %v2303_v57 = vld [vmem:[%s3610_s2 + $0x50] sm:$0xff] }
  0x30   : > { %v446_v3 = vadd.f32 %v422_v0, %v371_v61  ;;  %v515_v4 = vrot.slane %v481_v10, 1  ;;  %v516_v7 = vrot.slane %v482_v63, 1  ;;  %v558_v8 = vmul.f32 %v2565_v58, %v2498_v35  ;;  %v2703_v10 = vld [vmem:[%s3609_s1 + $0x20] ss:$0 sm:$0xff]  ;;  %v2708_v63 = vld [vmem:[%s3609_s1 + $0x21] ss:$0 sm:$0xff] }
  0x31   : > { %v466_v9 = vadd.f32 %v458_v59, %v445_v1  ;;  %v518_v11 = vrot.slane %v483_v2, 1  ;;  %v519_v12 = vrot.slane %v484_v40, 1  ;;  %v559_v13 = vmul.f32 %v2565_v58, %v2525_v43 }
  0x32   : > { %v467_v15 = vadd.f32 %v459_v60, %v446_v3  ;;  %v517_v16 = vsel %vm336_vm1, %v515_v4, %v516_v7  ;;  %v560_v17 = vmul.f32 %v2565_v58, %v2502_v36  ;;  %v561_v45 = vmul.f32 %v2565_v58, %v2528_v44 }
  0x33   : > { %v520_v18 = vsel %vm336_vm1, %v518_v11, %v519_v12  ;;  %v543_v21 = vadd.f32 %v517_v16, %v466_v9  ;;  %v592_v22 = vrot.slane %v558_v8, 2  ;;  %v593_v23 = vrot.slane %v559_v13, 2 }
  0x34   : > { %v544_v24 = vadd.f32 %v520_v18, %v467_v15  ;;  %v595_v25 = vrot.slane %v560_v17, 2  ;;  %v596_v26 = vrot.slane %v561_v45, 2  ;;  %v633_v27 = vmul.f32 %v2580_v14, %v2502_v36  ;;  %v2724_v15 = vld [vmem:[%s3609_s1 + $0x23] ss:$0 sm:$0xff] }
  0x35   : > { %v594_v5 = vsel %vm411_vm2, %v592_v22, %v593_v23  ;;  %v634_v28 = vmul.f32 %v2580_v14, %v2505_v37  ;;  %v656_v30 = vmul.f32 %v2590_v19, %v2502_v36  ;;  %v657_v58 = vmul.f32 %v2590_v19, %v2528_v44 }
  0x36   : > { %v597_v31 = vsel %vm411_vm2, %v595_v25, %v596_v26  ;;  %v620_v32 = vadd.f32 %v594_v5, %v543_v21  ;;  %v658_v49 = vmul.f32 %v2590_v19, %v2505_v37  ;;  %v659_v50 = vmul.f32 %v2590_v19, %v2536_v46  ;;  %v2304_v19 = vld [vmem:[%s3610_s2 + $0x58] sm:$0xff]  ;;  %v2737_v25 = vld [vmem:[%s3609_s1 + $0x24] ss:$0 sm:$0xff] }
  0x37   : > { %v621_v51 = vadd.f32 %v597_v31, %v544_v24  ;;  %v688_v6 = vrot.slane %v656_v30, 1  ;;  %v689_v52 = vrot.slane %v657_v58, 1  ;;  %v730_v14 = vmul.f32 %v2600_v29, %v2502_v36 }
  0x38   : > { %v641_v53 = vadd.f32 %v633_v27, %v620_v32  ;;  %v691_v54 = vrot.slane %v658_v49, 1  ;;  %v692_v56 = vrot.slane %v659_v50, 1  ;;  %v731_v55 = vmul.f32 %v2600_v29, %v2528_v44  ;;  %v2746_v49 = vld [vmem:[%s3609_s1 + $0x25] ss:$0 sm:$0xff] }
  0x39   : > { %v642_v59 = vadd.f32 %v634_v28, %v621_v51  ;;  %v690_v60 = vsel %vm336_vm1, %v688_v6, %v689_v52  ;;  %v732_v61 = vmul.f32 %v2600_v29, %v2505_v37  ;;  %v733_v62 = vmul.f32 %v2600_v29, %v2536_v46  ;;  %v2714_v29 = vld [vmem:[%s3609_s1 + $0x22] ss:$0 sm:$0xff] }
  0x3a   : > { %v693_v0 = vsel %vm336_vm1, %v691_v54, %v692_v56  ;;  %v715_v1 = vadd.f32 %v690_v60, %v641_v53  ;;  %v762_v2 = vrot.slane %v730_v14, 2  ;;  %v763_v40 = vrot.slane %v731_v55, 2  ;;  %v2767_v60 = vld [vmem:[%s3609_s1 + $0x26] ss:$0 sm:$0xff] }
  0x3b   : > { %v716_v3 = vadd.f32 %v693_v0, %v642_v59  ;;  %v765_v4 = vrot.slane %v732_v61, 2  ;;  %v766_v7 = vrot.slane %v733_v62, 2  ;;  %v2003_v8 = vpack.c.bf16 %v2304_v19, %v2303_v57 }
  0x3c   : > { %v764_v9 = vsel %vm411_vm2, %v762_v2, %v763_v40  ;;  %v1493_v11 = vmul.f32 0.0, %v2703_v10  ;;  %v1494_v12 = vmul.f32 %v2703_v10, %v2492_v33  ;;  %v1506_v13 = vmul.f32 0.0, %v2708_v63 }
  0x3d   : > { %v767_v16 = vsel %vm411_vm2, %v765_v4, %v766_v7  ;;  %v789_v17 = vadd.f32 %v764_v9, %v715_v1  ;;  %v1507_v45 = vmul.f32 %v2708_v63, %v2492_v33  ;;  %v1508_v18 = vmul.f32 %v2708_v63, %v2511_v39  ;;  %v2778_v4 = vld [vmem:[%s3609_s1 + $0x27] ss:$0 sm:$0xff] }
  0x3e   : > { %v790_v21 = vadd.f32 %v767_v16, %v716_v3  ;;  %v1536_v22 = vrot.slane %v1506_v13, 1  ;;  %v1580_v23 = vmul.f32 0.0, %v2714_v29  ;;  %v1581_v24 = vmul.f32 %v2714_v29, %v2492_v33 }
  0x3f   : > { %v1538_v26 = vrot.slane %v1507_v45, 1  ;;  %v1539_v27 = vrot.slane %v1508_v18, 1  ;;  %v1582_v5 = vmul.f32 %v2714_v29, %v2511_v39  ;;  %v1654_v28 = vmul.f32 %v2724_v15, %v2492_v33  ;;  %v2787_v18 = vld [vmem:[%s3609_s1 + $0x28] ss:$0 sm:$0xff] }
  0x40   : > { %v796_v30 = vpack.c.bf16 %v790_v21, %v789_v17  ;;  %v1567_v58 = vadd.f32 %v1536_v22, %v1493_v11  ;;  %v1610_v31 = vrot.slane %v1580_v23, 2  ;;  %v1612_v32 = vrot.slane %v1581_v24, 2 }
  0x41   : > { %v1540_v50 = vsel %vm336_vm1, %v1538_v26, %v1539_v27  ;;  %v1613_v51 = vrot.slane %v1582_v5, 2  ;;  %v1655_v6 = vmul.f32 %v2724_v15, %v2495_v34  ;;  %v1675_v52 = vmul.f32 %v2737_v25, %v2492_v33 }
  0x42   : > { %2338 = vmatmul.mubr.msk.bf16.vlgmr.msra.gmra.mrb[0].mxu0 %vm810_vm3, %v796_v30  ;;  %v1568_v14 = vadd.f32 %v1540_v50, %v1494_v12  ;;  %v1641_v53 = vadd.f32 %v1610_v31, %v1567_v58  ;;  %v1676_v54 = vmul.f32 %v2737_v25, %v2511_v39  ;;  %v1677_v56 = vmul.f32 %v2737_v25, %v2495_v34 }
  0x43   : > { %2358 = vmatpush3.bf16.msra.mxu0 %v2485_v20  ;;  %v1614_v55 = vsel %vm411_vm2, %v1612_v32, %v1613_v51  ;;  %v1678_v57 = vmul.f32 %v2737_v25, %v2522_v42  ;;  %v1707_v19 = vrot.slane %v1675_v52, 1  ;;  %v1752_v59 = vmul.f32 %v2746_v49, %v2492_v33 }
  0x44   : > { %2359 = vmatprep.subr.bf16.mxu0 %v2003_v8  ;;  %v1642_v61 = vadd.f32 %v1614_v55, %v1568_v14  ;;  %v1662_v62 = vadd.f32 %v1654_v28, %v1641_v53  ;;  %v1708_v0 = vrot.slane %v1676_v54, 1  ;;  %v1710_v1 = vrot.slane %v1677_v56, 1 }
  0x45   : > { %v1711_v20 = vrot.slane %v1678_v57, 1  ;;  %v1753_v2 = vmul.f32 %v2746_v49, %v2511_v39  ;;  %v1754_v40 = vmul.f32 %v2746_v49, %v2495_v34  ;;  %v1755_v3 = vmul.f32 %v2746_v49, %v2522_v42 }
  0x46   : > { %v1663_v7 = vadd.f32 %v1655_v6, %v1642_v61  ;;  %v1709_v9 = vsel %vm336_vm1, %v1707_v19, %v1708_v0  ;;  %v1784_v11 = vrot.slane %v1752_v59, 2  ;;  %v1829_v12 = vmul.f32 %v2767_v60, %v2495_v34 }
  0x47   : > { %2360 = vmatpush3.bf16.msra.mxu0 %v2003_v8  ;;  %v1712_v13 = vsel %vm336_vm1, %v1710_v1, %v1711_v20  ;;  %v1739_v16 = vadd.f32 %v1709_v9, %v1662_v62  ;;  %v1785_v17 = vrot.slane %v1753_v2, 2  ;;  %v1787_v45 = vrot.slane %v1754_v40, 2 }
  0x48   : > { %v1740_v21 = vadd.f32 %v1712_v13, %v1663_v7  ;;  %v1788_v22 = vrot.slane %v1755_v3, 2  ;;  %v1830_v23 = vmul.f32 %v2767_v60, %v2498_v35  ;;  %v1850_v24 = vmul.f32 %v2778_v4, %v2495_v34 }
  0x49   : > { %v1786_v8 = vsel %vm411_vm2, %v1784_v11, %v1785_v17  ;;  %v1851_v26 = vmul.f32 %v2778_v4, %v2522_v42  ;;  %v1852_v27 = vmul.f32 %v2778_v4, %v2498_v35  ;;  %v1853_v5 = vmul.f32 %v2778_v4, %v2525_v43 }
  0x4a   : > { %v1789_v28 = vsel %vm411_vm2, %v1787_v45, %v1788_v22  ;;  %v1816_v30 = vadd.f32 %v1786_v8, %v1739_v16  ;;  %v1880_v58 = vrot.slane %v1850_v24, 1  ;;  %v1924_v31 = vmul.f32 %v2787_v18, %v2495_v34 }
  0x4b   : > { %v1817_v32 = vadd.f32 %v1789_v28, %v1740_v21  ;;  %v1881_v50 = vrot.slane %v1851_v26, 1  ;;  %v1883_v51 = vrot.slane %v1852_v27, 1  ;;  %v1884_v6 = vrot.slane %v1853_v5, 1 }
  0x4c   : > { %v1837_v52 = vadd.f32 %v1829_v12, %v1816_v30  ;;  %v1925_v14 = vmul.f32 %v2787_v18, %v2522_v42  ;;  %v1926_v53 = vmul.f32 %v2787_v18, %v2498_v35  ;;  %v1927_v54 = vmul.f32 %v2787_v18, %v2525_v43 }
  0x4d   : > { %v1838_v56 = vadd.f32 %v1830_v23, %v1817_v32  ;;  %v1882_v55 = vsel %vm336_vm1, %v1880_v58, %v1881_v50  ;;  %v1885_v57 = vsel %vm336_vm1, %v1883_v51, %v1884_v6  ;;  %v1954_v19 = vrot.slane %v1924_v31, 2 }
  0x4e   : > { %v1911_v59 = vadd.f32 %v1882_v55, %v1837_v52  ;;  %v1955_v61 = vrot.slane %v1925_v14, 2  ;;  %v1957_v62 = vrot.slane %v1926_v53, 2  ;;  %v1958_v0 = vrot.slane %v1927_v54, 2 }
  0x4f   : > { %v1912_v1 = vadd.f32 %v1885_v57, %v1838_v56  ;;  %v1495_v20 = vmul.f32 %v2703_v10, %v2495_v34  ;;  %v1496_v2 = vmul.f32 %v2703_v10, %v2498_v35  ;;  %v1509_v40 = vmul.f32 %v2708_v63, %v2495_v34 }
  0x50   : > { %v1956_v3 = vsel %vm411_vm2, %v1954_v19, %v1955_v61  ;;  %v1959_v7 = vsel %vm411_vm2, %v1957_v62, %v1958_v0  ;;  %v1510_v9 = vmul.f32 %v2708_v63, %v2522_v42  ;;  %v1511_v11 = vmul.f32 %v2708_v63, %v2498_v35 }
  0x51   : > { %v1985_v12 = vadd.f32 %v1956_v3, %v1911_v59  ;;  %v1986_v13 = vadd.f32 %v1959_v7, %v1912_v1  ;;  %v1512_v16 = vmul.f32 %v2708_v63, %v2525_v43  ;;  %v1541_v17 = vrot.slane %v1509_v40, 1 }
  0x52   : > { %v1542_v45 = vrot.slane %v1510_v9, 1  ;;  %v1544_v21 = vrot.slane %v1511_v11, 1  ;;  %v1583_v22 = vmul.f32 %v2714_v29, %v2495_v34  ;;  %v1584_v23 = vmul.f32 %v2714_v29, %v2522_v42 }
  0x53   : > { %v1993_v24 = vpack.c.bf16 %v1986_v13, %v1985_v12  ;;  %v1545_v8 = vrot.slane %v1512_v16, 1  ;;  %v1585_v26 = vmul.f32 %v2714_v29, %v2498_v35  ;;  %v1586_v27 = vmul.f32 %v2714_v29, %v2525_v43 }
  0x54   : > { %v1543_v5 = vsel %vm336_vm1, %v1541_v17, %v1542_v45  ;;  %v1615_v28 = vrot.slane %v1583_v22, 2  ;;  %v1616_v30 = vrot.slane %v1584_v23, 2  ;;  %v1656_v58 = vmul.f32 %v2724_v15, %v2498_v35 }
  0x55   : > { %2361 = vmatprep.mubr.msk.bf16.mxu0 %vm810_vm3, %v1993_v24  ;;  %v1546_v31 = vsel %vm336_vm1, %v1544_v21, %v1545_v8  ;;  %v1569_v32 = vadd.f32 %v1543_v5, %v1495_v20  ;;  %v1618_v50 = vrot.slane %v1585_v26, 2  ;;  %v1619_v51 = vrot.slane %v1586_v27, 2 }
  0x56   : > { %v1570_v6 = vadd.f32 %v1546_v31, %v1496_v2  ;;  %v1617_v52 = vsel %vm411_vm2, %v1615_v28, %v1616_v30  ;;  %v1657_v14 = vmul.f32 %v2724_v15, %v2502_v36  ;;  %v1679_v53 = vmul.f32 %v2737_v25, %v2498_v35 }
  0x57   : > { %v1620_v54 = vsel %vm411_vm2, %v1618_v50, %v1619_v51  ;;  %v1643_v56 = vadd.f32 %v1617_v52, %v1569_v32  ;;  %v1680_v55 = vmul.f32 %v2737_v25, %v2525_v43  ;;  %v1681_v57 = vmul.f32 %v2737_v25, %v2502_v36 }
  0x58   : > { %v1644_v19 = vadd.f32 %v1620_v54, %v1570_v6  ;;  %v1682_v59 = vmul.f32 %v2737_v25, %v2528_v44  ;;  %v1713_v61 = vrot.slane %v1679_v53, 1  ;;  %v1756_v62 = vmul.f32 %v2746_v49, %v2498_v35 }
  0x59   : > { %v1664_v0 = vadd.f32 %v1656_v58, %v1643_v56  ;;  %v1714_v1 = vrot.slane %v1680_v55, 1  ;;  %v1716_v20 = vrot.slane %v1681_v57, 1  ;;  %v1757_v2 = vmul.f32 %v2746_v49, %v2525_v43 }
  0x5a   : > { %v1665_v40 = vadd.f32 %v1657_v14, %v1644_v19  ;;  %v1717_v3 = vrot.slane %v1682_v59, 1  ;;  %v1758_v7 = vmul.f32 %v2746_v49, %v2502_v36  ;;  %v1759_v9 = vmul.f32 %v2746_v49, %v2528_v44 }
  0x5b   : > { %v1715_v11 = vsel %vm336_vm1, %v1713_v61, %v1714_v1  ;;  %v1790_v12 = vrot.slane %v1756_v62, 2  ;;  %v1791_v13 = vrot.slane %v1757_v2, 2  ;;  %v1831_v16 = vmul.f32 %v2767_v60, %v2502_v36 }
  0x5c   : > { %v1718_v17 = vsel %vm336_vm1, %v1716_v20, %v1717_v3  ;;  %v1741_v45 = vadd.f32 %v1715_v11, %v1664_v0  ;;  %v1793_v21 = vrot.slane %v1758_v7, 2  ;;  %v1794_v22 = vrot.slane %v1759_v9, 2 }
  0x5d   : > { %v1742_v23 = vadd.f32 %v1718_v17, %v1665_v40  ;;  %v1792_v24 = vsel %vm411_vm2, %v1790_v12, %v1791_v13  ;;  %v1832_v8 = vmul.f32 %v2767_v60, %v2505_v37  ;;  %v1854_v26 = vmul.f32 %v2778_v4, %v2502_v36 }
  0x5e   : > { %v1795_v27 = vsel %vm411_vm2, %v1793_v21, %v1794_v22  ;;  %v1818_v5 = vadd.f32 %v1792_v24, %v1741_v45  ;;  %v1855_v28 = vmul.f32 %v2778_v4, %v2528_v44  ;;  %v1856_v30 = vmul.f32 %v2778_v4, %v2505_v37 }
  0x5f   : > { %v1819_v58 = vadd.f32 %v1795_v27, %v1742_v23  ;;  %v1857_v31 = vmul.f32 %v2778_v4, %v2536_v46  ;;  %v1886_v32 = vrot.slane %v1854_v26, 1  ;;  %v1928_v50 = vmul.f32 %v2787_v18, %v2502_v36 }
  0x60   : > { %v1839_v51 = vadd.f32 %v1831_v16, %v1818_v5  ;;  %v1887_v6 = vrot.slane %v1855_v28, 1  ;;  %v1889_v52 = vrot.slane %v1856_v30, 1  ;;  %v1929_v14 = vmul.f32 %v2787_v18, %v2528_v44 }
  0x61   : > { %v1840_v53 = vadd.f32 %v1832_v8, %v1819_v58  ;;  %v1890_v54 = vrot.slane %v1857_v31, 1  ;;  %v1930_v56 = vmul.f32 %v2787_v18, %v2505_v37  ;;  %v1931_v55 = vmul.f32 %v2787_v18, %v2536_v46 }
  0x62   : > { %v1888_v57 = vsel %vm336_vm1, %v1886_v32, %v1887_v6  ;;  %v1960_v19 = vrot.slane %v1928_v50, 2  ;;  %v1961_v59 = vrot.slane %v1929_v14, 2  ;;  %v1497_v61 = vmul.f32 %v2703_v10, %v2502_v36 }
  0x63   : > { %v1891_v62 = vsel %vm336_vm1, %v1889_v52, %v1890_v54  ;;  %v1913_v0 = vadd.f32 %v1888_v57, %v1839_v51  ;;  %v1963_v1 = vrot.slane %v1930_v56, 2  ;;  %v1964_v20 = vrot.slane %v1931_v55, 2 }
  0x64   : > { %v1914_v2 = vadd.f32 %v1891_v62, %v1840_v53  ;;  %v1962_v40 = vsel %vm411_vm2, %v1960_v19, %v1961_v59  ;;  %v1498_v3 = vmul.f32 %v2703_v10, %v2505_v37  ;;  %v1513_v7 = vmul.f32 %v2708_v63, %v2502_v36 }
  0x65   : > { %v1965_v9 = vsel %vm411_vm2, %v1963_v1, %v1964_v20  ;;  %v1987_v11 = vadd.f32 %v1962_v40, %v1913_v0  ;;  %v1514_v12 = vmul.f32 %v2708_v63, %v2528_v44  ;;  %v1515_v13 = vmul.f32 %v2708_v63, %v2505_v37 }
  0x66   : > { %v1988_v16 = vadd.f32 %v1965_v9, %v1914_v2  ;;  %v1516_v17 = vmul.f32 %v2708_v63, %v2536_v46  ;;  %v1547_v45 = vrot.slane %v1513_v7, 1  ;;  %v1587_v21 = vmul.f32 %v2714_v29, %v2502_v36 }
  0x67   : > { %v1548_v22 = vrot.slane %v1514_v12, 1  ;;  %v1550_v23 = vrot.slane %v1515_v13, 1  ;;  %v1588_v24 = vmul.f32 %v2714_v29, %v2528_v44  ;;  %v1589_v8 = vmul.f32 %v2714_v29, %v2505_v37 }
  0x68   : > { %v1994_v26 = vpack.c.bf16 %v1988_v16, %v1987_v11  ;;  %v1551_v27 = vrot.slane %v1516_v17, 1  ;;  %v1590_v5 = vmul.f32 %v2714_v29, %v2536_v46  ;;  %v1621_v28 = vrot.slane %v1587_v21, 2 }
  0x69   : > { %v1549_v30 = vsel %vm336_vm1, %v1547_v45, %v1548_v22  ;;  %v1622_v58 = vrot.slane %v1588_v24, 2  ;;  %v1624_v31 = vrot.slane %v1589_v8, 2  ;;  %v1658_v32 = vmul.f32 %v2724_v15, %v2505_v37 }
  0x6a   : > { %2362 = vmatmul.mubr.msk.bf16.vlgmr.msra.gmra.mrb[4].mxu0 %vm810_vm3, %v1994_v26  ;;  %v1552_v50 = vsel %vm336_vm1, %v1550_v23, %v1551_v27  ;;  %v1571_v51 = vadd.f32 %v1549_v30, %v1497_v61  ;;  %v1625_v6 = vrot.slane %v1590_v5, 2  ;;  %v1659_v52 = vmul.f32 %v2724_v15, %v2508_v38 }
  0x6b   : > { %v1572_v14 = vadd.f32 %v1552_v50, %v1498_v3  ;;  %v1623_v53 = vsel %vm411_vm2, %v1621_v28, %v1622_v58  ;;  %v1683_v54 = vmul.f32 %v2737_v25, %v2505_v37  ;;  %v1684_v56 = vmul.f32 %v2737_v25, %v2536_v46 }
  0x6c   : > { %v1626_v55 = vsel %vm411_vm2, %v1624_v31, %v1625_v6  ;;  %v1645_v57 = vadd.f32 %v1623_v53, %v1571_v51  ;;  %v1685_v19 = vmul.f32 %v2737_v25, %v2508_v38  ;;  %v1686_v59 = vmul.f32 %v2737_v25, %v2539_v47 }
  0x6d   : > { %v1646_v61 = vadd.f32 %v1626_v55, %v1572_v14  ;;  %v1719_v62 = vrot.slane %v1683_v54, 1  ;;  %v1720_v0 = vrot.slane %v1684_v56, 1  ;;  %v1760_v1 = vmul.f32 %v2746_v49, %v2505_v37  ;;  %v246_v56 = vld [vmem:[%s2477_s14 + $0x38] sm:$0xff] }
  0x6e   : > { %v1666_v20 = vadd.f32 %v1658_v32, %v1645_v57  ;;  %v1722_v2 = vrot.slane %v1685_v19, 1  ;;  %v1723_v40 = vrot.slane %v1686_v59, 1  ;;  %v1761_v3 = vmul.f32 %v2746_v49, %v2536_v46 }
  0x6f   : > { %v1667_v7 = vadd.f32 %v1659_v52, %v1646_v61  ;;  %v1721_v9 = vsel %vm336_vm1, %v1719_v62, %v1720_v0  ;;  %v1762_v11 = vmul.f32 %v2746_v49, %v2508_v38  ;;  %v1763_v12 = vmul.f32 %v2746_v49, %v2539_v47 }
  0x70   : > { %v1724_v13 = vsel %vm336_vm1, %v1722_v2, %v1723_v40  ;;  %v1743_v16 = vadd.f32 %v1721_v9, %v1666_v20  ;;  %v1796_v17 = vrot.slane %v1760_v1, 2  ;;  %v1797_v45 = vrot.slane %v1761_v3, 2 }
  0x71   : > { %v1744_v21 = vadd.f32 %v1724_v13, %v1667_v7  ;;  %v1799_v22 = vrot.slane %v1762_v11, 2  ;;  %v1800_v23 = vrot.slane %v1763_v12, 2  ;;  %v1833_v24 = vmul.f32 %v2767_v60, %v2508_v38 }
  0x72   : > { %v1798_v8 = vsel %vm411_vm2, %v1796_v17, %v1797_v45  ;;  %v1834_v26 = vmul.f32 %v2767_v60, %v2519_v41  ;;  %v1858_v27 = vmul.f32 %v2778_v4, %v2508_v38  ;;  %v1859_v5 = vmul.f32 %v2778_v4, %v2539_v47 }
  0x73   : > { %v1801_v28 = vsel %vm411_vm2, %v1799_v22, %v1800_v23  ;;  %v1820_v30 = vadd.f32 %v1798_v8, %v1743_v16  ;;  %v1860_v58 = vmul.f32 %v2778_v4, %v2519_v41  ;;  %v1861_v31 = vmul.f32 %v2778_v4, %v2542_v48 }
  0x74   : > { %v1821_v32 = vadd.f32 %v1801_v28, %v1744_v21  ;;  %v1892_v50 = vrot.slane %v1858_v27, 1  ;;  %v1893_v51 = vrot.slane %v1859_v5, 1  ;;  %v1932_v6 = vmul.f32 %v2787_v18, %v2508_v38 }
  0x75   : > { %v1841_v52 = vadd.f32 %v1833_v24, %v1820_v30  ;;  %v1895_v14 = vrot.slane %v1860_v58, 1  ;;  %v1896_v53 = vrot.slane %v1861_v31, 1  ;;  %v1933_v54 = vmul.f32 %v2787_v18, %v2539_v47 }
  0x76   : > { %v1842_v55 = vadd.f32 %v1834_v26, %v1821_v32  ;;  %v1894_v57 = vsel %vm336_vm1, %v1892_v50, %v1893_v51  ;;  %v1934_v19 = vmul.f32 %v2787_v18, %v2519_v41  ;;  %v1935_v59 = vmul.f32 %v2787_v18, %v2542_v48 }
  0x77   : > { %v1897_v61 = vsel %vm336_vm1, %v1895_v14, %v1896_v53  ;;  %v1915_v62 = vadd.f32 %v1894_v57, %v1841_v52  ;;  %v1966_v0 = vrot.slane %v1932_v6, 2  ;;  %v1967_v1 = vrot.slane %v1933_v54, 2 }
  0x78   : > { %v1916_v20 = vadd.f32 %v1897_v61, %v1842_v55  ;;  %v1969_v2 = vrot.slane %v1934_v19, 2  ;;  %v1970_v40 = vrot.slane %v1935_v59, 2  ;;  %v262_v3 = vrot.slane %v246_v56, 7 }
  0x79   : > { %v1968_v7 = vsel %vm411_vm2, %v1966_v0, %v1967_v1  ;;  %v1499_v9 = vmul.f32 %v2703_v10, %v2508_v38  ;;  %v1500_v11 = vmul.f32 %v2703_v10, %v2519_v41  ;;  %v1517_v12 = vmul.f32 %v2708_v63, %v2508_v38 }
  0x7a   : > { %v1971_v13 = vsel %vm411_vm2, %v1969_v2, %v1970_v40  ;;  %v1989_v16 = vadd.f32 %v1968_v7, %v1915_v62  ;;  %v2967_v17 = vsel %vm271_vm0, 0.0, %v262_v3  ;;  %v2970_v45 = vsel %vm271_vm0, %v262_v3, 0.0 }
  0x7b   : > { %v1990_v21 = vadd.f32 %v1971_v13, %v1916_v20  ;;  %v1518_v22 = vmul.f32 %v2708_v63, %v2539_v47  ;;  %v1519_v23 = vmul.f32 %v2708_v63, %v2519_v41  ;;  %v1520_v10 = vmul.f32 %v2708_v63, %v2542_v48 }
  0x7c   : > { %v1553_v24 = vrot.slane %v1517_v12, 1  ;;  %v1591_v8 = vmul.f32 %v2714_v29, %v2508_v38  ;;  %v1592_v26 = vmul.f32 %v2714_v29, %v2539_v47  ;;  %v1593_v27 = vmul.f32 %v2714_v29, %v2519_v41 }
  0x7d   : > { %v1995_v5 = vpack.c.bf16 %v1990_v21, %v1989_v16  ;;  %v1554_v28 = vrot.slane %v1518_v22, 1  ;;  %v1556_v30 = vrot.slane %v1519_v23, 1  ;;  %v1557_v58 = vrot.slane %v1520_v10, 1 }
  0x7e   : > { %v1594_v31 = vmul.f32 %v2714_v29, %v2542_v48  ;;  %v1627_v32 = vrot.slane %v1591_v8, 2  ;;  %v1628_v50 = vrot.slane %v1592_v26, 2  ;;  %v1630_v63 = vrot.slane %v1593_v27, 2 }
  0x7f   : > { %2365 = vmatprep.mubr.msk.bf16.mxu0 %vm810_vm3, %v1995_v5  ;;  %v1555_v51 = vsel %vm336_vm1, %v1553_v24, %v1554_v28  ;;  %v1558_v6 = vsel %vm336_vm1, %v1556_v30, %v1557_v58  ;;  %v1660_v52 = vmul.f32 %v2724_v15, %v2519_v41  ;;  %v1661_v14 = vmul.f32 %v2724_v15, %v2967_v17 }
  0x80   : > { %v1573_v53 = vadd.f32 %v1555_v51, %v1499_v9  ;;  %v1574_v54 = vadd.f32 %v1558_v6, %v1500_v11  ;;  %v1629_v56 = vsel %vm411_vm2, %v1627_v32, %v1628_v50  ;;  %v1631_v29 = vrot.slane %v1594_v31, 2 }
  0x81   : > { %v1687_v55 = vmul.f32 %v2737_v25, %v2519_v41  ;;  %v1688_v57 = vmul.f32 %v2737_v25, %v2542_v48  ;;  %v1689_v19 = vmul.f32 %v2737_v25, %v2967_v17  ;;  %v1690_v59 = vmul.f32 %v2737_v25, %v2970_v45 }
  0x82   : > { %v1632_v61 = vsel %vm411_vm2, %v1630_v63, %v1631_v29  ;;  %v1647_v15 = vadd.f32 %v1629_v56, %v1573_v53  ;;  %v1764_v62 = vmul.f32 %v2746_v49, %v2519_v41  ;;  %v1765_v0 = vmul.f32 %v2746_v49, %v2542_v48 }
  0x83   : > { %v1648_v1 = vadd.f32 %v1632_v61, %v1574_v54  ;;  %v1725_v20 = vrot.slane %v1687_v55, 1  ;;  %v1726_v2 = vrot.slane %v1688_v57, 1  ;;  %v1728_v40 = vrot.slane %v1689_v19, 1  ;;  %v3042_v61 = vld [vmem:[%s3609_s1 + $0x1] ss:$0 sm:$0xff] }
  0x84   : > { %v1668_v3 = vadd.f32 %v1660_v52, %v1647_v15  ;;  %v1729_v7 = vrot.slane %v1690_v59, 1  ;;  %v1766_v9 = vmul.f32 %v2746_v49, %v2967_v17  ;;  %v1767_v25 = vmul.f32 %v2746_v49, %v2970_v45 }
  0x85   : > { %v1669_v11 = vadd.f32 %v1661_v14, %v1648_v1  ;;  %v1727_v12 = vsel %vm336_vm1, %v1725_v20, %v1726_v2  ;;  %v1802_v13 = vrot.slane %v1764_v62, 2  ;;  %v1803_v16 = vrot.slane %v1765_v0, 2  ;;  %v3055_v20 = vld [vmem:[%s3609_s1 + $0x2] ss:$0 sm:$0xff] }
  0x86   : > { %v1730_v21 = vsel %vm336_vm1, %v1728_v40, %v1729_v7  ;;  %v1745_v22 = vadd.f32 %v1727_v12, %v1668_v3  ;;  %v1805_v23 = vrot.slane %v1766_v9, 2  ;;  %v1806_v10 = vrot.slane %v1767_v25, 2 }
  0x87   : > { %v1746_v24 = vadd.f32 %v1730_v21, %v1669_v11  ;;  %v1804_v8 = vsel %vm411_vm2, %v1802_v13, %v1803_v16  ;;  %v1835_v26 = vmul.f32 %v2767_v60, %v2967_v17  ;;  %v1836_v27 = vmul.f32 0.0, %v2767_v60 }
  0x88   : > { %v1807_v49 = vsel %vm411_vm2, %v1805_v23, %v1806_v10  ;;  %v1822_v5 = vadd.f32 %v1804_v8, %v1745_v22  ;;  %v1862_v28 = vmul.f32 %v2778_v4, %v2967_v17  ;;  %v1863_v30 = vmul.f32 %v2778_v4, %v2970_v45 }
  0x89   : > { %v1823_v58 = vadd.f32 %v1807_v49, %v1746_v24  ;;  %v1864_v31 = vmul.f32 0.0, %v2778_v4  ;;  %v1936_v32 = vmul.f32 %v2787_v18, %v2967_v17  ;;  %v1937_v50 = vmul.f32 %v2787_v18, %v2970_v45  ;;  %v3032_v4 = vld [vmem:[%s3609_s1] ss:$0 sm:$0xff] }
  0x8a   : > { %v1843_v63 = vadd.f32 %v1835_v26, %v1822_v5  ;;  %v1898_v60 = vrot.slane %v1862_v28, 1  ;;  %v1899_v51 = vrot.slane %v1863_v30, 1  ;;  %v1938_v6 = vmul.f32 0.0, %v2787_v18  ;;  %v3070_v26 = vld [vmem:[%s3609_s1 + $0x3] ss:$0 sm:$0xff] }
  0x8b   : > { %v1844_v52 = vadd.f32 %v1836_v27, %v1823_v58  ;;  %v1901_v14 = vrot.slane %v1864_v31, 1  ;;  %v1972_v53 = vrot.slane %v1936_v32, 2  ;;  %v1973_v54 = vrot.slane %v1937_v50, 2  ;;  %v3081_v31 = vld [vmem:[%s3609_s1 + $0x4] ss:$0 sm:$0xff] }
  0x8c   : > { %v1900_v56 = vsel %vm336_vm1, %v1898_v60, %v1899_v51  ;;  %v1975_v29 = vrot.slane %v1938_v6, 2  ;;  %v297_v55 = vmul.f32 %v3032_v4, %v2502_v36  ;;  %v298_v57 = vmul.f32 %v3032_v4, %v2505_v37 }
  0x8d   : > { %v1917_v19 = vadd.f32 %v1900_v56, %v1843_v63  ;;  %v1918_v18 = vadd.f32 %v1901_v14, %v1844_v52  ;;  %v1974_v59 = vsel %vm411_vm2, %v1972_v53, %v1973_v54  ;;  %v313_v15 = vmul.f32 %v3042_v61, %v2502_v36  ;;  %v3095_v52 = vld [vmem:[%s3609_s1 + $0x5] ss:$0 sm:$0xff] }
  0x8e   : > { %v314_v62 = vmul.f32 %v3042_v61, %v2528_v44  ;;  %v315_v0 = vmul.f32 %v3042_v61, %v2505_v37  ;;  %v316_v1 = vmul.f32 %v3042_v61, %v2536_v46  ;;  %v388_v2 = vmul.f32 %v3055_v20, %v2502_v36 }
  0x8f   : > { %v1991_v40 = vadd.f32 %v1974_v59, %v1917_v19  ;;  %v1992_v3 = vadd.f32 %v1975_v29, %v1918_v18  ;;  %v348_v7 = vrot.slane %v313_v15, 1  ;;  %v389_v9 = vmul.f32 %v3055_v20, %v2528_v44 }
  0x90   : > { %v349_v25 = vrot.slane %v314_v62, 1  ;;  %v351_v11 = vrot.slane %v315_v0, 1  ;;  %v352_v12 = vrot.slane %v316_v1, 1  ;;  %v390_v13 = vmul.f32 %v3055_v20, %v2505_v37 }
  0x91   : > { %v1996_v16 = vpack.c.bf16 %v1992_v3, %v1991_v40  ;;  %v391_v21 = vmul.f32 %v3055_v20, %v2536_v46  ;;  %v423_v22 = vrot.slane %v388_v2, 2  ;;  %v424_v23 = vrot.slane %v389_v9, 2 }
  0x92   : > { %v350_v10 = vsel %vm336_vm1, %v348_v7, %v349_v25  ;;  %v353_v24 = vsel %vm336_vm1, %v351_v11, %v352_v12  ;;  %v426_v8 = vrot.slane %v390_v13, 2  ;;  %v460_v27 = vmul.f32 %v3070_v26, %v2505_v37  ;;  %v3110_v25 = vld [vmem:[%s3609_s1 + $0x6] ss:$0 sm:$0xff] }
  0x93   : > { %2366 = vmatmul.mubr.msk.bf16.gmra.mrb[8].mxu0 %vm810_vm3, %v1996_v16  ;;  %v372_v49 = vadd.f32 %v350_v10, %v297_v55  ;;  %v373_v5 = vadd.f32 %v353_v24, %v298_v57  ;;  %v425_v28 = vsel %vm411_vm2, %v423_v22, %v424_v23  ;;  %v427_v30 = vrot.slane %v391_v21, 2  ;;  %v3120_v16 = vld [vmem:[%s3609_s1 + $0x7] ss:$0 sm:$0xff] }
  0x94   : > { %v461_v58 = vmul.f32 %v3070_v26, %v2508_v38  ;;  %v485_v32 = vmul.f32 %v3081_v31, %v2505_v37  ;;  %v486_v50 = vmul.f32 %v3081_v31, %v2536_v46  ;;  %v487_v63 = vmul.f32 %v3081_v31, %v2508_v38 }
  0x95   : > { %v428_v60 = vsel %vm411_vm2, %v426_v8, %v427_v30  ;;  %v447_v51 = vadd.f32 %v425_v28, %v372_v49  ;;  %v488_v6 = vmul.f32 %v3081_v31, %v2539_v47  ;;  %v562_v14 = vmul.f32 %v3095_v52, %v2505_v37 }
  0x96   : > { %v448_v53 = vadd.f32 %v428_v60, %v373_v5  ;;  %v521_v54 = vrot.slane %v485_v32, 1  ;;  %v522_v56 = vrot.slane %v486_v50, 1  ;;  %v524_v29 = vrot.slane %v487_v63, 1 }
  0x97   : > { %v468_v55 = vadd.f32 %v460_v27, %v447_v51  ;;  %v525_v57 = vrot.slane %v488_v6, 1  ;;  %v563_v19 = vmul.f32 %v3095_v52, %v2536_v46  ;;  %v564_v18 = vmul.f32 %v3095_v52, %v2508_v38  ;;  %v3134_v27 = vld [vmem:[%s3609_s1 + $0x8] ss:$0 sm:$0xff] }
  0x98   : > { %v469_v59 = vadd.f32 %v461_v58, %v448_v53  ;;  %v523_v15 = vsel %vm336_vm1, %v521_v54, %v522_v56  ;;  %v565_v62 = vmul.f32 %v3095_v52, %v2539_v47  ;;  %v598_v0 = vrot.slane %v562_v14, 2 }
  0x99   : > { %v526_v1 = vsel %vm336_vm1, %v524_v29, %v525_v57  ;;  %v545_v2 = vadd.f32 %v523_v15, %v468_v55  ;;  %v599_v40 = vrot.slane %v563_v19, 2  ;;  %v601_v3 = vrot.slane %v564_v18, 2 }
  0x9a   : > { %v546_v7 = vadd.f32 %v526_v1, %v469_v59  ;;  %v602_v9 = vrot.slane %v565_v62, 2  ;;  %v635_v11 = vmul.f32 %v3110_v25, %v2508_v38  ;;  %v636_v12 = vmul.f32 %v3110_v25, %v2519_v41 }
  0x9b   : > { %v600_v13 = vsel %vm411_vm2, %v598_v0, %v599_v40  ;;  %v660_v21 = vmul.f32 %v3120_v16, %v2508_v38  ;;  %v661_v22 = vmul.f32 %v3120_v16, %v2539_v47  ;;  %v662_v23 = vmul.f32 %v3120_v16, %v2519_v41 }
  0x9c   : > { %v603_v10 = vsel %vm411_vm2, %v601_v3, %v602_v9  ;;  %v622_v24 = vadd.f32 %v600_v13, %v545_v2  ;;  %v663_v8 = vmul.f32 %v3120_v16, %v2542_v48  ;;  %v734_v49 = vmul.f32 %v3134_v27, %v2508_v38 }
  0x9d   : > { %v623_v5 = vadd.f32 %v603_v10, %v546_v7  ;;  %v694_v28 = vrot.slane %v660_v21, 1  ;;  %v695_v30 = vrot.slane %v661_v22, 1  ;;  %v697_v58 = vrot.slane %v662_v23, 1 }
  0x9e   : > { %v643_v32 = vadd.f32 %v635_v11, %v622_v24  ;;  %v698_v50 = vrot.slane %v663_v8, 1  ;;  %v735_v63 = vmul.f32 %v3134_v27, %v2539_v47  ;;  %v736_v60 = vmul.f32 %v3134_v27, %v2519_v41 }
  0x9f   : > { %v644_v51 = vadd.f32 %v636_v12, %v623_v5  ;;  %v696_v6 = vsel %vm336_vm1, %v694_v28, %v695_v30  ;;  %v737_v14 = vmul.f32 %v3134_v27, %v2542_v48  ;;  %v768_v53 = vrot.slane %v734_v49, 2 }
  0xa0   : > { %v699_v54 = vsel %vm336_vm1, %v697_v58, %v698_v50  ;;  %v717_v56 = vadd.f32 %v696_v6, %v643_v32  ;;  %v769_v29 = vrot.slane %v735_v63, 2  ;;  %v771_v55 = vrot.slane %v736_v60, 2 }
  0xa1   : > { %v718_v57 = vadd.f32 %v699_v54, %v644_v51  ;;  %v772_v19 = vrot.slane %v737_v14, 2  ;;  %v299_v18 = vmul.f32 %v3032_v4, %v2508_v38  ;;  %v300_v59 = vmul.f32 %v3032_v4, %v2519_v41 }
  0xa2   : > { %v770_v15 = vsel %vm411_vm2, %v768_v53, %v769_v29  ;;  %v317_v62 = vmul.f32 %v3042_v61, %v2508_v38  ;;  %v318_v0 = vmul.f32 %v3042_v61, %v2539_v47  ;;  %v319_v1 = vmul.f32 %v3042_v61, %v2519_v41 }
  0xa3   : > { %v773_v2 = vsel %vm411_vm2, %v771_v55, %v772_v19  ;;  %v791_v40 = vadd.f32 %v770_v15, %v717_v56  ;;  %v320_v3 = vmul.f32 %v3042_v61, %v2542_v48  ;;  %v392_v4 = vmul.f32 %v3055_v20, %v2508_v38 }
  0xa4   : > { %v792_v7 = vadd.f32 %v773_v2, %v718_v57  ;;  %v354_v9 = vrot.slane %v317_v62, 1  ;;  %v355_v11 = vrot.slane %v318_v0, 1  ;;  %v357_v12 = vrot.slane %v319_v1, 1 }
  0xa5   : > { %v358_v13 = vrot.slane %v320_v3, 1  ;;  %v393_v21 = vmul.f32 %v3055_v20, %v2539_v47  ;;  %v394_v22 = vmul.f32 %v3055_v20, %v2519_v41  ;;  %v395_v23 = vmul.f32 %v3055_v20, %v2542_v48 }
  0xa6   : > { %v797_v10 = vpack.c.bf16 %v792_v7, %v791_v40  ;;  %v356_v61 = vsel %vm336_vm1, %v354_v9, %v355_v11  ;;  %v429_v24 = vrot.slane %v392_v4, 2  ;;  %v462_v8 = vmul.f32 %v3070_v26, %v2519_v41 }
  0xa7   : > { %v359_v49 = vsel %vm336_vm1, %v357_v12, %v358_v13  ;;  %v374_v5 = vadd.f32 %v356_v61, %v299_v18  ;;  %v430_v28 = vrot.slane %v393_v21, 2  ;;  %v432_v30 = vrot.slane %v394_v22, 2 }
  0xa8   : > { %2341 = vmatprep.mubr.msk.bf16.mxu1 %vm810_vm3, %v797_v10  ;;  %v375_v58 = vadd.f32 %v359_v49, %v300_v59  ;;  %v433_v32 = vrot.slane %v395_v23, 2  ;;  %v463_v50 = vmul.f32 %v3070_v26, %v2967_v17  ;;  %v489_v20 = vmul.f32 %v3081_v31, %v2519_v41  ;;  %v2274_v23 = vld [vmem:[%s3610_s2 + $0x20] sm:$0xff]  ;;  %v2276_v49 = vld [vmem:[%s3610_s2 + $0x30] sm:$0xff] }
  0xa9   : > { %v431_v63 = vsel %vm411_vm2, %v429_v24, %v430_v28  ;;  %v490_v60 = vmul.f32 %v3081_v31, %v2542_v48  ;;  %v491_v51 = vmul.f32 %v3081_v31, %v2967_v17  ;;  %v492_v6 = vmul.f32 %v3081_v31, %v2970_v45 }
  0xaa   : > { %v434_v14 = vsel %vm411_vm2, %v432_v30, %v433_v32  ;;  %v449_v53 = vadd.f32 %v431_v63, %v374_v5  ;;  %v527_v54 = vrot.slane %v489_v20, 1  ;;  %v566_v26 = vmul.f32 %v3095_v52, %v2519_v41  ;;  %v3225_v32 = vld [vmem:[%s3609_s1 + $0x10] ss:$0 sm:$0xff] }
  0xab   : > { %v450_v56 = vadd.f32 %v434_v14, %v375_v58  ;;  %v528_v29 = vrot.slane %v490_v60, 1  ;;  %v530_v55 = vrot.slane %v491_v51, 1  ;;  %v531_v57 = vrot.slane %v492_v6, 1  ;;  %v3230_v51 = vld [vmem:[%s3609_s1 + $0x11] ss:$0 sm:$0xff] }
  0xac   : > { %v470_v19 = vadd.f32 %v462_v8, %v449_v53  ;;  %v567_v18 = vmul.f32 %v3095_v52, %v2542_v48  ;;  %v568_v59 = vmul.f32 %v3095_v52, %v2967_v17  ;;  %v569_v31 = vmul.f32 %v3095_v52, %v2970_v45 }
  0xad   : > { %v471_v15 = vadd.f32 %v463_v50, %v450_v56  ;;  %v529_v62 = vsel %vm336_vm1, %v527_v54, %v528_v29  ;;  %v532_v0 = vsel %vm336_vm1, %v530_v55, %v531_v57  ;;  %v604_v1 = vrot.slane %v566_v26, 2 }
  0xae   : > { %v547_v2 = vadd.f32 %v529_v62, %v470_v19  ;;  %v605_v40 = vrot.slane %v567_v18, 2  ;;  %v607_v3 = vrot.slane %v568_v59, 2  ;;  %v608_v4 = vrot.slane %v569_v31, 2  ;;  %v3250_v31 = vld [vmem:[%s3609_s1 + $0x13] ss:$0 sm:$0xff] }
  0xaf   : > { %v548_v7 = vadd.f32 %v532_v0, %v471_v15  ;;  %v637_v9 = vmul.f32 %v3110_v25, %v2967_v17  ;;  %v638_v11 = vmul.f32 0.0, %v3110_v25  ;;  %v664_v12 = vmul.f32 %v3120_v16, %v2967_v17  ;;  %v2275_v25 = vld [vmem:[%s3610_s2 + $0x28] sm:$0xff] }
  0xb0   : > { %v606_v52 = vsel %vm411_vm2, %v604_v1, %v605_v40  ;;  %v609_v13 = vsel %vm411_vm2, %v607_v3, %v608_v4  ;;  %v665_v21 = vmul.f32 %v3120_v16, %v2970_v45  ;;  %v666_v22 = vmul.f32 0.0, %v3120_v16  ;;  %v2277_v16 = vld [vmem:[%s3610_s2 + $0x38] sm:$0xff] }
  0xb1   : > { %v624_v10 = vadd.f32 %v606_v52, %v547_v2  ;;  %v625_v61 = vadd.f32 %v609_v13, %v548_v7  ;;  %v700_v24 = vrot.slane %v664_v12, 1  ;;  %v738_v8 = vmul.f32 %v3134_v27, %v2967_v17  ;;  %v3260_v7 = vld [vmem:[%s3609_s1 + $0x14] ss:$0 sm:$0xff]  ;;  %v3267_v13 = vld [vmem:[%s3609_s1 + $0x15] ss:$0 sm:$0xff] }
  0xb2   : > { %v701_v5 = vrot.slane %v665_v21, 1  ;;  %v703_v28 = vrot.slane %v666_v22, 1  ;;  %v739_v30 = vmul.f32 %v3134_v27, %v2970_v45  ;;  %v740_v58 = vmul.f32 0.0, %v3134_v27  ;;  %v3236_v27 = vld [vmem:[%s3609_s1 + $0x12] ss:$0 sm:$0xff] }
  0xb3   : > { %v645_v50 = vadd.f32 %v637_v9, %v624_v10  ;;  %v646_v20 = vadd.f32 %v638_v11, %v625_v61  ;;  %v774_v63 = vrot.slane %v738_v8, 2  ;;  %v1403_v60 = vpack.c.bf16 %v2275_v25, %v2274_v23 }
  0xb4   : > { %v702_v6 = vsel %vm336_vm1, %v700_v24, %v701_v5  ;;  %v775_v14 = vrot.slane %v739_v30, 2  ;;  %v777_v53 = vrot.slane %v740_v58, 2  ;;  %v1404_v54 = vpack.c.bf16 %v2277_v16, %v2276_v49 }
  0xb5   : > { %v719_v26 = vadd.f32 %v702_v6, %v645_v50  ;;  %v720_v56 = vadd.f32 %v703_v28, %v646_v20  ;;  %2345 = vmatprep.subr.bf16.mxu1 %v1403_v60  ;;  %v894_v29 = vmul.f32 0.0, %v3225_v32  ;;  %v895_v55 = vmul.f32 %v3225_v32, %v2492_v33 }
  0xb6   : > { %v776_v57 = vsel %vm411_vm2, %v774_v63, %v775_v14  ;;  %v907_v19 = vmul.f32 0.0, %v3230_v51  ;;  %v908_v18 = vmul.f32 %v3230_v51, %v2492_v33  ;;  %v909_v59 = vmul.f32 %v3230_v51, %v2511_v39 }
  0xb7   : > { %v793_v15 = vadd.f32 %v776_v57, %v719_v26  ;;  %v794_v62 = vadd.f32 %v777_v53, %v720_v56  ;;  %v981_v0 = vmul.f32 0.0, %v3236_v27  ;;  %v982_v1 = vmul.f32 %v3236_v27, %v2492_v33  ;;  %v3291_v53 = vld [vmem:[%s3609_s1 + $0x16] ss:$0 sm:$0xff] }
  0xb8   : > { %v937_v2 = vrot.slane %v907_v19, 1  ;;  %v939_v40 = vrot.slane %v908_v18, 1  ;;  %v940_v3 = vrot.slane %v909_v59, 1  ;;  %v983_v4 = vmul.f32 %v3236_v27, %v2511_v39  ;;  %v3305_v59 = vld [vmem:[%s3609_s1 + $0x18] ss:$0 sm:$0xff] }
  0xb9   : > { %v798_v9 = vpack.c.bf16 %v794_v62, %v793_v15  ;;  %v1011_v11 = vrot.slane %v981_v0, 2  ;;  %v1013_v12 = vrot.slane %v982_v1, 2  ;;  %v1055_v52 = vmul.f32 %v3250_v31, %v2492_v33 }
  0xba   : > { %v941_v21 = vsel %vm336_vm1, %v939_v40, %v940_v3  ;;  %v968_v22 = vadd.f32 %v937_v2, %v894_v29  ;;  %v1014_v23 = vrot.slane %v983_v4, 2  ;;  %v1056_v25 = vmul.f32 %v3250_v31, %v2495_v34 }
  0xbb   : > { %2342 = vmatmul.mubr.msk.bf16.vlgmr.msra.gmra.mrb[0].mxu1 %vm810_vm3, %v798_v9  ;;  %v969_v10 = vadd.f32 %v941_v21, %v895_v55  ;;  %v1076_v61 = vmul.f32 %v3260_v7, %v2492_v33  ;;  %v1077_v24 = vmul.f32 %v3260_v7, %v2511_v39  ;;  %v1078_v8 = vmul.f32 %v3260_v7, %v2495_v34  ;;  %v3299_v55 = vld [vmem:[%s3609_s1 + $0x17] ss:$0 sm:$0xff] }
  0xbc   : > { %2346 = vmatpush3.bf16.msra.mxu1 %v1403_v60  ;;  %v1015_v49 = vsel %vm411_vm2, %v1013_v12, %v1014_v23  ;;  %v1042_v16 = vadd.f32 %v1011_v11, %v968_v22  ;;  %v1079_v5 = vmul.f32 %v3260_v7, %v2522_v42  ;;  %v1153_v28 = vmul.f32 %v3267_v13, %v2492_v33 }
  0xbd   : > { %2347 = vmatprep.subr.bf16.mxu1 %v1404_v54  ;;  %v1043_v30 = vadd.f32 %v1015_v49, %v969_v10  ;;  %v1108_v58 = vrot.slane %v1076_v61, 1  ;;  %v1109_v50 = vrot.slane %v1077_v24, 1  ;;  %v1111_v20 = vrot.slane %v1078_v8, 1 }
  0xbe   : > { %v1063_v63 = vadd.f32 %v1055_v52, %v1042_v16  ;;  %v1112_v6 = vrot.slane %v1079_v5, 1  ;;  %v1154_v14 = vmul.f32 %v3267_v13, %v2511_v39  ;;  %v1155_v60 = vmul.f32 %v3267_v13, %v2495_v34 }
  0xbf   : > { %v1064_v26 = vadd.f32 %v1056_v25, %v1043_v30  ;;  %v1110_v33 = vsel %vm336_vm1, %v1108_v58, %v1109_v50  ;;  %v1156_v56 = vmul.f32 %v3267_v13, %v2522_v42  ;;  %v1185_v29 = vrot.slane %v1153_v28, 2 }
  0xc0   : > { %2348 = vmatpush3.bf16.msra.mxu1 %v1404_v54  ;;  %v1113_v39 = vsel %vm336_vm1, %v1111_v20, %v1112_v6  ;;  %v1140_v57 = vadd.f32 %v1110_v33, %v1063_v63  ;;  %v1186_v19 = vrot.slane %v1154_v14, 2  ;;  %v1188_v18 = vrot.slane %v1155_v60, 2 }
  0xc1   : > { %v1141_v15 = vadd.f32 %v1113_v39, %v1064_v26  ;;  %v1189_v62 = vrot.slane %v1156_v56, 2  ;;  %v1230_v0 = vmul.f32 %v3291_v53, %v2495_v34  ;;  %v1231_v1 = vmul.f32 %v3291_v53, %v2498_v35 }
  0xc2   : > { %v1187_v54 = vsel %vm411_vm2, %v1185_v29, %v1186_v19  ;;  %v1251_v2 = vmul.f32 %v3299_v55, %v2495_v34  ;;  %v1252_v40 = vmul.f32 %v3299_v55, %v2522_v42  ;;  %v1253_v3 = vmul.f32 %v3299_v55, %v2498_v35 }
  0xc3   : > { %v1190_v4 = vsel %vm411_vm2, %v1188_v18, %v1189_v62  ;;  %v1217_v9 = vadd.f32 %v1187_v54, %v1140_v57  ;;  %v1254_v11 = vmul.f32 %v3299_v55, %v2525_v43  ;;  %v1325_v12 = vmul.f32 %v3305_v59, %v2495_v34 }
  0xc4   : > { %v1218_v52 = vadd.f32 %v1190_v4, %v1141_v15  ;;  %v1281_v21 = vrot.slane %v1251_v2, 1  ;;  %v1282_v22 = vrot.slane %v1252_v40, 1  ;;  %v1284_v23 = vrot.slane %v1253_v3, 1 }
  0xc5   : > { %v1238_v25 = vadd.f32 %v1230_v0, %v1217_v9  ;;  %v1285_v10 = vrot.slane %v1254_v11, 1  ;;  %v1326_v61 = vmul.f32 %v3305_v59, %v2522_v42  ;;  %v1327_v24 = vmul.f32 %v3305_v59, %v2498_v35 }
  0xc6   : > { %v1239_v8 = vadd.f32 %v1231_v1, %v1218_v52  ;;  %v1283_v49 = vsel %vm336_vm1, %v1281_v21, %v1282_v22  ;;  %v1328_v16 = vmul.f32 %v3305_v59, %v2525_v43  ;;  %v1355_v5 = vrot.slane %v1325_v12, 2 }
  0xc7   : > { %v1286_v28 = vsel %vm336_vm1, %v1284_v23, %v1285_v10  ;;  %v1312_v30 = vadd.f32 %v1283_v49, %v1238_v25  ;;  %v1356_v58 = vrot.slane %v1326_v61, 2  ;;  %v1358_v50 = vrot.slane %v1327_v24, 2 }
  0xc8   : > { %v1313_v20 = vadd.f32 %v1286_v28, %v1239_v8  ;;  %v1359_v63 = vrot.slane %v1328_v16, 2  ;;  %v896_v6 = vmul.f32 %v3225_v32, %v2495_v34  ;;  %v897_v14 = vmul.f32 %v3225_v32, %v2498_v35 }
  0xc9   : > { %v1357_v60 = vsel %vm411_vm2, %v1355_v5, %v1356_v58  ;;  %v910_v26 = vmul.f32 %v3230_v51, %v2495_v34  ;;  %v911_v33 = vmul.f32 %v3230_v51, %v2522_v42  ;;  %v912_v56 = vmul.f32 %v3230_v51, %v2498_v35 }
  0xca   : > { %v1360_v29 = vsel %vm411_vm2, %v1358_v50, %v1359_v63  ;;  %v1386_v39 = vadd.f32 %v1357_v60, %v1312_v30  ;;  %v913_v57 = vmul.f32 %v3230_v51, %v2525_v43  ;;  %v984_v19 = vmul.f32 %v3236_v27, %v2495_v34 }
  0xcb   : > { %v1387_v18 = vadd.f32 %v1360_v29, %v1313_v20  ;;  %v942_v15 = vrot.slane %v910_v26, 1  ;;  %v943_v62 = vrot.slane %v911_v33, 1  ;;  %v945_v0 = vrot.slane %v912_v56, 1 }
  0xcc   : > { %v946_v1 = vrot.slane %v913_v57, 1  ;;  %v985_v54 = vmul.f32 %v3236_v27, %v2522_v42  ;;  %v986_v2 = vmul.f32 %v3236_v27, %v2498_v35  ;;  %v987_v40 = vmul.f32 %v3236_v27, %v2525_v43 }
  0xcd   : > { %v1394_v3 = vpack.c.bf16 %v1387_v18, %v1386_v39  ;;  %v944_v4 = vsel %vm336_vm1, %v942_v15, %v943_v62  ;;  %v1016_v9 = vrot.slane %v984_v19, 2  ;;  %v1057_v34 = vmul.f32 %v3250_v31, %v2498_v35 }
  0xce   : > { %v947_v11 = vsel %vm336_vm1, %v945_v0, %v946_v1  ;;  %v970_v12 = vadd.f32 %v944_v4, %v896_v6  ;;  %v1017_v52 = vrot.slane %v985_v54, 2  ;;  %v1019_v21 = vrot.slane %v986_v2, 2 }
  0xcf   : > { %2349 = vmatprep.mubr.msk.bf16.mxu1 %vm810_vm3, %v1394_v3  ;;  %v971_v42 = vadd.f32 %v947_v11, %v897_v14  ;;  %v1020_v22 = vrot.slane %v987_v40, 2  ;;  %v1058_v23 = vmul.f32 %v3250_v31, %v2502_v36  ;;  %v1080_v25 = vmul.f32 %v3260_v7, %v2498_v35 }
  0xd0   : > { %v1018_v10 = vsel %vm411_vm2, %v1016_v9, %v1017_v52  ;;  %v1081_v61 = vmul.f32 %v3260_v7, %v2525_v43  ;;  %v1082_v24 = vmul.f32 %v3260_v7, %v2502_v36  ;;  %v1083_v8 = vmul.f32 %v3260_v7, %v2528_v44 }
  0xd1   : > { %v1021_v49 = vsel %vm411_vm2, %v1019_v21, %v1020_v22  ;;  %v1044_v16 = vadd.f32 %v1018_v10, %v970_v12  ;;  %v1114_v5 = vrot.slane %v1080_v25, 1  ;;  %v1157_v28 = vmul.f32 %v3267_v13, %v2498_v35 }
  0xd2   : > { %v1045_v30 = vadd.f32 %v1021_v49, %v971_v42  ;;  %v1115_v58 = vrot.slane %v1081_v61, 1  ;;  %v1117_v50 = vrot.slane %v1082_v24, 1  ;;  %v1118_v20 = vrot.slane %v1083_v8, 1 }
  0xd3   : > { %v1065_v63 = vadd.f32 %v1057_v34, %v1044_v16  ;;  %v1158_v6 = vmul.f32 %v3267_v13, %v2525_v43  ;;  %v1159_v14 = vmul.f32 %v3267_v13, %v2502_v36  ;;  %v1160_v60 = vmul.f32 %v3267_v13, %v2528_v44 }
  0xd4   : > { %v1066_v26 = vadd.f32 %v1058_v23, %v1045_v30  ;;  %v1116_v33 = vsel %vm336_vm1, %v1114_v5, %v1115_v58  ;;  %v1119_v56 = vsel %vm336_vm1, %v1117_v50, %v1118_v20  ;;  %v1191_v35 = vrot.slane %v1157_v28, 2 }
  0xd5   : > { %v1142_v29 = vadd.f32 %v1116_v33, %v1065_v63  ;;  %v1192_v39 = vrot.slane %v1158_v6, 2  ;;  %v1194_v57 = vrot.slane %v1159_v14, 2  ;;  %v1195_v19 = vrot.slane %v1160_v60, 2 }
  0xd6   : > { %v1143_v18 = vadd.f32 %v1119_v56, %v1066_v26  ;;  %v1232_v43 = vmul.f32 %v3291_v53, %v2502_v36  ;;  %v1233_v15 = vmul.f32 %v3291_v53, %v2505_v37  ;;  %v1255_v62 = vmul.f32 %v3299_v55, %v2502_v36 }
  0xd7   : > { %v1193_v0 = vsel %vm411_vm2, %v1191_v35, %v1192_v39  ;;  %v1196_v1 = vsel %vm411_vm2, %v1194_v57, %v1195_v19  ;;  %v1256_v54 = vmul.f32 %v3299_v55, %v2528_v44  ;;  %v1257_v2 = vmul.f32 %v3299_v55, %v2505_v37 }
  0xd8   : > { %v1219_v40 = vadd.f32 %v1193_v0, %v1142_v29  ;;  %v1220_v3 = vadd.f32 %v1196_v1, %v1143_v18  ;;  %v1258_v4 = vmul.f32 %v3299_v55, %v2536_v46  ;;  %v1287_v9 = vrot.slane %v1255_v62, 1 }
  0xd9   : > { %v1288_v34 = vrot.slane %v1256_v54, 1  ;;  %v1290_v11 = vrot.slane %v1257_v2, 1  ;;  %v1329_v12 = vmul.f32 %v3305_v59, %v2502_v36  ;;  %v1330_v52 = vmul.f32 %v3305_v59, %v2528_v44 }
  0xda   : > { %v1240_v21 = vadd.f32 %v1232_v43, %v1219_v40  ;;  %v1241_v42 = vadd.f32 %v1233_v15, %v1220_v3  ;;  %v1291_v22 = vrot.slane %v1258_v4, 1  ;;  %v1331_v23 = vmul.f32 %v3305_v59, %v2505_v37 }
  0xdb   : > { %v1289_v25 = vsel %vm336_vm1, %v1287_v9, %v1288_v34  ;;  %v1332_v10 = vmul.f32 %v3305_v59, %v2536_v46  ;;  %v1361_v61 = vrot.slane %v1329_v12, 2  ;;  %v1362_v24 = vrot.slane %v1330_v52, 2 }
  0xdc   : > { %v1292_v8 = vsel %vm336_vm1, %v1290_v11, %v1291_v22  ;;  %v1314_v49 = vadd.f32 %v1289_v25, %v1240_v21  ;;  %v1364_v16 = vrot.slane %v1331_v23, 2  ;;  %v898_v5 = vmul.f32 %v3225_v32, %v2502_v36 }
  0xdd   : > { %v1315_v28 = vadd.f32 %v1292_v8, %v1241_v42  ;;  %v1363_v30 = vsel %vm411_vm2, %v1361_v61, %v1362_v24  ;;  %v1365_v58 = vrot.slane %v1332_v10, 2  ;;  %v899_v50 = vmul.f32 %v3225_v32, %v2505_v37 }
  0xde   : > { %v1388_v20 = vadd.f32 %v1363_v30, %v1314_v49  ;;  %v914_v63 = vmul.f32 %v3230_v51, %v2502_v36  ;;  %v915_v6 = vmul.f32 %v3230_v51, %v2528_v44  ;;  %v916_v14 = vmul.f32 %v3230_v51, %v2505_v37 }
  0xdf   : > { %v1366_v60 = vsel %vm411_vm2, %v1364_v16, %v1365_v58  ;;  %v917_v26 = vmul.f32 %v3230_v51, %v2536_v46  ;;  %v988_v33 = vmul.f32 %v3236_v27, %v2502_v36  ;;  %v989_v56 = vmul.f32 %v3236_v27, %v2528_v44 }
  0xe0   : > { %v1389_v35 = vadd.f32 %v1366_v60, %v1315_v28  ;;  %v948_v29 = vrot.slane %v914_v63, 1  ;;  %v949_v39 = vrot.slane %v915_v6, 1  ;;  %v951_v57 = vrot.slane %v916_v14, 1 }
  0xe1   : > { %v952_v19 = vrot.slane %v917_v26, 1  ;;  %v990_v18 = vmul.f32 %v3236_v27, %v2505_v37  ;;  %v991_v43 = vmul.f32 %v3236_v27, %v2536_v46  ;;  %v1022_v15 = vrot.slane %v988_v33, 2 }
  0xe2   : > { %v1395_v62 = vpack.c.bf16 %v1389_v35, %v1388_v20  ;;  %v950_v0 = vsel %vm336_vm1, %v948_v29, %v949_v39  ;;  %v1023_v1 = vrot.slane %v989_v56, 2  ;;  %v1059_v36 = vmul.f32 %v3250_v31, %v2505_v37 }
  0xe3   : > { %v953_v44 = vsel %vm336_vm1, %v951_v57, %v952_v19  ;;  %v972_v54 = vadd.f32 %v950_v0, %v898_v5  ;;  %v1025_v2 = vrot.slane %v990_v18, 2  ;;  %v1026_v40 = vrot.slane %v991_v43, 2 }
  0xe4   : > { %2350 = vmatmul.mubr.msk.bf16.vlgmr.msra.gmra.mrb[4].mxu1 %vm810_vm3, %v1395_v62  ;;  %v973_v3 = vadd.f32 %v953_v44, %v899_v50  ;;  %v1024_v4 = vsel %vm411_vm2, %v1022_v15, %v1023_v1  ;;  %v1060_v9 = vmul.f32 %v3250_v31, %v2508_v38  ;;  %v1084_v34 = vmul.f32 %v3260_v7, %v2505_v37 }
  0xe5   : > { %v1027_v11 = vsel %vm411_vm2, %v1025_v2, %v1026_v40  ;;  %v1046_v12 = vadd.f32 %v1024_v4, %v972_v54  ;;  %v1085_v52 = vmul.f32 %v3260_v7, %v2536_v46  ;;  %v1086_v21 = vmul.f32 %v3260_v7, %v2508_v38 }
  0xe6   : > { %v1047_v42 = vadd.f32 %v1027_v11, %v973_v3  ;;  %v1087_v22 = vmul.f32 %v3260_v7, %v2539_v47  ;;  %v1120_v23 = vrot.slane %v1084_v34, 1  ;;  %v1161_v25 = vmul.f32 %v3267_v13, %v2505_v37 }
  0xe7   : > { %v1067_v10 = vadd.f32 %v1059_v36, %v1046_v12  ;;  %v1121_v61 = vrot.slane %v1085_v52, 1  ;;  %v1123_v24 = vrot.slane %v1086_v21, 1  ;;  %v1162_v8 = vmul.f32 %v3267_v13, %v2536_v46 }
  0xe8   : > { %v1068_v49 = vadd.f32 %v1060_v9, %v1047_v42  ;;  %v1124_v16 = vrot.slane %v1087_v22, 1  ;;  %v1163_v5 = vmul.f32 %v3267_v13, %v2508_v38  ;;  %v1164_v28 = vmul.f32 %v3267_v13, %v2539_v47 }
  0xe9   : > { %v1122_v30 = vsel %vm336_vm1, %v1120_v23, %v1121_v61  ;;  %v1197_v58 = vrot.slane %v1161_v25, 2  ;;  %v1198_v50 = vrot.slane %v1162_v8, 2  ;;  %v1234_v37 = vmul.f32 %v3291_v53, %v2508_v38 }
  0xea   : > { %v1125_v20 = vsel %vm336_vm1, %v1123_v24, %v1124_v16  ;;  %v1144_v63 = vadd.f32 %v1122_v30, %v1067_v10  ;;  %v1200_v6 = vrot.slane %v1163_v5, 2  ;;  %v1201_v46 = vrot.slane %v1164_v28, 2 }
  0xeb   : > { %v1145_v14 = vadd.f32 %v1125_v20, %v1068_v49  ;;  %v1199_v60 = vsel %vm411_vm2, %v1197_v58, %v1198_v50  ;;  %v1235_v26 = vmul.f32 %v3291_v53, %v2519_v41  ;;  %v1259_v33 = vmul.f32 %v3299_v55, %v2508_v38 }
  0xec   : > { %v1202_v56 = vsel %vm411_vm2, %v1200_v6, %v1201_v46  ;;  %v1221_v35 = vadd.f32 %v1199_v60, %v1144_v63  ;;  %v1260_v29 = vmul.f32 %v3299_v55, %v2539_v47  ;;  %v1261_v39 = vmul.f32 %v3299_v55, %v2519_v41 }
  0xed   : > { %v1222_v57 = vadd.f32 %v1202_v56, %v1145_v14  ;;  %v1262_v19 = vmul.f32 %v3299_v55, %v2542_v48  ;;  %v1293_v18 = vrot.slane %v1259_v33, 1  ;;  %v1333_v43 = vmul.f32 %v3305_v59, %v2508_v38 }
  0xee   : > { %v1242_v15 = vadd.f32 %v1234_v37, %v1221_v35  ;;  %v1294_v62 = vrot.slane %v1260_v29, 1  ;;  %v1296_v0 = vrot.slane %v1261_v39, 1  ;;  %v1334_v1 = vmul.f32 %v3305_v59, %v2539_v47 }
  0xef   : > { %v1243_v36 = vadd.f32 %v1235_v26, %v1222_v57  ;;  %v1297_v44 = vrot.slane %v1262_v19, 1  ;;  %v1335_v54 = vmul.f32 %v3305_v59, %v2519_v41  ;;  %v1336_v2 = vmul.f32 %v3305_v59, %v2542_v48 }
  0xf0   : > { %v1295_v40 = vsel %vm336_vm1, %v1293_v18, %v1294_v62  ;;  %v1367_v3 = vrot.slane %v1333_v43, 2  ;;  %v1368_v4 = vrot.slane %v1334_v1, 2  ;;  %v900_v9 = vmul.f32 %v3225_v32, %v2508_v38 }
  0xf1   : > { %v1298_v34 = vsel %vm336_vm1, %v1296_v0, %v1297_v44  ;;  %v1316_v11 = vadd.f32 %v1295_v40, %v1242_v15  ;;  %v1370_v12 = vrot.slane %v1335_v54, 2  ;;  %v1371_v52 = vrot.slane %v1336_v2, 2 }
  0xf2   : > { %v1317_v21 = vadd.f32 %v1298_v34, %v1243_v36  ;;  %v1369_v42 = vsel %vm411_vm2, %v1367_v3, %v1368_v4  ;;  %v901_v22 = vmul.f32 %v3225_v32, %v2519_v41  ;;  %v918_v23 = vmul.f32 %v3230_v51, %v2508_v38 }
  0xf3   : > { %v1372_v25 = vsel %vm411_vm2, %v1370_v12, %v1371_v52  ;;  %v1390_v10 = vadd.f32 %v1369_v42, %v1316_v11  ;;  %v919_v61 = vmul.f32 %v3230_v51, %v2539_v47  ;;  %v920_v24 = vmul.f32 %v3230_v51, %v2519_v41 }
  0xf4   : > { %v1391_v8 = vadd.f32 %v1372_v25, %v1317_v21  ;;  %v921_v49 = vmul.f32 %v3230_v51, %v2542_v48  ;;  %v954_v16 = vrot.slane %v918_v23, 1  ;;  %v992_v32 = vmul.f32 %v3236_v27, %v2508_v38 }
  0xf5   : > { %v955_v5 = vrot.slane %v919_v61, 1  ;;  %v957_v28 = vrot.slane %v920_v24, 1  ;;  %v993_v30 = vmul.f32 %v3236_v27, %v2539_v47  ;;  %v994_v58 = vmul.f32 %v3236_v27, %v2519_v41 }
  0xf6   : > { %v1396_v50 = vpack.c.bf16 %v1391_v8, %v1390_v10  ;;  %v958_v37 = vrot.slane %v921_v49, 1  ;;  %v995_v20 = vmul.f32 %v3236_v27, %v2542_v48  ;;  %v1028_v63 = vrot.slane %v992_v32, 2 }
  0xf7   : > { %v956_v51 = vsel %vm336_vm1, %v954_v16, %v955_v5  ;;  %v1029_v6 = vrot.slane %v993_v30, 2  ;;  %v1031_v46 = vrot.slane %v994_v58, 2  ;;  %v1061_v38 = vmul.f32 %v3250_v31, %v2519_v41 }
  0xf8   : > { %2353 = vmatprep.mubr.msk.bf16.mxu1 %vm810_vm3, %v1396_v50  ;;  %v959_v47 = vsel %vm336_vm1, %v957_v28, %v958_v37  ;;  %v974_v14 = vadd.f32 %v956_v51, %v900_v9  ;;  %v1032_v60 = vrot.slane %v995_v20, 2  ;;  %v1062_v26 = vmul.f32 %v3250_v31, %v2967_v17 }
  0xf9   : > { %v975_v33 = vadd.f32 %v959_v47, %v901_v22  ;;  %v1030_v27 = vsel %vm411_vm2, %v1028_v63, %v1029_v6  ;;  %v1088_v56 = vmul.f32 %v3260_v7, %v2519_v41  ;;  %v1089_v35 = vmul.f32 %v3260_v7, %v2542_v48 }
  0xfa   : > { %v1033_v29 = vsel %vm411_vm2, %v1031_v46, %v1032_v60  ;;  %v1048_v39 = vadd.f32 %v1030_v27, %v974_v14  ;;  %v1090_v57 = vmul.f32 %v3260_v7, %v2967_v17  ;;  %v1091_v19 = vmul.f32 %v3260_v7, %v2970_v45 }
  0xfb   : > { %v1049_v18 = vadd.f32 %v1033_v29, %v975_v33  ;;  %v1126_v31 = vrot.slane %v1088_v56, 1  ;;  %v1127_v43 = vrot.slane %v1089_v35, 1  ;;  %v1165_v15 = vmul.f32 %v3267_v13, %v2519_v41 }
  0xfc   : > { %v1069_v62 = vadd.f32 %v1061_v38, %v1048_v39  ;;  %v1129_v0 = vrot.slane %v1090_v57, 1  ;;  %v1130_v1 = vrot.slane %v1091_v19, 1  ;;  %v1166_v36 = vmul.f32 %v3267_v13, %v2542_v48 }
  0xfd   : > { %v1070_v44 = vadd.f32 %v1062_v26, %v1049_v18  ;;  %v1128_v54 = vsel %vm336_vm1, %v1126_v31, %v1127_v43  ;;  %v1167_v2 = vmul.f32 %v3267_v13, %v2967_v17  ;;  %v1168_v7 = vmul.f32 %v3267_v13, %v2970_v45  ;;  %v2305_v26 = vld [vmem:[%s3611_s3 + $0x2] ss:$0 sm:$0xff] }
  0xfe   : > { %v1131_v40 = vsel %vm336_vm1, %v1129_v0, %v1130_v1  ;;  %v1146_v3 = vadd.f32 %v1128_v54, %v1069_v62  ;;  %v1203_v4 = vrot.slane %v1165_v15, 2  ;;  %v1204_v41 = vrot.slane %v1166_v36, 2 }
  0xff   : > { %v1147_v9 = vadd.f32 %v1131_v40, %v1070_v44  ;;  %v1206_v34 = vrot.slane %v1167_v2, 2  ;;  %v1207_v11 = vrot.slane %v1168_v7, 2  ;;  %v1236_v48 = vmul.f32 %v3291_v53, %v2967_v17 }
 0x100   : > { %v1205_v12 = vsel %vm411_vm2, %v1203_v4, %v1204_v41  ;;  %v1237_v52 = vmul.f32 0.0, %v3291_v53  ;;  %v1263_v21 = vmul.f32 %v3299_v55, %v2967_v17  ;;  %v1264_v13 = vmul.f32 %v3299_v55, %v2970_v45 }
 0x101   : > { %v1208_v42 = vsel %vm411_vm2, %v1206_v34, %v1207_v11  ;;  %v1223_v22 = vadd.f32 %v1205_v12, %v1146_v3  ;;  %v1265_v23 = vmul.f32 0.0, %v3299_v55  ;;  %v1337_v25 = vmul.f32 %v3305_v59, %v2967_v17  ;;  %v2278_v11 = vld [vmem:[%s3611_s3 + $0x1] ss:$0 sm:$0xff] }
 0x102   : > { %v1224_v10 = vadd.f32 %v1208_v42, %v1147_v9  ;;  %v1299_v61 = vrot.slane %v1263_v21, 1  ;;  %v1300_v24 = vrot.slane %v1264_v13, 1  ;;  %v1338_v53 = vmul.f32 %v3305_v59, %v2970_v45  ;;  %v2251_v45 = vld [vmem:[%s3611_s3] ss:$0 sm:$0xff] }
 0x103   : > { %v1244_v8 = vadd.f32 %v1236_v48, %v1223_v22  ;;  %v1302_v49 = vrot.slane %v1265_v23, 1  ;;  %v1339_v16 = vmul.f32 0.0, %v3305_v59  ;;  %v1373_v32 = vrot.slane %v1337_v25, 2 }
 0x104   : > { %v1245_v5 = vadd.f32 %v1237_v52, %v1224_v10  ;;  %v1301_v28 = vsel %vm336_vm1, %v1299_v61, %v1300_v24  ;;  %v1374_v30 = vrot.slane %v1338_v53, 2 }
 0x105   : > { %v1318_v55 = vadd.f32 %v1301_v28, %v1244_v8  ;;  %v1376_v58 = vrot.slane %v1339_v16, 2 }
 0x106   : > { %v1319_v50 = vadd.f32 %v1302_v49, %v1245_v5  ;;  %v1375_v17 = vsel %vm411_vm2, %v1373_v32, %v1374_v30 }
 0x107   : > { %v1392_v37 = vadd.f32 %v1375_v17, %v1318_v55 }
 0x108   : > { %v1393_v20 = vadd.f32 %v1376_v58, %v1319_v50 }
 0x10a   : > { %v1397_v63 = vpack.c.bf16 %v1393_v20, %v1392_v37 }
 0x10c   : > { %2354 = vmatmul.mubr.msk.bf16.gmra.mrb[8].mxu1 %vm810_vm3, %v1397_v63 }
 0x115   : > { %v2339_v59 = vpop.f32.mrb[0].mxu0 }
 0x116   : > { %v866_v51 = vadd.f32 %v2339_v59, %v2251_v45  ;;  %v857_v6 = vpop.f32.mrb[1].mxu0 }
 0x117   : > { %v858_v46 = vadd.f32 %v2251_v45, %v857_v6  ;;  %v2340_v38 = vpop.f32.mrb[2].mxu0 }
 0x118   : > { %2128 = vst.msk [vmem:[%s3551_s6 + $0x10] sm:$0xff] %vm810_vm3, %v866_v51  ;;  %v869_v47 = vadd.f32 %v2340_v38, %v2251_v45  ;;  %v860_v14 = vpop.f32.mrb[3].mxu0 }
 0x119   : > { %2126 = vst.msk [vmem:[%s3551_s6] sm:$0xff] %vm810_vm3, %v858_v46  ;;  %v861_v60 = vadd.f32 %v2251_v45, %v860_v14 }
 0x11a   : > { %2129 = vst.msk [vmem:[%s3551_s6 + $0x18] sm:$0xff] %vm810_vm3, %v869_v47 }
 0x11b   : > { %2127 = vst.msk [vmem:[%s3551_s6 + $0x8] sm:$0xff] %vm810_vm3, %v861_v60 }
 0x13d   : > { %v2363_v33 = vpop.f32.mrb[4].mxu0 }
 0x13e   : > { %v2064_v27 = vadd.f32 %v2363_v33, %v2305_v26  ;;  %v2055_v56 = vpop.f32.mrb[5].mxu0 }
 0x13f   : > { %v2056_v35 = vadd.f32 %v2305_v26, %v2055_v56  ;;  %v2364_v29 = vpop.f32.mrb[6].mxu0 }
 0x140   : > { %2098 = vrot.lane.b32.xlu1 %v2064_v27, %s2399_s9  ;;  %v2058_v39 = vpop.f32.mrb[7].mxu0  ;;  %v2067_v57 = vadd.f32 %v2364_v29, %v2305_v26 }
 0x141   : > { %2094 = vrot.lane.b32.xlu0 %v2056_v35, %s2399_s9  ;;  %v2059_v19 = vadd.f32 %v2305_v26, %v2058_v39 }
 0x144   : > { %2100 = vrot.lane.b32.xlu1 %v2067_v57, %s2399_s9 }
 0x145   : > { %2096 = vrot.lane.b32.xlu0 %v2059_v19, %s2399_s9 }
 0x166   : > { %v2367_v18 = vpop.f32.mrb[8].mxu0 }
 0x167   : > { %v2071_v31 = vpop.f32.mrb[9].mxu0  ;;  %v2080_v1 = vadd.f32 %v2367_v18, %v2305_v26 }
 0x168   : > { %v2072_v43 = vadd.f32 %v2305_v26, %v2071_v31  ;;  %v2368_v15 = vpop.f32.mrb[10].mxu0 }
 0x169   : > { %v2074_v62 = vpop.f32.mrb[11].mxu0  ;;  %v2083_v36 = vadd.f32 %v2368_v15, %v2305_v26 }
 0x16a   : > { %v2075_v0 = vadd.f32 %v2305_v26, %v2074_v62  ;;  %2102 = vrot.lane.b32.xlu0 %v2072_v43, %s2399_s9 }
 0x16c   : > { %2104 = vrot.lane.b32.xlu1 %v2075_v0, %s2399_s9 }
 0x16e   : > { %2106 = vrot.lane.b32.xlu0 %v2080_v1, %s2399_s9 }
 0x170   : > { %2108 = vrot.lane.b32.xlu1 %v2083_v36, %s2399_s9 }
 0x18e   : > { %v2343_v44 = vpop.f32.mrb[0].mxu1 }
 0x18f   : > { %v882_v54 = vadd.f32 %v2343_v44, %v2251_v45  ;;  %v873_v2 = vpop.f32.mrb[1].mxu1 }
 0x190   : > { %v874_v7 = vadd.f32 %v2251_v45, %v873_v2  ;;  %v2344_v40 = vpop.f32.mrb[2].mxu1 }
 0x191   : > { %2132 = vst.msk [vmem:[%s3551_s6 + $0x30] sm:$0xff] %vm810_vm3, %v882_v54  ;;  %v885_v3 = vadd.f32 %v2344_v40, %v2251_v45  ;;  %v876_v4 = vpop.f32.mrb[3].mxu1 }
 0x192   : > { %2130 = vst.msk [vmem:[%s3551_s6 + $0x20] sm:$0xff] %vm810_vm3, %v874_v7  ;;  %v877_v41 = vadd.f32 %v2251_v45, %v876_v4 }
 0x193   : > { %2133 = vst.msk [vmem:[%s3551_s6 + $0x38] sm:$0xff] %vm810_vm3, %v885_v3 }
 0x194   : > { %2131 = vst.msk [vmem:[%s3551_s6 + $0x28] sm:$0xff] %vm810_vm3, %v877_v41 }
 0x1b2   : > { %v2099_v9 = vpop.permute.xlu1 %2098 }
 0x1b3   : > { %v2095_v34 = vpop.permute.xlu0 %2094 }
 0x1b6   : > { %v2101_v42 = vpop.permute.xlu1 %2100 }
 0x1b7   : > { %v2351_v48 = vpop.f32.mrb[4].mxu1  ;;  %v2097_v10 = vpop.permute.xlu0 %2096 }
 0x1b8   : > { %v1465_v12 = vadd.f32 %v2351_v48, %v2278_v11  ;;  %v1456_v52 = vpop.f32.mrb[5].mxu1 }
 0x1b9   : > { %v1457_v21 = vadd.f32 %v2278_v11, %v1456_v52  ;;  %v2352_v13 = vpop.f32.mrb[6].mxu1 }
 0x1ba   : > { %v2120_v22 = vsel %vm810_vm3, %v1465_v12, %v2099_v9  ;;  %v1468_v23 = vadd.f32 %v2352_v13, %v2278_v11  ;;  %v1459_v25 = vpop.f32.mrb[7].mxu1 }
 0x1bb   : > { %2137 = vst.msk [vmem:[%s3579_s16 + $0x10] sm:$0xff] %vm2134_vm4, %v2120_v22  ;;  %v2118_v61 = vsel %vm810_vm3, %v1457_v21, %v2095_v34  ;;  %v1460_v24 = vadd.f32 %v2278_v11, %v1459_v25 }
 0x1bc   : > { %2135 = vst.msk [vmem:[%s3579_s16] sm:$0xff] %vm2134_vm4, %v2118_v61  ;;  %v2121_v53 = vsel %vm810_vm3, %v1468_v23, %v2101_v42 }
 0x1bd   : > { %2138 = vst.msk [vmem:[%s3579_s16 + $0x18] sm:$0xff] %vm2134_vm4, %v2121_v53  ;;  %v2119_v8 = vsel %vm810_vm3, %v1460_v24, %v2097_v10 }
 0x1be   : > { %2136 = vst.msk [vmem:[%s3579_s16 + $0x8] sm:$0xff] %vm2134_vm4, %v2119_v8 }
 0x1dc   : > { %v2103_v49 = vpop.permute.xlu0 %2102 }
 0x1de   : > { %v2105_v16 = vpop.permute.xlu1 %2104 }
 0x1df   : > { %v2355_v32 = vpop.f32.mrb[8].mxu1 }
 0x1e0   : > { %v1481_v5 = vadd.f32 %v2355_v32, %v2278_v11  ;;  %v1472_v28 = vpop.f32.mrb[9].mxu1  ;;  %v2107_v30 = vpop.permute.xlu0 %2106 }
 0x1e1   : > { %v1473_v55 = vadd.f32 %v2278_v11, %v1472_v28  ;;  %v2356_v58 = vpop.f32.mrb[10].mxu1 }
 0x1e2   : > { %v1484_v50 = vadd.f32 %v2356_v58, %v2278_v11  ;;  %v1475_v17 = vpop.f32.mrb[11].mxu1  ;;  %v2124_v37 = vsel %vm810_vm3, %v1481_v5, %v2107_v30  ;;  %v2109_v20 = vpop.permute.xlu1 %2108 }
 0x1e3   : > { %v1476_v63 = vadd.f32 %v2278_v11, %v1475_v17  ;;  %v2122_v45 = vsel %vm810_vm3, %v1473_v55, %v2103_v49  ;;  %2141 = vst.msk [vmem:[%s3579_s16 + $0x30] sm:$0xff] %vm2134_vm4, %v2124_v37 }
 0x1e4   : > { %2139 = vst.msk [vmem:[%s3579_s16 + $0x20] sm:$0xff] %vm2134_vm4, %v2122_v45  ;;  %v2125_v59 = vsel %vm810_vm3, %v1484_v50, %v2109_v20 }
 0x1e5   : > { %v2123_v51 = vsel %vm810_vm3, %v1476_v63, %v2105_v16  ;;  %2142 = vst.msk [vmem:[%s3579_s16 + $0x38] sm:$0xff] %vm2134_vm4, %v2125_v59 }
 0x1e6   : > { %2140 = vst.msk [vmem:[%s3579_s16 + $0x28] sm:$0xff] %vm2134_vm4, %v2123_v51 }
 0x1e7 PF: > { %s16_s18 = sadd.s32 1, %s2397_s18  }
 0x1e8   : > { %p13_p4 = scmp.ge.s32.totalorder %s16_s18, 4  }
 0x1ea   :  { %15 = sbr.rel (!%p13_p4) target bundleno = 1 (0x1), region = 82 }

</bundles_post_ra>
